<compile_context>
chip_gen: v7x
topology: tpu7x:2x2x1
jax: 0.10.0
libtpu: 0.0.40
codegen_flags: <defaults>
</compile_context>

<pallas_src>
import functools

import numpy as np

import jax
import jax.numpy as jnp
from jax.experimental import pallas as pl
from jax.experimental.pallas import tpu as pltpu


# --------------------------------------------------------------------------
# Kernel A: query projection (feature_extractor with wq/bq/scale folded in)
# --------------------------------------------------------------------------

def _query_kernel(p_ref, w_ref, b_ref, o_ref):
    o_ref[0] = (jnp.dot(p_ref[0], w_ref[...], preferred_element_type=jnp.float32)
                + b_ref[...])


def query_projection(prompt, w, b):
    """prompt: [B, Sp, hidden]; w: [hidden, H*E] (wq, bq, 1/sqrt(D) folded in)."""
    B, Sp, hidden = prompt.shape
    N = w.shape[1]
    return pl.pallas_call(
        _query_kernel,
        grid=(B,),
        in_specs=[
            pl.BlockSpec((1, Sp, hidden), lambda i: (i, 0, 0)),
            pl.BlockSpec((hidden, N), lambda i: (0, 0)),
            pl.BlockSpec((1, N), lambda i: (0, 0)),
        ],
        out_specs=pl.BlockSpec((1, Sp, N), lambda i: (i, 0, 0)),
        out_shape=jax.ShapeDtypeStruct((B, Sp, N), jnp.float32),
        compiler_params=pltpu.CompilerParams(
            dimension_semantics=("parallel",),
            vmem_limit_bytes=32 * 1024 * 1024,
        ),
    )(prompt, w, b)


# --------------------------------------------------------------------------
# Kernel B: fused CNN + multi-head attention + prediction heads
# --------------------------------------------------------------------------

def _conv_layer(x, s_ref, w_ref, b_ref):
    """One stride-2 / pad-1 / k=3 conv + ReLU.

    x: [N_in, Cin] (spatial row-major), s_ref: [9, N_out, N_in] 0/1 tap-selection
    (boundary zero-padding folded in), w_ref: [9, Cin, Cout], b_ref: [1, Cout].
    """
    n_out = s_ref.shape[1]
    c_out = w_ref.shape[2]
    acc = jnp.zeros((n_out, c_out), jnp.float32)
    for t in range(9):                              # static unroll, 9 taps
        g = jnp.dot(s_ref[t], x, preferred_element_type=jnp.float32)   # gather tap
        acc = acc + jnp.dot(g, w_ref[t], preferred_element_type=jnp.float32)
    return jnp.maximum(acc + b_ref[...], 0.0)       # bias + ReLU


def _fused_kernel(img_ref, q_ref,
                  s1, w1, b1, s2, w2, b2, s3, w3, b3,
                  wkv, bkv, wo, bo, hw1, hb1, hw2, hb2, fiw, fib,
                  small_ref, interp_ref, attnw_ref, *, num_heads):
    # ---- CNN encoder: all intermediates stay on-chip ----
    x = img_ref[0]                                  # [H*W, Cin_pad]
    x = _conv_layer(x, s1, w1, b1)                  # [64, 32]
    x = _conv_layer(x, s2, w2, b2)                  # [16, 64]
    kv = _conv_layer(x, s3, w3, b3)                 # [S, 128] keys/values sequence

    S = kv.shape[0]
    q = q_ref[0]                                    # [L, E], pre-projected & scaled
    L, E = q.shape
    D = E // num_heads

    # ---- fused K/V projection on the real S rows (no key padding) ----
    kvp = jnp.dot(kv, wkv[...], preferred_element_type=jnp.float32) + bkv[...]
    k = kvp[:, :E]
    v = kvp[:, E:]

    # ---- per-head attention; mean over queries folded before the out-projection ----
    attn_sum = jnp.zeros((L, S), jnp.float32)
    ctx = jnp.zeros((1, E), jnp.float32)
    for h in range(num_heads):                      # static unroll, 8 heads
        lo, hi = h * D, (h + 1) * D
        s_h = jax.lax.dot_general(q[:, lo:hi], k[:, lo:hi],
                                  (((1,), (1,)), ((), ())),
                                  preferred_element_type=jnp.float32)   # [L, S]
        m = jnp.max(s_h, axis=-1, keepdims=True)
        p = jnp.exp(s_h - m)
        a = p / jnp.sum(p, axis=-1, keepdims=True)  # exact softmax (visible output)
        attn_sum = attn_sum + a
        a_mean = jnp.mean(a, axis=0, keepdims=True)                      # [1, S]
        ch = jnp.dot(a_mean, v[:, lo:hi], preferred_element_type=jnp.float32)  # [1, D]
        ctx = ctx + jnp.dot(ch, wo[lo:hi, :], preferred_element_type=jnp.float32)

    attended = ctx + bo[...]                        # [1, E] mean-over-queries features

    # ---- fused prediction heads (rot + dig packed into one 128-wide slab) ----
    h1 = jnp.maximum(
        jnp.dot(attended, hw1[...], preferred_element_type=jnp.float32) + hb1[...],
        0.0)
    small_ref[0] = jnp.dot(h1, hw2[...], preferred_element_type=jnp.float32) + hb2[...]
    interp_ref[0] = (jnp.dot(attended, fiw[...], preferred_element_type=jnp.float32)
                     + fib[...])

    # ---- head-averaged attention weights, zero-extended to a lane-dense slab ----
    aw = attn_sum * (1.0 / num_heads)
    wpad = attnw_ref.shape[2] - S
    if wpad:
        aw = jnp.concatenate([aw, jnp.zeros((L, wpad), jnp.float32)], axis=-1)
    attnw_ref[0] = aw


def fused_forward_call(img, queries, p, num_heads):
    B, Np, Cin = img.shape
    L, E = queries.shape[1], queries.shape[2]
    S = p['s3'].shape[1]
    S_pad = max(128, ((S + 127) // 128) * 128)

    weights = [p['s1'], p['w1'], p['b1'], p['s2'], p['w2'], p['b2'],
               p['s3'], p['w3'], p['b3'], p['wkv'], p['bkv'], p['wo'], p['bo'],
               p['hw1'], p['hb1'], p['hw2'], p['hb2'], p['fiw'], p['fib']]

    def full_spec(a):
        nd = a.ndim
        return pl.BlockSpec(a.shape, lambda i, _nd=nd: (0,) * _nd)

    return pl.pallas_call(
        functools.partial(_fused_kernel, num_heads=num_heads),
        grid=(B,),
        in_specs=[pl.BlockSpec((1, Np, Cin), lambda i: (i, 0, 0)),
                  pl.BlockSpec((1, L, E), lambda i: (i, 0, 0))]
                 + [full_spec(a) for a in weights],
        out_specs=(pl.BlockSpec((1, 1, E), lambda i: (i, 0, 0)),
                   pl.BlockSpec((1, 1, E), lambda i: (i, 0, 0)),
                   pl.BlockSpec((1, L, S_pad), lambda i: (i, 0, 0))),
        out_shape=(jax.ShapeDtypeStruct((B, 1, E), jnp.float32),
                   jax.ShapeDtypeStruct((B, 1, E), jnp.float32),
                   jax.ShapeDtypeStruct((B, L, S_pad), jnp.float32)),
        compiler_params=pltpu.CompilerParams(
            dimension_semantics=("parallel",),
            vmem_limit_bytes=32 * 1024 * 1024,
        ),
    )(img, queries, *weights)


# --------------------------------------------------------------------------
# Parameters: synthetic init (PyTorch-equivalent layouts) + offline folding
# --------------------------------------------------------------------------

def init_params(key, hidden_size=768, num_heads=8):
    E = 128

    def nrm(k, shape, scale=0.1):
        return scale * jax.random.normal(k, shape, dtype=jnp.float32)

    specs = [
        ('conv1_w', (3, 3, 1, 32)), ('conv1_b', (32,)),
        ('conv2_w', (3, 3, 32, 64)), ('conv2_b', (64,)),
        ('conv3_w', (3, 3, 64, 128)), ('conv3_b', (128,)),
        ('fe_w', (hidden_size, E * num_heads)), ('fe_b', (E * num_heads,)),
        ('wq', (E, E)), ('bq', (E,)),
        ('wk', (E, E)), ('bk', (E,)),
        ('wv', (E, E)), ('bv', (E,)),
        ('wo', (E, E)), ('bo', (E,)),
        ('rot1_w', (E, 64)), ('rot1_b', (64,)),
        ('rot2_w', (64, 1)), ('rot2_b', (1,)),
        ('dig1_w', (E, 64)), ('dig1_b', (64,)),
        ('dig2_w', (64, 10)), ('dig2_b', (10,)),
        ('fi_w', (E, E)), ('fi_b', (E,)),
    ]
    keys = jax.random.split(key, len(specs))
    return {name: nrm(k, shp) for (name, shp), k in zip(specs, keys)}


def _build_select(h_in, w_in, k=3, stride=2, pad=1):
    """0/1 selection matrices S[t, p_out, q_in] for a k=3/stride-2/pad-1 conv tap t.

    Zero boundary padding is folded in as all-zero rows, so the kernel works on the
    unpadded spatial flattening of each layer's input.
    """
    h_out = (h_in + 2 * pad - k) // stride + 1
    w_out = (w_in + 2 * pad - k) // stride + 1
    S = np.zeros((k * k, h_out * w_out, h_in * w_in), np.float32)
    for kh in range(k):
        for kw in range(k):
            t = kh * k + kw
            for ho in range(h_out):
                for wo in range(w_out):
                    hi = ho * stride + kh - pad
                    wi = wo * stride + kw - pad
                    if 0 <= hi < h_in and 0 <= wi < w_in:
                        S[t, ho * w_out + wo, hi * w_in + wi] = 1.0
    return jnp.asarray(S), h_out, w_out


def prepare_params(p, image_hw=(16, 16), num_heads=8):
    """Fold / repack PyTorch-equivalent params into the fused-kernel layout."""
    E = 128
    H, W = image_hw
    s1, h1, w1 = _build_select(H, W)
    s2, h2, w2 = _build_select(h1, w1)
    s3, _, _ = _build_select(h2, w2)

    # conv weights -> [9, Cin, Cout]; layer-1 Cin zero-padded 1 -> 8 only
    c1 = jnp.pad(p['conv1_w'].reshape(9, 1, 32), ((0, 0), (0, 7), (0, 0)))
    c2 = p['conv2_w'].reshape(9, 32, 64)
    c3 = p['conv3_w'].reshape(9, 64, 128)

    # fold wq, bq and the 1/sqrt(head_dim) scale into the feature extractor
    hidden = p['fe_w'].shape[0]
    D = E // num_heads
    scale = 1.0 / (D ** 0.5)
    few = p['fe_w'].reshape(hidden, num_heads, E)
    few = jnp.einsum('hje,ef->hjf', few, p['wq']) * scale
    feb = (p['fe_b'].reshape(num_heads, E) @ p['wq'] + p['bq']) * scale

    # pack rot2/dig2 into one block-structured [128, 128] matmul:
    #   col 0 = rotation, cols 1..10 = digits, rest zero.
    hw2 = jnp.zeros((E, E), jnp.float32)
    hw2 = hw2.at[:64, 0:1].set(p['rot2_w'])
    hw2 = hw2.at[64:128, 1:11].set(p['dig2_w'])
    hb2 = jnp.zeros((E,), jnp.float32)
    hb2 = hb2.at[0].set(p['rot2_b'][0])
    hb2 = hb2.at[1:11].set(p['dig2_b'])

    return dict(
        s1=s1, w1=c1, b1=p['conv1_b'].reshape(1, -1),
        s2=s2, w2=c2, b2=p['conv2_b'].reshape(1, -1),
        s3=s3, w3=c3, b3=p['conv3_b'].reshape(1, -1),
        fe_w=few.reshape(hidden, num_heads * E),
        fe_b=feb.reshape(1, num_heads * E),
        wkv=jnp.concatenate([p['wk'], p['wv']], axis=1),
        bkv=jnp.concatenate([p['bk'], p['bv']]).reshape(1, -1),
        wo=p['wo'], bo=p['bo'].reshape(1, -1),
        hw1=jnp.concatenate([p['rot1_w'], p['dig1_w']], axis=1),
        hb1=jnp.concatenate([p['rot1_b'], p['dig1_b']]).reshape(1, -1),
        hw2=hw2, hb2=hb2.reshape(1, -1),
        fiw=p['fi_w'], fib=p['fi_b'].reshape(1, -1),
    )


# --------------------------------------------------------------------------
# Forward pass (mirrors InterpretableAttentionLLMRotatedMNIST.forward)
# --------------------------------------------------------------------------

def forward(params, image, prompt_embedding, num_heads=8):
    """image: [B, 1, H, W] (NCHW); prompt_embedding: [B, Sp, hidden].

    Returns (digit_pred [B,10], rotation_pred [B,1],
             interpretable_features [B,128], attention_weights [B, L, S]).
    """
    B, _, H, W = image.shape
    E = 128
    S = params['s3'].shape[1]            # number of keys = final conv spatial size

    # CNN input: flatten spatial row-major, zero-pad Cin 1 -> 8
    img = jnp.pad(image.reshape(B, H * W, 1), ((0, 0), (0, 0), (0, 7)))

    # --- prompt encoder ---
    # TODO(synk): BERT (AutoModel) + tokenizer have no Pallas equivalent; the
    # deterministic `prompt_embedding` input replaces llm(**tokens).last_hidden_state.
    q_raw = query_projection(prompt_embedding, params['fe_w'], params['fe_b'])
    queries = q_raw.reshape(B, -1, E)    # [B, L, E], L = Sp * num_heads

    small, interp, attnw = fused_forward_call(img, queries, params, num_heads)

    rotation_pred = small[:, 0, 0:1]
    digit_pred = small[:, 0, 1:11]
    interpretable = interp[:, 0, :]
    attention_weights = attnw[:, :, :S]
    return digit_pred, rotation_pred, interpretable, attention_weights


# --------------------------------------------------------------------------
# Pure-JAX reference (for in-script numerical verification)
# --------------------------------------------------------------------------

def reference_forward(raw, image, prompt, num_heads=8):
    E = 128
    D = E // num_heads
    scale = 1.0 / (D ** 0.5)
    x = image
    for wn, bn in (('conv1_w', 'conv1_b'), ('conv2_w', 'conv2_b'),
                   ('conv3_w', 'conv3_b')):
        x = jax.lax.conv_general_dilated(
            x, raw[wn], (2, 2), ((1, 1), (1, 1)),
            dimension_numbers=('NCHW', 'HWIO', 'NCHW'))
        x = jax.nn.relu(x + raw[bn][None, :, None, None])
    B, C, Ho, Wo = x.shape
    kv = x.reshape(B, C, Ho * Wo).transpose(0, 2, 1)                 # [B, S, C]
    fe = prompt @ raw['fe_w'] + raw['fe_b']
    queries = fe.reshape(B, -1, E)                                    # [B, L, E]
    q = queries @ raw['wq'] + raw['bq']
    k = kv @ raw['wk'] + raw['bk']
    v = kv @ raw['wv'] + raw['bv']
    ctxs, attns = [], []
    for h in range(num_heads):
        qs, ks, vs = (t[..., h * D:(h + 1) * D] for t in (q, k, v))
        a = jax.nn.softmax(jnp.einsum('bld,bsd->bls', qs, ks) * scale, axis=-1)
        attns.append(a)
        ctxs.append(jnp.einsum('bls,bsd->bld', a, vs))
    out = jnp.concatenate(ctxs, axis=-1) @ raw['wo'] + raw['bo']
    attended = out.mean(axis=1)                                       # [B, E]
    attn_w = sum(attns) / num_heads                                   # [B, L, S]
    rot = (jax.nn.relu(attended @ raw['rot1_w'] + raw['rot1_b'])
           @ raw['rot2_w'] + raw['rot2_b'])
    dig = (jax.nn.relu(attended @ raw['dig1_w'] + raw['dig1_b'])
           @ raw['dig2_w'] + raw['dig2_b'])
    interp = attended @ raw['fi_w'] + raw['fi_b']
    return dig, rot, interp, attn_w


# --------------------------------------------------------------------------
# Demo
# --------------------------------------------------------------------------

if __name__ == "__main__":
    key = jax.random.PRNGKey(0)
    k_param, k_img, k_prompt = jax.random.split(key, 3)

    num_heads = 8
    B, H_img, W_img = 2, 16, 16          # 16x16 -> 8 -> 4 -> 2 after three stride-2 convs
    Sp, hidden = 4, 768                  # small synthetic prompt sequence

    raw = init_params(k_param, hidden_size=hidden, num_heads=num_heads)
    params = prepare_params(raw, image_hw=(H_img, W_img), num_heads=num_heads)

    image = jax.random.normal(k_img, (B, 1, H_img, W_img), dtype=jnp.float32)
    prompt_embedding = jax.random.normal(k_prompt, (B, Sp, hidden), dtype=jnp.float32)

    fwd = jax.jit(functools.partial(forward, num_heads=num_heads))
    outs = fwd(params, image, prompt_embedding)
    jax.block_until_ready(outs)

    digit_pred, rotation_pred, interp, attn_w = outs
    assert digit_pred.shape == (B, 10)
    assert rotation_pred.shape == (B, 1)
    assert interp.shape == (B, 128)
    assert attn_w.shape == (B, Sp * num_heads, (H_img // 8) * (W_img // 8))

    # numerical check against a pure-JAX reference of the PyTorch module
    ref_dig, ref_rot, ref_interp, ref_attn = reference_forward(
        raw, image, prompt_embedding, num_heads)
    assert jnp.allclose(digit_pred, ref_dig, atol=2e-3, rtol=2e-3)
    assert jnp.allclose(rotation_pred, ref_rot, atol=2e-3, rtol=2e-3)
    assert jnp.allclose(interp, ref_interp, atol=2e-3, rtol=2e-3)
    assert jnp.allclose(attn_w, ref_attn, atol=2e-3, rtol=2e-3)

    print("KERNEL_OK")
</pallas_src>

<mosaic_0001>
module attributes {stable_mosaic.version = 11 : i64} {
  func.func @_query_kernel(%arg0: i32, %arg1: memref<1x4x768xf32, #tpu.memory_space<vmem>>, %arg2: memref<768x1024xf32, #tpu.memory_space<vmem>>, %arg3: memref<1x1024xf32, #tpu.memory_space<vmem>>, %arg4: memref<1x4x1024xf32, #tpu.memory_space<vmem>>) attributes {dimension_semantics = [#tpu.dimension_semantics<parallel>], iteration_bounds = array<i64: 2>, scalar_prefetch = 0 : i64, scratch_operands = 0 : i64, tpu.core_type = #tpu.core_type<tc>, window_params = [{transform_indices = @transform_0, window_bounds = array<i64: 1, 4, 768>}, {pipeline_mode = #tpu.pipeline_mode<synchronous>, transform_indices = @transform_1, window_bounds = array<i64: 768, 1024>}, {pipeline_mode = #tpu.pipeline_mode<synchronous>, transform_indices = @transform_2, window_bounds = array<i64: 1, 1024>}, {transform_indices = @transform_3, window_bounds = array<i64: 1, 4, 1024>}]} {
    %c0 = arith.constant 0 : index
    %c0_0 = arith.constant 0 : index
    %c0_1 = arith.constant 0 : index
    %0 = vector.load %arg1[%c0, %c0_0, %c0_1] : memref<1x4x768xf32, #tpu.memory_space<vmem>>, vector<1x4x768xf32>
    %1 = vector.shape_cast %0 : vector<1x4x768xf32> to vector<4x768xf32>
    %c0_2 = arith.constant 0 : index
    %c0_3 = arith.constant 0 : index
    %2 = vector.load %arg2[%c0_2, %c0_3] : memref<768x1024xf32, #tpu.memory_space<vmem>>, vector<768x1024xf32>
    %cst = arith.constant dense<0.000000e+00> : vector<4x1024xf32>
    %3 = tpu.matmul %1, %2, %cst {dimension_numbers = #tpu.dot_dimension_numbers<[1], [0], [0], [1], [0, 0, 1, 1], [], []>} : vector<4x768xf32>, vector<768x1024xf32>, vector<4x1024xf32> -> vector<4x1024xf32>
    %c0_4 = arith.constant 0 : index
    %c0_5 = arith.constant 0 : index
    %4 = vector.load %arg3[%c0_4, %c0_5] : memref<1x1024xf32, #tpu.memory_space<vmem>>, vector<1x1024xf32>
    %5 = vector.broadcast %4 : vector<1x1024xf32> to vector<4x1024xf32>
    %6 = arith.addf %3, %5 : vector<4x1024xf32>
    %c0_6 = arith.constant 0 : index
    %c0_7 = arith.constant 0 : index
    %c0_8 = arith.constant 0 : index
    %7 = vector.load %arg4[%c0_6, %c0_7, %c0_8] : memref<1x4x1024xf32, #tpu.memory_space<vmem>>, vector<1x4x1024xf32>
    %8 = vector.shape_cast %7 : vector<1x4x1024xf32> to vector<4x1024xf32>
    %9 = vector.shape_cast %6 : vector<4x1024xf32> to vector<1x4x1024xf32>
    tpu.vector_store %arg4[%c0_6, %c0_7, %c0_8], %9 {strides = array<i32>} : memref<1x4x1024xf32, #tpu.memory_space<vmem>>, vector<1x4x1024xf32>,
    return
  }
  func.func @transform_0(%arg0: i32) -> (i32, i32, i32) {
    %c0_i32 = arith.constant 0 : i32
    %c0_i32_0 = arith.constant 0 : i32
    %c0_i32_1 = arith.constant 0 : i32
    return %arg0, %c0_i32, %c0_i32_0 : i32, i32, i32
  }
  func.func @transform_1(%arg0: i32) -> (i32, i32) {
    %c0_i32 = arith.constant 0 : i32
    %c0_i32_0 = arith.constant 0 : i32
    %c0_i32_1 = arith.constant 0 : i32
    return %c0_i32, %c0_i32_0 : i32, i32
  }
  func.func @transform_2(%arg0: i32) -> (i32, i32) {
    %c0_i32 = arith.constant 0 : i32
    %c0_i32_0 = arith.constant 0 : i32
    %c0_i32_1 = arith.constant 0 : i32
    return %c0_i32, %c0_i32_0 : i32, i32
  }
  func.func @transform_3(%arg0: i32) -> (i32, i32, i32) {
    %c0_i32 = arith.constant 0 : i32
    %c0_i32_0 = arith.constant 0 : i32
    %c0_i32_1 = arith.constant 0 : i32
    return %arg0, %c0_i32, %c0_i32_0 : i32, i32, i32
  }
}

module attributes {stable_mosaic.version = 11 : i64} {
  func.func @_fused_kernel(%arg0: i32, %arg1: memref<1x256x8xf32, #tpu.memory_space<vmem>>, %arg2: memref<1x32x128xf32, #tpu.memory_space<vmem>>, %arg3: memref<9x64x256xf32, #tpu.memory_space<vmem>>, %arg4: memref<9x8x32xf32, #tpu.memory_space<vmem>>, %arg5: memref<1x32xf32, #tpu.memory_space<vmem>>, %arg6: memref<9x16x64xf32, #tpu.memory_space<vmem>>, %arg7: memref<9x32x64xf32, #tpu.memory_space<vmem>>, %arg8: memref<1x64xf32, #tpu.memory_space<vmem>>, %arg9: memref<9x4x16xf32, #tpu.memory_space<vmem>>, %arg10: memref<9x64x128xf32, #tpu.memory_space<vmem>>, %arg11: memref<1x128xf32, #tpu.memory_space<vmem>>, %arg12: memref<128x256xf32, #tpu.memory_space<vmem>>, %arg13: memref<1x256xf32, #tpu.memory_space<vmem>>, %arg14: memref<128x128xf32, #tpu.memory_space<vmem>>, %arg15: memref<1x128xf32, #tpu.memory_space<vmem>>, %arg16: memref<128x128xf32, #tpu.memory_space<vmem>>, %arg17: memref<1x128xf32, #tpu.memory_space<vmem>>, %arg18: memref<128x128xf32, #tpu.memory_space<vmem>>, %arg19: memref<1x128xf32, #tpu.memory_space<vmem>>, %arg20: memref<128x128xf32, #tpu.memory_space<vmem>>, %arg21: memref<1x128xf32, #tpu.memory_space<vmem>>, %arg22: memref<1x1x128xf32, #tpu.memory_space<vmem>>, %arg23: memref<1x1x128xf32, #tpu.memory_space<vmem>>, %arg24: memref<1x32x128xf32, #tpu.memory_space<vmem>>) attributes {dimension_semantics = [#tpu.dimension_semantics<parallel>], iteration_bounds = array<i64: 2>, scalar_prefetch = 0 : i64, scratch_operands = 0 : i64, tpu.core_type = #tpu.core_type<tc>, window_params = [{transform_indices = @transform_0, window_bounds = array<i64: 1, 256, 8>}, {transform_indices = @transform_1, window_bounds = array<i64: 1, 32, 128>}, {pipeline_mode = #tpu.pipeline_mode<synchronous>, transform_indices = @transform_2, window_bounds = array<i64: 9, 64, 256>}, {pipeline_mode = #tpu.pipeline_mode<synchronous>, transform_indices = @transform_3, window_bounds = array<i64: 9, 8, 32>}, {pipeline_mode = #tpu.pipeline_mode<synchronous>, transform_indices = @transform_4, window_bounds = array<i64: 1, 32>}, {pipeline_mode = #tpu.pipeline_mode<synchronous>, transform_indices = @transform_5, window_bounds = array<i64: 9, 16, 64>}, {pipeline_mode = #tpu.pipeline_mode<synchronous>, transform_indices = @transform_6, window_bounds = array<i64: 9, 32, 64>}, {pipeline_mode = #tpu.pipeline_mode<synchronous>, transform_indices = @transform_7, window_bounds = array<i64: 1, 64>}, {pipeline_mode = #tpu.pipeline_mode<synchronous>, transform_indices = @transform_8, window_bounds = array<i64: 9, 4, 16>}, {pipeline_mode = #tpu.pipeline_mode<synchronous>, transform_indices = @transform_9, window_bounds = array<i64: 9, 64, 128>}, {pipeline_mode = #tpu.pipeline_mode<synchronous>, transform_indices = @transform_10, window_bounds = array<i64: 1, 128>}, {pipeline_mode = #tpu.pipeline_mode<synchronous>, transform_indices = @transform_11, window_bounds = array<i64: 128, 256>}, {pipeline_mode = #tpu.pipeline_mode<synchronous>, transform_indices = @transform_12, window_bounds = array<i64: 1, 256>}, {pipeline_mode = #tpu.pipeline_mode<synchronous>, transform_indices = @transform_13, window_bounds = array<i64: 128, 128>}, {pipeline_mode = #tpu.pipeline_mode<synchronous>, transform_indices = @transform_14, window_bounds = array<i64: 1, 128>}, {pipeline_mode = #tpu.pipeline_mode<synchronous>, transform_indices = @transform_15, window_bounds = array<i64: 128, 128>}, {pipeline_mode = #tpu.pipeline_mode<synchronous>, transform_indices = @transform_16, window_bounds = array<i64: 1, 128>}, {pipeline_mode = #tpu.pipeline_mode<synchronous>, transform_indices = @transform_17, window_bounds = array<i64: 128, 128>}, {pipeline_mode = #tpu.pipeline_mode<synchronous>, transform_indices = @transform_18, window_bounds = array<i64: 1, 128>}, {pipeline_mode = #tpu.pipeline_mode<synchronous>, transform_indices = @transform_19, window_bounds = array<i64: 128, 128>}, {pipeline_mode = #tpu.pipeline_mode<synchronous>, transform_indices = @transform_20, window_bounds = array<i64: 1, 128>}, {transform_indices = @transform_21, window_bounds = array<i64: 1, 1, 128>}, {transform_indices = @transform_22, window_bounds = array<i64: 1, 1, 128>}, {transform_indices = @transform_23, window_bounds = array<i64: 1, 32, 128>}]} {
    %c0 = arith.constant 0 : index
    %c0_0 = arith.constant 0 : index
    %c0_1 = arith.constant 0 : index
    %0 = vector.load %arg1[%c0, %c0_0, %c0_1] : memref<1x256x8xf32, #tpu.memory_space<vmem>>, vector<1x256x8xf32>
    %1 = vector.shape_cast %0 : vector<1x256x8xf32> to vector<256x8xf32>
    %cst = arith.constant 0.000000e+00 : f32
    %2 = vector.broadcast %cst : f32 to vector<64x32xf32>
    %c0_2 = arith.constant 0 : index
    %c0_3 = arith.constant 0 : index
    %c0_4 = arith.constant 0 : index
    %3 = vector.load %arg3[%c0_2, %c0_3, %c0_4] : memref<9x64x256xf32, #tpu.memory_space<vmem>>, vector<1x64x256xf32>
    %4 = vector.shape_cast %3 : vector<1x64x256xf32> to vector<64x256xf32>
    %cst_5 = arith.constant dense<0.000000e+00> : vector<64x8xf32>
    %5 = tpu.matmul %4, %1, %cst_5 {dimension_numbers = #tpu.dot_dimension_numbers<[1], [0], [0], [1], [0, 0, 1, 1], [], []>} : vector<64x256xf32>, vector<256x8xf32>, vector<64x8xf32> -> vector<64x8xf32>
    %c0_6 = arith.constant 0 : index
    %c0_7 = arith.constant 0 : index
    %c0_8 = arith.constant 0 : index
    %6 = vector.load %arg4[%c0_6, %c0_7, %c0_8] : memref<9x8x32xf32, #tpu.memory_space<vmem>>, vector<1x8x32xf32>
    %7 = vector.shape_cast %6 : vector<1x8x32xf32> to vector<8x32xf32>
    %cst_9 = arith.constant dense<0.000000e+00> : vector<64x32xf32>
    %8 = tpu.matmul %5, %7, %cst_9 {dimension_numbers = #tpu.dot_dimension_numbers<[1], [0], [0], [1], [0, 0, 1, 1], [], []>} : vector<64x8xf32>, vector<8x32xf32>, vector<64x32xf32> -> vector<64x32xf32>
    %9 = arith.addf %2, %8 : vector<64x32xf32>
    %c1 = arith.constant 1 : index
    %c0_10 = arith.constant 0 : index
    %c0_11 = arith.constant 0 : index
    %10 = vector.load %arg3[%c1, %c0_10, %c0_11] : memref<9x64x256xf32, #tpu.memory_space<vmem>>, vector<1x64x256xf32>
    %11 = vector.shape_cast %10 : vector<1x64x256xf32> to vector<64x256xf32>
    %cst_12 = arith.constant dense<0.000000e+00> : vector<64x8xf32>
    %12 = tpu.matmul %11, %1, %cst_12 {dimension_numbers = #tpu.dot_dimension_numbers<[1], [0], [0], [1], [0, 0, 1, 1], [], []>} : vector<64x256xf32>, vector<256x8xf32>, vector<64x8xf32> -> vector<64x8xf32>
    %c1_13 = arith.constant 1 : index
    %c0_14 = arith.constant 0 : index
    %c0_15 = arith.constant 0 : index
    %13 = vector.load %arg4[%c1_13, %c0_14, %c0_15] : memref<9x8x32xf32, #tpu.memory_space<vmem>>, vector<1x8x32xf32>
    %14 = vector.shape_cast %13 : vector<1x8x32xf32> to vector<8x32xf32>
    %cst_16 = arith.constant dense<0.000000e+00> : vector<64x32xf32>
    %15 = tpu.matmul %12, %14, %cst_16 {dimension_numbers = #tpu.dot_dimension_numbers<[1], [0], [0], [1], [0, 0, 1, 1], [], []>} : vector<64x8xf32>, vector<8x32xf32>, vector<64x32xf32> -> vector<64x32xf32>
    %16 = arith.addf %9, %15 : vector<64x32xf32>
    %c2 = arith.constant 2 : index
    %c0_17 = arith.constant 0 : index
    %c0_18 = arith.constant 0 : index
    %17 = vector.load %arg3[%c2, %c0_17, %c0_18] : memref<9x64x256xf32, #tpu.memory_space<vmem>>, vector<1x64x256xf32>
    %18 = vector.shape_cast %17 : vector<1x64x256xf32> to vector<64x256xf32>
    %cst_19 = arith.constant dense<0.000000e+00> : vector<64x8xf32>
    %19 = tpu.matmul %18, %1, %cst_19 {dimension_numbers = #tpu.dot_dimension_numbers<[1], [0], [0], [1], [0, 0, 1, 1], [], []>} : vector<64x256xf32>, vector<256x8xf32>, vector<64x8xf32> -> vector<64x8xf32>
    %c2_20 = arith.constant 2 : index
    %c0_21 = arith.constant 0 : index
    %c0_22 = arith.constant 0 : index
    %20 = vector.load %arg4[%c2_20, %c0_21, %c0_22] : memref<9x8x32xf32, #tpu.memory_space<vmem>>, vector<1x8x32xf32>
    %21 = vector.shape_cast %20 : vector<1x8x32xf32> to vector<8x32xf32>
    %cst_23 = arith.constant dense<0.000000e+00> : vector<64x32xf32>
    %22 = tpu.matmul %19, %21, %cst_23 {dimension_numbers = #tpu.dot_dimension_numbers<[1], [0], [0], [1], [0, 0, 1, 1], [], []>} : vector<64x8xf32>, vector<8x32xf32>, vector<64x32xf32> -> vector<64x32xf32>
    %23 = arith.addf %16, %22 : vector<64x32xf32>
    %c3 = arith.constant 3 : index
    %c0_24 = arith.constant 0 : index
    %c0_25 = arith.constant 0 : index
    %24 = vector.load %arg3[%c3, %c0_24, %c0_25] : memref<9x64x256xf32, #tpu.memory_space<vmem>>, vector<1x64x256xf32>
    %25 = vector.shape_cast %24 : vector<1x64x256xf32> to vector<64x256xf32>
    %cst_26 = arith.constant dense<0.000000e+00> : vector<64x8xf32>
    %26 = tpu.matmul %25, %1, %cst_26 {dimension_numbers = #tpu.dot_dimension_numbers<[1], [0], [0], [1], [0, 0, 1, 1], [], []>} : vector<64x256xf32>, vector<256x8xf32>, vector<64x8xf32> -> vector<64x8xf32>
    %c3_27 = arith.constant 3 : index
    %c0_28 = arith.constant 0 : index
    %c0_29 = arith.constant 0 : index
    %27 = vector.load %arg4[%c3_27, %c0_28, %c0_29] : memref<9x8x32xf32, #tpu.memory_space<vmem>>, vector<1x8x32xf32>
    %28 = vector.shape_cast %27 : vector<1x8x32xf32> to vector<8x32xf32>
    %cst_30 = arith.constant dense<0.000000e+00> : vector<64x32xf32>
    %29 = tpu.matmul %26, %28, %cst_30 {dimension_numbers = #tpu.dot_dimension_numbers<[1], [0], [0], [1], [0, 0, 1, 1], [], []>} : vector<64x8xf32>, vector<8x32xf32>, vector<64x32xf32> -> vector<64x32xf32>
    %30 = arith.addf %23, %29 : vector<64x32xf32>
    %c4 = arith.constant 4 : index
    %c0_31 = arith.constant 0 : index
    %c0_32 = arith.constant 0 : index
    %31 = vector.load %arg3[%c4, %c0_31, %c0_32] : memref<9x64x256xf32, #tpu.memory_space<vmem>>, vector<1x64x256xf32>
    %32 = vector.shape_cast %31 : vector<1x64x256xf32> to vector<64x256xf32>
    %cst_33 = arith.constant dense<0.000000e+00> : vector<64x8xf32>
    %33 = tpu.matmul %32, %1, %cst_33 {dimension_numbers = #tpu.dot_dimension_numbers<[1], [0], [0], [1], [0, 0, 1, 1], [], []>} : vector<64x256xf32>, vector<256x8xf32>, vector<64x8xf32> -> vector<64x8xf32>
    %c4_34 = arith.constant 4 : index
    %c0_35 = arith.constant 0 : index
    %c0_36 = arith.constant 0 : index
    %34 = vector.load %arg4[%c4_34, %c0_35, %c0_36] : memref<9x8x32xf32, #tpu.memory_space<vmem>>, vector<1x8x32xf32>
    %35 = vector.shape_cast %34 : vector<1x8x32xf32> to vector<8x32xf32>
    %cst_37 = arith.constant dense<0.000000e+00> : vector<64x32xf32>
    %36 = tpu.matmul %33, %35, %cst_37 {dimension_numbers = #tpu.dot_dimension_numbers<[1], [0], [0], [1], [0, 0, 1, 1], [], []>} : vector<64x8xf32>, vector<8x32xf32>, vector<64x32xf32> -> vector<64x32xf32>
    %37 = arith.addf %30, %36 : vector<64x32xf32>
    %c5 = arith.constant 5 : index
    %c0_38 = arith.constant 0 : index
    %c0_39 = arith.constant 0 : index
    %38 = vector.load %arg3[%c5, %c0_38, %c0_39] : memref<9x64x256xf32, #tpu.memory_space<vmem>>, vector<1x64x256xf32>
    %39 = vector.shape_cast %38 : vector<1x64x256xf32> to vector<64x256xf32>
    %cst_40 = arith.constant dense<0.000000e+00> : vector<64x8xf32>
    %40 = tpu.matmul %39, %1, %cst_40 {dimension_numbers = #tpu.dot_dimension_numbers<[1], [0], [0], [1], [0, 0, 1, 1], [], []>} : vector<64x256xf32>, vector<256x8xf32>, vector<64x8xf32> -> vector<64x8xf32>
    %c5_41 = arith.constant 5 : index
    %c0_42 = arith.constant 0 : index
    %c0_43 = arith.constant 0 : index
    %41 = vector.load %arg4[%c5_41, %c0_42, %c0_43] : memref<9x8x32xf32, #tpu.memory_space<vmem>>, vector<1x8x32xf32>
    %42 = vector.shape_cast %41 : vector<1x8x32xf32> to vector<8x32xf32>
    %cst_44 = arith.constant dense<0.000000e+00> : vector<64x32xf32>
    %43 = tpu.matmul %40, %42, %cst_44 {dimension_numbers = #tpu.dot_dimension_numbers<[1], [0], [0], [1], [0, 0, 1, 1], [], []>} : vector<64x8xf32>, vector<8x32xf32>, vector<64x32xf32> -> vector<64x32xf32>
    %44 = arith.addf %37, %43 : vector<64x32xf32>
    %c6 = arith.constant 6 : index
    %c0_45 = arith.constant 0 : index
    %c0_46 = arith.constant 0 : index
    %45 = vector.load %arg3[%c6, %c0_45, %c0_46] : memref<9x64x256xf32, #tpu.memory_space<vmem>>, vector<1x64x256xf32>
    %46 = vector.shape_cast %45 : vector<1x64x256xf32> to vector<64x256xf32>
    %cst_47 = arith.constant dense<0.000000e+00> : vector<64x8xf32>
    %47 = tpu.matmul %46, %1, %cst_47 {dimension_numbers = #tpu.dot_dimension_numbers<[1], [0], [0], [1], [0, 0, 1, 1], [], []>} : vector<64x256xf32>, vector<256x8xf32>, vector<64x8xf32> -> vector<64x8xf32>
    %c6_48 = arith.constant 6 : index
    %c0_49 = arith.constant 0 : index
    %c0_50 = arith.constant 0 : index
    %48 = vector.load %arg4[%c6_48, %c0_49, %c0_50] : memref<9x8x32xf32, #tpu.memory_space<vmem>>, vector<1x8x32xf32>
    %49 = vector.shape_cast %48 : vector<1x8x32xf32> to vector<8x32xf32>
    %cst_51 = arith.constant dense<0.000000e+00> : vector<64x32xf32>
    %50 = tpu.matmul %47, %49, %cst_51 {dimension_numbers = #tpu.dot_dimension_numbers<[1], [0], [0], [1], [0, 0, 1, 1], [], []>} : vector<64x8xf32>, vector<8x32xf32>, vector<64x32xf32> -> vector<64x32xf32>
    %51 = arith.addf %44, %50 : vector<64x32xf32>
    %c7 = arith.constant 7 : index
    %c0_52 = arith.constant 0 : index
    %c0_53 = arith.constant 0 : index
    %52 = vector.load %arg3[%c7, %c0_52, %c0_53] : memref<9x64x256xf32, #tpu.memory_space<vmem>>, vector<1x64x256xf32>
    %53 = vector.shape_cast %52 : vector<1x64x256xf32> to vector<64x256xf32>
    %cst_54 = arith.constant dense<0.000000e+00> : vector<64x8xf32>
    %54 = tpu.matmul %53, %1, %cst_54 {dimension_numbers = #tpu.dot_dimension_numbers<[1], [0], [0], [1], [0, 0, 1, 1], [], []>} : vector<64x256xf32>, vector<256x8xf32>, vector<64x8xf32> -> vector<64x8xf32>
    %c7_55 = arith.constant 7 : index
    %c0_56 = arith.constant 0 : index
    %c0_57 = arith.constant 0 : index
    %55 = vector.load %arg4[%c7_55, %c0_56, %c0_57] : memref<9x8x32xf32, #tpu.memory_space<vmem>>, vector<1x8x32xf32>
    %56 = vector.shape_cast %55 : vector<1x8x32xf32> to vector<8x32xf32>
    %cst_58 = arith.constant dense<0.000000e+00> : vector<64x32xf32>
    %57 = tpu.matmul %54, %56, %cst_58 {dimension_numbers = #tpu.dot_dimension_numbers<[1], [0], [0], [1], [0, 0, 1, 1], [], []>} : vector<64x8xf32>, vector<8x32xf32>, vector<64x32xf32> -> vector<64x32xf32>
    %58 = arith.addf %51, %57 : vector<64x32xf32>
    %c8 = arith.constant 8 : index
    %c0_59 = arith.constant 0 : index
    %c0_60 = arith.constant 0 : index
    %59 = vector.load %arg3[%c8, %c0_59, %c0_60] : memref<9x64x256xf32, #tpu.memory_space<vmem>>, vector<1x64x256xf32>
    %60 = vector.shape_cast %59 : vector<1x64x256xf32> to vector<64x256xf32>
    %cst_61 = arith.constant dense<0.000000e+00> : vector<64x8xf32>
    %61 = tpu.matmul %60, %1, %cst_61 {dimension_numbers = #tpu.dot_dimension_numbers<[1], [0], [0], [1], [0, 0, 1, 1], [], []>} : vector<64x256xf32>, vector<256x8xf32>, vector<64x8xf32> -> vector<64x8xf32>
    %c8_62 = arith.constant 8 : index
    %c0_63 = arith.constant 0 : index
    %c0_64 = arith.constant 0 : index
    %62 = vector.load %arg4[%c8_62, %c0_63, %c0_64] : memref<9x8x32xf32, #tpu.memory_space<vmem>>, vector<1x8x32xf32>
    %63 = vector.shape_cast %62 : vector<1x8x32xf32> to vector<8x32xf32>
    %cst_65 = arith.constant dense<0.000000e+00> : vector<64x32xf32>
    %64 = tpu.matmul %61, %63, %cst_65 {dimension_numbers = #tpu.dot_dimension_numbers<[1], [0], [0], [1], [0, 0, 1, 1], [], []>} : vector<64x8xf32>, vector<8x32xf32>, vector<64x32xf32> -> vector<64x32xf32>
    %65 = arith.addf %58, %64 : vector<64x32xf32>
    %c0_66 = arith.constant 0 : index
    %c0_67 = arith.constant 0 : index
    %66 = vector.load %arg5[%c0_66, %c0_67] : memref<1x32xf32, #tpu.memory_space<vmem>>, vector<1x32xf32>
    %67 = vector.broadcast %66 : vector<1x32xf32> to vector<64x32xf32>
    %68 = arith.addf %65, %67 : vector<64x32xf32>
    %cst_68 = arith.constant 0.000000e+00 : f32
    %69 = vector.broadcast %cst_68 : f32 to vector<64x32xf32>
    %70 = arith.maximumf %68, %69 : vector<64x32xf32>
    %cst_69 = arith.constant 0.000000e+00 : f32
    %71 = vector.broadcast %cst_69 : f32 to vector<16x64xf32>
    %c0_70 = arith.constant 0 : index
    %c0_71 = arith.constant 0 : index
    %c0_72 = arith.constant 0 : index
    %72 = vector.load %arg6[%c0_70, %c0_71, %c0_72] : memref<9x16x64xf32, #tpu.memory_space<vmem>>, vector<1x16x64xf32>
    %73 = vector.shape_cast %72 : vector<1x16x64xf32> to vector<16x64xf32>
    %cst_73 = arith.constant dense<0.000000e+00> : vector<16x32xf32>
    %74 = tpu.matmul %73, %70, %cst_73 {dimension_numbers = #tpu.dot_dimension_numbers<[1], [0], [0], [1], [0, 0, 1, 1], [], []>} : vector<16x64xf32>, vector<64x32xf32>, vector<16x32xf32> -> vector<16x32xf32>
    %c0_74 = arith.constant 0 : index
    %c0_75 = arith.constant 0 : index
    %c0_76 = arith.constant 0 : index
    %75 = vector.load %arg7[%c0_74, %c0_75, %c0_76] : memref<9x32x64xf32, #tpu.memory_space<vmem>>, vector<1x32x64xf32>
    %76 = vector.shape_cast %75 : vector<1x32x64xf32> to vector<32x64xf32>
    %cst_77 = arith.constant dense<0.000000e+00> : vector<16x64xf32>
    %77 = tpu.matmul %74, %76, %cst_77 {dimension_numbers = #tpu.dot_dimension_numbers<[1], [0], [0], [1], [0, 0, 1, 1], [], []>} : vector<16x32xf32>, vector<32x64xf32>, vector<16x64xf32> -> vector<16x64xf32>
    %78 = arith.addf %71, %77 : vector<16x64xf32>
    %c1_78 = arith.constant 1 : index
    %c0_79 = arith.constant 0 : index
    %c0_80 = arith.constant 0 : index
    %79 = vector.load %arg6[%c1_78, %c0_79, %c0_80] : memref<9x16x64xf32, #tpu.memory_space<vmem>>, vector<1x16x64xf32>
    %80 = vector.shape_cast %79 : vector<1x16x64xf32> to vector<16x64xf32>
    %cst_81 = arith.constant dense<0.000000e+00> : vector<16x32xf32>
    %81 = tpu.matmul %80, %70, %cst_81 {dimension_numbers = #tpu.dot_dimension_numbers<[1], [0], [0], [1], [0, 0, 1, 1], [], []>} : vector<16x64xf32>, vector<64x32xf32>, vector<16x32xf32> -> vector<16x32xf32>
    %c1_82 = arith.constant 1 : index
    %c0_83 = arith.constant 0 : index
    %c0_84 = arith.constant 0 : index
    %82 = vector.load %arg7[%c1_82, %c0_83, %c0_84] : memref<9x32x64xf32, #tpu.memory_space<vmem>>, vector<1x32x64xf32>
    %83 = vector.shape_cast %82 : vector<1x32x64xf32> to vector<32x64xf32>
    %cst_85 = arith.constant dense<0.000000e+00> : vector<16x64xf32>
    %84 = tpu.matmul %81, %83, %cst_85 {dimension_numbers = #tpu.dot_dimension_numbers<[1], [0], [0], [1], [0, 0, 1, 1], [], []>} : vector<16x32xf32>, vector<32x64xf32>, vector<16x64xf32> -> vector<16x64xf32>
    %85 = arith.addf %78, %84 : vector<16x64xf32>
    %c2_86 = arith.constant 2 : index
    %c0_87 = arith.constant 0 : index
    %c0_88 = arith.constant 0 : index
    %86 = vector.load %arg6[%c2_86, %c0_87, %c0_88] : memref<9x16x64xf32, #tpu.memory_space<vmem>>, vector<1x16x64xf32>
    %87 = vector.shape_cast %86 : vector<1x16x64xf32> to vector<16x64xf32>
    %cst_89 = arith.constant dense<0.000000e+00> : vector<16x32xf32>
    %88 = tpu.matmul %87, %70, %cst_89 {dimension_numbers = #tpu.dot_dimension_numbers<[1], [0], [0], [1], [0, 0, 1, 1], [], []>} : vector<16x64xf32>, vector<64x32xf32>, vector<16x32xf32> -> vector<16x32xf32>
    %c2_90 = arith.constant 2 : index
    %c0_91 = arith.constant 0 : index
    %c0_92 = arith.constant 0 : index
    %89 = vector.load %arg7[%c2_90, %c0_91, %c0_92] : memref<9x32x64xf32, #tpu.memory_space<vmem>>, vector<1x32x64xf32>
    %90 = vector.shape_cast %89 : vector<1x32x64xf32> to vector<32x64xf32>
    %cst_93 = arith.constant dense<0.000000e+00> : vector<16x64xf32>
    %91 = tpu.matmul %88, %90, %cst_93 {dimension_numbers = #tpu.dot_dimension_numbers<[1], [0], [0], [1], [0, 0, 1, 1], [], []>} : vector<16x32xf32>, vector<32x64xf32>, vector<16x64xf32> -> vector<16x64xf32>
    %92 = arith.addf %85, %91 : vector<16x64xf32>
    %c3_94 = arith.constant 3 : index
    %c0_95 = arith.constant 0 : index
    %c0_96 = arith.constant 0 : index
    %93 = vector.load %arg6[%c3_94, %c0_95, %c0_96] : memref<9x16x64xf32, #tpu.memory_space<vmem>>, vector<1x16x64xf32>
    %94 = vector.shape_cast %93 : vector<1x16x64xf32> to vector<16x64xf32>
    %cst_97 = arith.constant dense<0.000000e+00> : vector<16x32xf32>
    %95 = tpu.matmul %94, %70, %cst_97 {dimension_numbers = #tpu.dot_dimension_numbers<[1], [0], [0], [1], [0, 0, 1, 1], [], []>} : vector<16x64xf32>, vector<64x32xf32>, vector<16x32xf32> -> vector<16x32xf32>
    %c3_98 = arith.constant 3 : index
    %c0_99 = arith.constant 0 : index
    %c0_100 = arith.constant 0 : index
    %96 = vector.load %arg7[%c3_98, %c0_99, %c0_100] : memref<9x32x64xf32, #tpu.memory_space<vmem>>, vector<1x32x64xf32>
    %97 = vector.shape_cast %96 : vector<1x32x64xf32> to vector<32x64xf32>
    %cst_101 = arith.constant dense<0.000000e+00> : vector<16x64xf32>
    %98 = tpu.matmul %95, %97, %cst_101 {dimension_numbers = #tpu.dot_dimension_numbers<[1], [0], [0], [1], [0, 0, 1, 1], [], []>} : vector<16x32xf32>, vector<32x64xf32>, vector<16x64xf32> -> vector<16x64xf32>
    %99 = arith.addf %92, %98 : vector<16x64xf32>
    %c4_102 = arith.constant 4 : index
    %c0_103 = arith.constant 0 : index
    %c0_104 = arith.constant 0 : index
    %100 = vector.load %arg6[%c4_102, %c0_103, %c0_104] : memref<9x16x64xf32, #tpu.memory_space<vmem>>, vector<1x16x64xf32>
    %101 = vector.shape_cast %100 : vector<1x16x64xf32> to vector<16x64xf32>
    %cst_105 = arith.constant dense<0.000000e+00> : vector<16x32xf32>
    %102 = tpu.matmul %101, %70, %cst_105 {dimension_numbers = #tpu.dot_dimension_numbers<[1], [0], [0], [1], [0, 0, 1, 1], [], []>} : vector<16x64xf32>, vector<64x32xf32>, vector<16x32xf32> -> vector<16x32xf32>
    %c4_106 = arith.constant 4 : index
    %c0_107 = arith.constant 0 : index
    %c0_108 = arith.constant 0 : index
    %103 = vector.load %arg7[%c4_106, %c0_107, %c0_108] : memref<9x32x64xf32, #tpu.memory_space<vmem>>, vector<1x32x64xf32>
    %104 = vector.shape_cast %103 : vector<1x32x64xf32> to vector<32x64xf32>
    %cst_109 = arith.constant dense<0.000000e+00> : vector<16x64xf32>
    %105 = tpu.matmul %102, %104, %cst_109 {dimension_numbers = #tpu.dot_dimension_numbers<[1], [0], [0], [1], [0, 0, 1, 1], [], []>} : vector<16x32xf32>, vector<32x64xf32>, vector<16x64xf32> -> vector<16x64xf32>
    %106 = arith.addf %99, %105 : vector<16x64xf32>
    %c5_110 = arith.constant 5 : index
    %c0_111 = arith.constant 0 : index
    %c0_112 = arith.constant 0 : index
    %107 = vector.load %arg6[%c5_110, %c0_111, %c0_112] : memref<9x16x64xf32, #tpu.memory_space<vmem>>, vector<1x16x64xf32>
    %108 = vector.shape_cast %107 : vector<1x16x64xf32> to vector<16x64xf32>
    %cst_113 = arith.constant dense<0.000000e+00> : vector<16x32xf32>
    %109 = tpu.matmul %108, %70, %cst_113 {dimension_numbers = #tpu.dot_dimension_numbers<[1], [0], [0], [1], [0, 0, 1, 1], [], []>} : vector<16x64xf32>, vector<64x32xf32>, vector<16x32xf32> -> vector<16x32xf32>
    %c5_114 = arith.constant 5 : index
    %c0_115 = arith.constant 0 : index
    %c0_116 = arith.constant 0 : index
    %110 = vector.load %arg7[%c5_114, %c0_115, %c0_116] : memref<9x32x64xf32, #tpu.memory_space<vmem>>, vector<1x32x64xf32>
    %111 = vector.shape_cast %110 : vector<1x32x64xf32> to vector<32x64xf32>
    %cst_117 = arith.constant dense<0.000000e+00> : vector<16x64xf32>
    %112 = tpu.matmul %109, %111, %cst_117 {dimension_numbers = #tpu.dot_dimension_numbers<[1], [0], [0], [1], [0, 0, 1, 1], [], []>} : vector<16x32xf32>, vector<32x64xf32>, vector<16x64xf32> -> vector<16x64xf32>
    %113 = arith.addf %106, %112 : vector<16x64xf32>
    %c6_118 = arith.constant 6 : index
    %c0_119 = arith.constant 0 : index
    %c0_120 = arith.constant 0 : index
    %114 = vector.load %arg6[%c6_118, %c0_119, %c0_120] : memref<9x16x64xf32, #tpu.memory_space<vmem>>, vector<1x16x64xf32>
    %115 = vector.shape_cast %114 : vector<1x16x64xf32> to vector<16x64xf32>
    %cst_121 = arith.constant dense<0.000000e+00> : vector<16x32xf32>
    %116 = tpu.matmul %115, %70, %cst_121 {dimension_numbers = #tpu.dot_dimension_numbers<[1], [0], [0], [1], [0, 0, 1, 1], [], []>} : vector<16x64xf32>, vector<64x32xf32>, vector<16x32xf32> -> vector<16x32xf32>
    %c6_122 = arith.constant 6 : index
    %c0_123 = arith.constant 0 : index
    %c0_124 = arith.constant 0 : index
    %117 = vector.load %arg7[%c6_122, %c0_123, %c0_124] : memref<9x32x64xf32, #tpu.memory_space<vmem>>, vector<1x32x64xf32>
    %118 = vector.shape_cast %117 : vector<1x32x64xf32> to vector<32x64xf32>
    %cst_125 = arith.constant dense<0.000000e+00> : vector<16x64xf32>
    %119 = tpu.matmul %116, %118, %cst_125 {dimension_numbers = #tpu.dot_dimension_numbers<[1], [0], [0], [1], [0, 0, 1, 1], [], []>} : vector<16x32xf32>, vector<32x64xf32>, vector<16x64xf32> -> vector<16x64xf32>
    %120 = arith.addf %113, %119 : vector<16x64xf32>
    %c7_126 = arith.constant 7 : index
    %c0_127 = arith.constant 0 : index
    %c0_128 = arith.constant 0 : index
    %121 = vector.load %arg6[%c7_126, %c0_127, %c0_128] : memref<9x16x64xf32, #tpu.memory_space<vmem>>, vector<1x16x64xf32>
    %122 = vector.shape_cast %121 : vector<1x16x64xf32> to vector<16x64xf32>
    %cst_129 = arith.constant dense<0.000000e+00> : vector<16x32xf32>
    %123 = tpu.matmul %122, %70, %cst_129 {dimension_numbers = #tpu.dot_dimension_numbers<[1], [0], [0], [1], [0, 0, 1, 1], [], []>} : vector<16x64xf32>, vector<64x32xf32>, vector<16x32xf32> -> vector<16x32xf32>
    %c7_130 = arith.constant 7 : index
    %c0_131 = arith.constant 0 : index
    %c0_132 = arith.constant 0 : index
    %124 = vector.load %arg7[%c7_130, %c0_131, %c0_132] : memref<9x32x64xf32, #tpu.memory_space<vmem>>, vector<1x32x64xf32>
    %125 = vector.shape_cast %124 : vector<1x32x64xf32> to vector<32x64xf32>
    %cst_133 = arith.constant dense<0.000000e+00> : vector<16x64xf32>
    %126 = tpu.matmul %123, %125, %cst_133 {dimension_numbers = #tpu.dot_dimension_numbers<[1], [0], [0], [1], [0, 0, 1, 1], [], []>} : vector<16x32xf32>, vector<32x64xf32>, vector<16x64xf32> -> vector<16x64xf32>
    %127 = arith.addf %120, %126 : vector<16x64xf32>
    %c8_134 = arith.constant 8 : index
    %c0_135 = arith.constant 0 : index
    %c0_136 = arith.constant 0 : index
    %128 = vector.load %arg6[%c8_134, %c0_135, %c0_136] : memref<9x16x64xf32, #tpu.memory_space<vmem>>, vector<1x16x64xf32>
    %129 = vector.shape_cast %128 : vector<1x16x64xf32> to vector<16x64xf32>
    %cst_137 = arith.constant dense<0.000000e+00> : vector<16x32xf32>
    %130 = tpu.matmul %129, %70, %cst_137 {dimension_numbers = #tpu.dot_dimension_numbers<[1], [0], [0], [1], [0, 0, 1, 1], [], []>} : vector<16x64xf32>, vector<64x32xf32>, vector<16x32xf32> -> vector<16x32xf32>
    %c8_138 = arith.constant 8 : index
    %c0_139 = arith.constant 0 : index
    %c0_140 = arith.constant 0 : index
    %131 = vector.load %arg7[%c8_138, %c0_139, %c0_140] : memref<9x32x64xf32, #tpu.memory_space<vmem>>, vector<1x32x64xf32>
    %132 = vector.shape_cast %131 : vector<1x32x64xf32> to vector<32x64xf32>
    %cst_141 = arith.constant dense<0.000000e+00> : vector<16x64xf32>
    %133 = tpu.matmul %130, %132, %cst_141 {dimension_numbers = #tpu.dot_dimension_numbers<[1], [0], [0], [1], [0, 0, 1, 1], [], []>} : vector<16x32xf32>, vector<32x64xf32>, vector<16x64xf32> -> vector<16x64xf32>
    %134 = arith.addf %127, %133 : vector<16x64xf32>
    %c0_142 = arith.constant 0 : index
    %c0_143 = arith.constant 0 : index
    %135 = vector.load %arg8[%c0_142, %c0_143] : memref<1x64xf32, #tpu.memory_space<vmem>>, vector<1x64xf32>
    %136 = vector.broadcast %135 : vector<1x64xf32> to vector<16x64xf32>
    %137 = arith.addf %134, %136 : vector<16x64xf32>
    %cst_144 = arith.constant 0.000000e+00 : f32
    %138 = vector.broadcast %cst_144 : f32 to vector<16x64xf32>
    %139 = arith.maximumf %137, %138 : vector<16x64xf32>
    %cst_145 = arith.constant 0.000000e+00 : f32
    %140 = vector.broadcast %cst_145 : f32 to vector<4x128xf32>
    %c0_146 = arith.constant 0 : index
    %c0_147 = arith.constant 0 : index
    %c0_148 = arith.constant 0 : index
    %141 = vector.load %arg9[%c0_146, %c0_147, %c0_148] : memref<9x4x16xf32, #tpu.memory_space<vmem>>, vector<1x4x16xf32>
    %142 = vector.shape_cast %141 : vector<1x4x16xf32> to vector<4x16xf32>
    %cst_149 = arith.constant dense<0.000000e+00> : vector<4x64xf32>
    %143 = tpu.matmul %142, %139, %cst_149 {dimension_numbers = #tpu.dot_dimension_numbers<[1], [0], [0], [1], [0, 0, 1, 1], [], []>} : vector<4x16xf32>, vector<16x64xf32>, vector<4x64xf32> -> vector<4x64xf32>
    %c0_150 = arith.constant 0 : index
    %c0_151 = arith.constant 0 : index
    %c0_152 = arith.constant 0 : index
    %144 = vector.load %arg10[%c0_150, %c0_151, %c0_152] : memref<9x64x128xf32, #tpu.memory_space<vmem>>, vector<1x64x128xf32>
    %145 = vector.shape_cast %144 : vector<1x64x128xf32> to vector<64x128xf32>
    %cst_153 = arith.constant dense<0.000000e+00> : vector<4x128xf32>
    %146 = tpu.matmul %143, %145, %cst_153 {dimension_numbers = #tpu.dot_dimension_numbers<[1], [0], [0], [1], [0, 0, 1, 1], [], []>} : vector<4x64xf32>, vector<64x128xf32>, vector<4x128xf32> -> vector<4x128xf32>
    %147 = arith.addf %140, %146 : vector<4x128xf32>
    %c1_154 = arith.constant 1 : index
    %c0_155 = arith.constant 0 : index
    %c0_156 = arith.constant 0 : index
    %148 = vector.load %arg9[%c1_154, %c0_155, %c0_156] : memref<9x4x16xf32, #tpu.memory_space<vmem>>, vector<1x4x16xf32>
    %149 = vector.shape_cast %148 : vector<1x4x16xf32> to vector<4x16xf32>
    %cst_157 = arith.constant dense<0.000000e+00> : vector<4x64xf32>
    %150 = tpu.matmul %149, %139, %cst_157 {dimension_numbers = #tpu.dot_dimension_numbers<[1], [0], [0], [1], [0, 0, 1, 1], [], []>} : vector<4x16xf32>, vector<16x64xf32>, vector<4x64xf32> -> vector<4x64xf32>
    %c1_158 = arith.constant 1 : index
    %c0_159 = arith.constant 0 : index
    %c0_160 = arith.constant 0 : index
    %151 = vector.load %arg10[%c1_158, %c0_159, %c0_160] : memref<9x64x128xf32, #tpu.memory_space<vmem>>, vector<1x64x128xf32>
    %152 = vector.shape_cast %151 : vector<1x64x128xf32> to vector<64x128xf32>
    %cst_161 = arith.constant dense<0.000000e+00> : vector<4x128xf32>
    %153 = tpu.matmul %150, %152, %cst_161 {dimension_numbers = #tpu.dot_dimension_numbers<[1], [0], [0], [1], [0, 0, 1, 1], [], []>} : vector<4x64xf32>, vector<64x128xf32>, vector<4x128xf32> -> vector<4x128xf32>
    %154 = arith.addf %147, %153 : vector<4x128xf32>
    %c2_162 = arith.constant 2 : index
    %c0_163 = arith.constant 0 : index
    %c0_164 = arith.constant 0 : index
    %155 = vector.load %arg9[%c2_162, %c0_163, %c0_164] : memref<9x4x16xf32, #tpu.memory_space<vmem>>, vector<1x4x16xf32>
    %156 = vector.shape_cast %155 : vector<1x4x16xf32> to vector<4x16xf32>
    %cst_165 = arith.constant dense<0.000000e+00> : vector<4x64xf32>
    %157 = tpu.matmul %156, %139, %cst_165 {dimension_numbers = #tpu.dot_dimension_numbers<[1], [0], [0], [1], [0, 0, 1, 1], [], []>} : vector<4x16xf32>, vector<16x64xf32>, vector<4x64xf32> -> vector<4x64xf32>
    %c2_166 = arith.constant 2 : index
    %c0_167 = arith.constant 0 : index
    %c0_168 = arith.constant 0 : index
    %158 = vector.load %arg10[%c2_166, %c0_167, %c0_168] : memref<9x64x128xf32, #tpu.memory_space<vmem>>, vector<1x64x128xf32>
    %159 = vector.shape_cast %158 : vector<1x64x128xf32> to vector<64x128xf32>
    %cst_169 = arith.constant dense<0.000000e+00> : vector<4x128xf32>
    %160 = tpu.matmul %157, %159, %cst_169 {dimension_numbers = #tpu.dot_dimension_numbers<[1], [0], [0], [1], [0, 0, 1, 1], [], []>} : vector<4x64xf32>, vector<64x128xf32>, vector<4x128xf32> -> vector<4x128xf32>
    %161 = arith.addf %154, %160 : vector<4x128xf32>
    %c3_170 = arith.constant 3 : index
    %c0_171 = arith.constant 0 : index
    %c0_172 = arith.constant 0 : index
    %162 = vector.load %arg9[%c3_170, %c0_171, %c0_172] : memref<9x4x16xf32, #tpu.memory_space<vmem>>, vector<1x4x16xf32>
    %163 = vector.shape_cast %162 : vector<1x4x16xf32> to vector<4x16xf32>
    %cst_173 = arith.constant dense<0.000000e+00> : vector<4x64xf32>
    %164 = tpu.matmul %163, %139, %cst_173 {dimension_numbers = #tpu.dot_dimension_numbers<[1], [0], [0], [1], [0, 0, 1, 1], [], []>} : vector<4x16xf32>, vector<16x64xf32>, vector<4x64xf32> -> vector<4x64xf32>
    %c3_174 = arith.constant 3 : index
    %c0_175 = arith.constant 0 : index
    %c0_176 = arith.constant 0 : index
    %165 = vector.load %arg10[%c3_174, %c0_175, %c0_176] : memref<9x64x128xf32, #tpu.memory_space<vmem>>, vector<1x64x128xf32>
    %166 = vector.shape_cast %165 : vector<1x64x128xf32> to vector<64x128xf32>
    %cst_177 = arith.constant dense<0.000000e+00> : vector<4x128xf32>
    %167 = tpu.matmul %164, %166, %cst_177 {dimension_numbers = #tpu.dot_dimension_numbers<[1], [0], [0], [1], [0, 0, 1, 1], [], []>} : vector<4x64xf32>, vector<64x128xf32>, vector<4x128xf32> -> vector<4x128xf32>
    %168 = arith.addf %161, %167 : vector<4x128xf32>
    %c4_178 = arith.constant 4 : index
    %c0_179 = arith.constant 0 : index
    %c0_180 = arith.constant 0 : index
    %169 = vector.load %arg9[%c4_178, %c0_179, %c0_180] : memref<9x4x16xf32, #tpu.memory_space<vmem>>, vector<1x4x16xf32>
    %170 = vector.shape_cast %169 : vector<1x4x16xf32> to vector<4x16xf32>
    %cst_181 = arith.constant dense<0.000000e+00> : vector<4x64xf32>
    %171 = tpu.matmul %170, %139, %cst_181 {dimension_numbers = #tpu.dot_dimension_numbers<[1], [0], [0], [1], [0, 0, 1, 1], [], []>} : vector<4x16xf32>, vector<16x64xf32>, vector<4x64xf32> -> vector<4x64xf32>
    %c4_182 = arith.constant 4 : index
    %c0_183 = arith.constant 0 : index
    %c0_184 = arith.constant 0 : index
    %172 = vector.load %arg10[%c4_182, %c0_183, %c0_184] : memref<9x64x128xf32, #tpu.memory_space<vmem>>, vector<1x64x128xf32>
    %173 = vector.shape_cast %172 : vector<1x64x128xf32> to vector<64x128xf32>
    %cst_185 = arith.constant dense<0.000000e+00> : vector<4x128xf32>
    %174 = tpu.matmul %171, %173, %cst_185 {dimension_numbers = #tpu.dot_dimension_numbers<[1], [0], [0], [1], [0, 0, 1, 1], [], []>} : vector<4x64xf32>, vector<64x128xf32>, vector<4x128xf32> -> vector<4x128xf32>
    %175 = arith.addf %168, %174 : vector<4x128xf32>
    %c5_186 = arith.constant 5 : index
    %c0_187 = arith.constant 0 : index
    %c0_188 = arith.constant 0 : index
    %176 = vector.load %arg9[%c5_186, %c0_187, %c0_188] : memref<9x4x16xf32, #tpu.memory_space<vmem>>, vector<1x4x16xf32>
    %177 = vector.shape_cast %176 : vector<1x4x16xf32> to vector<4x16xf32>
    %cst_189 = arith.constant dense<0.000000e+00> : vector<4x64xf32>
    %178 = tpu.matmul %177, %139, %cst_189 {dimension_numbers = #tpu.dot_dimension_numbers<[1], [0], [0], [1], [0, 0, 1, 1], [], []>} : vector<4x16xf32>, vector<16x64xf32>, vector<4x64xf32> -> vector<4x64xf32>
    %c5_190 = arith.constant 5 : index
    %c0_191 = arith.constant 0 : index
    %c0_192 = arith.constant 0 : index
    %179 = vector.load %arg10[%c5_190, %c0_191, %c0_192] : memref<9x64x128xf32, #tpu.memory_space<vmem>>, vector<1x64x128xf32>
    %180 = vector.shape_cast %179 : vector<1x64x128xf32> to vector<64x128xf32>
    %cst_193 = arith.constant dense<0.000000e+00> : vector<4x128xf32>
    %181 = tpu.matmul %178, %180, %cst_193 {dimension_numbers = #tpu.dot_dimension_numbers<[1], [0], [0], [1], [0, 0, 1, 1], [], []>} : vector<4x64xf32>, vector<64x128xf32>, vector<4x128xf32> -> vector<4x128xf32>
    %182 = arith.addf %175, %181 : vector<4x128xf32>
    %c6_194 = arith.constant 6 : index
    %c0_195 = arith.constant 0 : index
    %c0_196 = arith.constant 0 : index
    %183 = vector.load %arg9[%c6_194, %c0_195, %c0_196] : memref<9x4x16xf32, #tpu.memory_space<vmem>>, vector<1x4x16xf32>
    %184 = vector.shape_cast %183 : vector<1x4x16xf32> to vector<4x16xf32>
    %cst_197 = arith.constant dense<0.000000e+00> : vector<4x64xf32>
    %185 = tpu.matmul %184, %139, %cst_197 {dimension_numbers = #tpu.dot_dimension_numbers<[1], [0], [0], [1], [0, 0, 1, 1], [], []>} : vector<4x16xf32>, vector<16x64xf32>, vector<4x64xf32> -> vector<4x64xf32>
    %c6_198 = arith.constant 6 : index
    %c0_199 = arith.constant 0 : index
    %c0_200 = arith.constant 0 : index
    %186 = vector.load %arg10[%c6_198, %c0_199, %c0_200] : memref<9x64x128xf32, #tpu.memory_space<vmem>>, vector<1x64x128xf32>
    %187 = vector.shape_cast %186 : vector<1x64x128xf32> to vector<64x128xf32>
    %cst_201 = arith.constant dense<0.000000e+00> : vector<4x128xf32>
    %188 = tpu.matmul %185, %187, %cst_201 {dimension_numbers = #tpu.dot_dimension_numbers<[1], [0], [0], [1], [0, 0, 1, 1], [], []>} : vector<4x64xf32>, vector<64x128xf32>, vector<4x128xf32> -> vector<4x128xf32>
    %189 = arith.addf %182, %188 : vector<4x128xf32>
    %c7_202 = arith.constant 7 : index
    %c0_203 = arith.constant 0 : index
    %c0_204 = arith.constant 0 : index
    %190 = vector.load %arg9[%c7_202, %c0_203, %c0_204] : memref<9x4x16xf32, #tpu.memory_space<vmem>>, vector<1x4x16xf32>
    %191 = vector.shape_cast %190 : vector<1x4x16xf32> to vector<4x16xf32>
    %cst_205 = arith.constant dense<0.000000e+00> : vector<4x64xf32>
    %192 = tpu.matmul %191, %139, %cst_205 {dimension_numbers = #tpu.dot_dimension_numbers<[1], [0], [0], [1], [0, 0, 1, 1], [], []>} : vector<4x16xf32>, vector<16x64xf32>, vector<4x64xf32> -> vector<4x64xf32>
    %c7_206 = arith.constant 7 : index
    %c0_207 = arith.constant 0 : index
    %c0_208 = arith.constant 0 : index
    %193 = vector.load %arg10[%c7_206, %c0_207, %c0_208] : memref<9x64x128xf32, #tpu.memory_space<vmem>>, vector<1x64x128xf32>
    %194 = vector.shape_cast %193 : vector<1x64x128xf32> to vector<64x128xf32>
    %cst_209 = arith.constant dense<0.000000e+00> : vector<4x128xf32>
    %195 = tpu.matmul %192, %194, %cst_209 {dimension_numbers = #tpu.dot_dimension_numbers<[1], [0], [0], [1], [0, 0, 1, 1], [], []>} : vector<4x64xf32>, vector<64x128xf32>, vector<4x128xf32> -> vector<4x128xf32>
    %196 = arith.addf %189, %195 : vector<4x128xf32>
    %c8_210 = arith.constant 8 : index
    %c0_211 = arith.constant 0 : index
    %c0_212 = arith.constant 0 : index
    %197 = vector.load %arg9[%c8_210, %c0_211, %c0_212] : memref<9x4x16xf32, #tpu.memory_space<vmem>>, vector<1x4x16xf32>
    %198 = vector.shape_cast %197 : vector<1x4x16xf32> to vector<4x16xf32>
    %cst_213 = arith.constant dense<0.000000e+00> : vector<4x64xf32>
    %199 = tpu.matmul %198, %139, %cst_213 {dimension_numbers = #tpu.dot_dimension_numbers<[1], [0], [0], [1], [0, 0, 1, 1], [], []>} : vector<4x16xf32>, vector<16x64xf32>, vector<4x64xf32> -> vector<4x64xf32>
    %c8_214 = arith.constant 8 : index
    %c0_215 = arith.constant 0 : index
    %c0_216 = arith.constant 0 : index
    %200 = vector.load %arg10[%c8_214, %c0_215, %c0_216] : memref<9x64x128xf32, #tpu.memory_space<vmem>>, vector<1x64x128xf32>
    %201 = vector.shape_cast %200 : vector<1x64x128xf32> to vector<64x128xf32>
    %cst_217 = arith.constant dense<0.000000e+00> : vector<4x128xf32>
    %202 = tpu.matmul %199, %201, %cst_217 {dimension_numbers = #tpu.dot_dimension_numbers<[1], [0], [0], [1], [0, 0, 1, 1], [], []>} : vector<4x64xf32>, vector<64x128xf32>, vector<4x128xf32> -> vector<4x128xf32>
    %203 = arith.addf %196, %202 : vector<4x128xf32>
    %c0_218 = arith.constant 0 : index
    %c0_219 = arith.constant 0 : index
    %204 = vector.load %arg11[%c0_218, %c0_219] : memref<1x128xf32, #tpu.memory_space<vmem>>, vector<1x128xf32>
    %205 = vector.broadcast %204 : vector<1x128xf32> to vector<4x128xf32>
    %206 = arith.addf %203, %205 : vector<4x128xf32>
    %cst_220 = arith.constant 0.000000e+00 : f32
    %207 = vector.broadcast %cst_220 : f32 to vector<4x128xf32>
    %208 = arith.maximumf %206, %207 : vector<4x128xf32>
    %c0_221 = arith.constant 0 : index
    %c0_222 = arith.constant 0 : index
    %c0_223 = arith.constant 0 : index
    %209 = vector.load %arg2[%c0_221, %c0_222, %c0_223] : memref<1x32x128xf32, #tpu.memory_space<vmem>>, vector<1x32x128xf32>
    %210 = vector.shape_cast %209 : vector<1x32x128xf32> to vector<32x128xf32>
    %c0_224 = arith.constant 0 : index
    %c0_225 = arith.constant 0 : index
    %211 = vector.load %arg12[%c0_224, %c0_225] : memref<128x256xf32, #tpu.memory_space<vmem>>, vector<128x256xf32>
    %cst_226 = arith.constant dense<0.000000e+00> : vector<4x256xf32>
    %212 = tpu.matmul %208, %211, %cst_226 {dimension_numbers = #tpu.dot_dimension_numbers<[1], [0], [0], [1], [0, 0, 1, 1], [], []>} : vector<4x128xf32>, vector<128x256xf32>, vector<4x256xf32> -> vector<4x256xf32>
    %c0_227 = arith.constant 0 : index
    %c0_228 = arith.constant 0 : index
    %213 = vector.load %arg13[%c0_227, %c0_228] : memref<1x256xf32, #tpu.memory_space<vmem>>, vector<1x256xf32>
    %214 = vector.broadcast %213 : vector<1x256xf32> to vector<4x256xf32>
    %215 = arith.addf %212, %214 : vector<4x256xf32>
    %216 = vector.extract_strided_slice %215 {offsets = [0, 0], sizes = [4, 128], strides = [1, 1]} : vector<4x256xf32> to vector<4x128xf32>
    %217 = vector.extract_strided_slice %215 {offsets = [0, 128], sizes = [4, 128], strides = [1, 1]} : vector<4x256xf32> to vector<4x128xf32>
    %cst_229 = arith.constant 0.000000e+00 : f32
    %218 = vector.broadcast %cst_229 : f32 to vector<32x4xf32>
    %cst_230 = arith.constant 0.000000e+00 : f32
    %219 = vector.broadcast %cst_230 : f32 to vector<1x128xf32>
    %220 = vector.extract_strided_slice %210 {offsets = [0, 0], sizes = [32, 16], strides = [1, 1]} : vector<32x128xf32> to vector<32x16xf32>
    %221 = vector.extract_strided_slice %216 {offsets = [0, 0], sizes = [4, 16], strides = [1, 1]} : vector<4x128xf32> to vector<4x16xf32>
    %cst_231 = arith.constant dense<0.000000e+00> : vector<32x4xf32>
    %222 = tpu.matmul %220, %221, %cst_231 {dimension_numbers = #tpu.dot_dimension_numbers<[1], [1], [0], [0], [0, 0, 1, 0], [], []>} : vector<32x16xf32>, vector<4x16xf32>, vector<32x4xf32> -> vector<32x4xf32>
    %cst_232 = arith.constant dense<0xFF800000> : vector<32xf32>
    %223 = vector.multi_reduction <maximumf>, %222, %cst_232 [1] : vector<32x4xf32> to vector<32xf32>
    %224 = vector.shape_cast %223 : vector<32xf32> to vector<32x1xf32>
    %225 = vector.broadcast %224 : vector<32x1xf32> to vector<32x4xf32>
    %226 = arith.subf %222, %225 : vector<32x4xf32>
    %227 = math.exp %226 : vector<32x4xf32>
    %cst_233 = arith.constant dense<0.000000e+00> : vector<32xf32>
    %228 = vector.multi_reduction <add>, %227, %cst_233 [1] : vector<32x4xf32> to vector<32xf32>
    %229 = vector.shape_cast %228 : vector<32xf32> to vector<32x1xf32>
    %230 = vector.broadcast %229 : vector<32x1xf32> to vector<32x4xf32>
    %231 = arith.divf %227, %230 : vector<32x4xf32>
    %232 = arith.addf %218, %231 : vector<32x4xf32>
    %cst_234 = arith.constant dense<0.000000e+00> : vector<4xf32>
    %233 = vector.multi_reduction <add>, %231, %cst_234 [0] : vector<32x4xf32> to vector<4xf32>
    %234 = vector.shape_cast %233 : vector<4xf32> to vector<1x4xf32>
    %cst_235 = arith.constant 3.200000e+01 : f32
    %235 = vector.broadcast %cst_235 : f32 to vector<1x4xf32>
    %236 = arith.divf %234, %235 : vector<1x4xf32>
    %237 = vector.extract_strided_slice %217 {offsets = [0, 0], sizes = [4, 16], strides = [1, 1]} : vector<4x128xf32> to vector<4x16xf32>
    %cst_236 = arith.constant dense<0.000000e+00> : vector<1x16xf32>
    %238 = tpu.matmul %236, %237, %cst_236 {dimension_numbers = #tpu.dot_dimension_numbers<[1], [0], [0], [1], [0, 0, 1, 1], [], []>} : vector<1x4xf32>, vector<4x16xf32>, vector<1x16xf32> -> vector<1x16xf32>
    %c0_237 = arith.constant 0 : index
    %c0_238 = arith.constant 0 : index
    %239 = vector.load %arg14[%c0_237, %c0_238] : memref<128x128xf32, #tpu.memory_space<vmem>>, vector<16x128xf32>
    %cst_239 = arith.constant dense<0.000000e+00> : vector<1x128xf32>
    %240 = tpu.matmul %238, %239, %cst_239 {dimension_numbers = #tpu.dot_dimension_numbers<[1], [0], [0], [1], [0, 0, 1, 1], [], []>} : vector<1x16xf32>, vector<16x128xf32>, vector<1x128xf32> -> vector<1x128xf32>
    %241 = arith.addf %219, %240 : vector<1x128xf32>
    %242 = vector.extract_strided_slice %210 {offsets = [0, 16], sizes = [32, 16], strides = [1, 1]} : vector<32x128xf32> to vector<32x16xf32>
    %243 = vector.extract_strided_slice %216 {offsets = [0, 16], sizes = [4, 16], strides = [1, 1]} : vector<4x128xf32> to vector<4x16xf32>
    %cst_240 = arith.constant dense<0.000000e+00> : vector<32x4xf32>
    %244 = tpu.matmul %242, %243, %cst_240 {dimension_numbers = #tpu.dot_dimension_numbers<[1], [1], [0], [0], [0, 0, 1, 0], [], []>} : vector<32x16xf32>, vector<4x16xf32>, vector<32x4xf32> -> vector<32x4xf32>
    %cst_241 = arith.constant dense<0xFF800000> : vector<32xf32>
    %245 = vector.multi_reduction <maximumf>, %244, %cst_241 [1] : vector<32x4xf32> to vector<32xf32>
    %246 = vector.shape_cast %245 : vector<32xf32> to vector<32x1xf32>
    %247 = vector.broadcast %246 : vector<32x1xf32> to vector<32x4xf32>
    %248 = arith.subf %244, %247 : vector<32x4xf32>
    %249 = math.exp %248 : vector<32x4xf32>
    %cst_242 = arith.constant dense<0.000000e+00> : vector<32xf32>
    %250 = vector.multi_reduction <add>, %249, %cst_242 [1] : vector<32x4xf32> to vector<32xf32>
    %251 = vector.shape_cast %250 : vector<32xf32> to vector<32x1xf32>
    %252 = vector.broadcast %251 : vector<32x1xf32> to vector<32x4xf32>
    %253 = arith.divf %249, %252 : vector<32x4xf32>
    %254 = arith.addf %232, %253 : vector<32x4xf32>
    %cst_243 = arith.constant dense<0.000000e+00> : vector<4xf32>
    %255 = vector.multi_reduction <add>, %253, %cst_243 [0] : vector<32x4xf32> to vector<4xf32>
    %256 = vector.shape_cast %255 : vector<4xf32> to vector<1x4xf32>
    %cst_244 = arith.constant 3.200000e+01 : f32
    %257 = vector.broadcast %cst_244 : f32 to vector<1x4xf32>
    %258 = arith.divf %256, %257 : vector<1x4xf32>
    %259 = vector.extract_strided_slice %217 {offsets = [0, 16], sizes = [4, 16], strides = [1, 1]} : vector<4x128xf32> to vector<4x16xf32>
    %cst_245 = arith.constant dense<0.000000e+00> : vector<1x16xf32>
    %260 = tpu.matmul %258, %259, %cst_245 {dimension_numbers = #tpu.dot_dimension_numbers<[1], [0], [0], [1], [0, 0, 1, 1], [], []>} : vector<1x4xf32>, vector<4x16xf32>, vector<1x16xf32> -> vector<1x16xf32>
    %c16 = arith.constant 16 : index
    %c0_246 = arith.constant 0 : index
    %261 = vector.load %arg14[%c16, %c0_246] : memref<128x128xf32, #tpu.memory_space<vmem>>, vector<16x128xf32>
    %cst_247 = arith.constant dense<0.000000e+00> : vector<1x128xf32>
    %262 = tpu.matmul %260, %261, %cst_247 {dimension_numbers = #tpu.dot_dimension_numbers<[1], [0], [0], [1], [0, 0, 1, 1], [], []>} : vector<1x16xf32>, vector<16x128xf32>, vector<1x128xf32> -> vector<1x128xf32>
    %263 = arith.addf %241, %262 : vector<1x128xf32>
    %264 = vector.extract_strided_slice %210 {offsets = [0, 32], sizes = [32, 16], strides = [1, 1]} : vector<32x128xf32> to vector<32x16xf32>
    %265 = vector.extract_strided_slice %216 {offsets = [0, 32], sizes = [4, 16], strides = [1, 1]} : vector<4x128xf32> to vector<4x16xf32>
    %cst_248 = arith.constant dense<0.000000e+00> : vector<32x4xf32>
    %266 = tpu.matmul %264, %265, %cst_248 {dimension_numbers = #tpu.dot_dimension_numbers<[1], [1], [0], [0], [0, 0, 1, 0], [], []>} : vector<32x16xf32>, vector<4x16xf32>, vector<32x4xf32> -> vector<32x4xf32>
    %cst_249 = arith.constant dense<0xFF800000> : vector<32xf32>
    %267 = vector.multi_reduction <maximumf>, %266, %cst_249 [1] : vector<32x4xf32> to vector<32xf32>
    %268 = vector.shape_cast %267 : vector<32xf32> to vector<32x1xf32>
    %269 = vector.broadcast %268 : vector<32x1xf32> to vector<32x4xf32>
    %270 = arith.subf %266, %269 : vector<32x4xf32>
    %271 = math.exp %270 : vector<32x4xf32>
    %cst_250 = arith.constant dense<0.000000e+00> : vector<32xf32>
    %272 = vector.multi_reduction <add>, %271, %cst_250 [1] : vector<32x4xf32> to vector<32xf32>
    %273 = vector.shape_cast %272 : vector<32xf32> to vector<32x1xf32>
    %274 = vector.broadcast %273 : vector<32x1xf32> to vector<32x4xf32>
    %275 = arith.divf %271, %274 : vector<32x4xf32>
    %276 = arith.addf %254, %275 : vector<32x4xf32>
    %cst_251 = arith.constant dense<0.000000e+00> : vector<4xf32>
    %277 = vector.multi_reduction <add>, %275, %cst_251 [0] : vector<32x4xf32> to vector<4xf32>
    %278 = vector.shape_cast %277 : vector<4xf32> to vector<1x4xf32>
    %cst_252 = arith.constant 3.200000e+01 : f32
    %279 = vector.broadcast %cst_252 : f32 to vector<1x4xf32>
    %280 = arith.divf %278, %279 : vector<1x4xf32>
    %281 = vector.extract_strided_slice %217 {offsets = [0, 32], sizes = [4, 16], strides = [1, 1]} : vector<4x128xf32> to vector<4x16xf32>
    %cst_253 = arith.constant dense<0.000000e+00> : vector<1x16xf32>
    %282 = tpu.matmul %280, %281, %cst_253 {dimension_numbers = #tpu.dot_dimension_numbers<[1], [0], [0], [1], [0, 0, 1, 1], [], []>} : vector<1x4xf32>, vector<4x16xf32>, vector<1x16xf32> -> vector<1x16xf32>
    %c32 = arith.constant 32 : index
    %c0_254 = arith.constant 0 : index
    %283 = vector.load %arg14[%c32, %c0_254] : memref<128x128xf32, #tpu.memory_space<vmem>>, vector<16x128xf32>
    %cst_255 = arith.constant dense<0.000000e+00> : vector<1x128xf32>
    %284 = tpu.matmul %282, %283, %cst_255 {dimension_numbers = #tpu.dot_dimension_numbers<[1], [0], [0], [1], [0, 0, 1, 1], [], []>} : vector<1x16xf32>, vector<16x128xf32>, vector<1x128xf32> -> vector<1x128xf32>
    %285 = arith.addf %263, %284 : vector<1x128xf32>
    %286 = vector.extract_strided_slice %210 {offsets = [0, 48], sizes = [32, 16], strides = [1, 1]} : vector<32x128xf32> to vector<32x16xf32>
    %287 = vector.extract_strided_slice %216 {offsets = [0, 48], sizes = [4, 16], strides = [1, 1]} : vector<4x128xf32> to vector<4x16xf32>
    %cst_256 = arith.constant dense<0.000000e+00> : vector<32x4xf32>
    %288 = tpu.matmul %286, %287, %cst_256 {dimension_numbers = #tpu.dot_dimension_numbers<[1], [1], [0], [0], [0, 0, 1, 0], [], []>} : vector<32x16xf32>, vector<4x16xf32>, vector<32x4xf32> -> vector<32x4xf32>
    %cst_257 = arith.constant dense<0xFF800000> : vector<32xf32>
    %289 = vector.multi_reduction <maximumf>, %288, %cst_257 [1] : vector<32x4xf32> to vector<32xf32>
    %290 = vector.shape_cast %289 : vector<32xf32> to vector<32x1xf32>
    %291 = vector.broadcast %290 : vector<32x1xf32> to vector<32x4xf32>
    %292 = arith.subf %288, %291 : vector<32x4xf32>
    %293 = math.exp %292 : vector<32x4xf32>
    %cst_258 = arith.constant dense<0.000000e+00> : vector<32xf32>
    %294 = vector.multi_reduction <add>, %293, %cst_258 [1] : vector<32x4xf32> to vector<32xf32>
    %295 = vector.shape_cast %294 : vector<32xf32> to vector<32x1xf32>
    %296 = vector.broadcast %295 : vector<32x1xf32> to vector<32x4xf32>
    %297 = arith.divf %293, %296 : vector<32x4xf32>
    %298 = arith.addf %276, %297 : vector<32x4xf32>
    %cst_259 = arith.constant dense<0.000000e+00> : vector<4xf32>
    %299 = vector.multi_reduction <add>, %297, %cst_259 [0] : vector<32x4xf32> to vector<4xf32>
    %300 = vector.shape_cast %299 : vector<4xf32> to vector<1x4xf32>
    %cst_260 = arith.constant 3.200000e+01 : f32
    %301 = vector.broadcast %cst_260 : f32 to vector<1x4xf32>
    %302 = arith.divf %300, %301 : vector<1x4xf32>
    %303 = vector.extract_strided_slice %217 {offsets = [0, 48], sizes = [4, 16], strides = [1, 1]} : vector<4x128xf32> to vector<4x16xf32>
    %cst_261 = arith.constant dense<0.000000e+00> : vector<1x16xf32>
    %304 = tpu.matmul %302, %303, %cst_261 {dimension_numbers = #tpu.dot_dimension_numbers<[1], [0], [0], [1], [0, 0, 1, 1], [], []>} : vector<1x4xf32>, vector<4x16xf32>, vector<1x16xf32> -> vector<1x16xf32>
    %c48 = arith.constant 48 : index
    %c0_262 = arith.constant 0 : index
    %305 = vector.load %arg14[%c48, %c0_262] : memref<128x128xf32, #tpu.memory_space<vmem>>, vector<16x128xf32>
    %cst_263 = arith.constant dense<0.000000e+00> : vector<1x128xf32>
    %306 = tpu.matmul %304, %305, %cst_263 {dimension_numbers = #tpu.dot_dimension_numbers<[1], [0], [0], [1], [0, 0, 1, 1], [], []>} : vector<1x16xf32>, vector<16x128xf32>, vector<1x128xf32> -> vector<1x128xf32>
    %307 = arith.addf %285, %306 : vector<1x128xf32>
    %308 = vector.extract_strided_slice %210 {offsets = [0, 64], sizes = [32, 16], strides = [1, 1]} : vector<32x128xf32> to vector<32x16xf32>
    %309 = vector.extract_strided_slice %216 {offsets = [0, 64], sizes = [4, 16], strides = [1, 1]} : vector<4x128xf32> to vector<4x16xf32>
    %cst_264 = arith.constant dense<0.000000e+00> : vector<32x4xf32>
    %310 = tpu.matmul %308, %309, %cst_264 {dimension_numbers = #tpu.dot_dimension_numbers<[1], [1], [0], [0], [0, 0, 1, 0], [], []>} : vector<32x16xf32>, vector<4x16xf32>, vector<32x4xf32> -> vector<32x4xf32>
    %cst_265 = arith.constant dense<0xFF800000> : vector<32xf32>
    %311 = vector.multi_reduction <maximumf>, %310, %cst_265 [1] : vector<32x4xf32> to vector<32xf32>
    %312 = vector.shape_cast %311 : vector<32xf32> to vector<32x1xf32>
    %313 = vector.broadcast %312 : vector<32x1xf32> to vector<32x4xf32>
    %314 = arith.subf %310, %313 : vector<32x4xf32>
    %315 = math.exp %314 : vector<32x4xf32>
    %cst_266 = arith.constant dense<0.000000e+00> : vector<32xf32>
    %316 = vector.multi_reduction <add>, %315, %cst_266 [1] : vector<32x4xf32> to vector<32xf32>
    %317 = vector.shape_cast %316 : vector<32xf32> to vector<32x1xf32>
    %318 = vector.broadcast %317 : vector<32x1xf32> to vector<32x4xf32>
    %319 = arith.divf %315, %318 : vector<32x4xf32>
    %320 = arith.addf %298, %319 : vector<32x4xf32>
    %cst_267 = arith.constant dense<0.000000e+00> : vector<4xf32>
    %321 = vector.multi_reduction <add>, %319, %cst_267 [0] : vector<32x4xf32> to vector<4xf32>
    %322 = vector.shape_cast %321 : vector<4xf32> to vector<1x4xf32>
    %cst_268 = arith.constant 3.200000e+01 : f32
    %323 = vector.broadcast %cst_268 : f32 to vector<1x4xf32>
    %324 = arith.divf %322, %323 : vector<1x4xf32>
    %325 = vector.extract_strided_slice %217 {offsets = [0, 64], sizes = [4, 16], strides = [1, 1]} : vector<4x128xf32> to vector<4x16xf32>
    %cst_269 = arith.constant dense<0.000000e+00> : vector<1x16xf32>
    %326 = tpu.matmul %324, %325, %cst_269 {dimension_numbers = #tpu.dot_dimension_numbers<[1], [0], [0], [1], [0, 0, 1, 1], [], []>} : vector<1x4xf32>, vector<4x16xf32>, vector<1x16xf32> -> vector<1x16xf32>
    %c64 = arith.constant 64 : index
    %c0_270 = arith.constant 0 : index
    %327 = vector.load %arg14[%c64, %c0_270] : memref<128x128xf32, #tpu.memory_space<vmem>>, vector<16x128xf32>
    %cst_271 = arith.constant dense<0.000000e+00> : vector<1x128xf32>
    %328 = tpu.matmul %326, %327, %cst_271 {dimension_numbers = #tpu.dot_dimension_numbers<[1], [0], [0], [1], [0, 0, 1, 1], [], []>} : vector<1x16xf32>, vector<16x128xf32>, vector<1x128xf32> -> vector<1x128xf32>
    %329 = arith.addf %307, %328 : vector<1x128xf32>
    %330 = vector.extract_strided_slice %210 {offsets = [0, 80], sizes = [32, 16], strides = [1, 1]} : vector<32x128xf32> to vector<32x16xf32>
    %331 = vector.extract_strided_slice %216 {offsets = [0, 80], sizes = [4, 16], strides = [1, 1]} : vector<4x128xf32> to vector<4x16xf32>
    %cst_272 = arith.constant dense<0.000000e+00> : vector<32x4xf32>
    %332 = tpu.matmul %330, %331, %cst_272 {dimension_numbers = #tpu.dot_dimension_numbers<[1], [1], [0], [0], [0, 0, 1, 0], [], []>} : vector<32x16xf32>, vector<4x16xf32>, vector<32x4xf32> -> vector<32x4xf32>
    %cst_273 = arith.constant dense<0xFF800000> : vector<32xf32>
    %333 = vector.multi_reduction <maximumf>, %332, %cst_273 [1] : vector<32x4xf32> to vector<32xf32>
    %334 = vector.shape_cast %333 : vector<32xf32> to vector<32x1xf32>
    %335 = vector.broadcast %334 : vector<32x1xf32> to vector<32x4xf32>
    %336 = arith.subf %332, %335 : vector<32x4xf32>
    %337 = math.exp %336 : vector<32x4xf32>
    %cst_274 = arith.constant dense<0.000000e+00> : vector<32xf32>
    %338 = vector.multi_reduction <add>, %337, %cst_274 [1] : vector<32x4xf32> to vector<32xf32>
    %339 = vector.shape_cast %338 : vector<32xf32> to vector<32x1xf32>
    %340 = vector.broadcast %339 : vector<32x1xf32> to vector<32x4xf32>
    %341 = arith.divf %337, %340 : vector<32x4xf32>
    %342 = arith.addf %320, %341 : vector<32x4xf32>
    %cst_275 = arith.constant dense<0.000000e+00> : vector<4xf32>
    %343 = vector.multi_reduction <add>, %341, %cst_275 [0] : vector<32x4xf32> to vector<4xf32>
    %344 = vector.shape_cast %343 : vector<4xf32> to vector<1x4xf32>
    %cst_276 = arith.constant 3.200000e+01 : f32
    %345 = vector.broadcast %cst_276 : f32 to vector<1x4xf32>
    %346 = arith.divf %344, %345 : vector<1x4xf32>
    %347 = vector.extract_strided_slice %217 {offsets = [0, 80], sizes = [4, 16], strides = [1, 1]} : vector<4x128xf32> to vector<4x16xf32>
    %cst_277 = arith.constant dense<0.000000e+00> : vector<1x16xf32>
    %348 = tpu.matmul %346, %347, %cst_277 {dimension_numbers = #tpu.dot_dimension_numbers<[1], [0], [0], [1], [0, 0, 1, 1], [], []>} : vector<1x4xf32>, vector<4x16xf32>, vector<1x16xf32> -> vector<1x16xf32>
    %c80 = arith.constant 80 : index
    %c0_278 = arith.constant 0 : index
    %349 = vector.load %arg14[%c80, %c0_278] : memref<128x128xf32, #tpu.memory_space<vmem>>, vector<16x128xf32>
    %cst_279 = arith.constant dense<0.000000e+00> : vector<1x128xf32>
    %350 = tpu.matmul %348, %349, %cst_279 {dimension_numbers = #tpu.dot_dimension_numbers<[1], [0], [0], [1], [0, 0, 1, 1], [], []>} : vector<1x16xf32>, vector<16x128xf32>, vector<1x128xf32> -> vector<1x128xf32>
    %351 = arith.addf %329, %350 : vector<1x128xf32>
    %352 = vector.extract_strided_slice %210 {offsets = [0, 96], sizes = [32, 16], strides = [1, 1]} : vector<32x128xf32> to vector<32x16xf32>
    %353 = vector.extract_strided_slice %216 {offsets = [0, 96], sizes = [4, 16], strides = [1, 1]} : vector<4x128xf32> to vector<4x16xf32>
    %cst_280 = arith.constant dense<0.000000e+00> : vector<32x4xf32>
    %354 = tpu.matmul %352, %353, %cst_280 {dimension_numbers = #tpu.dot_dimension_numbers<[1], [1], [0], [0], [0, 0, 1, 0], [], []>} : vector<32x16xf32>, vector<4x16xf32>, vector<32x4xf32> -> vector<32x4xf32>
    %cst_281 = arith.constant dense<0xFF800000> : vector<32xf32>
    %355 = vector.multi_reduction <maximumf>, %354, %cst_281 [1] : vector<32x4xf32> to vector<32xf32>
    %356 = vector.shape_cast %355 : vector<32xf32> to vector<32x1xf32>
    %357 = vector.broadcast %356 : vector<32x1xf32> to vector<32x4xf32>
    %358 = arith.subf %354, %357 : vector<32x4xf32>
    %359 = math.exp %358 : vector<32x4xf32>
    %cst_282 = arith.constant dense<0.000000e+00> : vector<32xf32>
    %360 = vector.multi_reduction <add>, %359, %cst_282 [1] : vector<32x4xf32> to vector<32xf32>
    %361 = vector.shape_cast %360 : vector<32xf32> to vector<32x1xf32>
    %362 = vector.broadcast %361 : vector<32x1xf32> to vector<32x4xf32>
    %363 = arith.divf %359, %362 : vector<32x4xf32>
    %364 = arith.addf %342, %363 : vector<32x4xf32>
    %cst_283 = arith.constant dense<0.000000e+00> : vector<4xf32>
    %365 = vector.multi_reduction <add>, %363, %cst_283 [0] : vector<32x4xf32> to vector<4xf32>
    %366 = vector.shape_cast %365 : vector<4xf32> to vector<1x4xf32>
    %cst_284 = arith.constant 3.200000e+01 : f32
    %367 = vector.broadcast %cst_284 : f32 to vector<1x4xf32>
    %368 = arith.divf %366, %367 : vector<1x4xf32>
    %369 = vector.extract_strided_slice %217 {offsets = [0, 96], sizes = [4, 16], strides = [1, 1]} : vector<4x128xf32> to vector<4x16xf32>
    %cst_285 = arith.constant dense<0.000000e+00> : vector<1x16xf32>
    %370 = tpu.matmul %368, %369, %cst_285 {dimension_numbers = #tpu.dot_dimension_numbers<[1], [0], [0], [1], [0, 0, 1, 1], [], []>} : vector<1x4xf32>, vector<4x16xf32>, vector<1x16xf32> -> vector<1x16xf32>
    %c96 = arith.constant 96 : index
    %c0_286 = arith.constant 0 : index
    %371 = vector.load %arg14[%c96, %c0_286] : memref<128x128xf32, #tpu.memory_space<vmem>>, vector<16x128xf32>
    %cst_287 = arith.constant dense<0.000000e+00> : vector<1x128xf32>
    %372 = tpu.matmul %370, %371, %cst_287 {dimension_numbers = #tpu.dot_dimension_numbers<[1], [0], [0], [1], [0, 0, 1, 1], [], []>} : vector<1x16xf32>, vector<16x128xf32>, vector<1x128xf32> -> vector<1x128xf32>
    %373 = arith.addf %351, %372 : vector<1x128xf32>
    %374 = vector.extract_strided_slice %210 {offsets = [0, 112], sizes = [32, 16], strides = [1, 1]} : vector<32x128xf32> to vector<32x16xf32>
    %375 = vector.extract_strided_slice %216 {offsets = [0, 112], sizes = [4, 16], strides = [1, 1]} : vector<4x128xf32> to vector<4x16xf32>
    %cst_288 = arith.constant dense<0.000000e+00> : vector<32x4xf32>
    %376 = tpu.matmul %374, %375, %cst_288 {dimension_numbers = #tpu.dot_dimension_numbers<[1], [1], [0], [0], [0, 0, 1, 0], [], []>} : vector<32x16xf32>, vector<4x16xf32>, vector<32x4xf32> -> vector<32x4xf32>
    %cst_289 = arith.constant dense<0xFF800000> : vector<32xf32>
    %377 = vector.multi_reduction <maximumf>, %376, %cst_289 [1] : vector<32x4xf32> to vector<32xf32>
    %378 = vector.shape_cast %377 : vector<32xf32> to vector<32x1xf32>
    %379 = vector.broadcast %378 : vector<32x1xf32> to vector<32x4xf32>
    %380 = arith.subf %376, %379 : vector<32x4xf32>
    %381 = math.exp %380 : vector<32x4xf32>
    %cst_290 = arith.constant dense<0.000000e+00> : vector<32xf32>
    %382 = vector.multi_reduction <add>, %381, %cst_290 [1] : vector<32x4xf32> to vector<32xf32>
    %383 = vector.shape_cast %382 : vector<32xf32> to vector<32x1xf32>
    %384 = vector.broadcast %383 : vector<32x1xf32> to vector<32x4xf32>
    %385 = arith.divf %381, %384 : vector<32x4xf32>
    %386 = arith.addf %364, %385 : vector<32x4xf32>
    %cst_291 = arith.constant dense<0.000000e+00> : vector<4xf32>
    %387 = vector.multi_reduction <add>, %385, %cst_291 [0] : vector<32x4xf32> to vector<4xf32>
    %388 = vector.shape_cast %387 : vector<4xf32> to vector<1x4xf32>
    %cst_292 = arith.constant 3.200000e+01 : f32
    %389 = vector.broadcast %cst_292 : f32 to vector<1x4xf32>
    %390 = arith.divf %388, %389 : vector<1x4xf32>
    %391 = vector.extract_strided_slice %217 {offsets = [0, 112], sizes = [4, 16], strides = [1, 1]} : vector<4x128xf32> to vector<4x16xf32>
    %cst_293 = arith.constant dense<0.000000e+00> : vector<1x16xf32>
    %392 = tpu.matmul %390, %391, %cst_293 {dimension_numbers = #tpu.dot_dimension_numbers<[1], [0], [0], [1], [0, 0, 1, 1], [], []>} : vector<1x4xf32>, vector<4x16xf32>, vector<1x16xf32> -> vector<1x16xf32>
    %c112 = arith.constant 112 : index
    %c0_294 = arith.constant 0 : index
    %393 = vector.load %arg14[%c112, %c0_294] : memref<128x128xf32, #tpu.memory_space<vmem>>, vector<16x128xf32>
    %cst_295 = arith.constant dense<0.000000e+00> : vector<1x128xf32>
    %394 = tpu.matmul %392, %393, %cst_295 {dimension_numbers = #tpu.dot_dimension_numbers<[1], [0], [0], [1], [0, 0, 1, 1], [], []>} : vector<1x16xf32>, vector<16x128xf32>, vector<1x128xf32> -> vector<1x128xf32>
    %395 = arith.addf %373, %394 : vector<1x128xf32>
    %c0_296 = arith.constant 0 : index
    %c0_297 = arith.constant 0 : index
    %396 = vector.load %arg15[%c0_296, %c0_297] : memref<1x128xf32, #tpu.memory_space<vmem>>, vector<1x128xf32>
    %397 = arith.addf %395, %396 : vector<1x128xf32>
    %c0_298 = arith.constant 0 : index
    %c0_299 = arith.constant 0 : index
    %398 = vector.load %arg16[%c0_298, %c0_299] : memref<128x128xf32, #tpu.memory_space<vmem>>, vector<128x128xf32>
    %cst_300 = arith.constant dense<0.000000e+00> : vector<1x128xf32>
    %399 = tpu.matmul %397, %398, %cst_300 {dimension_numbers = #tpu.dot_dimension_numbers<[1], [0], [0], [1], [0, 0, 1, 1], [], []>} : vector<1x128xf32>, vector<128x128xf32>, vector<1x128xf32> -> vector<1x128xf32>
    %c0_301 = arith.constant 0 : index
    %c0_302 = arith.constant 0 : index
    %400 = vector.load %arg17[%c0_301, %c0_302] : memref<1x128xf32, #tpu.memory_space<vmem>>, vector<1x128xf32>
    %401 = arith.addf %399, %400 : vector<1x128xf32>
    %cst_303 = arith.constant 0.000000e+00 : f32
    %402 = vector.broadcast %cst_303 : f32 to vector<1x128xf32>
    %403 = arith.maximumf %401, %402 : vector<1x128xf32>
    %c0_304 = arith.constant 0 : index
    %c0_305 = arith.constant 0 : index
    %404 = vector.load %arg18[%c0_304, %c0_305] : memref<128x128xf32, #tpu.memory_space<vmem>>, vector<128x128xf32>
    %cst_306 = arith.constant dense<0.000000e+00> : vector<1x128xf32>
    %405 = tpu.matmul %403, %404, %cst_306 {dimension_numbers = #tpu.dot_dimension_numbers<[1], [0], [0], [1], [0, 0, 1, 1], [], []>} : vector<1x128xf32>, vector<128x128xf32>, vector<1x128xf32> -> vector<1x128xf32>
    %c0_307 = arith.constant 0 : index
    %c0_308 = arith.constant 0 : index
    %406 = vector.load %arg19[%c0_307, %c0_308] : memref<1x128xf32, #tpu.memory_space<vmem>>, vector<1x128xf32>
    %407 = arith.addf %405, %406 : vector<1x128xf32>
    %c0_309 = arith.constant 0 : index
    %c0_310 = arith.constant 0 : index
    %c0_311 = arith.constant 0 : index
    %408 = vector.load %arg22[%c0_309, %c0_310, %c0_311] : memref<1x1x128xf32, #tpu.memory_space<vmem>>, vector<1x1x128xf32>
    %409 = vector.shape_cast %408 : vector<1x1x128xf32> to vector<1x128xf32>
    %410 = vector.shape_cast %407 : vector<1x128xf32> to vector<1x1x128xf32>
    tpu.vector_store %arg22[%c0_309, %c0_310, %c0_311], %410 {strides = array<i32>} : memref<1x1x128xf32, #tpu.memory_space<vmem>>, vector<1x1x128xf32>,
    %c0_312 = arith.constant 0 : index
    %c0_313 = arith.constant 0 : index
    %411 = vector.load %arg20[%c0_312, %c0_313] : memref<128x128xf32, #tpu.memory_space<vmem>>, vector<128x128xf32>
    %cst_314 = arith.constant dense<0.000000e+00> : vector<1x128xf32>
    %412 = tpu.matmul %397, %411, %cst_314 {dimension_numbers = #tpu.dot_dimension_numbers<[1], [0], [0], [1], [0, 0, 1, 1], [], []>} : vector<1x128xf32>, vector<128x128xf32>, vector<1x128xf32> -> vector<1x128xf32>
    %c0_315 = arith.constant 0 : index
    %c0_316 = arith.constant 0 : index
    %413 = vector.load %arg21[%c0_315, %c0_316] : memref<1x128xf32, #tpu.memory_space<vmem>>, vector<1x128xf32>
    %414 = arith.addf %412, %413 : vector<1x128xf32>
    %c0_317 = arith.constant 0 : index
    %c0_318 = arith.constant 0 : index
    %c0_319 = arith.constant 0 : index
    %415 = vector.load %arg23[%c0_317, %c0_318, %c0_319] : memref<1x1x128xf32, #tpu.memory_space<vmem>>, vector<1x1x128xf32>
    %416 = vector.shape_cast %415 : vector<1x1x128xf32> to vector<1x128xf32>
    %417 = vector.shape_cast %414 : vector<1x128xf32> to vector<1x1x128xf32>
    tpu.vector_store %arg23[%c0_317, %c0_318, %c0_319], %417 {strides = array<i32>} : memref<1x1x128xf32, #tpu.memory_space<vmem>>, vector<1x1x128xf32>,
    %cst_320 = arith.constant 1.250000e-01 : f32
    %418 = vector.broadcast %cst_320 : f32 to vector<32x4xf32>
    %419 = arith.mulf %386, %418 : vector<32x4xf32>
    %cst_321 = arith.constant 0.000000e+00 : f32
    %420 = vector.broadcast %cst_321 : f32 to vector<32x124xf32>
    %421 = tpu.concatenate %419, %420 in 1 : vector<32x4xf32>, vector<32x124xf32> -> vector<32x128xf32>
    %c0_322 = arith.constant 0 : index
    %c0_323 = arith.constant 0 : index
    %c0_324 = arith.constant 0 : index
    %422 = vector.load %arg24[%c0_322, %c0_323, %c0_324] : memref<1x32x128xf32, #tpu.memory_space<vmem>>, vector<1x32x128xf32>
    %423 = vector.shape_cast %422 : vector<1x32x128xf32> to vector<32x128xf32>
    %424 = vector.shape_cast %421 : vector<32x128xf32> to vector<1x32x128xf32>
    tpu.vector_store %arg24[%c0_322, %c0_323, %c0_324], %424 {strides = array<i32>} : memref<1x32x128xf32, #tpu.memory_space<vmem>>, vector<1x32x128xf32>,
    return
  }
  func.func @transform_0(%arg0: i32) -> (i32, i32, i32) {
    %c0_i32 = arith.constant 0 : i32
    %c0_i32_0 = arith.constant 0 : i32
    %c0_i32_1 = arith.constant 0 : i32
    return %arg0, %c0_i32, %c0_i32_0 : i32, i32, i32
  }
  func.func @transform_1(%arg0: i32) -> (i32, i32, i32) {
    %c0_i32 = arith.constant 0 : i32
    %c0_i32_0 = arith.constant 0 : i32
    %c0_i32_1 = arith.constant 0 : i32
    return %arg0, %c0_i32, %c0_i32_0 : i32, i32, i32
  }
  func.func @transform_2(%arg0: i32) -> (i32, i32, i32) {
    %c0_i32 = arith.constant 0 : i32
    %c0_i32_0 = arith.constant 0 : i32
    %c0_i32_1 = arith.constant 0 : i32
    %c0_i32_2 = arith.constant 0 : i32
    return %c0_i32, %c0_i32_0, %c0_i32_1 : i32, i32, i32
  }
  func.func @transform_3(%arg0: i32) -> (i32, i32, i32) {
    %c0_i32 = arith.constant 0 : i32
    %c0_i32_0 = arith.constant 0 : i32
    %c0_i32_1 = arith.constant 0 : i32
    %c0_i32_2 = arith.constant 0 : i32
    return %c0_i32, %c0_i32_0, %c0_i32_1 : i32, i32, i32
  }
  func.func @transform_4(%arg0: i32) -> (i32, i32) {
    %c0_i32 = arith.constant 0 : i32
    %c0_i32_0 = arith.constant 0 : i32
    %c0_i32_1 = arith.constant 0 : i32
    return %c0_i32, %c0_i32_0 : i32, i32
  }
  func.func @transform_5(%arg0: i32) -> (i32, i32, i32) {
    %c0_i32 = arith.constant 0 : i32
    %c0_i32_0 = arith.constant 0 : i32
    %c0_i32_1 = arith.constant 0 : i32
    %c0_i32_2 = arith.constant 0 : i32
    return %c0_i32, %c0_i32_0, %c0_i32_1 : i32, i32, i32
  }
  func.func @transform_6(%arg0: i32) -> (i32, i32, i32) {
    %c0_i32 = arith.constant 0 : i32
    %c0_i32_0 = arith.constant 0 : i32
    %c0_i32_1 = arith.constant 0 : i32
    %c0_i32_2 = arith.constant 0 : i32
    return %c0_i32, %c0_i32_0, %c0_i32_1 : i32, i32, i32
  }
  func.func @transform_7(%arg0: i32) -> (i32, i32) {
    %c0_i32 = arith.constant 0 : i32
    %c0_i32_0 = arith.constant 0 : i32
    %c0_i32_1 = arith.constant 0 : i32
    return %c0_i32, %c0_i32_0 : i32, i32
  }
  func.func @transform_8(%arg0: i32) -> (i32, i32, i32) {
    %c0_i32 = arith.constant 0 : i32
    %c0_i32_0 = arith.constant 0 : i32
    %c0_i32_1 = arith.constant 0 : i32
    %c0_i32_2 = arith.constant 0 : i32
    return %c0_i32, %c0_i32_0, %c0_i32_1 : i32, i32, i32
  }
  func.func @transform_9(%arg0: i32) -> (i32, i32, i32) {
    %c0_i32 = arith.constant 0 : i32
    %c0_i32_0 = arith.constant 0 : i32
    %c0_i32_1 = arith.constant 0 : i32
    %c0_i32_2 = arith.constant 0 : i32
    return %c0_i32, %c0_i32_0, %c0_i32_1 : i32, i32, i32
  }
  func.func @transform_10(%arg0: i32) -> (i32, i32) {
    %c0_i32 = arith.constant 0 : i32
    %c0_i32_0 = arith.constant 0 : i32
    %c0_i32_1 = arith.constant 0 : i32
    return %c0_i32, %c0_i32_0 : i32, i32
  }
  func.func @transform_11(%arg0: i32) -> (i32, i32) {
    %c0_i32 = arith.constant 0 : i32
    %c0_i32_0 = arith.constant 0 : i32
    %c0_i32_1 = arith.constant 0 : i32
    return %c0_i32, %c0_i32_0 : i32, i32
  }
  func.func @transform_12(%arg0: i32) -> (i32, i32) {
    %c0_i32 = arith.constant 0 : i32
    %c0_i32_0 = arith.constant 0 : i32
    %c0_i32_1 = arith.constant 0 : i32
    return %c0_i32, %c0_i32_0 : i32, i32
  }
  func.func @transform_13(%arg0: i32) -> (i32, i32) {
    %c0_i32 = arith.constant 0 : i32
    %c0_i32_0 = arith.constant 0 : i32
    %c0_i32_1 = arith.constant 0 : i32
    return %c0_i32, %c0_i32_0 : i32, i32
  }
  func.func @transform_14(%arg0: i32) -> (i32, i32) {
    %c0_i32 = arith.constant 0 : i32
    %c0_i32_0 = arith.constant 0 : i32
    %c0_i32_1 = arith.constant 0 : i32
    return %c0_i32, %c0_i32_0 : i32, i32
  }
  func.func @transform_15(%arg0: i32) -> (i32, i32) {
    %c0_i32 = arith.constant 0 : i32
    %c0_i32_0 = arith.constant 0 : i32
    %c0_i32_1 = arith.constant 0 : i32
    return %c0_i32, %c0_i32_0 : i32, i32
  }
  func.func @transform_16(%arg0: i32) -> (i32, i32) {
    %c0_i32 = arith.constant 0 : i32
    %c0_i32_0 = arith.constant 0 : i32
    %c0_i32_1 = arith.constant 0 : i32
    return %c0_i32, %c0_i32_0 : i32, i32
  }
  func.func @transform_17(%arg0: i32) -> (i32, i32) {
    %c0_i32 = arith.constant 0 : i32
    %c0_i32_0 = arith.constant 0 : i32
    %c0_i32_1 = arith.constant 0 : i32
    return %c0_i32, %c0_i32_0 : i32, i32
  }
  func.func @transform_18(%arg0: i32) -> (i32, i32) {
    %c0_i32 = arith.constant 0 : i32
    %c0_i32_0 = arith.constant 0 : i32
    %c0_i32_1 = arith.constant 0 : i32
    return %c0_i32, %c0_i32_0 : i32, i32
  }
  func.func @transform_19(%arg0: i32) -> (i32, i32) {
    %c0_i32 = arith.constant 0 : i32
    %c0_i32_0 = arith.constant 0 : i32
    %c0_i32_1 = arith.constant 0 : i32
    return %c0_i32, %c0_i32_0 : i32, i32
  }
  func.func @transform_20(%arg0: i32) -> (i32, i32) {
    %c0_i32 = arith.constant 0 : i32
    %c0_i32_0 = arith.constant 0 : i32
    %c0_i32_1 = arith.constant 0 : i32
    return %c0_i32, %c0_i32_0 : i32, i32
  }
  func.func @transform_21(%arg0: i32) -> (i32, i32, i32) {
    %c0_i32 = arith.constant 0 : i32
    %c0_i32_0 = arith.constant 0 : i32
    %c0_i32_1 = arith.constant 0 : i32
    return %arg0, %c0_i32, %c0_i32_0 : i32, i32, i32
  }
  func.func @transform_22(%arg0: i32) -> (i32, i32, i32) {
    %c0_i32 = arith.constant 0 : i32
    %c0_i32_0 = arith.constant 0 : i32
    %c0_i32_1 = arith.constant 0 : i32
    return %arg0, %c0_i32, %c0_i32_0 : i32, i32, i32
  }
  func.func @transform_23(%arg0: i32) -> (i32, i32, i32) {
    %c0_i32 = arith.constant 0 : i32
    %c0_i32_0 = arith.constant 0 : i32
    %c0_i32_1 = arith.constant 0 : i32
    return %arg0, %c0_i32, %c0_i32_0 : i32, i32, i32
  }
}

</mosaic_0001>

<bundles_post_ra>
// kernel: forward.2
= control target key start
LH: loop header
LB: loop body
LE: loop exit
PB: predicated region body
PF: predicated region fallthrough
CT: control target
= control target key end

     0   :  { %8 = vsyncpa [#allocation3], 0  ;;  %s3240_s0 = inlined_call_operand.hbm [shape: f32[2,4,768], index: 0, kind: input, shape index: {}]   ;;  %s3241_s1 = inlined_call_operand.hbm [shape: f32[768,1024], index: 1, kind: input, shape index: {}]   ;;  %s3242_s2 = inlined_call_operand.hbm [shape: f32[1,1024], index: 2, kind: input, shape index: {}]   ;;  %s3243_s3 = inlined_call_operand.vmem [shape: f32[2,4,1024], index: 3, kind: output, shape index: {}]  }
   0x1   :  { %10 = vsyncpa [#allocation3 + $0x1], 0 }
   0x2   :  { %11 = vsyncpa [#allocation5], 0  ;;  %s3024_s12 = smov 0   ;;  %s3026_s13 = smov 0  }
   0x3   :  { %s3028_s14 = smov 0   ;;  %s3030_s15 = smov 0  }
   0x4 LB: > { %s3043_s16 = sadd.s32 4294967295, %s2997_s15   ;;  %p37_p0 = scmp.ne.s32.totalorder %s2989_s13, %s2985_s12  ;;  %s2997_s15 = sphi %s3030_s15, %s3258_s15   ;;  %s2993_s14 = sphi %s3028_s14, %s3257_s14   ;;  %s2989_s13 = sphi %s3026_s13, %s3256_s13   ;;  %s2985_s12 = sphi %s3024_s12, %s3255_s12  }
   0x5   : > { %p3244_p1 = scmp.eq.s32.totalorder %s3043_s16, 0  ;;  %p1997_p2 = scmp.ge.s32.totalorder %s2997_s15, 1 }
   0x6   : > { %p116_p3 = scmp.lt.s32.totalorder %s2997_s15, 3  ;;  %s2999_s19 = smov [#allocation4]  }
   0x7   : > { %p3051_p4 = por %p3244_p1, %p37_p0  ;;  %s128_s20 = sshll.u32 %s2999_s19, 4  ;;  %s129_s20 = int_to_ptr.vmem [resolvable:$true] %s128_s20 }
   0x8   : > { %p3055_p5 = pnand %p1997_p2, %p116_p3  ;;  %s3000_s22 = smov [#allocation6]  }
   0x9   : > { %s3247_s17 = scalar_select %p3051_p4, 1, 0 }
   0xa   : > { %s3248_s18 = scalar_select %p3055_p5, 1, 0 }
   0xb   : > { %p2815_p6 = pneg %p3055_p5  ;;  %s142_s23 = sshll.u32 %s3000_s22, 4  ;;  %s3067_s23 = int_to_ptr.vmem [resolvable:$true] %s142_s23 }
   0xc   : > { %s2873_s26 = scalar_lea.hbm %s3241_s1, 98304 }
   0xd   : > { %p3063_p7 = pnand %p2815_p6, %p3244_p1  ;;  %p2874_p8 = scmp.ne.s32.totalorder %s3241_s1, %s2873_s26 }
   0xe   : > { %p2880_p12 = scmp.lt.u32.totalorder %s2873_s26, %s3241_s1 }
   0xf   : > { %p2875_p9 = pneg %p3063_p7 }
  0x11   : > { %p2876_p10 = pnand %p2875_p9, %p2874_p8 }
  0x13   : > { %p2877_p11 = pneg %p2876_p10 }
  0x15   : > { %p2882_p13 = pnand %p2880_p12, %p2877_p11 }
  0x17   : > { %2885 = shalt.err (!%p2882_p13)
}
  0x18   : > { %s2886_s4 = scalar_lea.vmem %s129_s20, 98304  ;;  %p2894_p6 = scmp.lt.s32.totalorder %s129_s20, %s129_s20 }
  0x19   : > { %p2887_p0 = scmp.ne.s32.totalorder %s129_s20, %s2886_s4  ;;  %p2895_p1 = scmp.lt.s32.totalorder %s2886_s4, %s2886_s4 }
  0x1b   : > { %p2889_p2 = pnand %p2887_p0, %p2875_p9  ;;  %p2896_p4 = por %p2895_p1, %p2894_p6 }
  0x1d   : > { %p2890_p3 = pneg %p2889_p2 }
  0x1f   : > { %p2897_p5 = pnand %p2896_p4, %p2890_p3 }
  0x21   : > { %2900 = shalt.err (!%p2897_p5)
}
  0x22   : > { %s3001_s5 = smov 1024   ;;  %s3002_s6 = smov 64  }
  0x23   : > { %2818 = dma.hbm_to_vmem [thread:$0]  (!%p3063_p7), %s3241_s1, 98304, %s129_s20, [#allocation5], %s3001_s5, %s3001_s5, %s3002_s6  }
  0x24   : > { %s2901_s11 = scalar_lea.hbm %s3242_s2, 128 }
  0x25   : > { %p2902_p8 = scmp.ne.s32.totalorder %s3242_s2, %s2901_s11  ;;  %p2908_p5 = scmp.lt.u32.totalorder %s2901_s11, %s3242_s2 }
  0x27   : > { %p2904_p1 = pnand %p2902_p8, %p2875_p9 }
  0x29   : > { %p2905_p4 = pneg %p2904_p1 }
  0x2b   : > { %p2910_p10 = pnand %p2908_p5, %p2905_p4 }
  0x2d   : > { %2913 = shalt.err (!%p2910_p10)
}
  0x2e   : > { %s2914_s20 = scalar_lea.vmem %s3067_s23, 128  ;;  %p2922_p0 = scmp.lt.s32.totalorder %s3067_s23, %s3067_s23 }
  0x2f   : > { %p2915_p11 = scmp.ne.s32.totalorder %s3067_s23, %s2914_s20  ;;  %p2923_p2 = scmp.lt.s32.totalorder %s2914_s20, %s2914_s20 }
  0x31   : > { %p2917_p12 = pnand %p2915_p11, %p2875_p9  ;;  %p2924_p3 = por %p2923_p2, %p2922_p0 }
  0x33   : > { %p2918_p13 = pneg %p2917_p12 }
  0x35   : > { %p2925_p6 = pnand %p2924_p3, %p2918_p13 }
  0x37   : > { %2928 = shalt.err (!%p2925_p6)
}
  0x38   : > { %2821 = dma.hbm_to_vmem [thread:$0]  (!%p3063_p7), %s3242_s2, 128, %s3067_s23, [#allocation5]  }
  0x39   : > { %s3117_s27 = sadd.s32 1, %s2997_s15   ;;  %s24_s28 = sadd.s32 1, %s2993_s14 }
  0x3a   : > { %s21_s21 = ssub.s32 %s2997_s15, %s3117_s27  ;;  %p31_p9 = scmp.ne.s32.totalorder %s2993_s14, %s2989_s13 }
  0x3b   : > { %p22_p8 = scmp.eq.s32.totalorder %s21_s21, 0  ;;  %p32_p1 = scmp.eq.s32.totalorder %s2997_s15, 0 }
  0x3c   : > { %p2828_p4 = scmp.lt.s32.totalorder %s2997_s15, 2  ;;  %s153_s29 = sand.u32 1, %s2993_s14  }
  0x3d   : > { %s3128_s30 = scalar_select %p22_p8, %s2993_s14, %s24_s28  }
  0x3e   : > { %p33_p5 = por %p32_p1, %p31_p9  ;;  %s2802_s4 = smul.u32 24, %s153_s29 }
  0x3f   : > { %s2803_s5 = smul.u32 384, %s2997_s15  ;;  %s154_s15 = scalar_lea.sflag [#allocation3], %s153_s29 }
  0x40   : > { %p3131_p10 = pnand %p2828_p4, %p33_p5  ;;  %s157_s9 = scalar_lea.vmem [#allocation2], %s2802_s4 }
  0x41   : > { %s3138_s8 = scalar_lea.hbm %s3240_s0, %s2803_s5  ;;  %s165_s10 = sshll.u32 %s157_s9, 4  ;;  %s3140_s10 = int_to_ptr.vmem [resolvable:$true] %s165_s10 }
  0x42   : > { %s2929_s11 = scalar_lea.hbm %s3138_s8, 384  ;;  %p2931_p11 = pneg %p3131_p10 }
  0x43   : > { %p2930_p7 = scmp.ne.s32.totalorder %s3138_s8, %s2929_s11  ;;  %s2934_s22 = scalar_lea.hbm %s3240_s0, 768 }
  0x44   : > { %p2935_p0 = scmp.lt.u32.totalorder %s3138_s8, %s3240_s0  ;;  %p2936_p2 = scmp.lt.u32.totalorder %s2934_s22, %s2929_s11 }
  0x45   : > { %p2932_p12 = pnand %p2931_p11, %p2930_p7  ;;  %p2938_p6 = scmp.lt.u32.totalorder %s2929_s11, %s3138_s8 }
  0x46   : > { %p2937_p3 = por %p2936_p2, %p2935_p0 }
  0x47   : > { %p2933_p13 = pneg %p2932_p12 }
  0x48   : > { %p2939_p9 = por %p2938_p6, %p2937_p3 }
  0x4a   : > { %p2940_p8 = pnand %p2939_p9, %p2933_p13 }
  0x4c   : > { %2943 = shalt.err (!%p2940_p8)
}
  0x4d   : > { %s2944_s25 = scalar_lea.vmem %s3140_s10, 384  ;;  %s3003_s26 = smov [#allocation2]  }
  0x4e   : > { %p2945_p1 = scmp.ne.s32.totalorder %s3140_s10, %s2944_s25  ;;  %s2949_s28 = sshll.u32 %s3003_s26, 4  ;;  %s2950_s28 = int_to_ptr.vmem [resolvable:$false] %s2949_s28 }
  0x4f   : > { %s2951_s21 = scalar_lea.vmem %s2950_s28, 768  ;;  %p2952_p7 = scmp.lt.s32.totalorder %s3140_s10, %s2950_s28 }
  0x50   : > { %p2947_p4 = pnand %p2945_p1, %p2931_p11  ;;  %p2953_p12 = scmp.lt.s32.totalorder %s2951_s21, %s2944_s25 }
  0x52   : > { %p2948_p5 = pneg %p2947_p4  ;;  %p2954_p0 = por %p2953_p12, %p2952_p7 }
  0x54   : > { %p2955_p2 = pnand %p2954_p0, %p2948_p5 }
  0x56   : > { %2958 = shalt.err (!%p2955_p2)
}
  0x57   : > { %2825 = dma.hbm_to_vmem [thread:$0]  (!%p3131_p10), %s3138_s8, 384, %s3140_s10, %s154_s15  }
  0x58   : > { %p3251_p13 = scmp.ne.s32.totalorder %s3248_s18, 0 }
  0x59   : > { %s176_s29 = sand.u32 (!%p3251_p13), 1, %s2989_s13   ;;  %p3252_p11 = scmp.ne.s32.totalorder (!%p3251_p13), %s3247_s17, 0 }
  0x5a   : > { %174 = sbr.rel (%p3251_p13) target bundleno = 708 (0x2c4), region = 32  ;;  %s177_s5 = scalar_lea.sflag (!%p3251_p13), [#allocation3], %s176_s29 }
  0x5b   : > { %s2804_s4 = smul.u32 (!%p3251_p13), 24, %s176_s29 }
  0x5d   : > { %s3170_s23 = scalar_lea.vmem (!%p3251_p13), [#allocation2], %s2804_s4 }
  0x61   : > { %2976 = dma.done.wait (%p3252_p11), %s177_s5, 384  }
  0x62   : > { %2978 = vsyncadd (%p3252_p11), %s177_s5, 4294966912  ;;  %p3253_p3 = scmp.eq.s32.totalorder %s3043_s16, 0 }
  0x64   : > { %2980 = dma.done.wait (%p3253_p3), [#allocation5], 98432   ;;  %p3254_p10 = pmov %p3253_p3 }
  0x65   : > { %v220_v0 = vld [vmem:[#allocation4 + $0x8] sm:$0xff]  ;;  %v222_v2 = vld [vmem:[#allocation4 + $0x18] sm:$0xff]  ;;  %v219_v5 = vld [vmem:[#allocation4] sm:$0xff]  ;;  %p211_p6 = scmp.lt.s32.totalorder %s3043_s16, 1 }
  0x66   : > { %2982 = vsyncadd (%p3254_p10), [#allocation5], 4294868864  ;;  %v228_v1 = vld [vmem:[#allocation4 + $0x48] sm:$0xff]  ;;  %v230_v4 = vld [vmem:[#allocation4 + $0x58] sm:$0xff] }
  0x67   : > { %v2010_v3 = vpack.c.bf16 %v228_v1, %v220_v0  ;;  %v227_v6 = vld [vmem:[#allocation4 + $0x40] sm:$0xff]  ;;  %v2202_v7 = vpack.c.bf16 %v230_v4, %v222_v2  ;;  %v221_v9 = vld [vmem:[#allocation4 + $0x10] sm:$0xff]  ;;  %v236_v11 = vld [vmem:[#allocation4 + $0x88] sm:$0xff]  ;;  %s3260_s16 = smov (!%p211_p6, %s3043_s16), 1 }
  0x68   : > { %v2012_v8 = vpack.c.bf16 %v227_v6, %v219_v5  ;;  %v229_v10 = vld [vmem:[#allocation4 + $0x50] sm:$0xff]  ;;  %v244_v13 = vld [vmem:[#allocation4 + $0xc8] sm:$0xff]  ;;  %v238_v14 = vld [vmem:[#allocation4 + $0x98] sm:$0xff]  ;;  %s2009_s17 = sshll.u32 %s3260_s16, 5 }
  0x69   : > { %2011 = vmatprep.subr.bf16.mxu0 %v2010_v3  ;;  %v2204_v12 = vpack.c.bf16 %v229_v10, %v221_v9  ;;  %v246_v15 = vld [vmem:[#allocation4 + $0xd8] sm:$0xff]  ;;  %2203 = vmatprep.subr.bf16.mxu1 %v2202_v7  ;;  %v2014_v16 = vpack.c.bf16 %v244_v13, %v236_v11  ;;  %v235_v18 = vld [vmem:[#allocation4 + $0x80] sm:$0xff]  ;;  %v237_v20 = vld [vmem:[#allocation4 + $0x90] sm:$0xff]  ;;  %s215_s7 = scalar_lea.vmem %s3243_s3, %s2009_s17 }
  0x6a   : > { %2013 = vmatpush1.bf16.msra.mxu0 %v2012_v8  ;;  %v2206_v17 = vpack.c.bf16 %v246_v15, %v238_v14  ;;  %v243_v19 = vld [vmem:[#allocation4 + $0xc0] sm:$0xff]  ;;  %v245_v22 = vld [vmem:[#allocation4 + $0xd0] sm:$0xff]  ;;  %v252_v23 = vld [vmem:[#allocation4 + $0x108] sm:$0xff] }
  0x6b   : > { %2205 = vmatpush1.bf16.msra.mxu1 %v2204_v12  ;;  %v2016_v21 = vpack.c.bf16 %v243_v19, %v235_v18  ;;  %v260_v24 = vld [vmem:[#allocation4 + $0x148] sm:$0xff]  ;;  %2015 = vmatprep.subr.bf16.mxu0 %v2014_v16  ;;  %v2208_v25 = vpack.c.bf16 %v245_v22, %v237_v20  ;;  %v254_v27 = vld [vmem:[#allocation4 + $0x118] sm:$0xff]  ;;  %v251_v29 = vld [vmem:[#allocation4 + $0x100] sm:$0xff] }
  0x6c   : > { %2207 = vmatprep.subr.bf16.mxu1 %v2206_v17  ;;  %v2018_v26 = vpack.c.bf16 %v260_v24, %v252_v23  ;;  %v262_v28 = vld [vmem:[#allocation4 + $0x158] sm:$0xff]  ;;  %v259_v31 = vld [vmem:[#allocation4 + $0x140] sm:$0xff]  ;;  %v253_v32 = vld [vmem:[#allocation4 + $0x110] sm:$0xff] }
  0x6d   : > { %v2210_v30 = vpack.c.bf16 %v262_v28, %v254_v27  ;;  %v261_v33 = vld [vmem:[#allocation4 + $0x150] sm:$0xff]  ;;  %v2020_v34 = vpack.c.bf16 %v259_v31, %v251_v29  ;;  %v268_v35 = vld [vmem:[#allocation4 + $0x188] sm:$0xff]  ;;  %v270_v37 = vld [vmem:[#allocation4 + $0x198] sm:$0xff] }
  0x6e   : > { %2017 = vmatpush1.bf16.msra.mxu0 %v2016_v21  ;;  %v276_v36 = vld [vmem:[#allocation4 + $0x1c8] sm:$0xff]  ;;  %v2212_v38 = vpack.c.bf16 %v261_v33, %v253_v32  ;;  %v278_v40 = vld [vmem:[#allocation4 + $0x1d8] sm:$0xff]  ;;  %v267_v41 = vld [vmem:[#allocation4 + $0x180] sm:$0xff] }
  0x6f   : > { %2209 = vmatpush1.bf16.msra.mxu1 %v2208_v25  ;;  %2019 = vmatprep.subr.bf16.mxu0 %v2018_v26  ;;  %v2022_v39 = vpack.c.bf16 %v276_v36, %v268_v35  ;;  %v275_v42 = vld [vmem:[#allocation4 + $0x1c0] sm:$0xff]  ;;  %v2214_v43 = vpack.c.bf16 %v278_v40, %v270_v37  ;;  %v269_v44 = vld [vmem:[#allocation4 + $0x190] sm:$0xff]  ;;  %v284_v46 = vld [vmem:[#allocation4 + $0x208] sm:$0xff] }
  0x70   : > { %2211 = vmatprep.subr.bf16.mxu1 %v2210_v30  ;;  %v277_v45 = vld [vmem:[#allocation4 + $0x1d0] sm:$0xff]  ;;  %v292_v47 = vld [vmem:[#allocation4 + $0x248] sm:$0xff]  ;;  %v286_v48 = vld [vmem:[#allocation4 + $0x218] sm:$0xff]  ;;  %v2024_v50 = vpack.c.bf16 %v275_v42, %v267_v41 }
  0x71   : > { %v294_v49 = vld [vmem:[#allocation4 + $0x258] sm:$0xff]  ;;  %v2216_v51 = vpack.c.bf16 %v277_v45, %v269_v44  ;;  %v2026_v52 = vpack.c.bf16 %v292_v47, %v284_v46  ;;  %v283_v53 = vld [vmem:[#allocation4 + $0x200] sm:$0xff]  ;;  %v285_v55 = vld [vmem:[#allocation4 + $0x210] sm:$0xff] }
  0x72   : > { %2021 = vmatpush1.bf16.msra.mxu0 %v2020_v34  ;;  %v291_v54 = vld [vmem:[#allocation4 + $0x240] sm:$0xff]  ;;  %v2218_v56 = vpack.c.bf16 %v294_v49, %v286_v48  ;;  %v293_v57 = vld [vmem:[#allocation4 + $0x250] sm:$0xff]  ;;  %v300_v58 = vld [vmem:[#allocation4 + $0x288] sm:$0xff] }
  0x73   : > { %2213 = vmatpush1.bf16.msra.mxu1 %v2212_v38  ;;  %2023 = vmatprep.subr.bf16.mxu0 %v2022_v39  ;;  %v308_v59 = vld [vmem:[#allocation4 + $0x2c8] sm:$0xff]  ;;  %v302_v60 = vld [vmem:[#allocation4 + $0x298] sm:$0xff]  ;;  %v2028_v62 = vpack.c.bf16 %v291_v54, %v283_v53  ;;  %v2220_v63 = vpack.c.bf16 %v293_v57, %v285_v55  ;;  %v299_v1 = vld [vmem:[#allocation4 + $0x280] sm:$0xff] }
  0x74   : > { %2215 = vmatprep.subr.bf16.mxu1 %v2214_v43  ;;  %v310_v61 = vld [vmem:[#allocation4 + $0x2d8] sm:$0xff]  ;;  %v2030_v0 = vpack.c.bf16 %v308_v59, %v300_v58  ;;  %v307_v2 = vld [vmem:[#allocation4 + $0x2c0] sm:$0xff]  ;;  %v301_v3 = vld [vmem:[#allocation4 + $0x290] sm:$0xff] }
  0x75   : > { %v2222_v4 = vpack.c.bf16 %v310_v61, %v302_v60  ;;  %v309_v5 = vld [vmem:[#allocation4 + $0x2d0] sm:$0xff]  ;;  %v316_v6 = vld [vmem:[#allocation4 + $0x308] sm:$0xff]  ;;  %v318_v8 = vld [vmem:[#allocation4 + $0x318] sm:$0xff]  ;;  %v2032_v10 = vpack.c.bf16 %v307_v2, %v299_v1 }
  0x76   : > { %2025 = vmatpush1.bf16.msra.mxu0 %v2024_v50  ;;  %v324_v7 = vld [vmem:[#allocation4 + $0x348] sm:$0xff]  ;;  %v326_v9 = vld [vmem:[#allocation4 + $0x358] sm:$0xff]  ;;  %v2224_v11 = vpack.c.bf16 %v309_v5, %v301_v3  ;;  %v315_v13 = vld [vmem:[#allocation4 + $0x300] sm:$0xff] }
  0x77   : > { %2217 = vmatpush1.bf16.msra.mxu1 %v2216_v51  ;;  %2027 = vmatprep.subr.bf16.mxu0 %v2026_v52  ;;  %v2034_v12 = vpack.c.bf16 %v324_v7, %v316_v6  ;;  %v323_v14 = vld [vmem:[#allocation4 + $0x340] sm:$0xff]  ;;  %v317_v15 = vld [vmem:[#allocation4 + $0x310] sm:$0xff]  ;;  %v2226_v16 = vpack.c.bf16 %v326_v9, %v318_v8  ;;  %v332_v18 = vld [vmem:[#allocation4 + $0x388] sm:$0xff] }
  0x78   : > { %2219 = vmatprep.subr.bf16.mxu1 %v2218_v56  ;;  %v325_v17 = vld [vmem:[#allocation4 + $0x350] sm:$0xff]  ;;  %v340_v19 = vld [vmem:[#allocation4 + $0x3c8] sm:$0xff]  ;;  %v334_v20 = vld [vmem:[#allocation4 + $0x398] sm:$0xff]  ;;  %v2036_v22 = vpack.c.bf16 %v323_v14, %v315_v13 }
  0x79   : > { %v342_v21 = vld [vmem:[#allocation4 + $0x3d8] sm:$0xff]  ;;  %v2228_v23 = vpack.c.bf16 %v325_v17, %v317_v15  ;;  %v2038_v24 = vpack.c.bf16 %v340_v19, %v332_v18  ;;  %v331_v25 = vld [vmem:[#allocation4 + $0x380] sm:$0xff]  ;;  %v333_v27 = vld [vmem:[#allocation4 + $0x390] sm:$0xff] }
  0x7a   : > { %2029 = vmatpush1.bf16.msra.mxu0 %v2028_v62  ;;  %v339_v26 = vld [vmem:[#allocation4 + $0x3c0] sm:$0xff]  ;;  %v2230_v28 = vpack.c.bf16 %v342_v21, %v334_v20  ;;  %v341_v29 = vld [vmem:[#allocation4 + $0x3d0] sm:$0xff]  ;;  %v348_v30 = vld [vmem:[#allocation4 + $0x408] sm:$0xff] }
  0x7b   : > { %2221 = vmatpush1.bf16.msra.mxu1 %v2220_v63  ;;  %2031 = vmatprep.subr.bf16.mxu0 %v2030_v0  ;;  %v356_v31 = vld [vmem:[#allocation4 + $0x448] sm:$0xff]  ;;  %v350_v32 = vld [vmem:[#allocation4 + $0x418] sm:$0xff]  ;;  %v2040_v34 = vpack.c.bf16 %v339_v26, %v331_v25  ;;  %v2232_v35 = vpack.c.bf16 %v341_v29, %v333_v27  ;;  %v347_v37 = vld [vmem:[#allocation4 + $0x400] sm:$0xff] }
  0x7c   : > { %2223 = vmatprep.subr.bf16.mxu1 %v2222_v4  ;;  %v358_v33 = vld [vmem:[#allocation4 + $0x458] sm:$0xff]  ;;  %v2042_v36 = vpack.c.bf16 %v356_v31, %v348_v30  ;;  %v355_v38 = vld [vmem:[#allocation4 + $0x440] sm:$0xff]  ;;  %v349_v39 = vld [vmem:[#allocation4 + $0x410] sm:$0xff] }
  0x7d   : > { %v2234_v40 = vpack.c.bf16 %v358_v33, %v350_v32  ;;  %v357_v41 = vld [vmem:[#allocation4 + $0x450] sm:$0xff]  ;;  %v364_v42 = vld [vmem:[#allocation4 + $0x488] sm:$0xff]  ;;  %v366_v44 = vld [vmem:[#allocation4 + $0x498] sm:$0xff]  ;;  %v2044_v46 = vpack.c.bf16 %v355_v38, %v347_v37 }
  0x7e   : > { %2033 = vmatpush1.bf16.msra.mxu0 %v2032_v10  ;;  %v372_v43 = vld [vmem:[#allocation4 + $0x4c8] sm:$0xff]  ;;  %v374_v45 = vld [vmem:[#allocation4 + $0x4d8] sm:$0xff]  ;;  %v2236_v47 = vpack.c.bf16 %v357_v41, %v349_v39  ;;  %v363_v49 = vld [vmem:[#allocation4 + $0x480] sm:$0xff] }
  0x7f   : > { %2225 = vmatpush1.bf16.msra.mxu1 %v2224_v11  ;;  %2035 = vmatprep.subr.bf16.mxu0 %v2034_v12  ;;  %v2046_v48 = vpack.c.bf16 %v372_v43, %v364_v42  ;;  %v371_v50 = vld [vmem:[#allocation4 + $0x4c0] sm:$0xff]  ;;  %v365_v51 = vld [vmem:[#allocation4 + $0x490] sm:$0xff]  ;;  %v2238_v52 = vpack.c.bf16 %v374_v45, %v366_v44  ;;  %v380_v54 = vld [vmem:[#allocation4 + $0x508] sm:$0xff] }
  0x80   : > { %2227 = vmatprep.subr.bf16.mxu1 %v2226_v16  ;;  %v373_v53 = vld [vmem:[#allocation4 + $0x4d0] sm:$0xff]  ;;  %v388_v55 = vld [vmem:[#allocation4 + $0x548] sm:$0xff]  ;;  %v382_v56 = vld [vmem:[#allocation4 + $0x518] sm:$0xff]  ;;  %v2048_v58 = vpack.c.bf16 %v371_v50, %v363_v49 }
  0x81   : > { %v390_v57 = vld [vmem:[#allocation4 + $0x558] sm:$0xff]  ;;  %v2240_v59 = vpack.c.bf16 %v373_v53, %v365_v51  ;;  %v2050_v60 = vpack.c.bf16 %v388_v55, %v380_v54  ;;  %v379_v61 = vld [vmem:[#allocation4 + $0x500] sm:$0xff]  ;;  %v381_v63 = vld [vmem:[#allocation4 + $0x510] sm:$0xff] }
  0x82   : > { %2037 = vmatpush1.bf16.msra.mxu0 %v2036_v22  ;;  %v387_v62 = vld [vmem:[#allocation4 + $0x540] sm:$0xff]  ;;  %v2242_v0 = vpack.c.bf16 %v390_v57, %v382_v56  ;;  %v389_v1 = vld [vmem:[#allocation4 + $0x550] sm:$0xff]  ;;  %v396_v2 = vld [vmem:[#allocation4 + $0x588] sm:$0xff] }
  0x83   : > { %2229 = vmatpush1.bf16.msra.mxu1 %v2228_v23  ;;  %2039 = vmatprep.subr.bf16.mxu0 %v2038_v24  ;;  %v404_v3 = vld [vmem:[#allocation4 + $0x5c8] sm:$0xff]  ;;  %v398_v4 = vld [vmem:[#allocation4 + $0x598] sm:$0xff]  ;;  %v2052_v6 = vpack.c.bf16 %v387_v62, %v379_v61  ;;  %v395_v7 = vld [vmem:[#allocation4 + $0x580] sm:$0xff]  ;;  %v2244_v8 = vpack.c.bf16 %v389_v1, %v381_v63 }
  0x84   : > { %2231 = vmatprep.subr.bf16.mxu1 %v2230_v28  ;;  %v406_v5 = vld [vmem:[#allocation4 + $0x5d8] sm:$0xff]  ;;  %v2054_v9 = vpack.c.bf16 %v404_v3, %v396_v2  ;;  %v403_v10 = vld [vmem:[#allocation4 + $0x5c0] sm:$0xff]  ;;  %v397_v11 = vld [vmem:[#allocation4 + $0x590] sm:$0xff] }
  0x85   : > { %v405_v12 = vld [vmem:[#allocation4 + $0x5d0] sm:$0xff]  ;;  %v2246_v13 = vpack.c.bf16 %v406_v5, %v398_v4  ;;  %v412_v14 = vld [vmem:[#allocation4 + $0x608] sm:$0xff]  ;;  %v414_v17 = vld [vmem:[#allocation4 + $0x618] sm:$0xff]  ;;  %v2056_v20 = vpack.c.bf16 %v403_v10, %v395_v7 }
  0x86   : > { %2041 = vmatpush1.bf16.msra.mxu0 %v2040_v34  ;;  %v420_v15 = vld [vmem:[#allocation4 + $0x648] sm:$0xff]  ;;  %v422_v18 = vld [vmem:[#allocation4 + $0x658] sm:$0xff]  ;;  %v2248_v21 = vpack.c.bf16 %v405_v12, %v397_v11  ;;  %v411_v23 = vld [vmem:[#allocation4 + $0x600] sm:$0xff] }
  0x87   : > { %2233 = vmatpush1.bf16.msra.mxu1 %v2232_v35  ;;  %2043 = vmatprep.subr.bf16.mxu0 %v2042_v36  ;;  %v3181_v16 = vld [vmem:[%s3170_s23] sm:$0xff]  ;;  %v2058_v22 = vpack.c.bf16 %v420_v15, %v412_v14  ;;  %v419_v24 = vld [vmem:[#allocation4 + $0x640] sm:$0xff]  ;;  %v2250_v26 = vpack.c.bf16 %v422_v18, %v414_v17  ;;  %v430_v30 = vld [vmem:[#allocation4 + $0x698] sm:$0xff] }
  0x88   : > { %2235 = vmatprep.subr.bf16.mxu1 %v2234_v40  ;;  %v3185_v19 = vcombine.high %v3181_v16, %v3181_v16  ;;  %v413_v25 = vld [vmem:[#allocation4 + $0x610] sm:$0xff]  ;;  %v428_v28 = vld [vmem:[#allocation4 + $0x688] sm:$0xff]  ;;  %v438_v31 = vld [vmem:[#allocation4 + $0x6d8] sm:$0xff]  ;;  %v2060_v32 = vpack.c.bf16 %v419_v24, %v411_v23 }
  0x89   : > { %v421_v27 = vld [vmem:[#allocation4 + $0x650] sm:$0xff]  ;;  %v436_v29 = vld [vmem:[#allocation4 + $0x6c8] sm:$0xff]  ;;  %v427_v35 = vld [vmem:[#allocation4 + $0x680] sm:$0xff]  ;;  %v2254_v38 = vpack.c.bf16 %v438_v31, %v430_v30 }
  0x8a   : > { %2045 = vmatpush1.bf16.msra.mxu0 %v2044_v46  ;;  %1102 = vmatprep.mubr.f32.mxu0 %v3185_v19  ;;  %v2252_v33 = vpack.c.bf16 %v421_v27, %v413_v25  ;;  %v2062_v34 = vpack.c.bf16 %v436_v29, %v428_v28  ;;  %v435_v36 = vld [vmem:[#allocation4 + $0x6c0] sm:$0xff]  ;;  %v429_v37 = vld [vmem:[#allocation4 + $0x690] sm:$0xff]  ;;  %v444_v40 = vld [vmem:[#allocation4 + $0x708] sm:$0xff] }
  0x8b   : > { %2237 = vmatpush1.bf16.msra.mxu1 %v2236_v47  ;;  %2047 = vmatprep.subr.bf16.mxu0 %v2046_v48  ;;  %v437_v39 = vld [vmem:[#allocation4 + $0x6d0] sm:$0xff]  ;;  %v452_v41 = vld [vmem:[#allocation4 + $0x748] sm:$0xff]  ;;  %v446_v42 = vld [vmem:[#allocation4 + $0x718] sm:$0xff]  ;;  %v2064_v44 = vpack.c.bf16 %v435_v36, %v427_v35 }
  0x8c   : > { %2239 = vmatprep.subr.bf16.mxu1 %v2238_v52  ;;  %1315 = vmatprep.mubr.f32.mxu1 %v3185_v19  ;;  %v454_v43 = vld [vmem:[#allocation4 + $0x758] sm:$0xff]  ;;  %v2256_v45 = vpack.c.bf16 %v437_v39, %v429_v37  ;;  %v2066_v46 = vpack.c.bf16 %v452_v41, %v444_v40  ;;  %v443_v47 = vld [vmem:[#allocation4 + $0x700] sm:$0xff]  ;;  %v445_v49 = vld [vmem:[#allocation4 + $0x710] sm:$0xff] }
  0x8d   : > { %v451_v48 = vld [vmem:[#allocation4 + $0x740] sm:$0xff]  ;;  %v2258_v50 = vpack.c.bf16 %v454_v43, %v446_v42  ;;  %v453_v51 = vld [vmem:[#allocation4 + $0x750] sm:$0xff]  ;;  %v460_v52 = vld [vmem:[#allocation4 + $0x788] sm:$0xff] }
  0x8e   : > { %2049 = vmatpush1.bf16.msra.mxu0 %v2048_v58  ;;  %v468_v53 = vld [vmem:[#allocation4 + $0x7c8] sm:$0xff]  ;;  %v462_v54 = vld [vmem:[#allocation4 + $0x798] sm:$0xff]  ;;  %v2068_v56 = vpack.c.bf16 %v451_v48, %v443_v47  ;;  %v2260_v57 = vpack.c.bf16 %v453_v51, %v445_v49  ;;  %v461_v61 = vld [vmem:[#allocation4 + $0x790] sm:$0xff] }
  0x8f   : > { %2241 = vmatpush1.bf16.msra.mxu1 %v2240_v59  ;;  %2051 = vmatprep.subr.bf16.mxu0 %v2050_v60  ;;  %v470_v55 = vld [vmem:[#allocation4 + $0x7d8] sm:$0xff]  ;;  %v2070_v58 = vpack.c.bf16 %v468_v53, %v460_v52  ;;  %v459_v59 = vld [vmem:[#allocation4 + $0x780] sm:$0xff]  ;;  %v469_v63 = vld [vmem:[#allocation4 + $0x7d0] sm:$0xff] }
  0x90   : > { %2243 = vmatprep.subr.bf16.mxu1 %v2242_v0  ;;  %v467_v60 = vld [vmem:[#allocation4 + $0x7c0] sm:$0xff]  ;;  %v2262_v62 = vpack.c.bf16 %v470_v55, %v462_v54  ;;  %v476_v0 = vld [vmem:[#allocation4 + $0x808] sm:$0xff]  ;;  %v478_v2 = vld [vmem:[#allocation4 + $0x818] sm:$0xff]  ;;  %v2264_v5 = vpack.c.bf16 %v469_v63, %v461_v61 }
  0x91   : > { %v484_v1 = vld [vmem:[#allocation4 + $0x848] sm:$0xff]  ;;  %v486_v3 = vld [vmem:[#allocation4 + $0x858] sm:$0xff]  ;;  %v2072_v4 = vpack.c.bf16 %v467_v60, %v459_v59  ;;  %v475_v7 = vld [vmem:[#allocation4 + $0x800] sm:$0xff] }
  0x92   : > { %2053 = vmatpush1.bf16.msra.mxu0 %v2052_v6  ;;  %v2074_v6 = vpack.c.bf16 %v484_v1, %v476_v0  ;;  %v2266_v10 = vpack.c.bf16 %v486_v3, %v478_v2  ;;  %v485_v11 = vld [vmem:[#allocation4 + $0x850] sm:$0xff]  ;;  %v492_v12 = vld [vmem:[#allocation4 + $0x888] sm:$0xff]  ;;  %v494_v14 = vld [vmem:[#allocation4 + $0x898] sm:$0xff] }
  0x93   : > { %2245 = vmatpush1.bf16.msra.mxu1 %v2244_v8  ;;  %2055 = vmatprep.subr.bf16.mxu0 %v2054_v9  ;;  %v483_v8 = vld [vmem:[#allocation4 + $0x840] sm:$0xff]  ;;  %v477_v9 = vld [vmem:[#allocation4 + $0x810] sm:$0xff]  ;;  %v502_v15 = vld [vmem:[#allocation4 + $0x8d8] sm:$0xff] }
  0x94   : > { %2247 = vmatprep.subr.bf16.mxu1 %v2246_v13  ;;  %v500_v13 = vld [vmem:[#allocation4 + $0x8c8] sm:$0xff]  ;;  %v2076_v17 = vpack.c.bf16 %v483_v8, %v475_v7  ;;  %v2268_v18 = vpack.c.bf16 %v485_v11, %v477_v9  ;;  %v493_v23 = vld [vmem:[#allocation4 + $0x890] sm:$0xff]  ;;  %v2270_v24 = vpack.c.bf16 %v502_v15, %v494_v14  ;;  %v510_v28 = vld [vmem:[#allocation4 + $0x918] sm:$0xff] }
  0x95   : > { %v501_v25 = vld [vmem:[#allocation4 + $0x8d0] sm:$0xff]  ;;  %v516_v27 = vld [vmem:[#allocation4 + $0x948] sm:$0xff]  ;;  %v518_v29 = vld [vmem:[#allocation4 + $0x958] sm:$0xff] }
  0x96   : > { %2057 = vmatpush1.bf16.msra.mxu0 %v2056_v20  ;;  %v2078_v20 = vpack.c.bf16 %v500_v13, %v492_v12  ;;  %v2272_v31 = vpack.c.bf16 %v501_v25, %v493_v23  ;;  %v509_v35 = vld [vmem:[#allocation4 + $0x910] sm:$0xff]  ;;  %v2274_v36 = vpack.c.bf16 %v518_v29, %v510_v28  ;;  %v532_v39 = vld [vmem:[#allocation4 + $0x9c8] sm:$0xff]  ;;  %v526_v40 = vld [vmem:[#allocation4 + $0x998] sm:$0xff] }
  0x97   : > { %2249 = vmatpush1.bf16.msra.mxu1 %v2248_v21  ;;  %2059 = vmatprep.subr.bf16.mxu0 %v2058_v22  ;;  %v491_v21 = vld [vmem:[#allocation4 + $0x880] sm:$0xff]  ;;  %v517_v37 = vld [vmem:[#allocation4 + $0x950] sm:$0xff]  ;;  %v534_v41 = vld [vmem:[#allocation4 + $0x9d8] sm:$0xff] }
  0x98   : > { %2251 = vmatprep.subr.bf16.mxu1 %v2250_v26  ;;  %v499_v22 = vld [vmem:[#allocation4 + $0x8c0] sm:$0xff]  ;;  %v508_v26 = vld [vmem:[#allocation4 + $0x908] sm:$0xff]  ;;  %v2278_v47 = vpack.c.bf16 %v534_v41, %v526_v40  ;;  %v533_v48 = vld [vmem:[#allocation4 + $0x9d0] sm:$0xff] }
  0x99   : > { %v2080_v30 = vpack.c.bf16 %v499_v22, %v491_v21  ;;  %v540_v49 = vld [vmem:[#allocation4 + $0xa08] sm:$0xff]  ;;  %v542_v51 = vld [vmem:[#allocation4 + $0xa18] sm:$0xff]  ;;  %v549_v60 = vld [vmem:[#allocation4 + $0xa50] sm:$0xff] }
  0x9a   : > { %2061 = vmatpush1.bf16.msra.mxu0 %v2060_v32  ;;  %v2082_v32 = vpack.c.bf16 %v516_v27, %v508_v26  ;;  %v550_v52 = vld [vmem:[#allocation4 + $0xa58] sm:$0xff]  ;;  %v556_v61 = vld [vmem:[#allocation4 + $0xa88] sm:$0xff]  ;;  %v565_v8 = vld [vmem:[#allocation4 + $0xad0] sm:$0xff] }
  0x9b   : > { %2253 = vmatpush1.bf16.msra.mxu1 %v2252_v33  ;;  %2063 = vmatprep.subr.bf16.mxu0 %v2062_v34  ;;  %v507_v33 = vld [vmem:[#allocation4 + $0x900] sm:$0xff]  ;;  %v2282_v59 = vpack.c.bf16 %v550_v52, %v542_v51  ;;  %v558_v63 = vld [vmem:[#allocation4 + $0xa98] sm:$0xff]  ;;  %v572_v9 = vld [vmem:[#allocation4 + $0xb08] sm:$0xff] }
  0x9c   : > { %2255 = vmatprep.subr.bf16.mxu1 %v2254_v38  ;;  %v515_v34 = vld [vmem:[#allocation4 + $0x940] sm:$0xff]  ;;  %v524_v38 = vld [vmem:[#allocation4 + $0x988] sm:$0xff]  ;;  %v566_v0 = vld [vmem:[#allocation4 + $0xad8] sm:$0xff] }
  0x9d   : > { %v2084_v42 = vpack.c.bf16 %v515_v34, %v507_v33  ;;  %v2086_v43 = vpack.c.bf16 %v532_v39, %v524_v38  ;;  %v2286_v7 = vpack.c.bf16 %v566_v0, %v558_v63  ;;  %v574_v11 = vld [vmem:[#allocation4 + $0xb18] sm:$0xff]  ;;  %v571_v14 = vld [vmem:[#allocation4 + $0xb00] sm:$0xff]  ;;  %v581_v23 = vld [vmem:[#allocation4 + $0xb50] sm:$0xff] }
  0x9e   : > { %2065 = vmatpush1.bf16.msra.mxu0 %v2064_v44  ;;  %v523_v44 = vld [vmem:[#allocation4 + $0x980] sm:$0xff]  ;;  %v582_v12 = vld [vmem:[#allocation4 + $0xb58] sm:$0xff]  ;;  %v596_v25 = vld [vmem:[#allocation4 + $0xbc8] sm:$0xff] }
  0x9f   : > { %2257 = vmatpush1.bf16.msra.mxu1 %v2256_v45  ;;  %2067 = vmatprep.subr.bf16.mxu0 %v2066_v46  ;;  %v531_v45 = vld [vmem:[#allocation4 + $0x9c0] sm:$0xff]  ;;  %v525_v46 = vld [vmem:[#allocation4 + $0x990] sm:$0xff]  ;;  %v2290_v22 = vpack.c.bf16 %v582_v12, %v574_v11  ;;  %v590_v27 = vld [vmem:[#allocation4 + $0xb98] sm:$0xff] }
  0xa0   : > { %2259 = vmatprep.subr.bf16.mxu1 %v2258_v50  ;;  %v548_v50 = vld [vmem:[#allocation4 + $0xa48] sm:$0xff]  ;;  %v2088_v53 = vpack.c.bf16 %v531_v45, %v523_v44  ;;  %v2280_v54 = vpack.c.bf16 %v533_v48, %v525_v46  ;;  %v3192_v21 = vld [vmem:[%s3170_s23 + $0x8] sm:$0xff]  ;;  %v595_v33 = vld [vmem:[#allocation4 + $0xbc0] sm:$0xff] }
  0xa1   : > { %v2090_v55 = vpack.c.bf16 %v548_v50, %v540_v49  ;;  %v3196_v26 = vcombine.high %v3192_v21, %v3192_v21  ;;  %v598_v28 = vld [vmem:[#allocation4 + $0xbd8] sm:$0xff]  ;;  %v589_v34 = vld [vmem:[#allocation4 + $0xb90] sm:$0xff]  ;;  %v612_v38 = vld [vmem:[#allocation4 + $0xc48] sm:$0xff] }
  0xa2   : > { %2069 = vmatpush1.bf16.msra.mxu0 %v2068_v56  ;;  %v539_v56 = vld [vmem:[#allocation4 + $0xa00] sm:$0xff]  ;;  %v606_v39 = vld [vmem:[#allocation4 + $0xc18] sm:$0xff]  ;;  %v605_v45 = vld [vmem:[#allocation4 + $0xc10] sm:$0xff] }
  0xa3   : > { %2261 = vmatpush1.bf16.msra.mxu1 %v2260_v57  ;;  %2071 = vmatprep.subr.bf16.mxu0 %v2070_v58  ;;  %v547_v57 = vld [vmem:[#allocation4 + $0xa40] sm:$0xff]  ;;  %v541_v58 = vld [vmem:[#allocation4 + $0xa10] sm:$0xff]  ;;  %v614_v40 = vld [vmem:[#allocation4 + $0xc58] sm:$0xff] }
  0xa4   : > { %2263 = vmatprep.subr.bf16.mxu1 %v2262_v62  ;;  %v564_v62 = vld [vmem:[#allocation4 + $0xac8] sm:$0xff]  ;;  %v2092_v1 = vpack.c.bf16 %v547_v57, %v539_v56  ;;  %v2284_v2 = vpack.c.bf16 %v549_v60, %v541_v58  ;;  %v611_v44 = vld [vmem:[#allocation4 + $0xc40] sm:$0xff]  ;;  %v2298_v46 = vpack.c.bf16 %v614_v40, %v606_v39  ;;  %v622_v50 = vld [vmem:[#allocation4 + $0xc98] sm:$0xff] }
  0xa5   : > { %v2094_v3 = vpack.c.bf16 %v564_v62, %v556_v61  ;;  %v620_v48 = vld [vmem:[#allocation4 + $0xc88] sm:$0xff]  ;;  %v630_v51 = vld [vmem:[#allocation4 + $0xcd8] sm:$0xff]  ;;  %v627_v56 = vld [vmem:[#allocation4 + $0xcc0] sm:$0xff] }
  0xa6   : > { %2073 = vmatpush1.bf16.msra.mxu0 %v2072_v4  ;;  %v555_v4 = vld [vmem:[#allocation4 + $0xa80] sm:$0xff]  ;;  %v628_v49 = vld [vmem:[#allocation4 + $0xcc8] sm:$0xff]  ;;  %v621_v57 = vld [vmem:[#allocation4 + $0xc90] sm:$0xff]  ;;  %v2302_v58 = vpack.c.bf16 %v630_v51, %v622_v50 }
  0xa7   : > { %2265 = vmatpush1.bf16.msra.mxu1 %v2264_v5  ;;  %2075 = vmatprep.subr.bf16.mxu0 %v2074_v6  ;;  %v563_v5 = vld [vmem:[#allocation4 + $0xac0] sm:$0xff]  ;;  %v557_v6 = vld [vmem:[#allocation4 + $0xa90] sm:$0xff]  ;;  %v636_v60 = vld [vmem:[#allocation4 + $0xd08] sm:$0xff] }
  0xa8   : > { %2267 = vmatprep.subr.bf16.mxu1 %v2266_v10  ;;  %v580_v10 = vld [vmem:[#allocation4 + $0xb48] sm:$0xff]  ;;  %v2096_v13 = vpack.c.bf16 %v563_v5, %v555_v4  ;;  %v2288_v15 = vpack.c.bf16 %v565_v8, %v557_v6  ;;  %v638_v62 = vld [vmem:[#allocation4 + $0xd18] sm:$0xff]  ;;  %v643_v4 = vld [vmem:[#allocation4 + $0xd40] sm:$0xff] }
  0xa9   : > { %1103 = vmatmul.mubr.f32.vlgmr.msra.gmra.mrb[0].mxu0 %v3181_v16  ;;  %v644_v61 = vld [vmem:[#allocation4 + $0xd48] sm:$0xff]  ;;  %v646_v63 = vld [vmem:[#allocation4 + $0xd58] sm:$0xff]  ;;  %v637_v5 = vld [vmem:[#allocation4 + $0xd10] sm:$0xff] }
  0xaa   : > { %2077 = vmatpush1.bf16.msra.mxu0 %v2076_v17  ;;  %1316 = vmatmul.mubr.f32.vlgmr.msra.gmra.mrb[0].mxu1 %v3181_v16  ;;  %v2276_v16 = vpack.c.bf16 %v517_v37, %v509_v35  ;;  %v2098_v17 = vpack.c.bf16 %v580_v10, %v572_v9  ;;  %v2294_v35 = vpack.c.bf16 %v598_v28, %v590_v27  ;;  %v604_v37 = vld [vmem:[#allocation4 + $0xc08] sm:$0xff]  ;;  %v654_v10 = vld [vmem:[#allocation4 + $0xd98] sm:$0xff] }
  0xab   : > { %2269 = vmatpush1.bf16.msra.mxu1 %v2268_v18  ;;  %2079 = vmatprep.subr.bf16.mxu0 %v2078_v20  ;;  %v579_v18 = vld [vmem:[#allocation4 + $0xb40] sm:$0xff]  ;;  %v573_v20 = vld [vmem:[#allocation4 + $0xb10] sm:$0xff]  ;;  %v2306_v6 = vpack.c.bf16 %v646_v63, %v638_v62  ;;  %v652_v8 = vld [vmem:[#allocation4 + $0xd88] sm:$0xff] }
  0xac   : > { %2271 = vmatprep.subr.bf16.mxu1 %v2270_v24  ;;  %v588_v24 = vld [vmem:[#allocation4 + $0xb88] sm:$0xff]  ;;  %v2100_v29 = vpack.c.bf16 %v579_v18, %v571_v14  ;;  %1173 = vmatprep.mubr.f32.mxu0 %v3196_v26  ;;  %v662_v11 = vld [vmem:[#allocation4 + $0xdd8] sm:$0xff]  ;;  %v653_v18 = vld [vmem:[#allocation4 + $0xd90] sm:$0xff] }
  0xad   : > { %1386 = vmatprep.mubr.f32.mxu1 %v3196_v26  ;;  %v660_v9 = vld [vmem:[#allocation4 + $0xdc8] sm:$0xff]  ;;  %v678_v27 = vld [vmem:[#allocation4 + $0xe58] sm:$0xff] }
  0xae   : > { %2081 = vmatpush1.bf16.msra.mxu0 %v2080_v30  ;;  %v2292_v30 = vpack.c.bf16 %v581_v23, %v573_v20  ;;  %v2118_v14 = vpack.c.bf16 %v660_v9, %v652_v8  ;;  %v2310_v20 = vpack.c.bf16 %v662_v11, %v654_v10  ;;  %v668_v23 = vld [vmem:[#allocation4 + $0xe08] sm:$0xff]  ;;  %v694_v39 = vld [vmem:[#allocation4 + $0xed8] sm:$0xff] }
  0xaf   : > { %2273 = vmatpush1.bf16.msra.mxu1 %v2272_v31  ;;  %2083 = vmatprep.subr.bf16.mxu0 %v2082_v32  ;;  %v2102_v31 = vpack.c.bf16 %v596_v25, %v588_v24  ;;  %v587_v32 = vld [vmem:[#allocation4 + $0xb80] sm:$0xff]  ;;  %v676_v24 = vld [vmem:[#allocation4 + $0xe48] sm:$0xff]  ;;  %v670_v25 = vld [vmem:[#allocation4 + $0xe18] sm:$0xff] }
  0xb0   : > { %2275 = vmatprep.subr.bf16.mxu1 %v2274_v36  ;;  %v597_v36 = vld [vmem:[#allocation4 + $0xbd0] sm:$0xff]  ;;  %v2104_v41 = vpack.c.bf16 %v595_v33, %v587_v32  ;;  %v675_v32 = vld [vmem:[#allocation4 + $0xe40] sm:$0xff]  ;;  %v710_v50 = vld [vmem:[#allocation4 + $0xf58] sm:$0xff] }
  0xb1   : > { %v669_v33 = vld [vmem:[#allocation4 + $0xe10] sm:$0xff]  ;;  %v726_v62 = vld [vmem:[#allocation4 + $0xfd8] sm:$0xff]  ;;  %v740_v8 = vld [vmem:[#allocation4 + $0x1048] sm:$0xff] }
  0xb2   : > { %2085 = vmatpush1.bf16.msra.mxu0 %v2084_v42  ;;  %v2296_v42 = vpack.c.bf16 %v597_v36, %v589_v34  ;;  %v2314_v34 = vpack.c.bf16 %v678_v27, %v670_v25  ;;  %v684_v36 = vld [vmem:[#allocation4 + $0xe88] sm:$0xff]  ;;  %v734_v9 = vld [vmem:[#allocation4 + $0x1018] sm:$0xff] }
  0xb3   : > { %2277 = vmatpush1.bf16.msra.mxu1 %v2276_v16  ;;  %2087 = vmatprep.subr.bf16.mxu0 %v2086_v43  ;;  %v2106_v16 = vpack.c.bf16 %v612_v38, %v604_v37  ;;  %v603_v43 = vld [vmem:[#allocation4 + $0xc00] sm:$0xff]  ;;  %v692_v37 = vld [vmem:[#allocation4 + $0xec8] sm:$0xff]  ;;  %v686_v38 = vld [vmem:[#allocation4 + $0xe98] sm:$0xff] }
  0xb4   : > { %2279 = vmatprep.subr.bf16.mxu1 %v2278_v47  ;;  %v613_v47 = vld [vmem:[#allocation4 + $0xc50] sm:$0xff]  ;;  %v2108_v52 = vpack.c.bf16 %v611_v44, %v603_v43  ;;  %v691_v43 = vld [vmem:[#allocation4 + $0xec0] sm:$0xff]  ;;  %v742_v10 = vld [vmem:[#allocation4 + $0x1058] sm:$0xff] }
  0xb5   : > { %v685_v44 = vld [vmem:[#allocation4 + $0xe90] sm:$0xff]  ;;  %v758_v25 = vld [vmem:[#allocation4 + $0x10d8] sm:$0xff] }
  0xb6   : > { %2089 = vmatpush1.bf16.msra.mxu0 %v2088_v53  ;;  %v2300_v53 = vpack.c.bf16 %v613_v47, %v605_v45  ;;  %v2318_v45 = vpack.c.bf16 %v694_v39, %v686_v38  ;;  %v700_v47 = vld [vmem:[#allocation4 + $0xf08] sm:$0xff]  ;;  %v766_v39 = vld [vmem:[#allocation4 + $0x1118] sm:$0xff] }
  0xb7   : > { %2281 = vmatpush1.bf16.msra.mxu1 %v2280_v54  ;;  %2091 = vmatprep.subr.bf16.mxu0 %v2090_v55  ;;  %v2110_v54 = vpack.c.bf16 %v628_v49, %v620_v48  ;;  %v619_v55 = vld [vmem:[#allocation4 + $0xc80] sm:$0xff]  ;;  %v708_v48 = vld [vmem:[#allocation4 + $0xf48] sm:$0xff]  ;;  %v702_v49 = vld [vmem:[#allocation4 + $0xf18] sm:$0xff] }
  0xb8   : > { %2283 = vmatprep.subr.bf16.mxu1 %v2282_v59  ;;  %v629_v59 = vld [vmem:[#allocation4 + $0xcd0] sm:$0xff]  ;;  %v2112_v0 = vpack.c.bf16 %v627_v56, %v619_v55  ;;  %v707_v55 = vld [vmem:[#allocation4 + $0xf40] sm:$0xff] }
  0xb9   : > { %v701_v56 = vld [vmem:[#allocation4 + $0xf10] sm:$0xff] }
  0xba   : > { %2093 = vmatpush1.bf16.msra.mxu0 %v2092_v1  ;;  %v2304_v1 = vpack.c.bf16 %v629_v59, %v621_v57  ;;  %v2322_v57 = vpack.c.bf16 %v710_v50, %v702_v49  ;;  %v716_v59 = vld [vmem:[#allocation4 + $0xf88] sm:$0xff]  ;;  %v782_v50 = vld [vmem:[#allocation4 + $0x1198] sm:$0xff] }
  0xbb   : > { %2285 = vmatpush1.bf16.msra.mxu1 %v2284_v2  ;;  %2095 = vmatprep.subr.bf16.mxu0 %v2094_v3  ;;  %v2114_v2 = vpack.c.bf16 %v644_v61, %v636_v60  ;;  %v635_v3 = vld [vmem:[#allocation4 + $0xd00] sm:$0xff]  ;;  %v724_v60 = vld [vmem:[#allocation4 + $0xfc8] sm:$0xff]  ;;  %v718_v61 = vld [vmem:[#allocation4 + $0xf98] sm:$0xff] }
  0xbc   : > { %2287 = vmatprep.subr.bf16.mxu1 %v2286_v7  ;;  %v645_v7 = vld [vmem:[#allocation4 + $0xd50] sm:$0xff]  ;;  %v2116_v12 = vpack.c.bf16 %v643_v4, %v635_v3  ;;  %v723_v3 = vld [vmem:[#allocation4 + $0xfc0] sm:$0xff]  ;;  %v788_v49 = vld [vmem:[#allocation4 + $0x11c8] sm:$0xff] }
  0xbd   : > { %v717_v4 = vld [vmem:[#allocation4 + $0xf90] sm:$0xff] }
  0xbe   : > { %2097 = vmatpush1.bf16.msra.mxu0 %v2096_v13  ;;  %v2308_v13 = vpack.c.bf16 %v645_v7, %v637_v5  ;;  %v2326_v5 = vpack.c.bf16 %v726_v62, %v718_v61  ;;  %v732_v7 = vld [vmem:[#allocation4 + $0x1008] sm:$0xff]  ;;  %v798_v61 = vld [vmem:[#allocation4 + $0x1218] sm:$0xff] }
  0xbf   : > { %2289 = vmatpush1.bf16.msra.mxu1 %v2288_v15  ;;  %2099 = vmatprep.subr.bf16.mxu0 %v2098_v17  ;;  %v651_v15 = vld [vmem:[#allocation4 + $0xd80] sm:$0xff]  ;;  %v806_v62 = vld [vmem:[#allocation4 + $0x1258] sm:$0xff] }
  0xc0   : > { %2291 = vmatprep.subr.bf16.mxu1 %v2290_v22  ;;  %v659_v17 = vld [vmem:[#allocation4 + $0xdc0] sm:$0xff]  ;;  %v661_v22 = vld [vmem:[#allocation4 + $0xdd0] sm:$0xff] }
  0xc1   : > { %v2120_v28 = vpack.c.bf16 %v659_v17, %v651_v15  ;;  %v739_v15 = vld [vmem:[#allocation4 + $0x1040] sm:$0xff]  ;;  %v733_v17 = vld [vmem:[#allocation4 + $0x1010] sm:$0xff] }
  0xc2   : > { %2101 = vmatpush1.bf16.msra.mxu0 %v2100_v29  ;;  %v2312_v29 = vpack.c.bf16 %v661_v22, %v653_v18  ;;  %v2330_v18 = vpack.c.bf16 %v742_v10, %v734_v9  ;;  %v748_v22 = vld [vmem:[#allocation4 + $0x1088] sm:$0xff]  ;;  %v814_v9 = vld [vmem:[#allocation4 + $0x1298] sm:$0xff] }
  0xc3   : > { %2293 = vmatpush1.bf16.msra.mxu1 %v2292_v30  ;;  %2103 = vmatprep.subr.bf16.mxu0 %v2102_v31  ;;  %v2122_v30 = vpack.c.bf16 %v676_v24, %v668_v23  ;;  %v667_v31 = vld [vmem:[#allocation4 + $0xe00] sm:$0xff]  ;;  %v756_v23 = vld [vmem:[#allocation4 + $0x10c8] sm:$0xff]  ;;  %v750_v24 = vld [vmem:[#allocation4 + $0x1098] sm:$0xff] }
  0xc4   : > { %2295 = vmatprep.subr.bf16.mxu1 %v2294_v35  ;;  %v677_v35 = vld [vmem:[#allocation4 + $0xe50] sm:$0xff]  ;;  %v2124_v40 = vpack.c.bf16 %v675_v32, %v667_v31  ;;  %v747_v31 = vld [vmem:[#allocation4 + $0x1080] sm:$0xff]  ;;  %v822_v10 = vld [vmem:[#allocation4 + $0x12d8] sm:$0xff] }
  0xc5   : > { %v755_v32 = vld [vmem:[#allocation4 + $0x10c0] sm:$0xff] }
  0xc6   : > { %2105 = vmatpush1.bf16.msra.mxu0 %v2104_v41  ;;  %v2316_v41 = vpack.c.bf16 %v677_v35, %v669_v33  ;;  %v749_v33 = vld [vmem:[#allocation4 + $0x1090] sm:$0xff] }
  0xc7   : > { %2297 = vmatpush1.bf16.msra.mxu1 %v2296_v42  ;;  %2107 = vmatprep.subr.bf16.mxu0 %v2106_v16  ;;  %v2126_v42 = vpack.c.bf16 %v692_v37, %v684_v36  ;;  %v683_v16 = vld [vmem:[#allocation4 + $0xe80] sm:$0xff]  ;;  %v757_v35 = vld [vmem:[#allocation4 + $0x10d0] sm:$0xff]  ;;  %v764_v36 = vld [vmem:[#allocation4 + $0x1108] sm:$0xff] }
  0xc8   : > { %2299 = vmatprep.subr.bf16.mxu1 %v2298_v46  ;;  %v693_v46 = vld [vmem:[#allocation4 + $0xed0] sm:$0xff]  ;;  %v2128_v51 = vpack.c.bf16 %v691_v43, %v683_v16  ;;  %v772_v37 = vld [vmem:[#allocation4 + $0x1148] sm:$0xff]  ;;  %v763_v43 = vld [vmem:[#allocation4 + $0x1100] sm:$0xff] }
  0xc9   : > { %v2146_v16 = vpack.c.bf16 %v772_v37, %v764_v36  ;;  %v844_v36 = vld [vmem:[#allocation4 + $0x1388] sm:$0xff] }
  0xca   : > { %2109 = vmatpush1.bf16.msra.mxu0 %v2108_v52  ;;  %v2320_v52 = vpack.c.bf16 %v693_v46, %v685_v44  ;;  %v771_v44 = vld [vmem:[#allocation4 + $0x1140] sm:$0xff]  ;;  %v852_v37 = vld [vmem:[#allocation4 + $0x13c8] sm:$0xff] }
  0xcb   : > { %2301 = vmatpush1.bf16.msra.mxu1 %v2300_v53  ;;  %2111 = vmatprep.subr.bf16.mxu0 %v2110_v54  ;;  %v2130_v53 = vpack.c.bf16 %v708_v48, %v700_v47  ;;  %v699_v54 = vld [vmem:[#allocation4 + $0xf00] sm:$0xff]  ;;  %v773_v47 = vld [vmem:[#allocation4 + $0x1150] sm:$0xff]  ;;  %v780_v48 = vld [vmem:[#allocation4 + $0x1188] sm:$0xff] }
  0xcc   : > { %2303 = vmatprep.subr.bf16.mxu1 %v2302_v58  ;;  %v709_v58 = vld [vmem:[#allocation4 + $0xf50] sm:$0xff]  ;;  %v2132_v63 = vpack.c.bf16 %v707_v55, %v699_v54  ;;  %v779_v54 = vld [vmem:[#allocation4 + $0x1180] sm:$0xff] }
  0xcd   : > { %v787_v55 = vld [vmem:[#allocation4 + $0x11c0] sm:$0xff] }
  0xce   : > { %2113 = vmatpush1.bf16.msra.mxu0 %v2112_v0  ;;  %v2324_v0 = vpack.c.bf16 %v709_v58, %v701_v56  ;;  %v781_v56 = vld [vmem:[#allocation4 + $0x1190] sm:$0xff] }
  0xcf   : > { %2305 = vmatpush1.bf16.msra.mxu1 %v2304_v1  ;;  %2115 = vmatprep.subr.bf16.mxu0 %v2114_v2  ;;  %v2134_v1 = vpack.c.bf16 %v724_v60, %v716_v59  ;;  %v715_v2 = vld [vmem:[#allocation4 + $0xf80] sm:$0xff]  ;;  %v789_v58 = vld [vmem:[#allocation4 + $0x11d0] sm:$0xff]  ;;  %v796_v59 = vld [vmem:[#allocation4 + $0x1208] sm:$0xff] }
  0xd0   : > { %2307 = vmatprep.subr.bf16.mxu1 %v2306_v6  ;;  %v725_v6 = vld [vmem:[#allocation4 + $0xfd0] sm:$0xff]  ;;  %v2136_v11 = vpack.c.bf16 %v723_v3, %v715_v2  ;;  %v804_v60 = vld [vmem:[#allocation4 + $0x1248] sm:$0xff]  ;;  %v795_v2 = vld [vmem:[#allocation4 + $0x1200] sm:$0xff] }
  0xd1   : > { %v803_v3 = vld [vmem:[#allocation4 + $0x1240] sm:$0xff] }
  0xd2   : > { %2117 = vmatpush1.bf16.msra.mxu0 %v2116_v12  ;;  %v2328_v12 = vpack.c.bf16 %v725_v6, %v717_v4  ;;  %v797_v4 = vld [vmem:[#allocation4 + $0x1210] sm:$0xff] }
  0xd3   : > { %2309 = vmatpush1.bf16.msra.mxu1 %v2308_v13  ;;  %2119 = vmatprep.subr.bf16.mxu0 %v2118_v14  ;;  %v2138_v13 = vpack.c.bf16 %v740_v8, %v732_v7  ;;  %v731_v14 = vld [vmem:[#allocation4 + $0x1000] sm:$0xff]  ;;  %v805_v6 = vld [vmem:[#allocation4 + $0x1250] sm:$0xff]  ;;  %v812_v7 = vld [vmem:[#allocation4 + $0x1288] sm:$0xff] }
  0xd4   : > { %2311 = vmatprep.subr.bf16.mxu1 %v2310_v20  ;;  %v741_v20 = vld [vmem:[#allocation4 + $0x1050] sm:$0xff]  ;;  %v2140_v27 = vpack.c.bf16 %v739_v15, %v731_v14  ;;  %v820_v8 = vld [vmem:[#allocation4 + $0x12c8] sm:$0xff]  ;;  %v811_v14 = vld [vmem:[#allocation4 + $0x1280] sm:$0xff] }
  0xd5   : > { %v819_v15 = vld [vmem:[#allocation4 + $0x12c0] sm:$0xff] }
  0xd6   : > { %2121 = vmatpush1.bf16.msra.mxu0 %v2120_v28  ;;  %v3201_v28 = vld [vmem:[%s3170_s23 + $0x10] sm:$0xff] }
  0xd7   : > { %2313 = vmatpush1.bf16.msra.mxu1 %v2312_v29  ;;  %2123 = vmatprep.subr.bf16.mxu0 %v2122_v30  ;;  %v2332_v29 = vpack.c.bf16 %v741_v20, %v733_v17  ;;  %v2142_v30 = vpack.c.bf16 %v756_v23, %v748_v22  ;;  %v3205_v38 = vcombine.high %v3201_v28, %v3201_v28  ;;  %v813_v17 = vld [vmem:[#allocation4 + $0x1290] sm:$0xff]  ;;  %v828_v22 = vld [vmem:[#allocation4 + $0x1308] sm:$0xff] }
  0xd8   : > { %2315 = vmatprep.subr.bf16.mxu1 %v2314_v34  ;;  %v2334_v34 = vpack.c.bf16 %v758_v25, %v750_v24  ;;  %v821_v20 = vld [vmem:[#allocation4 + $0x12d0] sm:$0xff]  ;;  %v836_v23 = vld [vmem:[#allocation4 + $0x1348] sm:$0xff]  ;;  %v830_v24 = vld [vmem:[#allocation4 + $0x1318] sm:$0xff] }
  0xd9   : > { %v838_v25 = vld [vmem:[#allocation4 + $0x1358] sm:$0xff] }
  0xda   : > { %2125 = vmatpush1.bf16.msra.mxu0 %v2124_v40  ;;  %v774_v40 = vld [vmem:[#allocation4 + $0x1158] sm:$0xff] }
  0xdb   : > { %2317 = vmatpush1.bf16.msra.mxu1 %v2316_v41  ;;  %2127 = vmatprep.subr.bf16.mxu0 %v2126_v42  ;;  %v2144_v41 = vpack.c.bf16 %v755_v32, %v747_v31  ;;  %v2336_v42 = vpack.c.bf16 %v757_v35, %v749_v33  ;;  %v2338_v46 = vpack.c.bf16 %v774_v40, %v766_v39  ;;  %v827_v31 = vld [vmem:[#allocation4 + $0x1300] sm:$0xff]  ;;  %v829_v33 = vld [vmem:[#allocation4 + $0x1310] sm:$0xff]  ;;  %v846_v39 = vld [vmem:[#allocation4 + $0x1398] sm:$0xff] }
  0xdc   : > { %2319 = vmatprep.subr.bf16.mxu1 %v2318_v45  ;;  %v765_v45 = vld [vmem:[#allocation4 + $0x1110] sm:$0xff]  ;;  %v835_v32 = vld [vmem:[#allocation4 + $0x1340] sm:$0xff]  ;;  %v854_v40 = vld [vmem:[#allocation4 + $0x13d8] sm:$0xff] }
  0xdd   : > { %v837_v35 = vld [vmem:[#allocation4 + $0x1350] sm:$0xff] }
  0xde   : > { %2129 = vmatpush1.bf16.msra.mxu0 %v2128_v51  ;;  %v790_v51 = vld [vmem:[#allocation4 + $0x11d8] sm:$0xff] }
  0xdf   : > { %2321 = vmatpush1.bf16.msra.mxu1 %v2320_v52  ;;  %2131 = vmatprep.subr.bf16.mxu0 %v2130_v53  ;;  %v2340_v52 = vpack.c.bf16 %v773_v47, %v765_v45  ;;  %v2150_v53 = vpack.c.bf16 %v788_v49, %v780_v48  ;;  %v845_v45 = vld [vmem:[#allocation4 + $0x1390] sm:$0xff]  ;;  %v860_v48 = vld [vmem:[#allocation4 + $0x1408] sm:$0xff] }
  0xe0   : > { %2323 = vmatprep.subr.bf16.mxu1 %v2322_v57  ;;  %v2342_v57 = vpack.c.bf16 %v790_v51, %v782_v50  ;;  %v853_v47 = vld [vmem:[#allocation4 + $0x13d0] sm:$0xff]  ;;  %v868_v49 = vld [vmem:[#allocation4 + $0x1448] sm:$0xff]  ;;  %v862_v50 = vld [vmem:[#allocation4 + $0x1418] sm:$0xff] }
  0xe1   : > { %v870_v51 = vld [vmem:[#allocation4 + $0x1458] sm:$0xff] }
  0xe2   : > { %2133 = vmatpush1.bf16.msra.mxu0 %v2132_v63  ;;  %v2152_v63 = vpack.c.bf16 %v787_v55, %v779_v54  ;;  %v859_v54 = vld [vmem:[#allocation4 + $0x1400] sm:$0xff] }
  0xe3   : > { %2325 = vmatpush1.bf16.msra.mxu1 %v2324_v0  ;;  %2135 = vmatprep.subr.bf16.mxu0 %v2134_v1  ;;  %v2344_v0 = vpack.c.bf16 %v789_v58, %v781_v56  ;;  %v2154_v1 = vpack.c.bf16 %v804_v60, %v796_v59  ;;  %v867_v55 = vld [vmem:[#allocation4 + $0x1440] sm:$0xff]  ;;  %v861_v56 = vld [vmem:[#allocation4 + $0x1410] sm:$0xff]  ;;  %v876_v59 = vld [vmem:[#allocation4 + $0x1488] sm:$0xff] }
  0xe4   : > { %2327 = vmatprep.subr.bf16.mxu1 %v2326_v5  ;;  %v2346_v5 = vpack.c.bf16 %v806_v62, %v798_v61  ;;  %v869_v58 = vld [vmem:[#allocation4 + $0x1450] sm:$0xff]  ;;  %v884_v60 = vld [vmem:[#allocation4 + $0x14c8] sm:$0xff]  ;;  %v878_v61 = vld [vmem:[#allocation4 + $0x1498] sm:$0xff] }
  0xe5   : > { %v886_v62 = vld [vmem:[#allocation4 + $0x14d8] sm:$0xff] }
  0xe6   : > { %2137 = vmatpush1.bf16.msra.mxu0 %v2136_v11  ;;  %v2156_v11 = vpack.c.bf16 %v803_v3, %v795_v2  ;;  %v875_v2 = vld [vmem:[#allocation4 + $0x1480] sm:$0xff] }
  0xe7   : > { %2329 = vmatpush1.bf16.msra.mxu1 %v2328_v12  ;;  %2139 = vmatprep.subr.bf16.mxu0 %v2138_v13  ;;  %v2348_v12 = vpack.c.bf16 %v805_v6, %v797_v4  ;;  %v2158_v13 = vpack.c.bf16 %v820_v8, %v812_v7  ;;  %v883_v3 = vld [vmem:[#allocation4 + $0x14c0] sm:$0xff]  ;;  %v877_v4 = vld [vmem:[#allocation4 + $0x1490] sm:$0xff]  ;;  %v892_v7 = vld [vmem:[#allocation4 + $0x1508] sm:$0xff] }
  0xe8   : > { %2331 = vmatprep.subr.bf16.mxu1 %v2330_v18  ;;  %v2350_v18 = vpack.c.bf16 %v822_v10, %v814_v9  ;;  %v885_v6 = vld [vmem:[#allocation4 + $0x14d0] sm:$0xff]  ;;  %v900_v8 = vld [vmem:[#allocation4 + $0x1548] sm:$0xff]  ;;  %v894_v9 = vld [vmem:[#allocation4 + $0x1518] sm:$0xff] }
  0xe9   : > { %1174 = vmatmul.mubr.f32.vlgmr.msra.gmra.mrb[0].mxu0 %v3192_v21  ;;  %v902_v10 = vld [vmem:[#allocation4 + $0x1558] sm:$0xff] }
  0xea   : > { %2141 = vmatpush1.bf16.msra.mxu0 %v2140_v27  ;;  %1387 = vmatmul.mubr.f32.vlgmr.msra.gmra.mrb[0].mxu1 %v3192_v21  ;;  %v2148_v21 = vpack.c.bf16 %v771_v44, %v763_v43  ;;  %v2160_v27 = vpack.c.bf16 %v819_v15, %v811_v14  ;;  %v843_v43 = vld [vmem:[#allocation4 + $0x1380] sm:$0xff] }
  0xeb   : > { %2333 = vmatpush1.bf16.msra.mxu1 %v2332_v29  ;;  %2143 = vmatprep.subr.bf16.mxu0 %v2142_v30  ;;  %v2352_v29 = vpack.c.bf16 %v821_v20, %v813_v17  ;;  %v2162_v30 = vpack.c.bf16 %v836_v23, %v828_v22  ;;  %v851_v44 = vld [vmem:[#allocation4 + $0x13c0] sm:$0xff]  ;;  %v893_v17 = vld [vmem:[#allocation4 + $0x1510] sm:$0xff]  ;;  %v908_v22 = vld [vmem:[#allocation4 + $0x1588] sm:$0xff] }
  0xec   : > { %2335 = vmatprep.subr.bf16.mxu1 %v2334_v34  ;;  %1244 = vmatprep.mubr.f32.mxu0 %v3205_v38  ;;  %v2354_v34 = vpack.c.bf16 %v838_v25, %v830_v24  ;;  %v891_v14 = vld [vmem:[#allocation4 + $0x1500] sm:$0xff]  ;;  %v901_v20 = vld [vmem:[#allocation4 + $0x1550] sm:$0xff]  ;;  %v916_v23 = vld [vmem:[#allocation4 + $0x15c8] sm:$0xff] }
  0xed   : > { %1457 = vmatprep.mubr.f32.mxu1 %v3205_v38  ;;  %v899_v15 = vld [vmem:[#allocation4 + $0x1540] sm:$0xff]  ;;  %v910_v24 = vld [vmem:[#allocation4 + $0x1598] sm:$0xff] }
  0xee   : > { %2145 = vmatpush1.bf16.msra.mxu0 %v2144_v41  ;;  %v2164_v41 = vpack.c.bf16 %v835_v32, %v827_v31  ;;  %v918_v25 = vld [vmem:[#allocation4 + $0x15d8] sm:$0xff]  ;;  %v907_v31 = vld [vmem:[#allocation4 + $0x1580] sm:$0xff] }
  0xef   : > { %2337 = vmatpush1.bf16.msra.mxu1 %v2336_v42  ;;  %2147 = vmatprep.subr.bf16.mxu0 %v2146_v16  ;;  %v2356_v42 = vpack.c.bf16 %v837_v35, %v829_v33  ;;  %v2166_v16 = vpack.c.bf16 %v852_v37, %v844_v36  ;;  %v915_v32 = vld [vmem:[#allocation4 + $0x15c0] sm:$0xff]  ;;  %v909_v33 = vld [vmem:[#allocation4 + $0x1590] sm:$0xff]  ;;  %v924_v36 = vld [vmem:[#allocation4 + $0x1608] sm:$0xff] }
  0xf0   : > { %2339 = vmatprep.subr.bf16.mxu1 %v2338_v46  ;;  %v2358_v46 = vpack.c.bf16 %v854_v40, %v846_v39  ;;  %v917_v35 = vld [vmem:[#allocation4 + $0x15d0] sm:$0xff]  ;;  %v932_v37 = vld [vmem:[#allocation4 + $0x1648] sm:$0xff]  ;;  %v926_v39 = vld [vmem:[#allocation4 + $0x1618] sm:$0xff] }
  0xf1   : > { %v934_v40 = vld [vmem:[#allocation4 + $0x1658] sm:$0xff] }
  0xf2   : > { %2149 = vmatpush1.bf16.msra.mxu0 %v2148_v21  ;;  %v2168_v21 = vpack.c.bf16 %v851_v44, %v843_v43  ;;  %v923_v43 = vld [vmem:[#allocation4 + $0x1600] sm:$0xff] }
  0xf3   : > { %2341 = vmatpush1.bf16.msra.mxu1 %v2340_v52  ;;  %2151 = vmatprep.subr.bf16.mxu0 %v2150_v53  ;;  %v2360_v52 = vpack.c.bf16 %v853_v47, %v845_v45  ;;  %v2170_v53 = vpack.c.bf16 %v868_v49, %v860_v48  ;;  %v931_v44 = vld [vmem:[#allocation4 + $0x1640] sm:$0xff]  ;;  %v925_v45 = vld [vmem:[#allocation4 + $0x1610] sm:$0xff]  ;;  %v940_v48 = vld [vmem:[#allocation4 + $0x1688] sm:$0xff] }
  0xf4   : > { %2343 = vmatprep.subr.bf16.mxu1 %v2342_v57  ;;  %v2362_v57 = vpack.c.bf16 %v870_v51, %v862_v50  ;;  %v933_v47 = vld [vmem:[#allocation4 + $0x1650] sm:$0xff]  ;;  %v948_v49 = vld [vmem:[#allocation4 + $0x16c8] sm:$0xff]  ;;  %v942_v50 = vld [vmem:[#allocation4 + $0x1698] sm:$0xff] }
  0xf5   : > { %v950_v51 = vld [vmem:[#allocation4 + $0x16d8] sm:$0xff] }
  0xf6   : > { %2153 = vmatpush1.bf16.msra.mxu0 %v2152_v63  ;;  %v2172_v63 = vpack.c.bf16 %v867_v55, %v859_v54  ;;  %v939_v54 = vld [vmem:[#allocation4 + $0x1680] sm:$0xff] }
  0xf7   : > { %2345 = vmatpush1.bf16.msra.mxu1 %v2344_v0  ;;  %2155 = vmatprep.subr.bf16.mxu0 %v2154_v1  ;;  %v2364_v0 = vpack.c.bf16 %v869_v58, %v861_v56  ;;  %v2174_v1 = vpack.c.bf16 %v884_v60, %v876_v59  ;;  %v947_v55 = vld [vmem:[#allocation4 + $0x16c0] sm:$0xff]  ;;  %v941_v56 = vld [vmem:[#allocation4 + $0x1690] sm:$0xff]  ;;  %v956_v59 = vld [vmem:[#allocation4 + $0x1708] sm:$0xff] }
  0xf8   : > { %2347 = vmatprep.subr.bf16.mxu1 %v2346_v5  ;;  %v2366_v5 = vpack.c.bf16 %v886_v62, %v878_v61  ;;  %v949_v58 = vld [vmem:[#allocation4 + $0x16d0] sm:$0xff]  ;;  %v964_v60 = vld [vmem:[#allocation4 + $0x1748] sm:$0xff]  ;;  %v958_v61 = vld [vmem:[#allocation4 + $0x1718] sm:$0xff] }
  0xf9   : > { %v966_v62 = vld [vmem:[#allocation4 + $0x1758] sm:$0xff] }
  0xfa   : > { %2157 = vmatpush1.bf16.msra.mxu0 %v2156_v11  ;;  %v2176_v11 = vpack.c.bf16 %v883_v3, %v875_v2  ;;  %v955_v2 = vld [vmem:[#allocation4 + $0x1700] sm:$0xff] }
  0xfb   : > { %2349 = vmatpush1.bf16.msra.mxu1 %v2348_v12  ;;  %2159 = vmatprep.subr.bf16.mxu0 %v2158_v13  ;;  %v2368_v12 = vpack.c.bf16 %v885_v6, %v877_v4  ;;  %v2178_v13 = vpack.c.bf16 %v900_v8, %v892_v7  ;;  %v963_v3 = vld [vmem:[#allocation4 + $0x1740] sm:$0xff]  ;;  %v957_v4 = vld [vmem:[#allocation4 + $0x1710] sm:$0xff]  ;;  %v972_v7 = vld [vmem:[#allocation4 + $0x1788] sm:$0xff] }
  0xfc   : > { %2351 = vmatprep.subr.bf16.mxu1 %v2350_v18  ;;  %v2370_v18 = vpack.c.bf16 %v902_v10, %v894_v9  ;;  %v965_v6 = vld [vmem:[#allocation4 + $0x1750] sm:$0xff]  ;;  %v980_v8 = vld [vmem:[#allocation4 + $0x17c8] sm:$0xff]  ;;  %v974_v9 = vld [vmem:[#allocation4 + $0x1798] sm:$0xff] }
  0xfd   : > { %v982_v10 = vld [vmem:[#allocation4 + $0x17d8] sm:$0xff] }
  0xfe   : > { %2161 = vmatpush1.bf16.msra.mxu0 %v2160_v27  ;;  %v2180_v27 = vpack.c.bf16 %v899_v15, %v891_v14  ;;  %v971_v14 = vld [vmem:[#allocation4 + $0x1780] sm:$0xff] }
  0xff   : > { %2353 = vmatpush1.bf16.msra.mxu1 %v2352_v29  ;;  %2163 = vmatprep.subr.bf16.mxu0 %v2162_v30  ;;  %v2372_v29 = vpack.c.bf16 %v901_v20, %v893_v17  ;;  %v2182_v30 = vpack.c.bf16 %v916_v23, %v908_v22  ;;  %v979_v15 = vld [vmem:[#allocation4 + $0x17c0] sm:$0xff]  ;;  %v973_v17 = vld [vmem:[#allocation4 + $0x1790] sm:$0xff]  ;;  %v224_v22 = vld [vmem:[#allocation4 + $0x28] sm:$0xff] }
 0x100   : > { %2355 = vmatprep.subr.bf16.mxu1 %v2354_v34  ;;  %v2374_v34 = vpack.c.bf16 %v918_v25, %v910_v24  ;;  %v981_v20 = vld [vmem:[#allocation4 + $0x17d0] sm:$0xff]  ;;  %v232_v23 = vld [vmem:[#allocation4 + $0x68] sm:$0xff]  ;;  %v226_v24 = vld [vmem:[#allocation4 + $0x38] sm:$0xff] }
 0x101   : > { %v234_v25 = vld [vmem:[#allocation4 + $0x78] sm:$0xff] }
 0x102   : > { %2165 = vmatpush1.bf16.msra.mxu0 %v2164_v41  ;;  %v2184_v41 = vpack.c.bf16 %v915_v32, %v907_v31  ;;  %v223_v31 = vld [vmem:[#allocation4 + $0x20] sm:$0xff] }
 0x103   : > { %2357 = vmatpush1.bf16.msra.mxu1 %v2356_v42  ;;  %2167 = vmatprep.subr.bf16.mxu0 %v2166_v16  ;;  %v2376_v42 = vpack.c.bf16 %v917_v35, %v909_v33  ;;  %v2186_v16 = vpack.c.bf16 %v932_v37, %v924_v36  ;;  %v231_v32 = vld [vmem:[#allocation4 + $0x60] sm:$0xff]  ;;  %v225_v33 = vld [vmem:[#allocation4 + $0x30] sm:$0xff]  ;;  %v240_v36 = vld [vmem:[#allocation4 + $0xa8] sm:$0xff] }
 0x104   : > { %2359 = vmatprep.subr.bf16.mxu1 %v2358_v46  ;;  %v2378_v46 = vpack.c.bf16 %v934_v40, %v926_v39  ;;  %v233_v35 = vld [vmem:[#allocation4 + $0x70] sm:$0xff]  ;;  %v248_v37 = vld [vmem:[#allocation4 + $0xe8] sm:$0xff]  ;;  %v242_v39 = vld [vmem:[#allocation4 + $0xb8] sm:$0xff] }
 0x105   : > { %v250_v40 = vld [vmem:[#allocation4 + $0xf8] sm:$0xff] }
 0x106   : > { %2169 = vmatpush1.bf16.msra.mxu0 %v2168_v21  ;;  %v2188_v21 = vpack.c.bf16 %v931_v44, %v923_v43  ;;  %v239_v43 = vld [vmem:[#allocation4 + $0xa0] sm:$0xff] }
 0x107   : > { %2361 = vmatpush1.bf16.msra.mxu1 %v2360_v52  ;;  %2171 = vmatprep.subr.bf16.mxu0 %v2170_v53  ;;  %v2380_v52 = vpack.c.bf16 %v933_v47, %v925_v45  ;;  %v2190_v53 = vpack.c.bf16 %v948_v49, %v940_v48  ;;  %v247_v44 = vld [vmem:[#allocation4 + $0xe0] sm:$0xff]  ;;  %v241_v45 = vld [vmem:[#allocation4 + $0xb0] sm:$0xff]  ;;  %v256_v48 = vld [vmem:[#allocation4 + $0x128] sm:$0xff] }
 0x108   : > { %2363 = vmatprep.subr.bf16.mxu1 %v2362_v57  ;;  %v2382_v57 = vpack.c.bf16 %v950_v51, %v942_v50  ;;  %v249_v47 = vld [vmem:[#allocation4 + $0xf0] sm:$0xff]  ;;  %v264_v49 = vld [vmem:[#allocation4 + $0x168] sm:$0xff]  ;;  %v258_v50 = vld [vmem:[#allocation4 + $0x138] sm:$0xff] }
 0x109   : > { %v266_v51 = vld [vmem:[#allocation4 + $0x178] sm:$0xff] }
 0x10a   : > { %2173 = vmatpush1.bf16.msra.mxu0 %v2172_v63  ;;  %v2192_v63 = vpack.c.bf16 %v947_v55, %v939_v54  ;;  %v255_v54 = vld [vmem:[#allocation4 + $0x120] sm:$0xff] }
 0x10b   : > { %2365 = vmatpush1.bf16.msra.mxu1 %v2364_v0  ;;  %2175 = vmatprep.subr.bf16.mxu0 %v2174_v1  ;;  %v2384_v0 = vpack.c.bf16 %v949_v58, %v941_v56  ;;  %v2194_v1 = vpack.c.bf16 %v964_v60, %v956_v59  ;;  %v263_v55 = vld [vmem:[#allocation4 + $0x160] sm:$0xff]  ;;  %v257_v56 = vld [vmem:[#allocation4 + $0x130] sm:$0xff]  ;;  %v272_v59 = vld [vmem:[#allocation4 + $0x1a8] sm:$0xff] }
 0x10c   : > { %2367 = vmatprep.subr.bf16.mxu1 %v2366_v5  ;;  %v2386_v5 = vpack.c.bf16 %v966_v62, %v958_v61  ;;  %v265_v58 = vld [vmem:[#allocation4 + $0x170] sm:$0xff]  ;;  %v280_v60 = vld [vmem:[#allocation4 + $0x1e8] sm:$0xff]  ;;  %v274_v61 = vld [vmem:[#allocation4 + $0x1b8] sm:$0xff] }
 0x10d   : > { %v282_v62 = vld [vmem:[#allocation4 + $0x1f8] sm:$0xff] }
 0x10e   : > { %2177 = vmatpush1.bf16.msra.mxu0 %v2176_v11  ;;  %v2196_v11 = vpack.c.bf16 %v963_v3, %v955_v2  ;;  %v279_v2 = vld [vmem:[#allocation4 + $0x1e0] sm:$0xff]  ;;  %v273_v3 = vld [vmem:[#allocation4 + $0x1b0] sm:$0xff] }
 0x10f   : > { %2369 = vmatpush1.bf16.msra.mxu1 %v2368_v12  ;;  %2179 = vmatprep.subr.bf16.mxu0 %v2178_v13  ;;  %v2388_v12 = vpack.c.bf16 %v965_v6, %v957_v4  ;;  %v2198_v13 = vpack.c.bf16 %v980_v8, %v972_v7  ;;  %v2598_v4 = vpack.c.bf16 %v282_v62, %v274_v61  ;;  %v288_v6 = vld [vmem:[#allocation4 + $0x228] sm:$0xff]  ;;  %v290_v8 = vld [vmem:[#allocation4 + $0x238] sm:$0xff] }
 0x110   : > { %2371 = vmatprep.subr.bf16.mxu1 %v2370_v18  ;;  %v2390_v18 = vpack.c.bf16 %v982_v10, %v974_v9  ;;  %v296_v7 = vld [vmem:[#allocation4 + $0x268] sm:$0xff]  ;;  %v298_v9 = vld [vmem:[#allocation4 + $0x278] sm:$0xff] }
 0x112   : > { %2181 = vmatpush1.bf16.msra.mxu0 %v2180_v27  ;;  %v2200_v27 = vpack.c.bf16 %v979_v15, %v971_v14  ;;  %v289_v14 = vld [vmem:[#allocation4 + $0x230] sm:$0xff]  ;;  %v2602_v15 = vpack.c.bf16 %v298_v9, %v290_v8 }
 0x113   : > { %2373 = vmatpush1.bf16.msra.mxu1 %v2372_v29  ;;  %2183 = vmatprep.subr.bf16.mxu0 %v2182_v30  ;;  %v2392_v29 = vpack.c.bf16 %v981_v20, %v973_v17  ;;  %v2394_v30 = vpack.c.bf16 %v232_v23, %v224_v22  ;;  %v297_v17 = vld [vmem:[#allocation4 + $0x270] sm:$0xff]  ;;  %v312_v20 = vld [vmem:[#allocation4 + $0x2e8] sm:$0xff]  ;;  %v306_v22 = vld [vmem:[#allocation4 + $0x2b8] sm:$0xff] }
 0x114   : > { %2375 = vmatprep.subr.bf16.mxu1 %v2374_v34  ;;  %v2586_v34 = vpack.c.bf16 %v234_v25, %v226_v24  ;;  %v314_v23 = vld [vmem:[#allocation4 + $0x2f8] sm:$0xff]  ;;  %v2604_v25 = vpack.c.bf16 %v297_v17, %v289_v14  ;;  %v377_v14 = vld [vmem:[#allocation4 + $0x4f0] sm:$0xff]  ;;  %v392_v17 = vld [vmem:[#allocation4 + $0x568] sm:$0xff] }
 0x116   : > { %2185 = vmatpush1.bf16.msra.mxu0 %v2184_v41  ;;  %v2396_v41 = vpack.c.bf16 %v231_v32, %v223_v31  ;;  %v305_v31 = vld [vmem:[#allocation4 + $0x2b0] sm:$0xff]  ;;  %v2606_v32 = vpack.c.bf16 %v314_v23, %v306_v22 }
 0x117   : > { %2377 = vmatpush1.bf16.msra.mxu1 %v2376_v42  ;;  %2187 = vmatprep.subr.bf16.mxu0 %v2186_v16  ;;  %v2588_v42 = vpack.c.bf16 %v233_v35, %v225_v33  ;;  %v2398_v16 = vpack.c.bf16 %v248_v37, %v240_v36  ;;  %v313_v33 = vld [vmem:[#allocation4 + $0x2f0] sm:$0xff]  ;;  %v328_v35 = vld [vmem:[#allocation4 + $0x368] sm:$0xff]  ;;  %v322_v36 = vld [vmem:[#allocation4 + $0x338] sm:$0xff] }
 0x118   : > { %2379 = vmatprep.subr.bf16.mxu1 %v2378_v46  ;;  %v2590_v46 = vpack.c.bf16 %v250_v40, %v242_v39  ;;  %v330_v37 = vld [vmem:[#allocation4 + $0x378] sm:$0xff]  ;;  %v2608_v40 = vpack.c.bf16 %v313_v33, %v305_v31  ;;  %v393_v31 = vld [vmem:[#allocation4 + $0x570] sm:$0xff]  ;;  %v408_v33 = vld [vmem:[#allocation4 + $0x5e8] sm:$0xff] }
 0x11a   : > { %2189 = vmatpush1.bf16.msra.mxu0 %v2188_v21  ;;  %v2400_v21 = vpack.c.bf16 %v247_v44, %v239_v43  ;;  %v321_v43 = vld [vmem:[#allocation4 + $0x330] sm:$0xff]  ;;  %v2610_v44 = vpack.c.bf16 %v330_v37, %v322_v36 }
 0x11b   : > { %2381 = vmatpush1.bf16.msra.mxu1 %v2380_v52  ;;  %2191 = vmatprep.subr.bf16.mxu0 %v2190_v53  ;;  %v2592_v52 = vpack.c.bf16 %v249_v47, %v241_v45  ;;  %v2402_v53 = vpack.c.bf16 %v264_v49, %v256_v48  ;;  %v329_v45 = vld [vmem:[#allocation4 + $0x370] sm:$0xff]  ;;  %v344_v47 = vld [vmem:[#allocation4 + $0x3e8] sm:$0xff]  ;;  %v338_v48 = vld [vmem:[#allocation4 + $0x3b8] sm:$0xff] }
 0x11c   : > { %2383 = vmatprep.subr.bf16.mxu1 %v2382_v57  ;;  %v2594_v57 = vpack.c.bf16 %v266_v51, %v258_v50  ;;  %v346_v49 = vld [vmem:[#allocation4 + $0x3f8] sm:$0xff]  ;;  %v2612_v51 = vpack.c.bf16 %v329_v45, %v321_v43  ;;  %v409_v43 = vld [vmem:[#allocation4 + $0x5f0] sm:$0xff]  ;;  %v424_v45 = vld [vmem:[#allocation4 + $0x668] sm:$0xff] }
 0x11e   : > { %2193 = vmatpush1.bf16.msra.mxu0 %v2192_v63  ;;  %v2596_v63 = vpack.c.bf16 %v265_v58, %v257_v56  ;;  %v345_v56 = vld [vmem:[#allocation4 + $0x3f0] sm:$0xff]  ;;  %v360_v58 = vld [vmem:[#allocation4 + $0x468] sm:$0xff] }
 0x11f   : > { %2385 = vmatpush1.bf16.msra.mxu1 %v2384_v0  ;;  %2195 = vmatprep.subr.bf16.mxu0 %v2194_v1  ;;  %v2406_v0 = vpack.c.bf16 %v280_v60, %v272_v59  ;;  %v271_v1 = vld [vmem:[#allocation4 + $0x1a0] sm:$0xff]  ;;  %v354_v59 = vld [vmem:[#allocation4 + $0x438] sm:$0xff] }
 0x120   : > { %2387 = vmatprep.subr.bf16.mxu1 %v2386_v5  ;;  %v281_v5 = vld [vmem:[#allocation4 + $0x1f0] sm:$0xff]  ;;  %v2408_v10 = vpack.c.bf16 %v279_v2, %v271_v1  ;;  %v362_v60 = vld [vmem:[#allocation4 + $0x478] sm:$0xff] }
 0x121   : > { %v353_v1 = vld [vmem:[#allocation4 + $0x430] sm:$0xff]  ;;  %v2618_v2 = vpack.c.bf16 %v362_v60, %v354_v59 }
 0x122   : > { %2197 = vmatpush1.bf16.msra.mxu0 %v2196_v11  ;;  %v2410_v11 = vpack.c.bf16 %v296_v7, %v288_v6  ;;  %v370_v6 = vld [vmem:[#allocation4 + $0x4b8] sm:$0xff] }
 0x123   : > { %2389 = vmatpush1.bf16.msra.mxu1 %v2388_v12  ;;  %2199 = vmatprep.subr.bf16.mxu0 %v2198_v13  ;;  %v287_v12 = vld [vmem:[#allocation4 + $0x220] sm:$0xff]  ;;  %v378_v7 = vld [vmem:[#allocation4 + $0x4f8] sm:$0xff] }
 0x124   : > { %2391 = vmatprep.subr.bf16.mxu1 %v2390_v18  ;;  %v295_v13 = vld [vmem:[#allocation4 + $0x260] sm:$0xff]  ;;  %v304_v18 = vld [vmem:[#allocation4 + $0x2a8] sm:$0xff] }
 0x125   : > { %v2412_v24 = vpack.c.bf16 %v295_v13, %v287_v12  ;;  %v369_v12 = vld [vmem:[#allocation4 + $0x4b0] sm:$0xff]  ;;  %v2622_v13 = vpack.c.bf16 %v378_v7, %v370_v6 }
 0x126   : > { %2201 = vmatpush1.bf16.msra.mxu0 %v2200_v27  ;;  %v2414_v27 = vpack.c.bf16 %v312_v20, %v304_v18  ;;  %v386_v18 = vld [vmem:[#allocation4 + $0x538] sm:$0xff]  ;;  %v2624_v23 = vpack.c.bf16 %v377_v14, %v369_v12  ;;  %v457_v12 = vld [vmem:[#allocation4 + $0x770] sm:$0xff]  ;;  %v472_v14 = vld [vmem:[#allocation4 + $0x7e8] sm:$0xff] }
 0x127   : > { %2393 = vmatpush1.bf16.msra.mxu1 %v2392_v29  ;;  %2395 = vmatprep.subr.bf16.mxu0 %v2394_v30  ;;  %v303_v29 = vld [vmem:[#allocation4 + $0x2a0] sm:$0xff]  ;;  %v394_v20 = vld [vmem:[#allocation4 + $0x578] sm:$0xff] }
 0x128   : > { %2587 = vmatprep.subr.bf16.mxu1 %v2586_v34  ;;  %v311_v30 = vld [vmem:[#allocation4 + $0x2e0] sm:$0xff]  ;;  %v320_v34 = vld [vmem:[#allocation4 + $0x328] sm:$0xff] }
 0x129   : > { %1245 = vmatmul.mubr.f32.vlgmr.msra.gmra.mrb[0].mxu0 %v3201_v28  ;;  %v2416_v39 = vpack.c.bf16 %v311_v30, %v303_v29  ;;  %v385_v29 = vld [vmem:[#allocation4 + $0x530] sm:$0xff]  ;;  %v2626_v30 = vpack.c.bf16 %v394_v20, %v386_v18 }
 0x12a   : > { %1458 = vmatmul.mubr.f32.vlgmr.msra.gmra.mrb[0].mxu1 %v3201_v28  ;;  %2397 = vmatpush1.bf16.msra.mxu0 %v2396_v41  ;;  %v2404_v28 = vpack.c.bf16 %v263_v55, %v255_v54  ;;  %v2418_v41 = vpack.c.bf16 %v328_v35, %v320_v34  ;;  %v337_v54 = vld [vmem:[#allocation4 + $0x3b0] sm:$0xff]  ;;  %v2614_v55 = vpack.c.bf16 %v346_v49, %v338_v48  ;;  %v402_v34 = vld [vmem:[#allocation4 + $0x5b8] sm:$0xff] }
 0x12b   : > { %2589 = vmatpush1.bf16.msra.mxu1 %v2588_v42  ;;  %2399 = vmatprep.subr.bf16.mxu0 %v2398_v16  ;;  %v319_v42 = vld [vmem:[#allocation4 + $0x320] sm:$0xff]  ;;  %v2616_v62 = vpack.c.bf16 %v345_v56, %v337_v54  ;;  %v410_v35 = vld [vmem:[#allocation4 + $0x5f8] sm:$0xff]  ;;  %v2628_v37 = vpack.c.bf16 %v393_v31, %v385_v29  ;;  %v425_v54 = vld [vmem:[#allocation4 + $0x670] sm:$0xff] }
 0x12c   : > { %2591 = vmatprep.subr.bf16.mxu1 %v2590_v46  ;;  %1528 = vmatprep.mubr.f32.mxu0 %v3185_v19  ;;  %v327_v16 = vld [vmem:[#allocation4 + $0x360] sm:$0xff]  ;;  %v336_v46 = vld [vmem:[#allocation4 + $0x3a8] sm:$0xff]  ;;  %v473_v29 = vld [vmem:[#allocation4 + $0x7f0] sm:$0xff] }
 0x12d   : > { %1741 = vmatprep.mubr.f32.mxu1 %v3185_v19  ;;  %v2600_v19 = vpack.c.bf16 %v281_v5, %v273_v3  ;;  %v2420_v50 = vpack.c.bf16 %v327_v16, %v319_v42  ;;  %v361_v3 = vld [vmem:[#allocation4 + $0x470] sm:$0xff]  ;;  %v376_v5 = vld [vmem:[#allocation4 + $0x4e8] sm:$0xff]  ;;  %v2630_v16 = vpack.c.bf16 %v410_v35, %v402_v34 }
 0x12e   : > { %2401 = vmatpush1.bf16.msra.mxu0 %v2400_v21  ;;  %v2422_v21 = vpack.c.bf16 %v344_v47, %v336_v46  ;;  %v2620_v9 = vpack.c.bf16 %v361_v3, %v353_v1  ;;  %v401_v42 = vld [vmem:[#allocation4 + $0x5b0] sm:$0xff]  ;;  %v418_v46 = vld [vmem:[#allocation4 + $0x638] sm:$0xff]  ;;  %v440_v56 = vld [vmem:[#allocation4 + $0x6e8] sm:$0xff] }
 0x12f   : > { %2593 = vmatpush1.bf16.msra.mxu1 %v2592_v52  ;;  %2403 = vmatprep.subr.bf16.mxu0 %v2402_v53  ;;  %v335_v52 = vld [vmem:[#allocation4 + $0x3a0] sm:$0xff]  ;;  %v426_v47 = vld [vmem:[#allocation4 + $0x678] sm:$0xff]  ;;  %v2632_v49 = vpack.c.bf16 %v409_v43, %v401_v42  ;;  %v441_v1 = vld [vmem:[#allocation4 + $0x6f0] sm:$0xff] }
 0x130   : > { %2595 = vmatprep.subr.bf16.mxu1 %v2594_v57  ;;  %v343_v53 = vld [vmem:[#allocation4 + $0x3e0] sm:$0xff]  ;;  %v352_v57 = vld [vmem:[#allocation4 + $0x428] sm:$0xff]  ;;  %v489_v42 = vld [vmem:[#allocation4 + $0x870] sm:$0xff] }
 0x131   : > { %v2424_v61 = vpack.c.bf16 %v343_v53, %v335_v52  ;;  %v417_v52 = vld [vmem:[#allocation4 + $0x630] sm:$0xff]  ;;  %v2634_v53 = vpack.c.bf16 %v426_v47, %v418_v46  ;;  %v456_v3 = vld [vmem:[#allocation4 + $0x768] sm:$0xff] }
 0x132   : > { %2405 = vmatpush1.bf16.msra.mxu0 %v2404_v28  ;;  %v2426_v28 = vpack.c.bf16 %v360_v58, %v352_v57  ;;  %v434_v57 = vld [vmem:[#allocation4 + $0x6b8] sm:$0xff]  ;;  %v2636_v60 = vpack.c.bf16 %v425_v54, %v417_v52  ;;  %v488_v31 = vld [vmem:[#allocation4 + $0x868] sm:$0xff]  ;;  %v505_v52 = vld [vmem:[#allocation4 + $0x8f0] sm:$0xff] }
 0x133   : > { %2597 = vmatpush1.bf16.msra.mxu1 %v2596_v63  ;;  %2407 = vmatprep.subr.bf16.mxu0 %v2406_v0  ;;  %v351_v63 = vld [vmem:[#allocation4 + $0x420] sm:$0xff]  ;;  %v442_v58 = vld [vmem:[#allocation4 + $0x6f8] sm:$0xff]  ;;  %v504_v43 = vld [vmem:[#allocation4 + $0x8e8] sm:$0xff] }
 0x134   : > { %2599 = vmatprep.subr.bf16.mxu1 %v2598_v4  ;;  %v359_v0 = vld [vmem:[#allocation4 + $0x460] sm:$0xff]  ;;  %v368_v4 = vld [vmem:[#allocation4 + $0x4a8] sm:$0xff] }
 0x135   : > { %v2428_v8 = vpack.c.bf16 %v359_v0, %v351_v63  ;;  %v433_v63 = vld [vmem:[#allocation4 + $0x6b0] sm:$0xff]  ;;  %v2638_v0 = vpack.c.bf16 %v442_v58, %v434_v57  ;;  %v520_v54 = vld [vmem:[#allocation4 + $0x968] sm:$0xff]  ;;  %v522_v57 = vld [vmem:[#allocation4 + $0x978] sm:$0xff] }
 0x136   : > { %2409 = vmatpush1.bf16.msra.mxu0 %v2408_v10  ;;  %v2430_v10 = vpack.c.bf16 %v376_v5, %v368_v4  ;;  %v450_v4 = vld [vmem:[#allocation4 + $0x738] sm:$0xff]  ;;  %v2640_v7 = vpack.c.bf16 %v441_v1, %v433_v63  ;;  %v528_v1 = vld [vmem:[#allocation4 + $0x9a8] sm:$0xff] }
 0x137   : > { %2601 = vmatpush1.bf16.msra.mxu1 %v2600_v19  ;;  %2411 = vmatprep.subr.bf16.mxu0 %v2410_v11  ;;  %v367_v19 = vld [vmem:[#allocation4 + $0x4a0] sm:$0xff]  ;;  %v458_v5 = vld [vmem:[#allocation4 + $0x778] sm:$0xff] }
 0x138   : > { %2603 = vmatprep.subr.bf16.mxu1 %v2602_v15  ;;  %v375_v11 = vld [vmem:[#allocation4 + $0x4e0] sm:$0xff]  ;;  %v384_v15 = vld [vmem:[#allocation4 + $0x528] sm:$0xff] }
 0x139   : > { %v2432_v22 = vpack.c.bf16 %v375_v11, %v367_v19  ;;  %v449_v19 = vld [vmem:[#allocation4 + $0x730] sm:$0xff]  ;;  %v2642_v11 = vpack.c.bf16 %v458_v5, %v450_v4  ;;  %v538_v4 = vld [vmem:[#allocation4 + $0x9f8] sm:$0xff] }
 0x13a   : > { %2413 = vmatpush1.bf16.msra.mxu0 %v2412_v24  ;;  %v2434_v24 = vpack.c.bf16 %v392_v17, %v384_v15  ;;  %v466_v15 = vld [vmem:[#allocation4 + $0x7b8] sm:$0xff]  ;;  %v2644_v20 = vpack.c.bf16 %v457_v12, %v449_v19  ;;  %v544_v12 = vld [vmem:[#allocation4 + $0xa28] sm:$0xff] }
 0x13b   : > { %2605 = vmatpush1.bf16.msra.mxu1 %v2604_v25  ;;  %2415 = vmatprep.subr.bf16.mxu0 %v2414_v27  ;;  %v383_v25 = vld [vmem:[#allocation4 + $0x520] sm:$0xff]  ;;  %v474_v17 = vld [vmem:[#allocation4 + $0x7f8] sm:$0xff] }
 0x13c   : > { %2607 = vmatprep.subr.bf16.mxu1 %v2606_v32  ;;  %v391_v27 = vld [vmem:[#allocation4 + $0x560] sm:$0xff]  ;;  %v400_v32 = vld [vmem:[#allocation4 + $0x5a8] sm:$0xff] }
 0x13d   : > { %v2436_v36 = vpack.c.bf16 %v391_v27, %v383_v25  ;;  %v465_v25 = vld [vmem:[#allocation4 + $0x7b0] sm:$0xff]  ;;  %v2646_v27 = vpack.c.bf16 %v474_v17, %v466_v15  ;;  %v554_v15 = vld [vmem:[#allocation4 + $0xa78] sm:$0xff] }
 0x13e   : > { %2417 = vmatpush1.bf16.msra.mxu0 %v2416_v39  ;;  %v2438_v39 = vpack.c.bf16 %v408_v33, %v400_v32  ;;  %v482_v32 = vld [vmem:[#allocation4 + $0x838] sm:$0xff]  ;;  %v2648_v35 = vpack.c.bf16 %v473_v29, %v465_v25  ;;  %v553_v25 = vld [vmem:[#allocation4 + $0xa70] sm:$0xff]  ;;  %v568_v29 = vld [vmem:[#allocation4 + $0xae8] sm:$0xff] }
 0x13f   : > { %2609 = vmatpush1.bf16.msra.mxu1 %v2608_v40  ;;  %2419 = vmatprep.subr.bf16.mxu0 %v2418_v41  ;;  %v399_v40 = vld [vmem:[#allocation4 + $0x5a0] sm:$0xff]  ;;  %v490_v33 = vld [vmem:[#allocation4 + $0x878] sm:$0xff] }
 0x140   : > { %2611 = vmatprep.subr.bf16.mxu1 %v2610_v44  ;;  %v407_v41 = vld [vmem:[#allocation4 + $0x5e0] sm:$0xff]  ;;  %v416_v44 = vld [vmem:[#allocation4 + $0x628] sm:$0xff] }
 0x141   : > { %v2440_v48 = vpack.c.bf16 %v407_v41, %v399_v40  ;;  %v481_v40 = vld [vmem:[#allocation4 + $0x830] sm:$0xff]  ;;  %v2650_v41 = vpack.c.bf16 %v490_v33, %v482_v32 }
 0x142   : > { %2421 = vmatpush1.bf16.msra.mxu0 %v2420_v50  ;;  %v2442_v50 = vpack.c.bf16 %v424_v45, %v416_v44  ;;  %v498_v44 = vld [vmem:[#allocation4 + $0x8b8] sm:$0xff]  ;;  %v2652_v47 = vpack.c.bf16 %v489_v42, %v481_v40  ;;  %v569_v40 = vld [vmem:[#allocation4 + $0xaf0] sm:$0xff]  ;;  %v584_v42 = vld [vmem:[#allocation4 + $0xb68] sm:$0xff] }
 0x143   : > { %2613 = vmatpush1.bf16.msra.mxu1 %v2612_v51  ;;  %2423 = vmatprep.subr.bf16.mxu0 %v2422_v21  ;;  %v415_v51 = vld [vmem:[#allocation4 + $0x620] sm:$0xff]  ;;  %v506_v45 = vld [vmem:[#allocation4 + $0x8f8] sm:$0xff] }
 0x144   : > { %2615 = vmatprep.subr.bf16.mxu1 %v2614_v55  ;;  %v423_v21 = vld [vmem:[#allocation4 + $0x660] sm:$0xff]  ;;  %v432_v55 = vld [vmem:[#allocation4 + $0x6a8] sm:$0xff] }
 0x145   : > { %v2444_v59 = vpack.c.bf16 %v423_v21, %v415_v51  ;;  %v497_v51 = vld [vmem:[#allocation4 + $0x8b0] sm:$0xff]  ;;  %v2654_v21 = vpack.c.bf16 %v506_v45, %v498_v44 }
 0x146   : > { %2425 = vmatpush1.bf16.msra.mxu0 %v2424_v61  ;;  %v2446_v61 = vpack.c.bf16 %v440_v56, %v432_v55  ;;  %v2870_v55 = vld [vmem:[%s3170_s23] sm:$0xff]  ;;  %v514_v56 = vld [vmem:[#allocation4 + $0x938] sm:$0xff] }
 0x147   : > { %2617 = vmatpush1.bf16.msra.mxu1 %v2616_v62  ;;  %2427 = vmatprep.subr.bf16.mxu0 %v2426_v28  ;;  %v431_v62 = vld [vmem:[#allocation4 + $0x6a0] sm:$0xff]  ;;  %v2658_v63 = vpack.c.bf16 %v522_v57, %v514_v56 }
 0x148   : > { %2619 = vmatprep.subr.bf16.mxu1 %v2618_v2  ;;  %v439_v28 = vld [vmem:[#allocation4 + $0x6e0] sm:$0xff]  ;;  %v448_v2 = vld [vmem:[#allocation4 + $0x728] sm:$0xff] }
 0x149   : > { %v2448_v6 = vpack.c.bf16 %v439_v28, %v431_v62  ;;  %v519_v62 = vld [vmem:[#allocation4 + $0x960] sm:$0xff]  ;;  %v513_v28 = vld [vmem:[#allocation4 + $0x930] sm:$0xff] }
 0x14a   : > { %2429 = vmatpush1.bf16.msra.mxu0 %v2428_v8  ;;  %v2450_v8 = vpack.c.bf16 %v456_v3, %v448_v2  ;;  %v536_v2 = vld [vmem:[#allocation4 + $0x9e8] sm:$0xff]  ;;  %v530_v3 = vld [vmem:[#allocation4 + $0x9b8] sm:$0xff] }
 0x14b   : > { %2621 = vmatpush1.bf16.msra.mxu1 %v2620_v9  ;;  %2431 = vmatprep.subr.bf16.mxu0 %v2430_v10  ;;  %v447_v9 = vld [vmem:[#allocation4 + $0x720] sm:$0xff]  ;;  %v2662_v19 = vpack.c.bf16 %v538_v4, %v530_v3 }
 0x14c   : > { %2623 = vmatprep.subr.bf16.mxu1 %v2622_v13  ;;  %v455_v10 = vld [vmem:[#allocation4 + $0x760] sm:$0xff]  ;;  %v464_v13 = vld [vmem:[#allocation4 + $0x7a8] sm:$0xff] }
 0x14d   : > { %v2452_v18 = vpack.c.bf16 %v455_v10, %v447_v9  ;;  %v535_v9 = vld [vmem:[#allocation4 + $0x9e0] sm:$0xff]  ;;  %v529_v10 = vld [vmem:[#allocation4 + $0x9b0] sm:$0xff] }
 0x14e   : > { %2433 = vmatpush1.bf16.msra.mxu0 %v2432_v22  ;;  %v2454_v22 = vpack.c.bf16 %v472_v14, %v464_v13  ;;  %v552_v13 = vld [vmem:[#allocation4 + $0xa68] sm:$0xff]  ;;  %v546_v14 = vld [vmem:[#allocation4 + $0xa38] sm:$0xff] }
 0x14f   : > { %2625 = vmatpush1.bf16.msra.mxu1 %v2624_v23  ;;  %2435 = vmatprep.subr.bf16.mxu0 %v2434_v24  ;;  %v463_v23 = vld [vmem:[#allocation4 + $0x7a0] sm:$0xff] }
 0x150   : > { %2627 = vmatprep.subr.bf16.mxu1 %v2626_v30  ;;  %v471_v24 = vld [vmem:[#allocation4 + $0x7e0] sm:$0xff]  ;;  %v480_v30 = vld [vmem:[#allocation4 + $0x828] sm:$0xff] }
 0x151   : > { %v2456_v34 = vpack.c.bf16 %v471_v24, %v463_v23  ;;  %v545_v23 = vld [vmem:[#allocation4 + $0xa30] sm:$0xff]  ;;  %v2666_v24 = vpack.c.bf16 %v554_v15, %v546_v14 }
 0x152   : > { %2437 = vmatpush1.bf16.msra.mxu0 %v2436_v36  ;;  %v2458_v36 = vpack.c.bf16 %v488_v31, %v480_v30  ;;  %v562_v30 = vld [vmem:[#allocation4 + $0xab8] sm:$0xff]  ;;  %v2668_v33 = vpack.c.bf16 %v553_v25, %v545_v23  ;;  %v640_v23 = vld [vmem:[#allocation4 + $0xd28] sm:$0xff] }
 0x153   : > { %2629 = vmatpush1.bf16.msra.mxu1 %v2628_v37  ;;  %2439 = vmatprep.subr.bf16.mxu0 %v2438_v39  ;;  %v479_v37 = vld [vmem:[#allocation4 + $0x820] sm:$0xff]  ;;  %v570_v31 = vld [vmem:[#allocation4 + $0xaf8] sm:$0xff] }
 0x154   : > { %2631 = vmatprep.subr.bf16.mxu1 %v2630_v16  ;;  %v487_v39 = vld [vmem:[#allocation4 + $0x860] sm:$0xff]  ;;  %v496_v16 = vld [vmem:[#allocation4 + $0x8a8] sm:$0xff]  ;;  %v642_v25 = vld [vmem:[#allocation4 + $0xd38] sm:$0xff] }
 0x155   : > { %v2460_v46 = vpack.c.bf16 %v487_v39, %v479_v37  ;;  %v561_v37 = vld [vmem:[#allocation4 + $0xab0] sm:$0xff]  ;;  %v2670_v39 = vpack.c.bf16 %v570_v31, %v562_v30 }
 0x156   : > { %2441 = vmatpush1.bf16.msra.mxu0 %v2440_v48  ;;  %v2462_v48 = vpack.c.bf16 %v504_v43, %v496_v16  ;;  %v578_v16 = vld [vmem:[#allocation4 + $0xb38] sm:$0xff]  ;;  %v2672_v45 = vpack.c.bf16 %v569_v40, %v561_v37  ;;  %v656_v37 = vld [vmem:[#allocation4 + $0xda8] sm:$0xff] }
 0x157   : > { %2633 = vmatpush1.bf16.msra.mxu1 %v2632_v49  ;;  %2443 = vmatprep.subr.bf16.mxu0 %v2442_v50  ;;  %v495_v49 = vld [vmem:[#allocation4 + $0x8a0] sm:$0xff]  ;;  %v586_v43 = vld [vmem:[#allocation4 + $0xb78] sm:$0xff] }
 0x158   : > { %2635 = vmatprep.subr.bf16.mxu1 %v2634_v53  ;;  %v503_v50 = vld [vmem:[#allocation4 + $0x8e0] sm:$0xff]  ;;  %v512_v53 = vld [vmem:[#allocation4 + $0x928] sm:$0xff]  ;;  %v658_v40 = vld [vmem:[#allocation4 + $0xdb8] sm:$0xff] }
 0x159   : > { %v2464_v58 = vpack.c.bf16 %v503_v50, %v495_v49  ;;  %v577_v49 = vld [vmem:[#allocation4 + $0xb30] sm:$0xff]  ;;  %v2674_v50 = vpack.c.bf16 %v586_v43, %v578_v16 }
 0x15a   : > { %2445 = vmatpush1.bf16.msra.mxu0 %v2444_v59  ;;  %v2656_v59 = vpack.c.bf16 %v505_v52, %v497_v51  ;;  %v585_v51 = vld [vmem:[#allocation4 + $0xb70] sm:$0xff]  ;;  %v600_v52 = vld [vmem:[#allocation4 + $0xbe8] sm:$0xff] }
 0x15b   : > { %2637 = vmatpush1.bf16.msra.mxu1 %v2636_v60  ;;  %2447 = vmatprep.subr.bf16.mxu0 %v2446_v61  ;;  %v2466_v60 = vpack.c.bf16 %v520_v54, %v512_v53  ;;  %v511_v61 = vld [vmem:[#allocation4 + $0x920] sm:$0xff]  ;;  %v594_v53 = vld [vmem:[#allocation4 + $0xbb8] sm:$0xff]  ;;  %v2676_v56 = vpack.c.bf16 %v585_v51, %v577_v49  ;;  %v672_v49 = vld [vmem:[#allocation4 + $0xe28] sm:$0xff] }
 0x15c   : > { %2639 = vmatprep.subr.bf16.mxu1 %v2638_v0  ;;  %v521_v0 = vld [vmem:[#allocation4 + $0x970] sm:$0xff]  ;;  %v2468_v5 = vpack.c.bf16 %v519_v62, %v511_v61  ;;  %v602_v54 = vld [vmem:[#allocation4 + $0xbf8] sm:$0xff] }
 0x15d   : > { %v2678_v61 = vpack.c.bf16 %v602_v54, %v594_v53  ;;  %v601_v62 = vld [vmem:[#allocation4 + $0xbf0] sm:$0xff]  ;;  %v674_v51 = vld [vmem:[#allocation4 + $0xe38] sm:$0xff] }
 0x15e   : > { %2449 = vmatpush1.bf16.msra.mxu0 %v2448_v6  ;;  %v2660_v6 = vpack.c.bf16 %v521_v0, %v513_v28  ;;  %v608_v28 = vld [vmem:[#allocation4 + $0xc28] sm:$0xff]  ;;  %v610_v0 = vld [vmem:[#allocation4 + $0xc38] sm:$0xff] }
 0x15f   : > { %2641 = vmatpush1.bf16.msra.mxu1 %v2640_v7  ;;  %2451 = vmatprep.subr.bf16.mxu0 %v2450_v8  ;;  %v2470_v7 = vpack.c.bf16 %v536_v2, %v528_v1  ;;  %v527_v8 = vld [vmem:[#allocation4 + $0x9a0] sm:$0xff]  ;;  %v618_v1 = vld [vmem:[#allocation4 + $0xc78] sm:$0xff] }
 0x160   : > { %2643 = vmatprep.subr.bf16.mxu1 %v2642_v11  ;;  %v537_v11 = vld [vmem:[#allocation4 + $0x9f0] sm:$0xff]  ;;  %v2472_v17 = vpack.c.bf16 %v535_v9, %v527_v8  ;;  %v2682_v8 = vpack.c.bf16 %v618_v1, %v610_v0 }
 0x161   : > { %v617_v9 = vld [vmem:[#allocation4 + $0xc70] sm:$0xff] }
 0x162   : > { %2453 = vmatpush1.bf16.msra.mxu0 %v2452_v18  ;;  %v2474_v18 = vpack.c.bf16 %v552_v13, %v544_v12  ;;  %v634_v12 = vld [vmem:[#allocation4 + $0xcf8] sm:$0xff] }
 0x163   : > { %2645 = vmatpush1.bf16.msra.mxu1 %v2644_v20  ;;  %2455 = vmatprep.subr.bf16.mxu0 %v2454_v22  ;;  %v543_v20 = vld [vmem:[#allocation4 + $0xa20] sm:$0xff] }
 0x164   : > { %2647 = vmatprep.subr.bf16.mxu1 %v2646_v27  ;;  %v551_v22 = vld [vmem:[#allocation4 + $0xa60] sm:$0xff]  ;;  %v560_v27 = vld [vmem:[#allocation4 + $0xaa8] sm:$0xff] }
 0x165   : > { %v2476_v32 = vpack.c.bf16 %v551_v22, %v543_v20  ;;  %v633_v22 = vld [vmem:[#allocation4 + $0xcf0] sm:$0xff] }
 0x166   : > { %2457 = vmatpush1.bf16.msra.mxu0 %v2456_v34  ;;  %v2478_v34 = vpack.c.bf16 %v568_v29, %v560_v27  ;;  %v650_v27 = vld [vmem:[#allocation4 + $0xd78] sm:$0xff] }
 0x167   : > { %2649 = vmatpush1.bf16.msra.mxu1 %v2648_v35  ;;  %2459 = vmatprep.subr.bf16.mxu0 %v2458_v36  ;;  %v559_v35 = vld [vmem:[#allocation4 + $0xaa0] sm:$0xff] }
 0x168   : > { %2651 = vmatprep.subr.bf16.mxu1 %v2650_v41  ;;  %v567_v36 = vld [vmem:[#allocation4 + $0xae0] sm:$0xff]  ;;  %v576_v41 = vld [vmem:[#allocation4 + $0xb28] sm:$0xff] }
 0x169   : > { %1529 = vmatmul.mubr.f32.vlgmr.msra.gmra.mrb[2].mxu0 %v2870_v55  ;;  %v2480_v44 = vpack.c.bf16 %v567_v36, %v559_v35  ;;  %v2690_v35 = vpack.c.bf16 %v650_v27, %v642_v25  ;;  %v649_v36 = vld [vmem:[#allocation4 + $0xd70] sm:$0xff] }
 0x16a   : > { %2461 = vmatpush1.bf16.msra.mxu0 %v2460_v46  ;;  %1742 = vmatmul.mubr.f32.vlgmr.msra.gmra.mrb[2].mxu1 %v2870_v55  ;;  %v2482_v46 = vpack.c.bf16 %v584_v42, %v576_v41  ;;  %v666_v41 = vld [vmem:[#allocation4 + $0xdf8] sm:$0xff] }
 0x16b   : > { %2653 = vmatpush1.bf16.msra.mxu1 %v2652_v47  ;;  %2463 = vmatprep.subr.bf16.mxu0 %v2462_v48  ;;  %v575_v47 = vld [vmem:[#allocation4 + $0xb20] sm:$0xff] }
 0x16c   : > { %2655 = vmatprep.subr.bf16.mxu1 %v2654_v21  ;;  %1599 = vmatprep.mubr.f32.mxu0 %v3196_v26  ;;  %v583_v48 = vld [vmem:[#allocation4 + $0xb60] sm:$0xff]  ;;  %v592_v21 = vld [vmem:[#allocation4 + $0xba8] sm:$0xff] }
 0x16d   : > { %1812 = vmatprep.mubr.f32.mxu1 %v3196_v26  ;;  %v2664_v26 = vpack.c.bf16 %v537_v11, %v529_v10  ;;  %v2484_v55 = vpack.c.bf16 %v583_v48, %v575_v47  ;;  %v2486_v57 = vpack.c.bf16 %v600_v52, %v592_v21  ;;  %v624_v10 = vld [vmem:[#allocation4 + $0xca8] sm:$0xff]  ;;  %v626_v11 = vld [vmem:[#allocation4 + $0xcb8] sm:$0xff]  ;;  %v2694_v47 = vpack.c.bf16 %v666_v41, %v658_v40  ;;  %v665_v48 = vld [vmem:[#allocation4 + $0xdf0] sm:$0xff] }
 0x16e   : > { %2465 = vmatpush1.bf16.msra.mxu0 %v2464_v58  ;;  %v591_v58 = vld [vmem:[#allocation4 + $0xba0] sm:$0xff]  ;;  %v2686_v20 = vpack.c.bf16 %v634_v12, %v626_v11  ;;  %v682_v21 = vld [vmem:[#allocation4 + $0xe78] sm:$0xff] }
 0x16f   : > { %2657 = vmatpush1.bf16.msra.mxu1 %v2656_v59  ;;  %2467 = vmatprep.subr.bf16.mxu0 %v2466_v60  ;;  %v599_v59 = vld [vmem:[#allocation4 + $0xbe0] sm:$0xff]  ;;  %v593_v60 = vld [vmem:[#allocation4 + $0xbb0] sm:$0xff] }
 0x170   : > { %2659 = vmatprep.subr.bf16.mxu1 %v2658_v63  ;;  %v616_v63 = vld [vmem:[#allocation4 + $0xc68] sm:$0xff]  ;;  %v2488_v2 = vpack.c.bf16 %v599_v59, %v591_v58  ;;  %v2680_v3 = vpack.c.bf16 %v601_v62, %v593_v60  ;;  %v2698_v58 = vpack.c.bf16 %v682_v21, %v674_v51  ;;  %v681_v59 = vld [vmem:[#allocation4 + $0xe70] sm:$0xff]  ;;  %v690_v62 = vld [vmem:[#allocation4 + $0xeb8] sm:$0xff] }
 0x171   : > { %v2490_v4 = vpack.c.bf16 %v616_v63, %v608_v28  ;;  %v688_v60 = vld [vmem:[#allocation4 + $0xea8] sm:$0xff]  ;;  %v698_v28 = vld [vmem:[#allocation4 + $0xef8] sm:$0xff] }
 0x172   : > { %2469 = vmatpush1.bf16.msra.mxu0 %v2468_v5  ;;  %v607_v5 = vld [vmem:[#allocation4 + $0xc20] sm:$0xff] }
 0x173   : > { %2661 = vmatpush1.bf16.msra.mxu1 %v2660_v6  ;;  %2471 = vmatprep.subr.bf16.mxu0 %v2470_v7  ;;  %v615_v6 = vld [vmem:[#allocation4 + $0xc60] sm:$0xff]  ;;  %v609_v7 = vld [vmem:[#allocation4 + $0xc30] sm:$0xff] }
 0x174   : > { %2663 = vmatprep.subr.bf16.mxu1 %v2662_v19  ;;  %v632_v19 = vld [vmem:[#allocation4 + $0xce8] sm:$0xff]  ;;  %v2492_v13 = vpack.c.bf16 %v615_v6, %v607_v5  ;;  %v2684_v14 = vpack.c.bf16 %v617_v9, %v609_v7  ;;  %v2702_v5 = vpack.c.bf16 %v698_v28, %v690_v62  ;;  %v697_v6 = vld [vmem:[#allocation4 + $0xef0] sm:$0xff]  ;;  %v706_v9 = vld [vmem:[#allocation4 + $0xf38] sm:$0xff] }
 0x175   : > { %v2494_v15 = vpack.c.bf16 %v632_v19, %v624_v10  ;;  %v704_v7 = vld [vmem:[#allocation4 + $0xf28] sm:$0xff]  ;;  %v714_v10 = vld [vmem:[#allocation4 + $0xf78] sm:$0xff] }
 0x176   : > { %2473 = vmatpush1.bf16.msra.mxu0 %v2472_v17  ;;  %v623_v17 = vld [vmem:[#allocation4 + $0xca0] sm:$0xff] }
 0x177   : > { %2665 = vmatpush1.bf16.msra.mxu1 %v2664_v26  ;;  %2475 = vmatprep.subr.bf16.mxu0 %v2474_v18  ;;  %v631_v26 = vld [vmem:[#allocation4 + $0xce0] sm:$0xff]  ;;  %v625_v18 = vld [vmem:[#allocation4 + $0xcb0] sm:$0xff] }
 0x178   : > { %2667 = vmatprep.subr.bf16.mxu1 %v2666_v24  ;;  %v648_v24 = vld [vmem:[#allocation4 + $0xd68] sm:$0xff]  ;;  %v2496_v29 = vpack.c.bf16 %v631_v26, %v623_v17  ;;  %v2688_v30 = vpack.c.bf16 %v633_v22, %v625_v18  ;;  %v2706_v17 = vpack.c.bf16 %v714_v10, %v706_v9  ;;  %v713_v26 = vld [vmem:[#allocation4 + $0xf70] sm:$0xff]  ;;  %v722_v22 = vld [vmem:[#allocation4 + $0xfb8] sm:$0xff] }
 0x179   : > { %v2498_v31 = vpack.c.bf16 %v648_v24, %v640_v23  ;;  %v720_v18 = vld [vmem:[#allocation4 + $0xfa8] sm:$0xff]  ;;  %v730_v23 = vld [vmem:[#allocation4 + $0xff8] sm:$0xff] }
 0x17a   : > { %2477 = vmatpush1.bf16.msra.mxu0 %v2476_v32  ;;  %v639_v32 = vld [vmem:[#allocation4 + $0xd20] sm:$0xff] }
 0x17b   : > { %2669 = vmatpush1.bf16.msra.mxu1 %v2668_v33  ;;  %2479 = vmatprep.subr.bf16.mxu0 %v2478_v34  ;;  %v647_v33 = vld [vmem:[#allocation4 + $0xd60] sm:$0xff]  ;;  %v641_v34 = vld [vmem:[#allocation4 + $0xd30] sm:$0xff] }
 0x17c   : > { %2671 = vmatprep.subr.bf16.mxu1 %v2670_v39  ;;  %v664_v39 = vld [vmem:[#allocation4 + $0xde8] sm:$0xff]  ;;  %v2500_v42 = vpack.c.bf16 %v647_v33, %v639_v32  ;;  %v2692_v16 = vpack.c.bf16 %v649_v36, %v641_v34  ;;  %v2710_v32 = vpack.c.bf16 %v730_v23, %v722_v22  ;;  %v729_v33 = vld [vmem:[#allocation4 + $0xff0] sm:$0xff]  ;;  %v738_v36 = vld [vmem:[#allocation4 + $0x1038] sm:$0xff] }
 0x17d   : > { %v2502_v43 = vpack.c.bf16 %v664_v39, %v656_v37  ;;  %v736_v34 = vld [vmem:[#allocation4 + $0x1028] sm:$0xff]  ;;  %v746_v37 = vld [vmem:[#allocation4 + $0x1078] sm:$0xff] }
 0x17e   : > { %2481 = vmatpush1.bf16.msra.mxu0 %v2480_v44  ;;  %v655_v44 = vld [vmem:[#allocation4 + $0xda0] sm:$0xff] }
 0x17f   : > { %2673 = vmatpush1.bf16.msra.mxu1 %v2672_v45  ;;  %2483 = vmatprep.subr.bf16.mxu0 %v2482_v46  ;;  %v663_v45 = vld [vmem:[#allocation4 + $0xde0] sm:$0xff]  ;;  %v657_v46 = vld [vmem:[#allocation4 + $0xdb0] sm:$0xff] }
 0x180   : > { %2675 = vmatprep.subr.bf16.mxu1 %v2674_v50  ;;  %v680_v50 = vld [vmem:[#allocation4 + $0xe68] sm:$0xff]  ;;  %v2504_v52 = vpack.c.bf16 %v663_v45, %v655_v44  ;;  %v2696_v53 = vpack.c.bf16 %v665_v48, %v657_v46  ;;  %v2714_v44 = vpack.c.bf16 %v746_v37, %v738_v36  ;;  %v745_v45 = vld [vmem:[#allocation4 + $0x1070] sm:$0xff]  ;;  %v754_v48 = vld [vmem:[#allocation4 + $0x10b8] sm:$0xff] }
 0x181   : > { %v2506_v54 = vpack.c.bf16 %v680_v50, %v672_v49  ;;  %v752_v46 = vld [vmem:[#allocation4 + $0x10a8] sm:$0xff]  ;;  %v762_v49 = vld [vmem:[#allocation4 + $0x10f8] sm:$0xff] }
 0x182   : > { %2485 = vmatpush1.bf16.msra.mxu0 %v2484_v55  ;;  %v671_v55 = vld [vmem:[#allocation4 + $0xe20] sm:$0xff] }
 0x183   : > { %2677 = vmatpush1.bf16.msra.mxu1 %v2676_v56  ;;  %2487 = vmatprep.subr.bf16.mxu0 %v2486_v57  ;;  %v679_v56 = vld [vmem:[#allocation4 + $0xe60] sm:$0xff]  ;;  %v673_v57 = vld [vmem:[#allocation4 + $0xe30] sm:$0xff] }
 0x184   : > { %2679 = vmatprep.subr.bf16.mxu1 %v2678_v61  ;;  %v696_v61 = vld [vmem:[#allocation4 + $0xee8] sm:$0xff]  ;;  %v2508_v63 = vpack.c.bf16 %v679_v56, %v671_v55  ;;  %v2700_v0 = vpack.c.bf16 %v681_v59, %v673_v57  ;;  %v2718_v55 = vpack.c.bf16 %v762_v49, %v754_v48  ;;  %v761_v56 = vld [vmem:[#allocation4 + $0x10f0] sm:$0xff] }
 0x185   : > { %v2510_v1 = vpack.c.bf16 %v696_v61, %v688_v60  ;;  %v768_v57 = vld [vmem:[#allocation4 + $0x1128] sm:$0xff]  ;;  %v2871_v59 = vld [vmem:[%s3170_s23 + $0x8] sm:$0xff] }
 0x186   : > { %2489 = vmatpush1.bf16.msra.mxu0 %v2488_v2  ;;  %v687_v2 = vld [vmem:[#allocation4 + $0xea0] sm:$0xff]  ;;  %v770_v60 = vld [vmem:[#allocation4 + $0x1138] sm:$0xff] }
 0x187   : > { %2681 = vmatpush1.bf16.msra.mxu1 %v2680_v3  ;;  %2491 = vmatprep.subr.bf16.mxu0 %v2490_v4  ;;  %v695_v3 = vld [vmem:[#allocation4 + $0xee0] sm:$0xff]  ;;  %v689_v4 = vld [vmem:[#allocation4 + $0xeb0] sm:$0xff]  ;;  %v778_v61 = vld [vmem:[#allocation4 + $0x1178] sm:$0xff] }
 0x188   : > { %2683 = vmatprep.subr.bf16.mxu1 %v2682_v8  ;;  %v712_v8 = vld [vmem:[#allocation4 + $0xf68] sm:$0xff]  ;;  %v2512_v19 = vpack.c.bf16 %v695_v3, %v687_v2  ;;  %v2704_v11 = vpack.c.bf16 %v697_v6, %v689_v4  ;;  %v769_v2 = vld [vmem:[#allocation4 + $0x1130] sm:$0xff]  ;;  %v2722_v3 = vpack.c.bf16 %v778_v61, %v770_v60  ;;  %v847_v61 = vld [vmem:[#allocation4 + $0x13a0] sm:$0xff] }
 0x189   : > { %v2514_v12 = vpack.c.bf16 %v712_v8, %v704_v7  ;;  %v777_v4 = vld [vmem:[#allocation4 + $0x1170] sm:$0xff]  ;;  %v792_v6 = vld [vmem:[#allocation4 + $0x11e8] sm:$0xff]  ;;  %v786_v7 = vld [vmem:[#allocation4 + $0x11b8] sm:$0xff] }
 0x18a   : > { %2493 = vmatpush1.bf16.msra.mxu0 %v2492_v13  ;;  %v703_v13 = vld [vmem:[#allocation4 + $0xf20] sm:$0xff]  ;;  %v794_v8 = vld [vmem:[#allocation4 + $0x11f8] sm:$0xff]  ;;  %v2724_v10 = vpack.c.bf16 %v777_v4, %v769_v2  ;;  %v872_v2 = vld [vmem:[#allocation4 + $0x1468] sm:$0xff] }
 0x18b   : > { %2685 = vmatpush1.bf16.msra.mxu1 %v2684_v14  ;;  %2495 = vmatprep.subr.bf16.mxu0 %v2494_v15  ;;  %v711_v14 = vld [vmem:[#allocation4 + $0xf60] sm:$0xff]  ;;  %v705_v15 = vld [vmem:[#allocation4 + $0xf30] sm:$0xff]  ;;  %v874_v4 = vld [vmem:[#allocation4 + $0x1478] sm:$0xff] }
 0x18c   : > { %2687 = vmatprep.subr.bf16.mxu1 %v2686_v20  ;;  %v728_v20 = vld [vmem:[#allocation4 + $0xfe8] sm:$0xff]  ;;  %v2516_v24 = vpack.c.bf16 %v711_v14, %v703_v13  ;;  %v2708_v25 = vpack.c.bf16 %v713_v26, %v705_v15  ;;  %v785_v13 = vld [vmem:[#allocation4 + $0x11b0] sm:$0xff]  ;;  %v2726_v14 = vpack.c.bf16 %v794_v8, %v786_v7  ;;  %v863_v8 = vld [vmem:[#allocation4 + $0x1420] sm:$0xff] }
 0x18d   : > { %v2518_v27 = vpack.c.bf16 %v728_v20, %v720_v18  ;;  %v793_v15 = vld [vmem:[#allocation4 + $0x11f0] sm:$0xff]  ;;  %v808_v26 = vld [vmem:[#allocation4 + $0x1268] sm:$0xff]  ;;  %v802_v18 = vld [vmem:[#allocation4 + $0x1238] sm:$0xff] }
 0x18e   : > { %2497 = vmatpush1.bf16.msra.mxu0 %v2496_v29  ;;  %v719_v29 = vld [vmem:[#allocation4 + $0xfa0] sm:$0xff]  ;;  %v810_v20 = vld [vmem:[#allocation4 + $0x1278] sm:$0xff] }
 0x18f   : > { %2689 = vmatpush1.bf16.msra.mxu1 %v2688_v30  ;;  %2499 = vmatprep.subr.bf16.mxu0 %v2498_v31  ;;  %v727_v30 = vld [vmem:[#allocation4 + $0xfe0] sm:$0xff]  ;;  %v721_v31 = vld [vmem:[#allocation4 + $0xfb0] sm:$0xff] }
 0x190   : > { %2691 = vmatprep.subr.bf16.mxu1 %v2690_v35  ;;  %v744_v35 = vld [vmem:[#allocation4 + $0x1068] sm:$0xff]  ;;  %v2520_v39 = vpack.c.bf16 %v727_v30, %v719_v29  ;;  %v2712_v40 = vpack.c.bf16 %v729_v33, %v721_v31  ;;  %v2730_v29 = vpack.c.bf16 %v810_v20, %v802_v18  ;;  %v809_v30 = vld [vmem:[#allocation4 + $0x1270] sm:$0xff]  ;;  %v818_v33 = vld [vmem:[#allocation4 + $0x12b8] sm:$0xff] }
 0x191   : > { %v2522_v41 = vpack.c.bf16 %v744_v35, %v736_v34  ;;  %v816_v31 = vld [vmem:[#allocation4 + $0x12a8] sm:$0xff]  ;;  %v826_v34 = vld [vmem:[#allocation4 + $0x12f8] sm:$0xff]  ;;  %v879_v20 = vld [vmem:[#allocation4 + $0x14a0] sm:$0xff] }
 0x192   : > { %2501 = vmatpush1.bf16.msra.mxu0 %v2500_v42  ;;  %v735_v42 = vld [vmem:[#allocation4 + $0x1020] sm:$0xff] }
 0x193   : > { %2693 = vmatpush1.bf16.msra.mxu1 %v2692_v16  ;;  %2503 = vmatprep.subr.bf16.mxu0 %v2502_v43  ;;  %v743_v16 = vld [vmem:[#allocation4 + $0x1060] sm:$0xff]  ;;  %v737_v43 = vld [vmem:[#allocation4 + $0x1030] sm:$0xff] }
 0x194   : > { %2695 = vmatprep.subr.bf16.mxu1 %v2694_v47  ;;  %v760_v47 = vld [vmem:[#allocation4 + $0x10e8] sm:$0xff]  ;;  %v2524_v50 = vpack.c.bf16 %v743_v16, %v735_v42  ;;  %v2716_v51 = vpack.c.bf16 %v745_v45, %v737_v43  ;;  %v2734_v42 = vpack.c.bf16 %v826_v34, %v818_v33  ;;  %v825_v16 = vld [vmem:[#allocation4 + $0x12f0] sm:$0xff]  ;;  %v834_v45 = vld [vmem:[#allocation4 + $0x1338] sm:$0xff] }
 0x195   : > { %v2526_v21 = vpack.c.bf16 %v760_v47, %v752_v46  ;;  %v832_v43 = vld [vmem:[#allocation4 + $0x1328] sm:$0xff]  ;;  %v842_v46 = vld [vmem:[#allocation4 + $0x1378] sm:$0xff]  ;;  %v895_v34 = vld [vmem:[#allocation4 + $0x1520] sm:$0xff] }
 0x196   : > { %2505 = vmatpush1.bf16.msra.mxu0 %v2504_v52  ;;  %v751_v52 = vld [vmem:[#allocation4 + $0x10a0] sm:$0xff] }
 0x197   : > { %2697 = vmatpush1.bf16.msra.mxu1 %v2696_v53  ;;  %2507 = vmatprep.subr.bf16.mxu0 %v2506_v54  ;;  %v759_v53 = vld [vmem:[#allocation4 + $0x10e0] sm:$0xff]  ;;  %v753_v54 = vld [vmem:[#allocation4 + $0x10b0] sm:$0xff] }
 0x198   : > { %2699 = vmatprep.subr.bf16.mxu1 %v2698_v58  ;;  %v776_v58 = vld [vmem:[#allocation4 + $0x1168] sm:$0xff]  ;;  %v2528_v62 = vpack.c.bf16 %v759_v53, %v751_v52  ;;  %v2720_v28 = vpack.c.bf16 %v761_v56, %v753_v54  ;;  %v2738_v52 = vpack.c.bf16 %v842_v46, %v834_v45  ;;  %v841_v53 = vld [vmem:[#allocation4 + $0x1370] sm:$0xff]  ;;  %v850_v56 = vld [vmem:[#allocation4 + $0x13b8] sm:$0xff] }
 0x199   : > { %v848_v54 = vld [vmem:[#allocation4 + $0x13a8] sm:$0xff]  ;;  %v911_v46 = vld [vmem:[#allocation4 + $0x15a0] sm:$0xff] }
 0x19a   : > { %2509 = vmatpush1.bf16.msra.mxu0 %v2508_v63  ;;  %v2530_v63 = vpack.c.bf16 %v776_v58, %v768_v57  ;;  %v858_v57 = vld [vmem:[#allocation4 + $0x13f8] sm:$0xff] }
 0x19b   : > { %2701 = vmatpush1.bf16.msra.mxu1 %v2700_v0  ;;  %2511 = vmatprep.subr.bf16.mxu0 %v2510_v1  ;;  %v767_v0 = vld [vmem:[#allocation4 + $0x1120] sm:$0xff] }
 0x19c   : > { %2703 = vmatprep.subr.bf16.mxu1 %v2702_v5  ;;  %v775_v1 = vld [vmem:[#allocation4 + $0x1160] sm:$0xff]  ;;  %v784_v5 = vld [vmem:[#allocation4 + $0x11a8] sm:$0xff] }
 0x19d   : > { %v2532_v9 = vpack.c.bf16 %v775_v1, %v767_v0  ;;  %v857_v0 = vld [vmem:[#allocation4 + $0x13f0] sm:$0xff]  ;;  %v864_v1 = vld [vmem:[#allocation4 + $0x1428] sm:$0xff] }
 0x19e   : > { %2513 = vmatpush1.bf16.msra.mxu0 %v2512_v19  ;;  %v2534_v19 = vpack.c.bf16 %v792_v6, %v784_v5  ;;  %v2554_v7 = vpack.c.bf16 %v872_v2, %v864_v1 }
 0x19f   : > { %2705 = vmatpush1.bf16.msra.mxu1 %v2704_v11  ;;  %2515 = vmatprep.subr.bf16.mxu0 %v2514_v12  ;;  %v783_v11 = vld [vmem:[#allocation4 + $0x11a0] sm:$0xff] }
 0x1a0   : > { %2707 = vmatprep.subr.bf16.mxu1 %v2706_v17  ;;  %v791_v12 = vld [vmem:[#allocation4 + $0x11e0] sm:$0xff]  ;;  %v800_v17 = vld [vmem:[#allocation4 + $0x1228] sm:$0xff] }
 0x1a1   : > { %v2536_v22 = vpack.c.bf16 %v791_v12, %v783_v11  ;;  %v2538_v23 = vpack.c.bf16 %v808_v26, %v800_v17  ;;  %v873_v11 = vld [vmem:[#allocation4 + $0x1470] sm:$0xff]  ;;  %v880_v12 = vld [vmem:[#allocation4 + $0x14a8] sm:$0xff] }
 0x1a2   : > { %2517 = vmatpush1.bf16.msra.mxu0 %v2516_v24  ;;  %v799_v24 = vld [vmem:[#allocation4 + $0x1220] sm:$0xff] }
 0x1a3   : > { %2709 = vmatpush1.bf16.msra.mxu1 %v2708_v25  ;;  %2519 = vmatprep.subr.bf16.mxu0 %v2518_v27  ;;  %v807_v25 = vld [vmem:[#allocation4 + $0x1260] sm:$0xff]  ;;  %v801_v27 = vld [vmem:[#allocation4 + $0x1230] sm:$0xff] }
 0x1a4   : > { %2711 = vmatprep.subr.bf16.mxu1 %v2710_v32  ;;  %v824_v32 = vld [vmem:[#allocation4 + $0x12e8] sm:$0xff]  ;;  %v2540_v35 = vpack.c.bf16 %v807_v25, %v799_v24  ;;  %v2732_v36 = vpack.c.bf16 %v809_v30, %v801_v27  ;;  %v889_v24 = vld [vmem:[#allocation4 + $0x14f0] sm:$0xff]  ;;  %v906_v30 = vld [vmem:[#allocation4 + $0x1578] sm:$0xff] }
 0x1a5   : > { %v2542_v37 = vpack.c.bf16 %v824_v32, %v816_v31  ;;  %v896_v25 = vld [vmem:[#allocation4 + $0x1528] sm:$0xff] }
 0x1a6   : > { %2521 = vmatpush1.bf16.msra.mxu0 %v2520_v39  ;;  %v815_v39 = vld [vmem:[#allocation4 + $0x12a0] sm:$0xff]  ;;  %v904_v27 = vld [vmem:[#allocation4 + $0x1568] sm:$0xff] }
 0x1a7   : > { %2713 = vmatpush1.bf16.msra.mxu1 %v2712_v40  ;;  %2523 = vmatprep.subr.bf16.mxu0 %v2522_v41  ;;  %v823_v40 = vld [vmem:[#allocation4 + $0x12e0] sm:$0xff]  ;;  %v817_v41 = vld [vmem:[#allocation4 + $0x12b0] sm:$0xff]  ;;  %v2562_v33 = vpack.c.bf16 %v904_v27, %v896_v25 }
 0x1a8   : > { %2715 = vmatprep.subr.bf16.mxu1 %v2714_v44  ;;  %v840_v44 = vld [vmem:[#allocation4 + $0x1368] sm:$0xff]  ;;  %v2544_v47 = vpack.c.bf16 %v823_v40, %v815_v39  ;;  %v2736_v48 = vpack.c.bf16 %v825_v16, %v817_v41  ;;  %v905_v39 = vld [vmem:[#allocation4 + $0x1570] sm:$0xff]  ;;  %v922_v16 = vld [vmem:[#allocation4 + $0x15f8] sm:$0xff] }
 0x1a9   : > { %1600 = vmatmul.mubr.f32.vlgmr.msra.gmra.mrb[2].mxu0 %v2871_v59  ;;  %v2546_v49 = vpack.c.bf16 %v840_v44, %v832_v43  ;;  %v912_v40 = vld [vmem:[#allocation4 + $0x15a8] sm:$0xff] }
 0x1aa   : > { %2525 = vmatpush1.bf16.msra.mxu0 %v2524_v50  ;;  %1813 = vmatmul.mubr.f32.vlgmr.msra.gmra.mrb[2].mxu1 %v2871_v59  ;;  %v831_v50 = vld [vmem:[#allocation4 + $0x1320] sm:$0xff]  ;;  %v920_v41 = vld [vmem:[#allocation4 + $0x15e8] sm:$0xff] }
 0x1ab   : > { %2717 = vmatpush1.bf16.msra.mxu1 %v2716_v51  ;;  %2527 = vmatprep.subr.bf16.mxu0 %v2526_v21  ;;  %v839_v51 = vld [vmem:[#allocation4 + $0x1360] sm:$0xff]  ;;  %v833_v21 = vld [vmem:[#allocation4 + $0x1330] sm:$0xff]  ;;  %v2566_v45 = vpack.c.bf16 %v920_v41, %v912_v40 }
 0x1ac   : > { %2719 = vmatprep.subr.bf16.mxu1 %v2718_v55  ;;  %1670 = vmatprep.mubr.f32.mxu0 %v3205_v38  ;;  %v856_v55 = vld [vmem:[#allocation4 + $0x13e8] sm:$0xff]  ;;  %v2548_v58 = vpack.c.bf16 %v839_v51, %v831_v50  ;;  %v2740_v59 = vpack.c.bf16 %v841_v53, %v833_v21  ;;  %v921_v50 = vld [vmem:[#allocation4 + $0x15f0] sm:$0xff]  ;;  %v938_v53 = vld [vmem:[#allocation4 + $0x1678] sm:$0xff] }
 0x1ad   : > { %1883 = vmatprep.mubr.f32.mxu1 %v3205_v38  ;;  %v2728_v38 = vpack.c.bf16 %v793_v15, %v785_v13  ;;  %v2550_v60 = vpack.c.bf16 %v856_v55, %v848_v54  ;;  %v888_v13 = vld [vmem:[#allocation4 + $0x14e8] sm:$0xff]  ;;  %v890_v15 = vld [vmem:[#allocation4 + $0x14f8] sm:$0xff] }
 0x1ae   : > { %2529 = vmatpush1.bf16.msra.mxu0 %v2528_v62  ;;  %v855_v62 = vld [vmem:[#allocation4 + $0x13e0] sm:$0xff]  ;;  %v2558_v18 = vpack.c.bf16 %v888_v13, %v880_v12  ;;  %v928_v51 = vld [vmem:[#allocation4 + $0x1628] sm:$0xff] }
 0x1af   : > { %2721 = vmatpush1.bf16.msra.mxu1 %v2720_v28  ;;  %2531 = vmatprep.subr.bf16.mxu0 %v2530_v63  ;;  %v849_v28 = vld [vmem:[#allocation4 + $0x13b0] sm:$0xff]  ;;  %v2742_v63 = vpack.c.bf16 %v858_v57, %v850_v56  ;;  %v2552_v5 = vpack.c.bf16 %v855_v62, %v847_v61  ;;  %v936_v21 = vld [vmem:[#allocation4 + $0x1668] sm:$0xff]  ;;  %v927_v57 = vld [vmem:[#allocation4 + $0x1620] sm:$0xff] }
 0x1b0   : > { %2723 = vmatprep.subr.bf16.mxu1 %v2722_v3  ;;  %v866_v3 = vld [vmem:[#allocation4 + $0x1438] sm:$0xff]  ;;  %v2744_v6 = vpack.c.bf16 %v857_v0, %v849_v28  ;;  %v2570_v56 = vpack.c.bf16 %v936_v21, %v928_v51  ;;  %v937_v61 = vld [vmem:[#allocation4 + $0x1670] sm:$0xff]  ;;  %v944_v62 = vld [vmem:[#allocation4 + $0x16a8] sm:$0xff] }
 0x1b1   : > { %v952_v28 = vld [vmem:[#allocation4 + $0x16e8] sm:$0xff]  ;;  %v954_v0 = vld [vmem:[#allocation4 + $0x16f8] sm:$0xff] }
 0x1b2   : > { %2533 = vmatpush1.bf16.msra.mxu0 %v2532_v9  ;;  %v871_v9 = vld [vmem:[#allocation4 + $0x1460] sm:$0xff] }
 0x1b3   : > { %2725 = vmatpush1.bf16.msra.mxu1 %v2724_v10  ;;  %2535 = vmatprep.subr.bf16.mxu0 %v2534_v19  ;;  %v865_v10 = vld [vmem:[#allocation4 + $0x1430] sm:$0xff]  ;;  %v2746_v19 = vpack.c.bf16 %v874_v4, %v866_v3  ;;  %v2556_v17 = vpack.c.bf16 %v871_v9, %v863_v8  ;;  %v2574_v3 = vpack.c.bf16 %v952_v28, %v944_v62  ;;  %v943_v4 = vld [vmem:[#allocation4 + $0x16a0] sm:$0xff]  ;;  %v960_v9 = vld [vmem:[#allocation4 + $0x1728] sm:$0xff] }
 0x1b4   : > { %2727 = vmatprep.subr.bf16.mxu1 %v2726_v14  ;;  %v882_v14 = vld [vmem:[#allocation4 + $0x14b8] sm:$0xff]  ;;  %v2748_v26 = vpack.c.bf16 %v873_v11, %v865_v10  ;;  %v953_v8 = vld [vmem:[#allocation4 + $0x16f0] sm:$0xff]  ;;  %v968_v10 = vld [vmem:[#allocation4 + $0x1768] sm:$0xff] }
 0x1b5   : > { %v970_v11 = vld [vmem:[#allocation4 + $0x1778] sm:$0xff] }
 0x1b6   : > { %2537 = vmatpush1.bf16.msra.mxu0 %v2536_v22  ;;  %v887_v22 = vld [vmem:[#allocation4 + $0x14e0] sm:$0xff] }
 0x1b7   : > { %2729 = vmatpush1.bf16.msra.mxu1 %v2728_v38  ;;  %2539 = vmatprep.subr.bf16.mxu0 %v2538_v23  ;;  %v881_v38 = vld [vmem:[#allocation4 + $0x14b0] sm:$0xff]  ;;  %v2750_v23 = vpack.c.bf16 %v890_v15, %v882_v14  ;;  %v2560_v31 = vpack.c.bf16 %v887_v22, %v879_v20  ;;  %v2578_v14 = vpack.c.bf16 %v968_v10, %v960_v9  ;;  %v959_v15 = vld [vmem:[#allocation4 + $0x1720] sm:$0xff]  ;;  %v976_v22 = vld [vmem:[#allocation4 + $0x17a8] sm:$0xff] }
 0x1b8   : > { %2731 = vmatprep.subr.bf16.mxu1 %v2730_v29  ;;  %v898_v29 = vld [vmem:[#allocation4 + $0x1538] sm:$0xff]  ;;  %v2752_v32 = vpack.c.bf16 %v889_v24, %v881_v38  ;;  %v969_v20 = vld [vmem:[#allocation4 + $0x1770] sm:$0xff]  ;;  %v984_v38 = vld [vmem:[#allocation4 + $0x17e8] sm:$0xff] }
 0x1b9   : > { %v986_v24 = vld [vmem:[#allocation4 + $0x17f8] sm:$0xff] }
 0x1ba   : > { %2541 = vmatpush1.bf16.msra.mxu0 %v2540_v35  ;;  %v903_v35 = vld [vmem:[#allocation4 + $0x1560] sm:$0xff] }
 0x1bb   : > { %2733 = vmatpush1.bf16.msra.mxu1 %v2732_v36  ;;  %2543 = vmatprep.subr.bf16.mxu0 %v2542_v37  ;;  %v897_v36 = vld [vmem:[#allocation4 + $0x1530] sm:$0xff]  ;;  %v2754_v37 = vpack.c.bf16 %v906_v30, %v898_v29  ;;  %v2564_v43 = vpack.c.bf16 %v903_v35, %v895_v34  ;;  %v2582_v29 = vpack.c.bf16 %v984_v38, %v976_v22  ;;  %v975_v30 = vld [vmem:[#allocation4 + $0x17a0] sm:$0xff] }
 0x1bc   : > { %2735 = vmatprep.subr.bf16.mxu1 %v2734_v42  ;;  %v914_v42 = vld [vmem:[#allocation4 + $0x15b8] sm:$0xff]  ;;  %v2756_v44 = vpack.c.bf16 %v905_v39, %v897_v36  ;;  %v985_v34 = vld [vmem:[#allocation4 + $0x17f0] sm:$0xff]  ;;  %v989_v39 = vlaneseq }
 0x1be   : > { %2545 = vmatpush1.bf16.msra.mxu0 %v2544_v47  ;;  %v919_v47 = vld [vmem:[#allocation4 + $0x15e0] sm:$0xff]  ;;  %v990_v40 = vshrl.u32 %v989_v39, 7 }
 0x1bf   : > { %2737 = vmatpush1.bf16.msra.mxu1 %v2736_v48  ;;  %2547 = vmatprep.subr.bf16.mxu0 %v2546_v49  ;;  %v913_v48 = vld [vmem:[#allocation4 + $0x15b0] sm:$0xff]  ;;  %v2758_v49 = vpack.c.bf16 %v922_v16, %v914_v42  ;;  %v2568_v54 = vpack.c.bf16 %v919_v47, %v911_v46  ;;  %v987_v42 = vld [vmem:[#allocation6] sm:$0xff] }
 0x1c0   : > { %2739 = vmatprep.subr.bf16.mxu1 %v2738_v52  ;;  %v930_v52 = vld [vmem:[#allocation4 + $0x1638] sm:$0xff]  ;;  %v2760_v55 = vpack.c.bf16 %v921_v50, %v913_v48  ;;  %v991_v41 = vsub.s32 0, %v990_v40  ;;  %v999_v16 = vsub.s32 2, %v990_v40 }
 0x1c2   : > { %2549 = vmatpush1.bf16.msra.mxu0 %v2548_v58  ;;  %v935_v58 = vld [vmem:[#allocation4 + $0x1660] sm:$0xff]  ;;  %v1000_v46 = vrot.slane %v987_v42, %v999_v16 }
 0x1c3   : > { %2741 = vmatpush1.bf16.msra.mxu1 %v2740_v59  ;;  %2551 = vmatprep.subr.bf16.mxu0 %v2550_v60  ;;  %v929_v59 = vld [vmem:[#allocation4 + $0x1630] sm:$0xff]  ;;  %v2762_v60 = vpack.c.bf16 %v938_v53, %v930_v52  ;;  %v2572_v1 = vpack.c.bf16 %v935_v58, %v927_v57  ;;  %v1007_v58 = vsub.s32 4, %v990_v40 }
 0x1c4   : > { %2743 = vmatprep.subr.bf16.mxu1 %v2742_v63  ;;  %v946_v63 = vld [vmem:[#allocation4 + $0x16b8] sm:$0xff]  ;;  %v2764_v2 = vpack.c.bf16 %v937_v61, %v929_v59  ;;  %v1015_v59 = vsub.s32 6, %v990_v40  ;;  %v1019_v61 = vsub.s32 7, %v990_v40 }
 0x1c5   : > { %v1008_v62 = vrot.slane %v987_v42, %v1007_v58 }
 0x1c6   : > { %2553 = vmatpush1.bf16.msra.mxu0 %v2552_v5  ;;  %v951_v5 = vld [vmem:[#allocation4 + $0x16e0] sm:$0xff]  ;;  %v1016_v28 = vrot.slane %v987_v42, %v1015_v59 }
 0x1c7   : > { %2745 = vmatpush1.bf16.msra.mxu1 %v2744_v6  ;;  %2555 = vmatprep.subr.bf16.mxu0 %v2554_v7  ;;  %v945_v6 = vld [vmem:[#allocation4 + $0x16b0] sm:$0xff]  ;;  %v2766_v7 = vpack.c.bf16 %v954_v0, %v946_v63  ;;  %v2576_v12 = vpack.c.bf16 %v951_v5, %v943_v4  ;;  %v1020_v0 = vrot.slane %v987_v42, %v1019_v61 }
 0x1c8   : > { %2747 = vmatprep.subr.bf16.mxu1 %v2746_v19  ;;  %v962_v19 = vld [vmem:[#allocation4 + $0x1738] sm:$0xff]  ;;  %v2768_v13 = vpack.c.bf16 %v953_v8, %v945_v6 }
 0x1ca   : > { %2557 = vmatpush1.bf16.msra.mxu0 %v2556_v17  ;;  %v967_v17 = vld [vmem:[#allocation4 + $0x1760] sm:$0xff] }
 0x1cb   : > { %2749 = vmatpush1.bf16.msra.mxu1 %v2748_v26  ;;  %2559 = vmatprep.subr.bf16.mxu0 %v2558_v18  ;;  %v961_v26 = vld [vmem:[#allocation4 + $0x1730] sm:$0xff]  ;;  %v2770_v18 = vpack.c.bf16 %v970_v11, %v962_v19  ;;  %v2580_v25 = vpack.c.bf16 %v967_v17, %v959_v15 }
 0x1cc   : > { %2751 = vmatprep.subr.bf16.mxu1 %v2750_v23  ;;  %v978_v23 = vld [vmem:[#allocation4 + $0x17b8] sm:$0xff]  ;;  %v2772_v27 = vpack.c.bf16 %v969_v20, %v961_v26 }
 0x1ce   : > { %2561 = vmatpush1.bf16.msra.mxu0 %v2560_v31  ;;  %v983_v31 = vld [vmem:[#allocation4 + $0x17e0] sm:$0xff] }
 0x1cf   : > { %2753 = vmatpush1.bf16.msra.mxu1 %v2752_v32  ;;  %2563 = vmatprep.subr.bf16.mxu0 %v2562_v33  ;;  %v2774_v32 = vpack.c.bf16 %v986_v24, %v978_v23  ;;  %v977_v33 = vld [vmem:[#allocation4 + $0x17b0] sm:$0xff]  ;;  %v2584_v35 = vpack.c.bf16 %v983_v31, %v975_v30 }
 0x1d0   : > { %2755 = vmatprep.subr.bf16.mxu1 %v2754_v37  ;;  %v2776_v36 = vpack.c.bf16 %v985_v34, %v977_v33  ;;  %v2872_v37 = vld [vmem:[%s3170_s23 + $0x10] sm:$0xff] }
 0x1d2   : > { %2565 = vmatpush1.bf16.msra.mxu0 %v2564_v43  ;;  %v995_v43 = vsub.s32 1, %v990_v40 }
 0x1d3   : > { %2757 = vmatpush1.bf16.msra.mxu1 %v2756_v44  ;;  %2567 = vmatprep.subr.bf16.mxu0 %v2566_v45  ;;  %v1003_v44 = vsub.s32 3, %v990_v40  ;;  %v992_v45 = vrot.slane %v987_v42, %v991_v41 }
 0x1d4   : > { %2759 = vmatprep.subr.bf16.mxu1 %v2758_v49  ;;  %v996_v47 = vrot.slane %v987_v42, %v995_v43 }
 0x1d5   : > { %v1004_v48 = vrot.slane %v987_v42, %v1003_v44 }
 0x1d6   : > { %2569 = vmatpush1.bf16.msra.mxu0 %v2568_v54 }
 0x1d7   : > { %2761 = vmatpush1.bf16.msra.mxu1 %v2760_v55  ;;  %2571 = vmatprep.subr.bf16.mxu0 %v2570_v56 }
 0x1d8   : > { %2763 = vmatprep.subr.bf16.mxu1 %v2762_v60  ;;  %v1011_v60 = vsub.s32 5, %v990_v40 }
 0x1da   : > { %2573 = vmatpush1.bf16.msra.mxu0 %v2572_v1  ;;  %v1012_v63 = vrot.slane %v987_v42, %v1011_v60 }
 0x1db   : > { %2765 = vmatpush1.bf16.msra.mxu1 %v2764_v2  ;;  %2575 = vmatprep.subr.bf16.mxu0 %v2574_v3 }
 0x1dc   : > { %2767 = vmatprep.subr.bf16.mxu1 %v2766_v7 }
 0x1de   : > { %2577 = vmatpush1.bf16.msra.mxu0 %v2576_v12 }
 0x1df   : > { %2769 = vmatpush1.bf16.msra.mxu1 %v2768_v13  ;;  %2579 = vmatprep.subr.bf16.mxu0 %v2578_v14 }
 0x1e0   : > { %2771 = vmatprep.subr.bf16.mxu1 %v2770_v18 }
 0x1e2   : > { %2581 = vmatpush1.bf16.msra.mxu0 %v2580_v25 }
 0x1e3   : > { %2773 = vmatpush1.bf16.msra.mxu1 %v2772_v27  ;;  %2583 = vmatprep.subr.bf16.mxu0 %v2582_v29 }
 0x1e4   : > { %2775 = vmatprep.subr.bf16.mxu1 %v2774_v32 }
 0x1e6   : > { %2585 = vmatpush1.bf16.msra.mxu0 %v2584_v35 }
 0x1e7   : > { %2777 = vmatpush1.bf16.msra.mxu1 %v2776_v36 }
 0x1e9   : > { %1671 = vmatmul.mubr.f32.vlgmr.msra.gmra.mrb[2].mxu0 %v2872_v37 }
 0x1ea   : > { %1884 = vmatmul.mubr.f32.vlgmr.msra.gmra.mrb[2].mxu1 %v2872_v37 }
 0x1fc   : > { %v1246_v49 = vpop.f32.mrb[0].mxu0 }
 0x1fd   : > { %v2778_v50 = vadd.f32 %v1246_v49, %v992_v45  ;;  %v1459_v51 = vpop.f32.mrb[0].mxu1  ;;  %v1248_v21 = vpop.f32.mrb[1].mxu0 }
 0x1fe   : > { %v2780_v52 = vadd.f32 %v1459_v51, %v1000_v46  ;;  %v2779_v53 = vadd.f32 %v1248_v21, %v996_v47  ;;  %v1461_v54 = vpop.f32.mrb[1].mxu1 }
 0x1ff   : > { %v2781_v55 = vadd.f32 %v1461_v54, %v1004_v48 }
 0x200   : > { %v1898_v56 = vcombine.low %v2778_v50, %v2779_v53 }
 0x201   : > { %v1899_v57 = vcombine.low %v2780_v52, %v2781_v55 }
 0x202   : > { %1906 = vst [vmem:[%s215_s7] sm:$0xff] %v1898_v56 }
 0x203   : > { %1907 = vst [vmem:[%s215_s7 + $0x8] sm:$0xff] %v1899_v57 }
 0x2bc   : > { %v1672_v1 = vpop.f32.mrb[2].mxu0 }
 0x2bd   : > { %v2782_v2 = vadd.f32 %v1672_v1, %v1008_v62  ;;  %v1885_v3 = vpop.f32.mrb[2].mxu1  ;;  %v1674_v4 = vpop.f32.mrb[3].mxu0 }
 0x2be   : > { %v2784_v5 = vadd.f32 %v1885_v3, %v1016_v28  ;;  %v2783_v6 = vadd.f32 %v1674_v4, %v1012_v63  ;;  %v1887_v7 = vpop.f32.mrb[3].mxu1 }
 0x2bf   : > { %v2785_v8 = vadd.f32 %v1887_v7, %v1020_v0 }
 0x2c0   : > { %v1900_v9 = vcombine.low %v2782_v2, %v2783_v6 }
 0x2c1   : > { %v1901_v10 = vcombine.low %v2784_v5, %v2785_v8 }
 0x2c2   : > { %1908 = vst [vmem:[%s215_s7 + $0x10] sm:$0xff] %v1900_v9 }
 0x2c3   : > { %1909 = vst [vmem:[%s215_s7 + $0x18] sm:$0xff] %v1901_v10 }
 0x2c4 PF: > { %p14_p9 = scmp.ge.s32.totalorder %s3117_s27, 4   ;;  %s3255_s12 = smov %s2989_s13 }
 0x2c5   : > { %s3256_s13 = smov %s2993_s14  ;;  %s3257_s14 = smov %s3128_s30 }
 0x2c6   : > { %s3258_s15 = smov %s3117_s27  ;;  %16 = sbr.rel (!%p14_p9) target bundleno = 4 (0x4), region = 80 }
 0x2cd   :  { %1931 = vsyncpa [#allocation3], 1 }
 0x2ce   :  { %1933 = vsyncpa [#allocation3 + $0x1], 1 }
 0x2cf   :  { %1934 = vsyncpa [#allocation5], 1 }

// kernel: forward.3
= control target key start
LH: loop header
LB: loop body
LE: loop exit
PB: predicated region body
PF: predicated region fallthrough
CT: control target
= control target key end

     0   :  { %s15205_s0 = inlined_call_operand.vmem [shape: f32[2,256,8], index: 0, kind: input, shape index: {}]   ;;  %s15206_s1 = inlined_call_operand.vmem [shape: f32[2,32,128], index: 1, kind: input, shape index: {}]   ;;  %s15207_s2 = inlined_call_operand.vmem [shape: f32[9,64,256], index: 2, kind: input, shape index: {}]   ;;  %s15208_s3 = inlined_call_operand.vmem [shape: f32[9,8,32], index: 3, kind: input, shape index: {}]   ;;  %s15209_s4 = inlined_call_operand.vmem [shape: f32[1,32], index: 4, kind: input, shape index: {}]   ;;  %s15210_s5 = inlined_call_operand.vmem [shape: f32[9,16,64], index: 5, kind: input, shape index: {}]   ;;  %s15211_s6 = inlined_call_operand.vmem [shape: f32[9,32,64], index: 6, kind: input, shape index: {}]   ;;  %s15212_s7 = inlined_call_operand.vmem [shape: f32[1,64], index: 7, kind: input, shape index: {}]   ;;  %s15213_s8 = inlined_call_operand.vmem [shape: f32[9,4,16], index: 8, kind: input, shape index: {}]   ;;  %s15214_s9 = inlined_call_operand.vmem [shape: f32[9,64,128], index: 9, kind: input, shape index: {}]   ;;  %s15215_s10 = inlined_call_operand.vmem [shape: f32[1,128], index: 10, kind: input, shape index: {}]   ;;  %s15216_s11 = inlined_call_operand.vmem [shape: f32[128,256], index: 11, kind: input, shape index: {}]   ;;  %s15217_s12 = inlined_call_operand.vmem [shape: f32[1,256], index: 12, kind: input, shape index: {}]   ;;  %s15218_s13 = inlined_call_operand.vmem [shape: f32[128,128], index: 13, kind: input, shape index: {}]   ;;  %s15219_s14 = inlined_call_operand.vmem [shape: f32[1,128], index: 14, kind: input, shape index: {}]   ;;  %s15220_s15 = inlined_call_operand.vmem [shape: f32[128,128], index: 15, kind: input, shape index: {}]   ;;  %s15221_s16 = inlined_call_operand.vmem [shape: f32[1,128], index: 16, kind: input, shape index: {}]   ;;  %s15222_s17 = inlined_call_operand.vmem [shape: f32[128,128], index: 17, kind: input, shape index: {}]   ;;  %s15223_s18 = inlined_call_operand.vmem [shape: f32[1,128], index: 18, kind: input, shape index: {}]   ;;  %s15224_s19 = inlined_call_operand.vmem [shape: f32[128,128], index: 19, kind: input, shape index: {}]   ;;  %s15225_s20 = inlined_call_operand.vmem [shape: f32[1,128], index: 20, kind: input, shape index: {}]   ;;  %s15226_s21 = inlined_call_operand.vmem [shape: f32[2,1,128], index: 21, kind: output, shape index: {0}]   ;;  %s15227_s22 = inlined_call_operand.hbm [shape: f32[2,1,128], index: 22, kind: output, shape index: {1}]   ;;  %s15228_s23 = inlined_call_operand.vmem [shape: f32[2,32,128], index: 23, kind: output, shape index: {2}]  }
   0x1   :  { %15242 = sst [smem:[#allocation11_spill]] %s15205_s0 }
   0x2   :  { %15243 = sst [smem:[#allocation12_spill]] %s15206_s1 }
   0x3   :  { %15244 = sst [smem:[#allocation13_spill]] %s15207_s2 }
   0x4   :  { %15245 = sst [smem:[#allocation14_spill]] %s15208_s3 }
   0x5   :  { %15246 = sst [smem:[#allocation15_spill]] %s15209_s4 }
   0x6   :  { %15247 = sst [smem:[#allocation16_spill]] %s15210_s5 }
   0x7   :  { %15248 = sst [smem:[#allocation17_spill]] %s15211_s6 }
   0x8   :  { %15249 = sst [smem:[#allocation18_spill]] %s15212_s7 }
   0x9   :  { %15250 = sst [smem:[#allocation19_spill]] %s15213_s8 }
   0xa   :  { %15251 = sst [smem:[#allocation20_spill]] %s15226_s21 }
   0xb   :  { %29 = vsyncpa [#allocation3], 0 }
   0xc   :  { %31 = vsyncpa [#allocation3 + $0x1], 0  ;;  %s12760_s4 = smov 0   ;;  %s12762_s30 = smov 0  }
   0xd   :  { %s12764_s24 = smov 0   ;;  %s12766_s25 = smov 0  }
   0xe LB: > { %15252 = sst [smem:[#allocation5_spill]] %s12615_s4  ;;  %s12781_s5 = sadd.s32 4294967295, %s12627_s25   ;;  %s12627_s25 = sphi %s12766_s25, %s15273_s25   ;;  %s12623_s24 = sphi %s12764_s24, %s15275_s24   ;;  %s12619_s30 = sphi %s12762_s30, %s15277_s30   ;;  %s12615_s4 = sphi %s12760_s4, %s15276_s4  }
   0xf   : > { %15253 = sst [smem:[#allocation6_spill]] %s12623_s24  ;;  %s9209_s1 = sadd.s32 4294967294, %s12627_s25  }
  0x10   : > { %15254 = sst [smem:[#allocation7_spill]] %s12627_s25  ;;  %s12785_s26 = sadd.s32 1, %s12627_s25  }
  0x11   : > { %15255 = sst [smem:[#allocation8_spill]] %s12785_s26  ;;  %s521_s2 = sadd.s32 1, %s12623_s24 }
  0x12   : > { %s518_s6 = ssub.s32 %s12627_s25, %s12785_s26  ;;  %p531_p0 = scmp.ne.s32.totalorder %s12623_s24, %s12619_s30 }
  0x13   : > { %p519_p1 = scmp.eq.s32.totalorder %s518_s6, 0  ;;  %p532_p2 = scmp.eq.s32.totalorder %s12781_s5, 1 }
  0x14   : > { %p537_p3 = scmp.ne.s32.totalorder %s12619_s30, %s12615_s4  ;;  %p538_p4 = scmp.eq.s32.totalorder %s9209_s1, 1 }
  0x15   : > { %s12796_s27 = scalar_select %p519_p1, %s12623_s24, %s521_s2  }
  0x16   : > { %p12798_p5 = por %p532_p2, %p531_p0  ;;  %p12802_p6 = por %p538_p4, %p537_p3 }
  0x17   : > { %15256 = sst [smem:[#allocation9_spill]] %s12796_s27  ;;  %p9212_p7 = scmp.ge.s32.totalorder %s12627_s25, 1 }
  0x18   : > { %s15258_s28 = scalar_select %p12802_p6, 1, 0 }
  0x19   : > { %p655_p8 = scmp.lt.s32.totalorder %s12627_s25, 3 }
  0x1a   : > { %15259 = sst [smem:[#allocation10_spill]] %s15258_s28 }
  0x1b   : > { %p656_p9 = pnand %p9212_p7, %p655_p8 }
  0x1c   : > { %p731_p10 = scmp.lt.s32.totalorder (!%p656_p9), %s12781_s5, 1  ;;  %s15260_s0 = sld [smem:[#allocation13_spill]] (!%p656_p9)  ;;  %vm1027_vm0 = vcmask (!%p656_p9), 64512   ;;  %vm3138_vm1 = vcmask (!%p656_p9), 523264   ;;  %vm3313_vm2 = vcmask (!%p656_p9), 261120   ;;  %vm12630_vm3 = vmmov (!%p656_p9), 0  }
  0x1d   : > { %659 = sbr.rel (%p656_p9) target bundleno = 7452 (0x1d1c), region = 104  ;;  %s15261_s28 = sld [smem:[#allocation11_spill]] (!%p656_p9)  ;;  %vm4692_vm4 = vcmask (!%p656_p9), 130048   ;;  %vm6405_vm5 = vcmask (!%p656_p9), 1043456   ;;  %vm6338_vm6 = vcmask (!%p656_p9), 31744  }
  0x1e   : > { %s15262_s2 = sld [smem:[#allocation14_spill]] (!%p656_p9)  ;;  %s15263_s29 = sld [smem:[#allocation16_spill]] (!%p656_p9) }
  0x1f   : > { %s15264_s26 = sld [smem:[#allocation15_spill]] (!%p656_p9)  ;;  %s15265_s3 = sld [smem:[#allocation17_spill]] (!%p656_p9) }
  0x20   : > { %s15266_s25 = sld [smem:[#allocation18_spill]] (!%p656_p9)  ;;  %s15267_s8 = sld [smem:[#allocation19_spill]] (!%p656_p9) }
  0x21   : > { %s12634_s21 = smov (!%p656_p9), 80   ;;  %s12636_s24 = smov (!%p656_p9), 48  }
  0x22   : > { %v9220_v0 = vld [vmem:[%s15260_s0 + $0x88] sm:$0xff] (!%p656_p9)  ;;  %v9219_v50 = vld [vmem:[%s15260_s0 + $0x80] sm:$0xff] (!%p656_p9)  ;;  %v9222_v52 = vld [vmem:[%s15260_s0 + $0x98] sm:$0xff] (!%p656_p9) }
  0x23   : > { %984 = vmatprep.mubr.f32.mxu1 (!%p656_p9), %v9220_v0  ;;  %v782_v1 = vld [vmem:[%s15260_s0 + $0x8] sm:$0xff] (!%p656_p9)  ;;  %v781_v51 = vld [vmem:[%s15260_s0] sm:$0xff] (!%p656_p9)  ;;  %v784_v53 = vld [vmem:[%s15260_s0 + $0x18] sm:$0xff] (!%p656_p9) }
  0x24   : > { %s12813_s1 = scalar_select %p731_p10, %s12781_s5, 1  ;;  %861 = vmatprep.mubr.f32.mxu0 %v782_v1  ;;  %v9221_v54 = vld [vmem:[%s15260_s0 + $0x90] sm:$0xff]  ;;  %v9224_v56 = vld [vmem:[%s15260_s0 + $0xa8] sm:$0xff]  ;;  %v9223_v58 = vld [vmem:[%s15260_s0 + $0xa0] sm:$0xff] }
  0x25   : > { %v783_v55 = vld [vmem:[%s15260_s0 + $0x10] sm:$0xff]  ;;  %v786_v57 = vld [vmem:[%s15260_s0 + $0x28] sm:$0xff]  ;;  %v785_v59 = vld [vmem:[%s15260_s0 + $0x20] sm:$0xff] }
  0x26   : > { %s9671_s27 = sshll.u32 %s12813_s1, 8  ;;  %v9226_v60 = vld [vmem:[%s15260_s0 + $0xb8] sm:$0xff]  ;;  %v9225_v62 = vld [vmem:[%s15260_s0 + $0xb0] sm:$0xff]  ;;  %v9228_v0 = vld [vmem:[%s15260_s0 + $0xc8] sm:$0xff]  ;;  %s9672_s6 = sshll.u32 %s12813_s1, 5 }
  0x27   : > { %s12822_s4 = scalar_lea.vmem %s15261_s28, %s9671_s27  ;;  %v788_v61 = vld [vmem:[%s15260_s0 + $0x38] sm:$0xff]  ;;  %v787_v63 = vld [vmem:[%s15260_s0 + $0x30] sm:$0xff]  ;;  %v790_v1 = vld [vmem:[%s15260_s0 + $0x48] sm:$0xff]  ;;  %s12632_s27 = smov 112  }
  0x28   : > { %v765_v2 = vld [vmem:[%s12822_s4 + $0x80] sm:$0xff]  ;;  %v766_v3 = vld [vmem:[%s12822_s4 + $0x88] sm:$0xff]  ;;  %v767_v7 = vld [vmem:[%s12822_s4 + $0x90] sm:$0xff]  ;;  %s12639_s28 = smov [#allocation2]  }
  0x29   : > { %v749_v4 = vld [vmem:[%s12822_s4] sm:$0xff]  ;;  %v12827_v5 = vpack.c.bf16 %v766_v3, %v765_v2  ;;  %v750_v6 = vld [vmem:[%s12822_s4 + $0x8] sm:$0xff]  ;;  %v768_v8 = vld [vmem:[%s12822_s4 + $0x98] sm:$0xff] }
  0x2a   : > { %v12832_v9 = vpack.c.bf16 %v750_v6, %v749_v4  ;;  %v12834_v10 = vpack.c.bf16 %v768_v8, %v767_v7  ;;  %v751_v11 = vld [vmem:[%s12822_s4 + $0x10] sm:$0xff]  ;;  %v752_v12 = vld [vmem:[%s12822_s4 + $0x18] sm:$0xff]  ;;  %v769_v13 = vld [vmem:[%s12822_s4 + $0xa0] sm:$0xff] }
  0x2b   : > { %11570 = vmatprep.subr.bf16.mxu1 %v12827_v5  ;;  %v770_v14 = vld [vmem:[%s12822_s4 + $0xa8] sm:$0xff]  ;;  %11538 = vmatprep.subr.bf16.mxu0 %v12827_v5  ;;  %v12843_v15 = vpack.c.bf16 %v752_v12, %v751_v11  ;;  %v753_v17 = vld [vmem:[%s12822_s4 + $0x20] sm:$0xff]  ;;  %v771_v19 = vld [vmem:[%s12822_s4 + $0xb0] sm:$0xff] }
  0x2c   : > { %11572 = vmatpush3.bf16.msra.mxu1 %v12832_v9  ;;  %11540 = vmatpush3.bf16.msra.mxu0 %v12832_v9  ;;  %v12847_v16 = vpack.c.bf16 %v770_v14, %v769_v13  ;;  %v754_v18 = vld [vmem:[%s12822_s4 + $0x28] sm:$0xff]  ;;  %v772_v20 = vld [vmem:[%s12822_s4 + $0xb8] sm:$0xff]  ;;  %v755_v23 = vld [vmem:[%s12822_s4 + $0x30] sm:$0xff] }
  0x2d   : > { %11574 = vmatprep.subr.bf16.mxu1 %v12834_v10  ;;  %11542 = vmatprep.subr.bf16.mxu0 %v12834_v10  ;;  %v12855_v21 = vpack.c.bf16 %v754_v18, %v753_v17  ;;  %v12859_v22 = vpack.c.bf16 %v772_v20, %v771_v19  ;;  %v756_v24 = vld [vmem:[%s12822_s4 + $0x38] sm:$0xff]  ;;  %v773_v25 = vld [vmem:[%s12822_s4 + $0xc0] sm:$0xff]  ;;  %v774_v26 = vld [vmem:[%s12822_s4 + $0xc8] sm:$0xff] }
  0x2e   : > { %v12867_v27 = vpack.c.bf16 %v756_v24, %v755_v23  ;;  %v12871_v28 = vpack.c.bf16 %v774_v26, %v773_v25  ;;  %v757_v29 = vld [vmem:[%s12822_s4 + $0x40] sm:$0xff]  ;;  %v758_v30 = vld [vmem:[%s12822_s4 + $0x48] sm:$0xff]  ;;  %v775_v31 = vld [vmem:[%s12822_s4 + $0xd0] sm:$0xff] }
  0x2f   : > { %v776_v32 = vld [vmem:[%s12822_s4 + $0xd8] sm:$0xff]  ;;  %v12879_v33 = vpack.c.bf16 %v758_v30, %v757_v29  ;;  %v759_v35 = vld [vmem:[%s12822_s4 + $0x50] sm:$0xff]  ;;  %v777_v37 = vld [vmem:[%s12822_s4 + $0xe0] sm:$0xff] }
  0x30   : > { %11576 = vmatpush3.bf16.msra.mxu1 %v12843_v15  ;;  %11544 = vmatpush3.bf16.msra.mxu0 %v12843_v15  ;;  %v12883_v34 = vpack.c.bf16 %v776_v32, %v775_v31  ;;  %v760_v36 = vld [vmem:[%s12822_s4 + $0x58] sm:$0xff]  ;;  %v778_v38 = vld [vmem:[%s12822_s4 + $0xe8] sm:$0xff]  ;;  %v761_v41 = vld [vmem:[%s12822_s4 + $0x60] sm:$0xff] }
  0x31   : > { %11578 = vmatprep.subr.bf16.mxu1 %v12847_v16  ;;  %11546 = vmatprep.subr.bf16.mxu0 %v12847_v16  ;;  %v12891_v39 = vpack.c.bf16 %v760_v36, %v759_v35  ;;  %v12895_v40 = vpack.c.bf16 %v778_v38, %v777_v37  ;;  %v762_v42 = vld [vmem:[%s12822_s4 + $0x68] sm:$0xff]  ;;  %v779_v43 = vld [vmem:[%s12822_s4 + $0xf0] sm:$0xff]  ;;  %v780_v44 = vld [vmem:[%s12822_s4 + $0xf8] sm:$0xff] }
  0x32   : > { %v12903_v45 = vpack.c.bf16 %v762_v42, %v761_v41  ;;  %v12907_v46 = vpack.c.bf16 %v780_v44, %v779_v43  ;;  %v763_v47 = vld [vmem:[%s12822_s4 + $0x70] sm:$0xff]  ;;  %v764_v48 = vld [vmem:[%s12822_s4 + $0x78] sm:$0xff]  ;;  %v9227_v2 = vld [vmem:[%s15260_s0 + $0xc0] sm:$0xff] }
  0x33   : > { %v12913_v49 = vpack.c.bf16 %v764_v48, %v763_v47  ;;  %v789_v3 = vld [vmem:[%s15260_s0 + $0x40] sm:$0xff]  ;;  %v9230_v4 = vld [vmem:[%s15260_s0 + $0xd8] sm:$0xff]  ;;  %v9229_v7 = vld [vmem:[%s15260_s0 + $0xd0] sm:$0xff] }
  0x34   : > { %11580 = vmatpush3.bf16.msra.mxu1 %v12855_v21  ;;  %11548 = vmatpush3.bf16.msra.mxu0 %v12855_v21  ;;  %v792_v6 = vld [vmem:[%s15260_s0 + $0x58] sm:$0xff]  ;;  %v791_v8 = vld [vmem:[%s15260_s0 + $0x50] sm:$0xff]  ;;  %v9232_v11 = vld [vmem:[%s15260_s0 + $0xe8] sm:$0xff] }
  0x35   : > { %11582 = vmatprep.subr.bf16.mxu1 %v12859_v22  ;;  %11550 = vmatprep.subr.bf16.mxu0 %v12859_v22  ;;  %v794_v12 = vld [vmem:[%s15260_s0 + $0x68] sm:$0xff]  ;;  %v9231_v13 = vld [vmem:[%s15260_s0 + $0xe0] sm:$0xff]  ;;  %v9234_v17 = vld [vmem:[%s15260_s0 + $0xf8] sm:$0xff] }
  0x36   : > { %v793_v14 = vld [vmem:[%s15260_s0 + $0x60] sm:$0xff]  ;;  %v796_v18 = vld [vmem:[%s15260_s0 + $0x78] sm:$0xff]  ;;  %v9233_v19 = vld [vmem:[%s15260_s0 + $0xf0] sm:$0xff] }
  0x37   : > { %v795_v20 = vld [vmem:[%s15260_s0 + $0x70] sm:$0xff]  ;;  %v9253_v23 = vld [vmem:[%s15260_s0 + $0x108] sm:$0xff]  ;;  %v9252_v24 = vld [vmem:[%s15260_s0 + $0x100] sm:$0xff] }
  0x38   : > { %11584 = vmatpush3.bf16.msra.mxu1 %v12867_v27  ;;  %11552 = vmatpush3.bf16.msra.mxu0 %v12867_v27  ;;  %v9255_v25 = vld [vmem:[%s15260_s0 + $0x118] sm:$0xff]  ;;  %v9254_v26 = vld [vmem:[%s15260_s0 + $0x110] sm:$0xff]  ;;  %v9257_v29 = vld [vmem:[%s15260_s0 + $0x128] sm:$0xff] }
  0x39   : > { %11586 = vmatprep.subr.bf16.mxu1 %v12871_v28  ;;  %11554 = vmatprep.subr.bf16.mxu0 %v12871_v28  ;;  %v9256_v30 = vld [vmem:[%s15260_s0 + $0x120] sm:$0xff]  ;;  %v9259_v31 = vld [vmem:[%s15260_s0 + $0x138] sm:$0xff]  ;;  %v9258_v32 = vld [vmem:[%s15260_s0 + $0x130] sm:$0xff] }
  0x3a   : > { %v9261_v35 = vld [vmem:[%s15260_s0 + $0x148] sm:$0xff]  ;;  %v9260_v36 = vld [vmem:[%s15260_s0 + $0x140] sm:$0xff]  ;;  %v9263_v37 = vld [vmem:[%s15260_s0 + $0x158] sm:$0xff] }
  0x3b   : > { %v9262_v38 = vld [vmem:[%s15260_s0 + $0x150] sm:$0xff]  ;;  %v9265_v41 = vld [vmem:[%s15260_s0 + $0x168] sm:$0xff]  ;;  %v9264_v42 = vld [vmem:[%s15260_s0 + $0x160] sm:$0xff] }
  0x3c   : > { %11588 = vmatpush3.bf16.msra.mxu1 %v12879_v33  ;;  %11556 = vmatpush3.bf16.msra.mxu0 %v12879_v33  ;;  %v9267_v43 = vld [vmem:[%s15260_s0 + $0x178] sm:$0xff]  ;;  %v9266_v44 = vld [vmem:[%s15260_s0 + $0x170] sm:$0xff]  ;;  %v9278_v47 = vld [vmem:[%s15260_s0 + $0x188] sm:$0xff] }
  0x3d   : > { %11590 = vmatprep.subr.bf16.mxu1 %v12883_v34  ;;  %11558 = vmatprep.subr.bf16.mxu0 %v12883_v34  ;;  %v9277_v48 = vld [vmem:[%s15260_s0 + $0x180] sm:$0xff] }
  0x40   : > { %11592 = vmatpush3.bf16.msra.mxu1 %v12891_v39  ;;  %11560 = vmatpush3.bf16.msra.mxu0 %v12891_v39 }
  0x41   : > { %11594 = vmatprep.subr.bf16.mxu1 %v12895_v40  ;;  %11562 = vmatprep.subr.bf16.mxu0 %v12895_v40 }
  0x44   : > { %11596 = vmatpush3.bf16.msra.mxu1 %v12903_v45  ;;  %11564 = vmatpush3.bf16.msra.mxu0 %v12903_v45 }
  0x45   : > { %11598 = vmatprep.subr.bf16.mxu1 %v12907_v46  ;;  %11566 = vmatprep.subr.bf16.mxu0 %v12907_v46 }
  0x48   : > { %11600 = vmatpush3.bf16.msra.mxu1 %v12913_v49  ;;  %11568 = vmatpush3.bf16.msra.mxu0 %v12913_v49 }
  0x49   : > { %11602 = vmatprep.subr.bf16.mxu1 %v12827_v5 }
  0x4b   : > { %985 = vmatmul.mubr.f32.vlgmr.msra.gmra.mrb[0].mxu1 %v9219_v50  ;;  %862 = vmatmul.mubr.f32.vlgmr.msra.gmra.mrb[0].mxu0 %v781_v51  ;;  %v9280_v50 = vld [vmem:[%s15260_s0 + $0x198] sm:$0xff]  ;;  %v9279_v51 = vld [vmem:[%s15260_s0 + $0x190] sm:$0xff] }
  0x4c   : > { %11604 = vmatpush3.bf16.msra.mxu1 %v12832_v9  ;;  %989 = vmatprep.mubr.f32.mxu1 %v9222_v52  ;;  %v9282_v52 = vld [vmem:[%s15260_s0 + $0x1a8] sm:$0xff] }
  0x4d   : > { %11606 = vmatprep.subr.bf16.mxu1 %v12834_v10  ;;  %866 = vmatprep.mubr.f32.mxu0 %v784_v53  ;;  %v9281_v53 = vld [vmem:[%s15260_s0 + $0x1a0] sm:$0xff] }
  0x4f   : > { %990 = vmatmul.mubr.f32.gmra.mrb[2].mxu1 %v9221_v54  ;;  %867 = vmatmul.mubr.f32.gmra.mrb[2].mxu0 %v783_v55  ;;  %v9284_v54 = vld [vmem:[%s15260_s0 + $0x1b8] sm:$0xff]  ;;  %v9283_v55 = vld [vmem:[%s15260_s0 + $0x1b0] sm:$0xff] }
  0x50   : > { %11608 = vmatpush3.bf16.msra.mxu1 %v12843_v15  ;;  %994 = vmatprep.mubr.f32.mxu1 %v9224_v56  ;;  %v9286_v56 = vld [vmem:[%s15260_s0 + $0x1c8] sm:$0xff] }
  0x51   : > { %11610 = vmatprep.subr.bf16.mxu1 %v12847_v16  ;;  %871 = vmatprep.mubr.f32.mxu0 %v786_v57  ;;  %v9285_v57 = vld [vmem:[%s15260_s0 + $0x1c0] sm:$0xff] }
  0x53   : > { %995 = vmatmul.mubr.f32.gmra.mrb[4].mxu1 %v9223_v58  ;;  %872 = vmatmul.mubr.f32.gmra.mrb[4].mxu0 %v785_v59  ;;  %v9288_v58 = vld [vmem:[%s15260_s0 + $0x1d8] sm:$0xff]  ;;  %v9287_v59 = vld [vmem:[%s15260_s0 + $0x1d0] sm:$0xff] }
  0x54   : > { %11612 = vmatpush3.bf16.msra.mxu1 %v12855_v21  ;;  %999 = vmatprep.mubr.f32.mxu1 %v9226_v60  ;;  %v9290_v60 = vld [vmem:[%s15260_s0 + $0x1e8] sm:$0xff] }
  0x55   : > { %11614 = vmatprep.subr.bf16.mxu1 %v12859_v22  ;;  %876 = vmatprep.mubr.f32.mxu0 %v788_v61  ;;  %v9289_v61 = vld [vmem:[%s15260_s0 + $0x1e0] sm:$0xff] }
  0x57   : > { %1000 = vmatmul.mubr.f32.gmra.mrb[6].mxu1 %v9225_v62  ;;  %877 = vmatmul.mubr.f32.gmra.mrb[6].mxu0 %v787_v63  ;;  %v9292_v62 = vld [vmem:[%s15260_s0 + $0x1f8] sm:$0xff]  ;;  %v9235_v63 = vld [vmem:[%s15262_s2 + $0x8] sm:$0xff] }
  0x58   : > { %11616 = vmatpush3.bf16.msra.mxu1 %v12867_v27  ;;  %1004 = vmatprep.mubr.f32.mxu1 %v9228_v0  ;;  %v9291_v0 = vld [vmem:[%s15260_s0 + $0x1f0] sm:$0xff] }
  0x59   : > { %11618 = vmatprep.subr.bf16.mxu1 %v12871_v28  ;;  %881 = vmatprep.mubr.f32.mxu0 %v790_v1  ;;  %v9303_v1 = vld [vmem:[%s15260_s0 + $0x208] sm:$0xff] }
  0x5a   : > { %10642 = vmatprep.subr.mxu0 %v9235_v63 }
  0x5b   : > { %1005 = vmatmul.mubr.f32.gmra.mrb[8].mxu1 %v9227_v2  ;;  %882 = vmatmul.mubr.f32.gmra.mrb[8].mxu0 %v789_v3  ;;  %v9302_v2 = vld [vmem:[%s15260_s0 + $0x200] sm:$0xff]  ;;  %v9305_v3 = vld [vmem:[%s15260_s0 + $0x218] sm:$0xff] }
  0x5c   : > { %11620 = vmatpush3.bf16.msra.mxu1 %v12879_v33  ;;  %1009 = vmatprep.mubr.f32.mxu1 %v9230_v4  ;;  %v9304_v4 = vld [vmem:[%s15260_s0 + $0x210] sm:$0xff] }
  0x5d   : > { %11622 = vmatprep.subr.bf16.mxu1 %v12883_v34  ;;  %886 = vmatprep.mubr.f32.mxu0 %v792_v6  ;;  %v9307_v6 = vld [vmem:[%s15260_s0 + $0x228] sm:$0xff] }
  0x5e   : > { %10643 = vmatpush3.msra.mxu0 %v9235_v63 }
  0x5f   : > { %1010 = vmatmul.mubr.f32.gmra.mrb[10].mxu1 %v9229_v7  ;;  %887 = vmatmul.mubr.f32.gmra.mrb[10].mxu0 %v791_v8  ;;  %v9306_v7 = vld [vmem:[%s15260_s0 + $0x220] sm:$0xff]  ;;  %v9309_v8 = vld [vmem:[%s15260_s0 + $0x238] sm:$0xff] }
  0x60   : > { %11624 = vmatpush3.bf16.msra.mxu1 %v12891_v39  ;;  %1014 = vmatprep.mubr.f32.mxu1 %v9232_v11  ;;  %v9308_v11 = vld [vmem:[%s15260_s0 + $0x230] sm:$0xff] }
  0x61   : > { %11626 = vmatprep.subr.bf16.mxu1 %v12895_v40  ;;  %891 = vmatprep.mubr.f32.mxu0 %v794_v12  ;;  %v9311_v12 = vld [vmem:[%s15260_s0 + $0x248] sm:$0xff] }
  0x63   : > { %1015 = vmatmul.mubr.f32.gmra.mrb[12].mxu1 %v9231_v13  ;;  %892 = vmatmul.mubr.f32.gmra.mrb[12].mxu0 %v793_v14  ;;  %v9310_v13 = vld [vmem:[%s15260_s0 + $0x240] sm:$0xff]  ;;  %v9313_v14 = vld [vmem:[%s15260_s0 + $0x258] sm:$0xff] }
  0x64   : > { %11628 = vmatpush3.bf16.msra.mxu1 %v12903_v45  ;;  %1019 = vmatprep.mubr.f32.mxu1 %v9234_v17  ;;  %v9312_v17 = vld [vmem:[%s15260_s0 + $0x250] sm:$0xff] }
  0x65   : > { %11630 = vmatprep.subr.bf16.mxu1 %v12907_v46  ;;  %896 = vmatprep.mubr.f32.mxu0 %v796_v18  ;;  %v9315_v18 = vld [vmem:[%s15260_s0 + $0x268] sm:$0xff] }
  0x67   : > { %1020 = vmatmul.mubr.f32.gmra.mrb[14].mxu1 %v9233_v19  ;;  %897 = vmatmul.mubr.f32.gmra.mrb[14].mxu0 %v795_v20  ;;  %v13210_v19 = vld [vmem:[%s15262_s2] sm:$0xff] }
  0x68   : > { %11632 = vmatpush3.bf16.msra.mxu1 %v12913_v49  ;;  %1367 = vmatprep.mubr.f32.mxu1 %v9253_v23  ;;  %v9314_v20 = vld [vmem:[%s15260_s0 + $0x260] sm:$0xff]  ;;  %v9317_v23 = vld [vmem:[%s15260_s0 + $0x278] sm:$0xff] }
  0x69   : > { %11634 = vmatprep.subr.bf16.mxu1 %v12827_v5  ;;  %10656 = vmatprep.subr.mxu0 %v13210_v19 }
  0x6b   : > { %1368 = vmatmul.mubr.f32.vlgmr.msra.gmra.mrb[16].mxu1 %v9252_v24  ;;  %v9316_v24 = vld [vmem:[%s15260_s0 + $0x270] sm:$0xff] }
  0x6c   : > { %11636 = vmatpush3.bf16.msra.mxu1 %v12832_v9  ;;  %1372 = vmatprep.mubr.f32.mxu1 %v9255_v25  ;;  %v9353_v25 = vld [vmem:[%s15260_s0 + $0x308] sm:$0xff] }
  0x6d   : > { %11638 = vmatprep.subr.bf16.mxu1 %v12834_v10 }
  0x6f   : > { %1373 = vmatmul.mubr.f32.gmra.mrb[18].mxu1 %v9254_v26  ;;  %v9352_v26 = vld [vmem:[%s15260_s0 + $0x300] sm:$0xff] }
  0x70   : > { %11640 = vmatpush3.bf16.msra.mxu1 %v12843_v15  ;;  %1377 = vmatprep.mubr.f32.mxu1 %v9257_v29  ;;  %v9355_v29 = vld [vmem:[%s15260_s0 + $0x318] sm:$0xff] }
  0x71   : > { %11642 = vmatprep.subr.bf16.mxu1 %v12847_v16 }
  0x73   : > { %1378 = vmatmul.mubr.f32.gmra.mrb[20].mxu1 %v9256_v30  ;;  %v9354_v30 = vld [vmem:[%s15260_s0 + $0x310] sm:$0xff] }
  0x74   : > { %11644 = vmatpush3.bf16.msra.mxu1 %v12855_v21  ;;  %1382 = vmatprep.mubr.f32.mxu1 %v9259_v31  ;;  %v9357_v31 = vld [vmem:[%s15260_s0 + $0x328] sm:$0xff] }
  0x75   : > { %11646 = vmatprep.subr.bf16.mxu1 %v12859_v22 }
  0x77   : > { %1383 = vmatmul.mubr.f32.gmra.mrb[22].mxu1 %v9258_v32  ;;  %v9356_v32 = vld [vmem:[%s15260_s0 + $0x320] sm:$0xff] }
  0x78   : > { %11648 = vmatpush3.bf16.msra.mxu1 %v12867_v27  ;;  %1387 = vmatprep.mubr.f32.mxu1 %v9261_v35 }
  0x79   : > { %11650 = vmatprep.subr.bf16.mxu1 %v12871_v28 }
  0x7b   : > { %1388 = vmatmul.mubr.f32.gmra.mrb[24].mxu1 %v9260_v36 }
  0x7c   : > { %11652 = vmatpush3.bf16.msra.mxu1 %v12879_v33  ;;  %1392 = vmatprep.mubr.f32.mxu1 %v9263_v37 }
  0x7d   : > { %11654 = vmatprep.subr.bf16.mxu1 %v12883_v34 }
  0x7f   : > { %1393 = vmatmul.mubr.f32.gmra.mrb[26].mxu1 %v9262_v38 }
  0x80   : > { %11656 = vmatpush3.bf16.msra.mxu1 %v12891_v39  ;;  %1397 = vmatprep.mubr.f32.mxu1 %v9265_v41  ;;  %v9359_v41 = vld [vmem:[%s15260_s0 + $0x338] sm:$0xff] }
  0x81   : > { %11658 = vmatprep.subr.bf16.mxu1 %v12895_v40 }
  0x83   : > { %1398 = vmatmul.mubr.f32.gmra.mrb[28].mxu1 %v9264_v42  ;;  %v9358_v42 = vld [vmem:[%s15260_s0 + $0x330] sm:$0xff] }
  0x84   : > { %11660 = vmatpush3.bf16.msra.mxu1 %v12903_v45  ;;  %1402 = vmatprep.mubr.f32.mxu1 %v9267_v43 }
  0x85   : > { %11662 = vmatprep.subr.bf16.mxu1 %v12907_v46 }
  0x87   : > { %1403 = vmatmul.mubr.f32.gmra.mrb[30].mxu1 %v9266_v44 }
  0x88   : > { %11664 = vmatpush3.bf16.msra.mxu1 %v12913_v49  ;;  %1628 = vmatprep.mubr.f32.mxu1 %v9278_v47 }
  0x89   : > { %11666 = vmatprep.subr.bf16.mxu1 %v12827_v5 }
  0x8b   : > { %1629 = vmatmul.mubr.f32.vlgmr.msra.gmra.mrb[32].mxu1 %v9277_v48 }
  0x8c   : > { %11668 = vmatpush3.bf16.msra.mxu1 %v12832_v9  ;;  %1633 = vmatprep.mubr.f32.mxu1 %v9280_v50 }
  0x8d   : > { %11670 = vmatprep.subr.bf16.mxu1 %v12834_v10 }
  0x8f   : > { %1634 = vmatmul.mubr.f32.gmra.mrb[34].mxu1 %v9279_v51 }
  0x90   : > { %11672 = vmatpush3.bf16.msra.mxu1 %v12843_v15  ;;  %1638 = vmatprep.mubr.f32.mxu1 %v9282_v52  ;;  %v9361_v52 = vld [vmem:[%s15260_s0 + $0x348] sm:$0xff] }
  0x91   : > { %11674 = vmatprep.subr.bf16.mxu1 %v12847_v16 }
  0x93   : > { %1639 = vmatmul.mubr.f32.gmra.mrb[36].mxu1 %v9281_v53  ;;  %v9360_v53 = vld [vmem:[%s15260_s0 + $0x340] sm:$0xff] }
  0x94   : > { %11676 = vmatpush3.bf16.msra.mxu1 %v12855_v21  ;;  %1643 = vmatprep.mubr.f32.mxu1 %v9284_v54 }
  0x95   : > { %11678 = vmatprep.subr.bf16.mxu1 %v12859_v22 }
  0x97   : > { %1644 = vmatmul.mubr.f32.gmra.mrb[38].mxu1 %v9283_v55 }
  0x98   : > { %11680 = vmatpush3.bf16.msra.mxu1 %v12867_v27  ;;  %1648 = vmatprep.mubr.f32.mxu1 %v9286_v56  ;;  %v13274_v56 = vld [vmem:[%s15262_s2 + $0x10] sm:$0xff] }
  0x99   : > { %11682 = vmatprep.subr.bf16.mxu1 %v12871_v28 }
  0x9b   : > { %1649 = vmatmul.mubr.f32.gmra.mrb[40].mxu1 %v9285_v57 }
  0x9c   : > { %11684 = vmatpush3.bf16.msra.mxu1 %v12879_v33  ;;  %1653 = vmatprep.mubr.f32.mxu1 %v9288_v58 }
  0x9d   : > { %11686 = vmatprep.subr.bf16.mxu1 %v12883_v34 }
  0x9f   : > { %1654 = vmatmul.mubr.f32.gmra.mrb[42].mxu1 %v9287_v59  ;;  %v9363_v59 = vld [vmem:[%s15260_s0 + $0x358] sm:$0xff] }
  0xa0   : > { %11688 = vmatpush3.bf16.msra.mxu1 %v12891_v39  ;;  %1658 = vmatprep.mubr.f32.mxu1 %v9290_v60 }
  0xa1   : > { %11690 = vmatprep.subr.bf16.mxu1 %v12895_v40 }
  0xa3   : > { %1659 = vmatmul.mubr.f32.gmra.mrb[44].mxu1 %v9289_v61 }
  0xa4   : > { %11692 = vmatpush3.bf16.msra.mxu1 %v12903_v45  ;;  %1663 = vmatprep.mubr.f32.mxu1 %v9292_v62  ;;  %v9362_v62 = vld [vmem:[%s15260_s0 + $0x350] sm:$0xff] }
  0xa5   : > { %11694 = vmatprep.subr.bf16.mxu1 %v12907_v46 }
  0xa7   : > { %1664 = vmatmul.mubr.f32.gmra.mrb[46].mxu1 %v9291_v0 }
  0xa8   : > { %11696 = vmatpush3.bf16.msra.mxu1 %v12913_v49  ;;  %1889 = vmatprep.mubr.f32.mxu1 %v9303_v1 }
  0xa9   : > { %11730 = vmatprep.subr.bf16.mxu1 %v12827_v5 }
  0xab   : > { %1890 = vmatmul.mubr.f32.vlgmr.msra.gmra.mrb[48].mxu1 %v9302_v2 }
  0xac   : > { %1894 = vmatprep.mubr.f32.mxu1 %v9305_v3  ;;  %11732 = vmatpush3.bf16.msra.mxu1 %v12832_v9  ;;  %v9365_v3 = vld [vmem:[%s15260_s0 + $0x368] sm:$0xff] }
  0xad   : > { %11734 = vmatprep.subr.bf16.mxu1 %v12834_v10 }
  0xaf   : > { %1895 = vmatmul.mubr.f32.gmra.mrb[50].mxu1 %v9304_v4 }
  0xb0   : > { %1899 = vmatprep.mubr.f32.mxu1 %v9307_v6  ;;  %11736 = vmatpush3.bf16.msra.mxu1 %v12843_v15 }
  0xb1   : > { %11738 = vmatprep.subr.bf16.mxu1 %v12847_v16 }
  0xb3   : > { %1900 = vmatmul.mubr.f32.gmra.mrb[52].mxu1 %v9306_v7  ;;  %v9364_v7 = vld [vmem:[%s15260_s0 + $0x360] sm:$0xff] }
  0xb4   : > { %1904 = vmatprep.mubr.f32.mxu1 %v9309_v8  ;;  %11740 = vmatpush3.bf16.msra.mxu1 %v12855_v21 }
  0xb5   : > { %11742 = vmatprep.subr.bf16.mxu1 %v12859_v22 }
  0xb7   : > { %1905 = vmatmul.mubr.f32.gmra.mrb[54].mxu1 %v9308_v11 }
  0xb8   : > { %1909 = vmatprep.mubr.f32.mxu1 %v9311_v12  ;;  %11744 = vmatpush3.bf16.msra.mxu1 %v12867_v27 }
  0xb9   : > { %11746 = vmatprep.subr.bf16.mxu1 %v12871_v28 }
  0xbb   : > { %1910 = vmatmul.mubr.f32.gmra.mrb[56].mxu1 %v9310_v13 }
  0xbc   : > { %1914 = vmatprep.mubr.f32.mxu1 %v9313_v14  ;;  %11748 = vmatpush3.bf16.msra.mxu1 %v12879_v33  ;;  %v9367_v14 = vld [vmem:[%s15260_s0 + $0x378] sm:$0xff] }
  0xbd   : > { %11750 = vmatprep.subr.bf16.mxu1 %v12883_v34 }
  0xbf   : > { %1915 = vmatmul.mubr.f32.gmra.mrb[58].mxu1 %v9312_v17 }
  0xc0   : > { %1919 = vmatprep.mubr.f32.mxu1 %v9315_v18  ;;  %11752 = vmatpush3.bf16.msra.mxu1 %v12891_v39 }
  0xc1   : > { %11754 = vmatprep.subr.bf16.mxu1 %v12895_v40 }
  0xc3   : > { %1920 = vmatmul.mubr.f32.gmra.mrb[60].mxu1 %v9314_v20 }
  0xc4   : > { %1924 = vmatprep.mubr.f32.mxu1 %v9317_v23  ;;  %11756 = vmatpush3.bf16.msra.mxu1 %v12903_v45 }
  0xc5   : > { %11758 = vmatprep.subr.bf16.mxu1 %v12907_v46 }
  0xc7   : > { %1925 = vmatmul.mubr.f32.gmra.mrb[62].mxu1 %v9316_v24 }
  0xc8   : > { %11760 = vmatpush3.bf16.msra.mxu1 %v12913_v49  ;;  %2411 = vmatprep.mubr.f32.mxu1 %v9353_v25 }
  0xc9   : > { %11762 = vmatprep.subr.bf16.mxu1 %v12827_v5 }
  0xcb   : > { %2412 = vmatmul.mubr.f32.vlgmr.msra.gmra.mrb[64].mxu1 %v9352_v26  ;;  %v9378_v26 = vld [vmem:[%s15260_s0 + $0x388] sm:$0xff] }
  0xcc   : > { %11764 = vmatpush3.bf16.msra.mxu1 %v12832_v9  ;;  %2416 = vmatprep.mubr.f32.mxu1 %v9355_v29 }
  0xcd   : > { %11766 = vmatprep.subr.bf16.mxu1 %v12834_v10 }
  0xcf   : > { %2417 = vmatmul.mubr.f32.gmra.mrb[66].mxu1 %v9354_v30 }
  0xd0   : > { %11768 = vmatpush3.bf16.msra.mxu1 %v12843_v15  ;;  %2421 = vmatprep.mubr.f32.mxu1 %v9357_v31  ;;  %v9377_v31 = vld [vmem:[%s15260_s0 + $0x380] sm:$0xff] }
  0xd1   : > { %11770 = vmatprep.subr.bf16.mxu1 %v12847_v16 }
  0xd3   : > { %2422 = vmatmul.mubr.f32.gmra.mrb[68].mxu1 %v9356_v32 }
  0xd4   : > { %11772 = vmatpush3.bf16.msra.mxu1 %v12855_v21  ;;  %2426 = vmatprep.mubr.f32.mxu1 %v9359_v41 }
  0xd5   : > { %11774 = vmatprep.subr.bf16.mxu1 %v12859_v22 }
  0xd7   : > { %2427 = vmatmul.mubr.f32.gmra.mrb[70].mxu1 %v9358_v42 }
  0xd8   : > { %11776 = vmatpush3.bf16.msra.mxu1 %v12867_v27  ;;  %2431 = vmatprep.mubr.f32.mxu1 %v9361_v52  ;;  %v9382_v52 = vld [vmem:[%s15260_s0 + $0x3a8] sm:$0xff] }
  0xd9   : > { %11778 = vmatprep.subr.bf16.mxu1 %v12871_v28 }
  0xdb   : > { %2432 = vmatmul.mubr.f32.gmra.mrb[72].mxu1 %v9360_v53 }
  0xdc   : > { %11780 = vmatpush3.bf16.msra.mxu1 %v12879_v33  ;;  %2436 = vmatprep.mubr.f32.mxu1 %v9363_v59 }
  0xdd   : > { %11782 = vmatprep.subr.bf16.mxu1 %v12883_v34 }
  0xdf   : > { %2437 = vmatmul.mubr.f32.gmra.mrb[74].mxu1 %v9362_v62 }
  0xe0   : > { %11784 = vmatpush3.bf16.msra.mxu1 %v12891_v39  ;;  %2441 = vmatprep.mubr.f32.mxu1 %v9365_v3 }
  0xe1   : > { %11786 = vmatprep.subr.bf16.mxu1 %v12895_v40 }
  0xe3   : > { %2442 = vmatmul.mubr.f32.gmra.mrb[76].mxu1 %v9364_v7 }
  0xe4   : > { %11788 = vmatpush3.bf16.msra.mxu1 %v12903_v45  ;;  %2446 = vmatprep.mubr.f32.mxu1 %v9367_v14  ;;  %v9389_v14 = vld [vmem:[%s15260_s0 + $0x3e0] sm:$0xff] }
  0xe5   : > { %11790 = vmatprep.subr.bf16.mxu1 %v12907_v46 }
  0xe8   : > { %11792 = vmatpush3.bf16.msra.mxu1 %v12913_v49 }
  0xe9   : > { %11794 = vmatprep.subr.bf16.mxu1 %v12827_v5 }
 0x11e   : > { %v9762_v35 = vpop.f32.mrb[0].mxu1  ;;  %v9706_v36 = vpop.f32.mrb[0].mxu0 }
 0x11f   : > { %v9763_v37 = vpop.f32.mrb[1].mxu1  ;;  %v9707_v38 = vpop.f32.mrb[1].mxu0 }
 0x120   : > { %v9764_v43 = vadd.f32 %v9763_v37, %v9762_v35  ;;  %v13258_v44 = vadd.f32 %v9707_v38, %v9706_v36  ;;  %v9380_v38 = vld [vmem:[%s15260_s0 + $0x398] sm:$0xff] }
 0x122   : > { %v9765_v47 = vpop.f32.mrb[2].mxu1  ;;  %10644 = vmatprep.mubr.msk.f32.mxu0 %vm1027_vm0, %v9764_v43  ;;  %v9709_v48 = vpop.f32.mrb[2].mxu0  ;;  %v9379_v43 = vld [vmem:[%s15260_s0 + $0x390] sm:$0xff] }
 0x123   : > { %v9766_v50 = vpop.f32.mrb[3].mxu1  ;;  %v9710_v51 = vpop.f32.mrb[3].mxu0 }
 0x124   : > { %v9767_v54 = vadd.f32 %v9766_v50, %v9765_v47  ;;  %v13269_v55 = vadd.f32 %v9710_v51, %v9709_v48 }
 0x126   : > { %v9768_v57 = vpop.f32.mrb[4].mxu1  ;;  %10645 = vmatmul.mubr.msk.f32.vlgmr.msra.gmra.mrb[16].mxu0 %vm1027_vm0, %v9767_v54  ;;  %v9712_v58 = vpop.f32.mrb[4].mxu0 }
 0x127   : > { %v9769_v60 = vpop.f32.mrb[5].mxu1  ;;  %v9713_v61 = vpop.f32.mrb[5].mxu0  ;;  %10657 = vmatpush3.msra.mxu0 %v13210_v19  ;;  %v9366_v19 = vld [vmem:[%s15260_s0 + $0x370] sm:$0xff] }
 0x128   : > { %v9770_v63 = vadd.f32 %v9769_v60, %v9768_v57  ;;  %v13285_v0 = vadd.f32 %v9713_v61, %v9712_v58  ;;  %10670 = vmatprep.subr.mxu0 %v13274_v56  ;;  %2447 = vmatmul.mubr.f32.gmra.mrb[78].mxu1 %v9366_v19  ;;  %v9381_v57 = vld [vmem:[%s15260_s0 + $0x3a0] sm:$0xff]  ;;  %v9384_v61 = vld [vmem:[%s15260_s0 + $0x3b8] sm:$0xff] }
 0x129   : > { %2672 = vmatprep.mubr.f32.mxu1 %v9378_v26  ;;  %v9392_v19 = vld [vmem:[%s15260_s0 + $0x3f8] sm:$0xff]  ;;  %v9318_v26 = vld [vmem:[%s15262_s2 + $0x20] sm:$0xff] }
 0x12a   : > { %v9771_v1 = vpop.f32.mrb[6].mxu1  ;;  %10647 = vmatprep.mubr.msk.f32.mxu0 %vm1027_vm0, %v9770_v63  ;;  %v9715_v2 = vpop.f32.mrb[6].mxu0  ;;  %v9383_v63 = vld [vmem:[%s15260_s0 + $0x3b0] sm:$0xff] }
 0x12b   : > { %v9772_v4 = vpop.f32.mrb[7].mxu1  ;;  %v9716_v6 = vpop.f32.mrb[7].mxu0 }
 0x12c   : > { %v9773_v8 = vadd.f32 %v9772_v4, %v9771_v1  ;;  %v13298_v11 = vadd.f32 %v9716_v6, %v9715_v2  ;;  %2673 = vmatmul.mubr.f32.vlgmr.msra.gmra.mrb[80].mxu1 %v9377_v31  ;;  %v9293_v2 = vld [vmem:[%s15262_s2 + $0x18] sm:$0xff]  ;;  %v9385_v4 = vld [vmem:[%s15260_s0 + $0x3c0] sm:$0xff] }
 0x12d   : > { %11796 = vmatpush3.bf16.msra.mxu1 %v12832_v9  ;;  %2677 = vmatprep.mubr.f32.mxu1 %v9380_v38  ;;  %v9402_v31 = vld [vmem:[%s15260_s0 + $0x400] sm:$0xff]  ;;  %v9404_v38 = vld [vmem:[%s15260_s0 + $0x410] sm:$0xff] }
 0x12e   : > { %v9774_v12 = vpop.f32.mrb[8].mxu1  ;;  %10648 = vmatmul.mubr.msk.f32.gmra.mrb[18].mxu0 %vm1027_vm0, %v9773_v8  ;;  %v9718_v13 = vpop.f32.mrb[8].mxu0  ;;  %11798 = vmatprep.subr.bf16.mxu1 %v12834_v10 }
 0x12f   : > { %v9775_v17 = vpop.f32.mrb[9].mxu1  ;;  %v9719_v18 = vpop.f32.mrb[9].mxu0 }
 0x130   : > { %v9776_v20 = vadd.f32 %v9775_v17, %v9774_v12  ;;  %v13309_v23 = vadd.f32 %v9719_v18, %v9718_v13  ;;  %2678 = vmatmul.mubr.f32.gmra.mrb[82].mxu1 %v9379_v43  ;;  %v9390_v13 = vld [vmem:[%s15260_s0 + $0x3e8] sm:$0xff] }
 0x131   : > { %11800 = vmatpush3.bf16.msra.mxu1 %v12843_v15  ;;  %2682 = vmatprep.mubr.f32.mxu1 %v9382_v52 }
 0x132   : > { %v9777_v24 = vpop.f32.mrb[10].mxu1  ;;  %10650 = vmatprep.mubr.msk.f32.mxu0 %vm1027_vm0, %v9776_v20  ;;  %v9721_v25 = vpop.f32.mrb[10].mxu0  ;;  %11802 = vmatprep.subr.bf16.mxu1 %v12847_v16 }
 0x133   : > { %v9778_v29 = vpop.f32.mrb[11].mxu1  ;;  %v9722_v30 = vpop.f32.mrb[11].mxu0 }
 0x134   : > { %v9779_v32 = vadd.f32 %v9778_v29, %v9777_v24  ;;  %v13320_v35 = vadd.f32 %v9722_v30, %v9721_v25  ;;  %2683 = vmatmul.mubr.f32.gmra.mrb[84].mxu1 %v9381_v57  ;;  %v9403_v29 = vld [vmem:[%s15260_s0 + $0x408] sm:$0xff] }
 0x135   : > { %11804 = vmatpush3.bf16.msra.mxu1 %v12855_v21  ;;  %2687 = vmatprep.mubr.f32.mxu1 %v9384_v61  ;;  %v9410_v61 = vld [vmem:[%s15260_s0 + $0x440] sm:$0xff] }
 0x136   : > { %v9780_v36 = vpop.f32.mrb[12].mxu1  ;;  %10651 = vmatmul.mubr.msk.f32.gmra.mrb[20].mxu0 %vm1027_vm0, %v9779_v32  ;;  %v9724_v37 = vpop.f32.mrb[12].mxu0  ;;  %11806 = vmatprep.subr.bf16.mxu1 %v12859_v22 }
 0x137   : > { %v9781_v41 = vpop.f32.mrb[13].mxu1  ;;  %v9725_v42 = vpop.f32.mrb[13].mxu0 }
 0x138   : > { %v9782_v47 = vadd.f32 %v9781_v41, %v9780_v36  ;;  %v9726_v48 = vadd.f32 %v9725_v42, %v9724_v37  ;;  %2688 = vmatmul.mubr.f32.gmra.mrb[86].mxu1 %v9383_v63  ;;  %v9407_v42 = vld [vmem:[%s15260_s0 + $0x428] sm:$0xff]  ;;  %v9413_v63 = vld [vmem:[%s15260_s0 + $0x458] sm:$0xff] }
 0x139   : > { %11808 = vmatpush3.bf16.msra.mxu1 %v12867_v27 }
 0x13a   : > { %v9783_v50 = vpop.f32.mrb[14].mxu1  ;;  %10653 = vmatprep.mubr.msk.f32.mxu0 %vm1027_vm0, %v9782_v47  ;;  %v9727_v51 = vpop.f32.mrb[14].mxu0  ;;  %11810 = vmatprep.subr.bf16.mxu1 %v12871_v28 }
 0x13b   : > { %v9784_v53 = vpop.f32.mrb[15].mxu1  ;;  %v9728_v54 = vpop.f32.mrb[15].mxu0 }
 0x13c   : > { %v9785_v58 = vadd.f32 %v9784_v53, %v9783_v50  ;;  %v9729_v59 = vadd.f32 %v9728_v54, %v9727_v51  ;;  %v9409_v51 = vld [vmem:[%s15260_s0 + $0x438] sm:$0xff]  ;;  %v9408_v54 = vld [vmem:[%s15260_s0 + $0x430] sm:$0xff] }
 0x13d   : > { %11812 = vmatpush3.bf16.msra.mxu1 %v12879_v33 }
 0x13e   : > { %10654 = vmatmul.mubr.msk.f32.gmra.mrb[22].mxu0 %vm1027_vm0, %v9785_v58  ;;  %v9836_v60 = vpop.f32.mrb[16].mxu1  ;;  %11814 = vmatprep.subr.bf16.mxu1 %v12883_v34  ;;  %v9411_v58 = vld [vmem:[%s15260_s0 + $0x448] sm:$0xff] }
 0x13f   : > { %v9837_v62 = vpop.f32.mrb[17].mxu1  ;;  %10658 = vmatprep.mubr.msk.f32.mxu0 %vm1027_vm0, %v13258_v44  ;;  %v9386_v44 = vld [vmem:[%s15260_s0 + $0x3c8] sm:$0xff] }
 0x140   : > { %v9838_v1 = vadd.f32 %v9837_v62, %v9836_v60  ;;  %2692 = vmatprep.mubr.f32.mxu1 %v9386_v44 }
 0x141   : > { %2693 = vmatmul.mubr.f32.gmra.mrb[88].mxu1 %v9385_v4  ;;  %v9415_v4 = vld [vmem:[%s15260_s0 + $0x468] sm:$0xff] }
 0x142   : > { %10659 = vmatmul.mubr.msk.f32.vlgmr.msra.gmra.mrb[16].mxu0 %vm1027_vm0, %v13269_v55  ;;  %v9839_v3 = vpop.f32.mrb[18].mxu1  ;;  %v9388_v55 = vld [vmem:[%s15260_s0 + $0x3d8] sm:$0xff]  ;;  %11816 = vmatpush3.bf16.msra.mxu1 %v12891_v39 }
 0x143   : > { %v9840_v6 = vpop.f32.mrb[19].mxu1  ;;  %10661 = vmatprep.mubr.msk.f32.mxu0 %vm1027_vm0, %v13285_v0  ;;  %10671 = vmatpush3.msra.mxu0 %v13274_v56  ;;  %v9387_v56 = vld [vmem:[%s15260_s0 + $0x3d0] sm:$0xff] }
 0x144   : > { %v9841_v7 = vadd.f32 %v9840_v6, %v9839_v3  ;;  %10684 = vmatprep.subr.mxu0 %v9293_v2  ;;  %2697 = vmatprep.mubr.f32.mxu1 %v9388_v55  ;;  %v9412_v3 = vld [vmem:[%s15260_s0 + $0x450] sm:$0xff]  ;;  %v9414_v55 = vld [vmem:[%s15260_s0 + $0x460] sm:$0xff] }
 0x145   : > { %2698 = vmatmul.mubr.f32.gmra.mrb[90].mxu1 %v9387_v56  ;;  %11818 = vmatprep.subr.bf16.mxu1 %v12895_v40  ;;  %v9417_v56 = vld [vmem:[%s15260_s0 + $0x478] sm:$0xff] }
 0x146   : > { %10662 = vmatmul.mubr.msk.f32.gmra.mrb[18].mxu0 %vm1027_vm0, %v13298_v11  ;;  %v9842_v8 = vpop.f32.mrb[20].mxu1  ;;  %2702 = vmatprep.mubr.f32.mxu1 %v9390_v13 }
 0x147   : > { %v9843_v0 = vpop.f32.mrb[21].mxu1  ;;  %10664 = vmatprep.mubr.msk.f32.mxu0 %vm1027_vm0, %v13309_v23  ;;  %11820 = vmatpush3.bf16.msra.mxu1 %v12903_v45  ;;  %v9391_v23 = vld [vmem:[%s15260_s0 + $0x3f0] sm:$0xff] }
 0x148   : > { %v9844_v12 = vadd.f32 %v9843_v0, %v9842_v8  ;;  %11822 = vmatprep.subr.bf16.mxu1 %v12907_v46 }
 0x149   : > { %2703 = vmatmul.mubr.f32.gmra.mrb[92].mxu1 %v9389_v14 }
 0x14a   : > { %10665 = vmatmul.mubr.msk.f32.gmra.mrb[20].mxu0 %vm1027_vm0, %v13320_v35  ;;  %v9845_v11 = vpop.f32.mrb[22].mxu1  ;;  %2707 = vmatprep.mubr.f32.mxu1 %v9392_v19  ;;  %v9405_v35 = vld [vmem:[%s15260_s0 + $0x418] sm:$0xff] }
 0x14b   : > { %v9846_v17 = vpop.f32.mrb[23].mxu1  ;;  %10667 = vmatprep.mubr.msk.f32.mxu0 %vm1027_vm0, %v9726_v48  ;;  %11824 = vmatpush3.bf16.msra.mxu1 %v12913_v49  ;;  %v9406_v48 = vld [vmem:[%s15260_s0 + $0x420] sm:$0xff] }
 0x14c   : > { %v9847_v18 = vadd.f32 %v9846_v17, %v9845_v11 }
 0x14d   : > { %2708 = vmatmul.mubr.f32.gmra.mrb[94].mxu1 %v9391_v23 }
 0x14e   : > { %10668 = vmatmul.mubr.msk.f32.gmra.mrb[22].mxu0 %vm1027_vm0, %v9729_v59  ;;  %v9848_v20 = vpop.f32.mrb[24].mxu1  ;;  %2933 = vmatprep.mubr.f32.mxu1 %v9403_v29 }
 0x14f   : > { %v9849_v24 = vpop.f32.mrb[25].mxu1  ;;  %10672 = vmatprep.mubr.msk.f32.mxu0 %vm1027_vm0, %v9838_v1 }
 0x150   : > { %v9850_v25 = vadd.f32 %v9849_v24, %v9848_v20 }
 0x151   : > { %2934 = vmatmul.mubr.f32.vlgmr.msra.gmra.mrb[96].mxu1 %v9402_v31 }
 0x152   : > { %v9851_v30 = vpop.f32.mrb[26].mxu1  ;;  %10673 = vmatmul.mubr.msk.f32.vlgmr.msra.gmra.mrb[16].mxu0 %vm1027_vm0, %v9841_v7  ;;  %2938 = vmatprep.mubr.f32.mxu1 %v9405_v35 }
 0x153   : > { %v9852_v32 = vpop.f32.mrb[27].mxu1  ;;  %10675 = vmatprep.mubr.msk.f32.mxu0 %vm1027_vm0, %v9844_v12  ;;  %10685 = vmatpush3.msra.mxu0 %v9293_v2 }
 0x154   : > { %v9853_v36 = vadd.f32 %v9852_v32, %v9851_v30  ;;  %10698 = vmatprep.subr.mxu0 %v9318_v26 }
 0x155   : > { %2939 = vmatmul.mubr.f32.gmra.mrb[98].mxu1 %v9404_v38 }
 0x156   : > { %v9854_v37 = vpop.f32.mrb[28].mxu1  ;;  %10676 = vmatmul.mubr.msk.f32.gmra.mrb[18].mxu0 %vm1027_vm0, %v9847_v18  ;;  %2943 = vmatprep.mubr.f32.mxu1 %v9407_v42 }
 0x157   : > { %v9855_v41 = vpop.f32.mrb[29].mxu1  ;;  %10678 = vmatprep.mubr.msk.f32.mxu0 %vm1027_vm0, %v9850_v25 }
 0x158   : > { %v9856_v43 = vadd.f32 %v9855_v41, %v9854_v37 }
 0x159   : > { %2944 = vmatmul.mubr.f32.gmra.mrb[100].mxu1 %v9406_v48 }
 0x15a   : > { %v9857_v47 = vpop.f32.mrb[30].mxu1  ;;  %10679 = vmatmul.mubr.msk.f32.gmra.mrb[20].mxu0 %vm1027_vm0, %v9853_v36  ;;  %2948 = vmatprep.mubr.f32.mxu1 %v9409_v51 }
 0x15b   : > { %v9858_v50 = vpop.f32.mrb[31].mxu1  ;;  %10681 = vmatprep.mubr.msk.f32.mxu0 %vm1027_vm0, %v9856_v43 }
 0x15c   : > { %v9859_v52 = vadd.f32 %v9858_v50, %v9857_v47 }
 0x15d   : > { %2949 = vmatmul.mubr.f32.gmra.mrb[102].mxu1 %v9408_v54  ;;  %v9333_v54 = vld [vmem:[%s15260_s0 + $0x2b0] sm:$0xff] }
 0x15e   : > { %10682 = vmatmul.mubr.msk.f32.gmra.mrb[22].mxu0 %vm1027_vm0, %v9859_v52  ;;  %v9901_v53 = vpop.f32.mrb[32].mxu1  ;;  %2953 = vmatprep.mubr.f32.mxu1 %v9411_v58  ;;  %v9335_v58 = vld [vmem:[%s15260_s0 + $0x2c0] sm:$0xff] }
 0x15f   : > { %v9902_v57 = vpop.f32.mrb[33].mxu1 }
 0x160   : > { %v9903_v59 = vadd.f32 %v9902_v57, %v9901_v53  ;;  %v9336_v57 = vld [vmem:[%s15260_s0 + $0x2c8] sm:$0xff] }
 0x161   : > { %2954 = vmatmul.mubr.f32.gmra.mrb[104].mxu1 %v9410_v61  ;;  %v9340_v61 = vld [vmem:[%s15260_s0 + $0x2e8] sm:$0xff] }
 0x162   : > { %v9904_v60 = vpop.f32.mrb[34].mxu1  ;;  %10686 = vmatprep.mubr.msk.f32.mxu0 %vm1027_vm0, %v9903_v59  ;;  %2958 = vmatprep.mubr.f32.mxu1 %v9413_v63  ;;  %v9338_v59 = vld [vmem:[%s15260_s0 + $0x2d8] sm:$0xff] }
 0x163   : > { %v9905_v62 = vpop.f32.mrb[35].mxu1  ;;  %v9342_v63 = vld [vmem:[%s15260_s0 + $0x2f8] sm:$0xff] }
 0x164   : > { %v9906_v1 = vadd.f32 %v9905_v62, %v9904_v60  ;;  %v9337_v60 = vld [vmem:[%s15260_s0 + $0x2d0] sm:$0xff]  ;;  %v9339_v62 = vld [vmem:[%s15260_s0 + $0x2e0] sm:$0xff] }
 0x165   : > { %2959 = vmatmul.mubr.f32.gmra.mrb[106].mxu1 %v9412_v3 }
 0x166   : > { %v9907_v2 = vpop.f32.mrb[36].mxu1  ;;  %10687 = vmatmul.mubr.msk.f32.vlgmr.msra.gmra.mrb[16].mxu0 %vm1027_vm0, %v9906_v1  ;;  %2963 = vmatprep.mubr.f32.mxu1 %v9415_v4  ;;  %v9341_v1 = vld [vmem:[%s15260_s0 + $0x2f0] sm:$0xff] }
 0x167   : > { %v9908_v44 = vpop.f32.mrb[37].mxu1  ;;  %10699 = vmatpush3.msra.mxu0 %v9318_v26 }
 0x168   : > { %v9909_v6 = vadd.f32 %v9908_v44, %v9907_v2  ;;  %11698 = vmatprep.subr.bf16.mxu0 %v12827_v5  ;;  %v9416_v5 = vld [vmem:[%s15260_s0 + $0x470] sm:$0xff] }
 0x169   : > { %2964 = vmatmul.mubr.f32.gmra.mrb[108].mxu1 %v9414_v55 }
 0x16a   : > { %v9910_v7 = vpop.f32.mrb[38].mxu1  ;;  %10689 = vmatprep.mubr.msk.f32.mxu0 %vm1027_vm0, %v9909_v6  ;;  %2968 = vmatprep.mubr.f32.mxu1 %v9417_v56 }
 0x16b   : > { %v9911_v8 = vpop.f32.mrb[39].mxu1 }
 0x16c   : > { %v9912_v0 = vadd.f32 %v9911_v8, %v9910_v7 }
 0x16d   : > { %2969 = vmatmul.mubr.f32.gmra.mrb[110].mxu1 %v9416_v5 }
 0x16e   : > { %v9913_v12 = vpop.f32.mrb[40].mxu1  ;;  %10690 = vmatmul.mubr.msk.f32.gmra.mrb[18].mxu0 %vm1027_vm0, %v9912_v0 }
 0x16f   : > { %v9914_v13 = vpop.f32.mrb[41].mxu1 }
 0x170   : > { %v9915_v11 = vadd.f32 %v9914_v13, %v9913_v12 }
 0x172   : > { %v9916_v14 = vpop.f32.mrb[42].mxu1  ;;  %10692 = vmatprep.mubr.msk.f32.mxu0 %vm1027_vm0, %v9915_v11 }
 0x173   : > { %v9917_v17 = vpop.f32.mrb[43].mxu1 }
 0x174   : > { %v9918_v18 = vadd.f32 %v9917_v17, %v9916_v14 }
 0x176   : > { %v9919_v19 = vpop.f32.mrb[44].mxu1  ;;  %10693 = vmatmul.mubr.msk.f32.gmra.mrb[20].mxu0 %vm1027_vm0, %v9918_v18 }
 0x177   : > { %v9920_v20 = vpop.f32.mrb[45].mxu1 }
 0x178   : > { %v9921_v23 = vadd.f32 %v9920_v20, %v9919_v19 }
 0x17a   : > { %v9922_v24 = vpop.f32.mrb[46].mxu1  ;;  %10695 = vmatprep.mubr.msk.f32.mxu0 %vm1027_vm0, %v9921_v23 }
 0x17b   : > { %v9923_v25 = vpop.f32.mrb[47].mxu1 }
 0x17c   : > { %v9924_v26 = vadd.f32 %v9923_v25, %v9922_v24 }
 0x17e   : > { %10696 = vmatmul.mubr.msk.f32.gmra.mrb[22].mxu0 %vm1027_vm0, %v9924_v26  ;;  %v9966_v29 = vpop.f32.mrb[48].mxu1 }
 0x17f   : > { %v9967_v30 = vpop.f32.mrb[49].mxu1 }
 0x180   : > { %v9968_v31 = vadd.f32 %v9967_v30, %v9966_v29 }
 0x182   : > { %v9969_v32 = vpop.f32.mrb[50].mxu1  ;;  %10700 = vmatprep.mubr.msk.f32.mxu0 %vm1027_vm0, %v9968_v31 }
 0x183   : > { %v9970_v35 = vpop.f32.mrb[51].mxu1 }
 0x184   : > { %v9971_v36 = vadd.f32 %v9970_v35, %v9969_v32 }
 0x186   : > { %10701 = vmatmul.mubr.msk.f32.vlgmr.msra.gmra.mrb[16].mxu0 %vm1027_vm0, %v9971_v36  ;;  %v9972_v37 = vpop.f32.mrb[52].mxu1  ;;  %v9368_v36 = vld [vmem:[%s15262_s2 + $0x30] sm:$0xff] }
 0x187   : > { %11700 = vmatpush3.bf16.msra.mxu0 %v12832_v9  ;;  %v9973_v38 = vpop.f32.mrb[53].mxu1 }
 0x188   : > { %v9974_v41 = vadd.f32 %v9973_v38, %v9972_v37  ;;  %11702 = vmatprep.subr.bf16.mxu0 %v12834_v10 }
 0x18a   : > { %v9975_v42 = vpop.f32.mrb[54].mxu1  ;;  %10703 = vmatprep.mubr.msk.f32.mxu0 %vm1027_vm0, %v9974_v41 }
 0x18b   : > { %11704 = vmatpush3.bf16.msra.mxu0 %v12843_v15  ;;  %v9976_v43 = vpop.f32.mrb[55].mxu1 }
 0x18c   : > { %v9977_v47 = vadd.f32 %v9976_v43, %v9975_v42  ;;  %11706 = vmatprep.subr.bf16.mxu0 %v12847_v16 }
 0x18e   : > { %v9978_v48 = vpop.f32.mrb[56].mxu1  ;;  %10704 = vmatmul.mubr.msk.f32.gmra.mrb[18].mxu0 %vm1027_vm0, %v9977_v47 }
 0x18f   : > { %11708 = vmatpush3.bf16.msra.mxu0 %v12855_v21  ;;  %v9979_v50 = vpop.f32.mrb[57].mxu1 }
 0x190   : > { %v9980_v9 = vadd.f32 %v9979_v50, %v9978_v48  ;;  %11710 = vmatprep.subr.bf16.mxu0 %v12859_v22 }
 0x192   : > { %v9981_v51 = vpop.f32.mrb[58].mxu1  ;;  %10706 = vmatprep.mubr.msk.f32.mxu0 %vm1027_vm0, %v9980_v9 }
 0x193   : > { %11712 = vmatpush3.bf16.msra.mxu0 %v12867_v27  ;;  %v9982_v10 = vpop.f32.mrb[59].mxu1 }
 0x194   : > { %v9983_v15 = vadd.f32 %v9982_v10, %v9981_v51  ;;  %11714 = vmatprep.subr.bf16.mxu0 %v12871_v28  ;;  %v9328_v28 = vld [vmem:[%s15260_s0 + $0x288] sm:$0xff] }
 0x196   : > { %v9984_v52 = vpop.f32.mrb[60].mxu1  ;;  %10707 = vmatmul.mubr.msk.f32.gmra.mrb[20].mxu0 %vm1027_vm0, %v9983_v15 }
 0x197   : > { %11716 = vmatpush3.bf16.msra.mxu0 %v12879_v33  ;;  %v9985_v16 = vpop.f32.mrb[61].mxu1  ;;  %v9343_v33 = vld [vmem:[%s15262_s2 + $0x28] sm:$0xff] }
 0x198   : > { %v9986_v21 = vadd.f32 %v9985_v16, %v9984_v52  ;;  %11718 = vmatprep.subr.bf16.mxu0 %v12883_v34  ;;  %v9327_v34 = vld [vmem:[%s15260_s0 + $0x280] sm:$0xff] }
 0x19a   : > { %v9987_v53 = vpop.f32.mrb[62].mxu1  ;;  %10709 = vmatprep.mubr.msk.f32.mxu0 %vm1027_vm0, %v9986_v21 }
 0x19b   : > { %11720 = vmatpush3.bf16.msra.mxu0 %v12891_v39  ;;  %v9988_v22 = vpop.f32.mrb[63].mxu1  ;;  %v9330_v39 = vld [vmem:[%s15260_s0 + $0x298] sm:$0xff] }
 0x19c   : > { %v9989_v27 = vadd.f32 %v9988_v22, %v9987_v53  ;;  %11722 = vmatprep.subr.bf16.mxu0 %v12895_v40  ;;  %v9329_v40 = vld [vmem:[%s15260_s0 + $0x290] sm:$0xff] }
 0x19e   : > { %10710 = vmatmul.mubr.msk.f32.gmra.mrb[22].mxu0 %vm1027_vm0, %v9989_v27  ;;  %v10096_v2 = vpop.f32.mrb[64].mxu1 }
 0x19f   : > { %11724 = vmatpush3.bf16.msra.mxu0 %v12903_v45  ;;  %2150 = vmatprep.mubr.f32.mxu0 %v9328_v28  ;;  %v9332_v45 = vld [vmem:[%s15260_s0 + $0x2a8] sm:$0xff]  ;;  %v10097_v3 = vpop.f32.mrb[65].mxu1 }
 0x1a0   : > { %11726 = vmatprep.subr.bf16.mxu0 %v12907_v46  ;;  %v9331_v46 = vld [vmem:[%s15260_s0 + $0x2a0] sm:$0xff]  ;;  %v13542_v44 = vadd.f32 %v10097_v3, %v10096_v2 }
 0x1a2   : > { %v10099_v4 = vpop.f32.mrb[66].mxu1 }
 0x1a3   : > { %11728 = vmatpush3.bf16.msra.mxu0 %v12913_v49  ;;  %v9334_v49 = vld [vmem:[%s15260_s0 + $0x2b8] sm:$0xff]  ;;  %v10100_v6 = vpop.f32.mrb[67].mxu1  ;;  %s12635_s0 = smov 64  }
 0x1a4   : > { %10712 = vmatprep.subr.mxu0 %v9343_v33  ;;  %v13544_v7 = vadd.f32 %v10100_v6, %v10099_v4 }
 0x1a6   : > { %2151 = vmatmul.mubr.f32.vlgmr.msra.gmra.mrb[24].mxu0 %v9327_v34  ;;  %v10102_v55 = vpop.f32.mrb[68].mxu1 }
 0x1a7   : > { %2155 = vmatprep.mubr.f32.mxu0 %v9330_v39  ;;  %10713 = vmatpush3.msra.mxu0 %v9343_v33  ;;  %v10103_v8 = vpop.f32.mrb[69].mxu1 }
 0x1a8   : > { %v13546_v56 = vadd.f32 %v10103_v8, %v10102_v55  ;;  %10726 = vmatprep.subr.mxu0 %v9368_v36 }
 0x1aa   : > { %2156 = vmatmul.mubr.f32.gmra.mrb[26].mxu0 %v9329_v40  ;;  %v10105_v0 = vpop.f32.mrb[70].mxu1 }
 0x1ab   : > { %2160 = vmatprep.mubr.f32.mxu0 %v9332_v45  ;;  %v10106_v12 = vpop.f32.mrb[71].mxu1 }
 0x1ac   : > { %v13548_v5 = vadd.f32 %v10106_v12, %v10105_v0 }
 0x1ae   : > { %2161 = vmatmul.mubr.f32.gmra.mrb[28].mxu0 %v9331_v46  ;;  %v10108_v13 = vpop.f32.mrb[72].mxu1 }
 0x1af   : > { %2165 = vmatprep.mubr.f32.mxu0 %v9334_v49  ;;  %v10109_v11 = vpop.f32.mrb[73].mxu1 }
 0x1b0   : > { %v13550_v14 = vadd.f32 %v10109_v11, %v10108_v13 }
 0x1b2   : > { %2166 = vmatmul.mubr.f32.gmra.mrb[30].mxu0 %v9333_v54  ;;  %v10111_v17 = vpop.f32.mrb[74].mxu1 }
 0x1b3   : > { %2170 = vmatprep.mubr.f32.mxu0 %v9336_v57  ;;  %v10112_v18 = vpop.f32.mrb[75].mxu1 }
 0x1b4   : > { %v13552_v19 = vadd.f32 %v10112_v18, %v10111_v17 }
 0x1b6   : > { %2171 = vmatmul.mubr.f32.gmra.mrb[32].mxu0 %v9335_v58  ;;  %v10114_v20 = vpop.f32.mrb[76].mxu1 }
 0x1b7   : > { %2175 = vmatprep.mubr.f32.mxu0 %v9338_v59  ;;  %v10115_v23 = vpop.f32.mrb[77].mxu1 }
 0x1b8   : > { %v13554_v24 = vadd.f32 %v10115_v23, %v10114_v20 }
 0x1ba   : > { %2176 = vmatmul.mubr.f32.gmra.mrb[34].mxu0 %v9337_v60 }
 0x1bb   : > { %2180 = vmatprep.mubr.f32.mxu0 %v9340_v61 }
 0x1be   : > { %2181 = vmatmul.mubr.f32.gmra.mrb[36].mxu0 %v9339_v62 }
 0x1bf   : > { %2185 = vmatprep.mubr.f32.mxu0 %v9342_v63 }
 0x1c2   : > { %2186 = vmatmul.mubr.f32.gmra.mrb[38].mxu0 %v9341_v1 }
 0x1fb   : > { %v10117_v25 = vpop.f32.mrb[78].mxu1 }
 0x1fc   : > { %v10118_v26 = vpop.f32.mrb[79].mxu1 }
 0x1fd   : > { %v13556_v29 = vadd.f32 %v10118_v26, %v10117_v25  ;;  %v9393_v26 = vld [vmem:[%s15262_s2 + $0x38] sm:$0xff] }
 0x1ff   : > { %v10161_v30 = vpop.f32.mrb[80].mxu1 }
 0x200   : > { %v10162_v31 = vpop.f32.mrb[81].mxu1 }
 0x201   : > { %v13558_v32 = vadd.f32 %v10162_v31, %v10161_v30 }
 0x203   : > { %v10164_v35 = vpop.f32.mrb[82].mxu1 }
 0x204   : > { %v10165_v37 = vpop.f32.mrb[83].mxu1 }
 0x205   : > { %v13563_v38 = vadd.f32 %v10165_v37, %v10164_v35 }
 0x207   : > { %v10167_v41 = vpop.f32.mrb[84].mxu1 }
 0x208   : > { %v10168_v42 = vpop.f32.mrb[85].mxu1 }
 0x209   : > { %v13565_v43 = vadd.f32 %v10168_v42, %v10167_v41 }
 0x20b   : > { %v10170_v47 = vpop.f32.mrb[86].mxu1 }
 0x20c   : > { %v10171_v48 = vpop.f32.mrb[87].mxu1 }
 0x20d   : > { %v13567_v50 = vadd.f32 %v10171_v48, %v10170_v47 }
 0x214   : > { %v10173_v9 = vpop.f32.mrb[88].mxu1 }
 0x215   : > { %v10174_v51 = vpop.f32.mrb[89].mxu1 }
 0x216   : > { %v13569_v10 = vadd.f32 %v10174_v51, %v10173_v9 }
 0x218   : > { %v10176_v15 = vpop.f32.mrb[90].mxu1 }
 0x219   : > { %v10177_v52 = vpop.f32.mrb[91].mxu1 }
 0x21a   : > { %v13571_v16 = vadd.f32 %v10177_v52, %v10176_v15 }
 0x21c   : > { %v10179_v21 = vpop.f32.mrb[92].mxu1 }
 0x21d   : > { %v10180_v53 = vpop.f32.mrb[93].mxu1 }
 0x21e   : > { %v13573_v22 = vadd.f32 %v10180_v53, %v10179_v21 }
 0x220   : > { %v10182_v27 = vpop.f32.mrb[94].mxu1 }
 0x221   : > { %v10183_v28 = vpop.f32.mrb[95].mxu1 }
 0x222   : > { %v13575_v33 = vadd.f32 %v10183_v28, %v10182_v27 }
 0x224   : > { %v10226_v34 = vpop.f32.mrb[96].mxu1 }
 0x225   : > { %v10227_v39 = vpop.f32.mrb[97].mxu1 }
 0x226   : > { %v13577_v40 = vadd.f32 %v10227_v39, %v10226_v34  ;;  %v9418_v39 = vld [vmem:[%s15262_s2 + $0x40] sm:$0xff] }
 0x228   : > { %v10229_v45 = vpop.f32.mrb[98].mxu1 }
 0x229   : > { %v10230_v46 = vpop.f32.mrb[99].mxu1 }
 0x22a   : > { %v13579_v49 = vadd.f32 %v10230_v46, %v10229_v45 }
 0x22c   : > { %v10232_v54 = vpop.f32.mrb[100].mxu1 }
 0x22d   : > { %v10233_v57 = vpop.f32.mrb[101].mxu1 }
 0x22e   : > { %v13581_v58 = vadd.f32 %v10233_v57, %v10232_v54 }
 0x230   : > { %v10235_v59 = vpop.f32.mrb[102].mxu1 }
 0x231   : > { %v10236_v60 = vpop.f32.mrb[103].mxu1 }
 0x232   : > { %v13583_v61 = vadd.f32 %v10236_v60, %v10235_v59 }
 0x234   : > { %v10238_v62 = vpop.f32.mrb[104].mxu1 }
 0x235   : > { %v10239_v63 = vpop.f32.mrb[105].mxu1 }
 0x236   : > { %v13585_v1 = vadd.f32 %v10239_v63, %v10238_v62 }
 0x238   : > { %v10241_v2 = vpop.f32.mrb[106].mxu1 }
 0x239   : > { %v10242_v3 = vpop.f32.mrb[107].mxu1 }
 0x23a   : > { %v13587_v4 = vadd.f32 %v10242_v3, %v10241_v2 }
 0x23c   : > { %v10244_v6 = vpop.f32.mrb[108].mxu1 }
 0x23d   : > { %v10245_v55 = vpop.f32.mrb[109].mxu1 }
 0x23e   : > { %v13589_v8 = vadd.f32 %v10245_v55, %v10244_v6  ;;  %v9443_v6 = vld [vmem:[%s15263_s29 + $0x28] sm:$0xff]  ;;  %v9430_v55 = vld [vmem:[%s15263_s29 + $0x10] sm:$0xff] }
 0x240   : > { %v10247_v0 = vpop.f32.mrb[110].mxu1 }
 0x241   : > { %v10248_v12 = vpop.f32.mrb[111].mxu1 }
 0x242   : > { %v13591_v13 = vadd.f32 %v10248_v12, %v10247_v0  ;;  %v9431_v0 = vld [vmem:[%s15263_s29 + $0x18] sm:$0xff] }
 0x243   : > { %v9453_v12 = vld [vmem:[%s15263_s29 + $0x38] sm:$0xff] }
 0x279   : > { %v10031_v11 = vpop.f32.mrb[24].mxu0 }
 0x27a   : > { %v10032_v17 = vpop.f32.mrb[25].mxu0 }
 0x27b   : > { %v10033_v18 = vadd.f32 %v10032_v17, %v10031_v11  ;;  %v9473_v11 = vld [vmem:[%s15263_s29 + $0x58] sm:$0xff]  ;;  %v9482_v17 = vld [vmem:[%s15263_s29 + $0x60] sm:$0xff] }
 0x27d   : > { %v10034_v20 = vpop.f32.mrb[26].mxu0  ;;  %10714 = vmatprep.mubr.msk.f32.mxu0 %vm1027_vm0, %v10033_v18  ;;  %v9483_v18 = vld [vmem:[%s15263_s29 + $0x68] sm:$0xff] }
 0x27e   : > { %v10035_v23 = vpop.f32.mrb[27].mxu0 }
 0x27f   : > { %v10036_v25 = vadd.f32 %v10035_v23, %v10034_v20  ;;  %v9434_v20 = vld [vmem:[%s15265_s3 + $0x20] sm:$0xff]  ;;  %v9435_v23 = vld [vmem:[%s15265_s3 + $0x28] sm:$0xff] }
 0x281   : > { %v10037_v30 = vpop.f32.mrb[28].mxu0  ;;  %10715 = vmatmul.mubr.msk.f32.vlgmr.msra.gmra.mrb[16].mxu0 %vm1027_vm0, %v10036_v25  ;;  %v9436_v25 = vld [vmem:[%s15265_s3 + $0x30] sm:$0xff] }
 0x282   : > { %v10038_v31 = vpop.f32.mrb[29].mxu0  ;;  %10727 = vmatpush3.msra.mxu0 %v9368_v36 }
 0x283   : > { %v10039_v35 = vadd.f32 %v10038_v31, %v10037_v30  ;;  %10740 = vmatprep.subr.mxu0 %v9393_v26  ;;  %v9437_v30 = vld [vmem:[%s15265_s3 + $0x38] sm:$0xff] }
 0x284   : > { %v11861_v31 = vpack.c.bf16 %v9437_v30, %v9436_v25  ;;  %v9496_v25 = vld [vmem:[%s15265_s3 + $0xe0] sm:$0xff] }
 0x285   : > { %v10040_v37 = vpop.f32.mrb[30].mxu0  ;;  %10717 = vmatprep.mubr.msk.f32.mxu0 %vm1027_vm0, %v10039_v35  ;;  %v3220_v35 = vld [vmem:[%s15265_s3] sm:$0xff] }
 0x286   : > { %v10041_v41 = vpop.f32.mrb[31].mxu0 }
 0x287   : > { %v10042_v42 = vadd.f32 %v10041_v41, %v10040_v37  ;;  %v3221_v37 = vld [vmem:[%s15265_s3 + $0x8] sm:$0xff] }
 0x288   : > { %v11865_v41 = vpack.c.bf16 %v3221_v37, %v3220_v35  ;;  %v9499_v35 = vld [vmem:[%s15265_s3 + $0xf8] sm:$0xff] }
 0x289   : > { %v10043_v47 = vpop.f32.mrb[32].mxu0  ;;  %10718 = vmatmul.mubr.msk.f32.gmra.mrb[18].mxu0 %vm1027_vm0, %v10042_v42  ;;  %v9492_v42 = vld [vmem:[%s15263_s29 + $0x70] sm:$0xff] }
 0x28a   : > { %v10044_v48 = vpop.f32.mrb[33].mxu0 }
 0x28b   : > { %v10045_v9 = vadd.f32 %v10044_v48, %v10043_v47  ;;  %v9493_v47 = vld [vmem:[%s15263_s29 + $0x78] sm:$0xff] }
 0x28d   : > { %v10046_v51 = vpop.f32.mrb[34].mxu0  ;;  %10720 = vmatprep.mubr.msk.f32.mxu0 %vm1027_vm0, %v10045_v9 }
 0x28e   : > { %v10047_v15 = vpop.f32.mrb[35].mxu0 }
 0x28f   : > { %v10048_v52 = vadd.f32 %v10047_v15, %v10046_v51 }
 0x291   : > { %v10049_v21 = vpop.f32.mrb[36].mxu0  ;;  %10721 = vmatmul.mubr.msk.f32.gmra.mrb[20].mxu0 %vm1027_vm0, %v10048_v52  ;;  %v3222_v52 = vld [vmem:[%s15265_s3 + $0x10] sm:$0xff] }
 0x292   : > { %v10050_v36 = vpop.f32.mrb[37].mxu0 }
 0x293   : > { %v10051_v53 = vadd.f32 %v10050_v36, %v10049_v21  ;;  %v3223_v21 = vld [vmem:[%s15265_s3 + $0x18] sm:$0xff] }
 0x295   : > { %v10052_v27 = vpop.f32.mrb[38].mxu0  ;;  %10723 = vmatprep.mubr.msk.f32.mxu0 %vm1027_vm0, %v10051_v53 }
 0x296   : > { %v10053_v28 = vpop.f32.mrb[39].mxu0 }
 0x297   : > { %v10054_v34 = vadd.f32 %v10053_v28, %v10052_v27  ;;  %v11869_v28 = vpack.c.bf16 %v3223_v21, %v3222_v52  ;;  %v12629_v52 = vmov 0.0|0.0   ;;  %v4766_v21 = vld [vmem:[%s15214_s9] sm:$0xff] }
 0x299   : > { %10724 = vmatmul.mubr.msk.f32.gmra.mrb[22].mxu0 %vm1027_vm0, %v10054_v34 }
 0x29a   : > { %10728 = vmatprep.mubr.msk.f32.mxu0 %vm1027_vm0, %v13542_v44  ;;  %v3136_v44 = vld [vmem:[%s15263_s29] sm:$0xff] }
 0x29d   : > { %10729 = vmatmul.mubr.msk.f32.vlgmr.msra.gmra.mrb[16].mxu0 %vm1027_vm0, %v13544_v7  ;;  %v9442_v7 = vld [vmem:[%s15263_s29 + $0x20] sm:$0xff] }
 0x29e   : > { %10731 = vmatprep.mubr.msk.f32.mxu0 %vm1027_vm0, %v13546_v56  ;;  %10741 = vmatpush3.msra.mxu0 %v9393_v26  ;;  %v9427_v56 = vld [vmem:[%s15264_s26] ss:$0 sm:$0xff]  ;;  %v11857_v26 = vpack.c.bf16 %v9435_v23, %v9434_v20  ;;  %v9489_v20 = vld [vmem:[%s15265_s3 + $0xd8] sm:$0xff] }
 0x29f   : > { %10754 = vmatprep.subr.mxu0 %v9418_v39  ;;  %10844 = vmatprep.mubr.msk.f32.mxu1 %vm3138_vm1, %v9442_v7 }
 0x2a1   : > { %10732 = vmatmul.mubr.msk.f32.gmra.mrb[18].mxu0 %vm1027_vm0, %v13548_v5 }
 0x2a2   : > { %10734 = vmatprep.mubr.msk.f32.mxu0 %vm1027_vm0, %v13550_v14 }
 0x2a5   : > { %10735 = vmatmul.mubr.msk.f32.gmra.mrb[20].mxu0 %vm1027_vm0, %v13552_v19 }
 0x2a6   : > { %10737 = vmatprep.mubr.msk.f32.mxu0 %vm1027_vm0, %v13554_v24 }
 0x2a9   : > { %10738 = vmatmul.mubr.msk.f32.gmra.mrb[22].mxu0 %vm1027_vm0, %v13556_v29 }
 0x2aa   : > { %10742 = vmatprep.mubr.msk.f32.mxu0 %vm1027_vm0, %v13558_v32 }
 0x2ad   : > { %10743 = vmatmul.mubr.msk.f32.vlgmr.msra.gmra.mrb[16].mxu0 %vm1027_vm0, %v13563_v38 }
 0x2ae   : > { %10745 = vmatprep.mubr.msk.f32.mxu0 %vm1027_vm0, %v13565_v43  ;;  %10755 = vmatpush3.msra.mxu0 %v9418_v39  ;;  %v9446_v39 = vld [vmem:[%s15265_s3 + $0x40] sm:$0xff] }
 0x2b1   : > { %10746 = vmatmul.mubr.msk.f32.gmra.mrb[18].mxu0 %vm1027_vm0, %v13567_v50 }
 0x2b2   : > { %10748 = vmatprep.mubr.msk.f32.mxu0 %vm1027_vm0, %v13569_v10 }
 0x2b5   : > { %10749 = vmatmul.mubr.msk.f32.gmra.mrb[20].mxu0 %vm1027_vm0, %v13571_v16 }
 0x2b6   : > { %10751 = vmatprep.mubr.msk.f32.mxu0 %vm1027_vm0, %v13573_v22 }
 0x2b9   : > { %10752 = vmatmul.mubr.msk.f32.gmra.mrb[22].mxu0 %vm1027_vm0, %v13575_v33 }
 0x2ba   : > { %10756 = vmatprep.mubr.msk.f32.mxu0 %vm1027_vm0, %v13577_v40 }
 0x2bd   : > { %10757 = vmatmul.mubr.msk.f32.vlgmr.msra.gmra.mrb[16].mxu0 %vm1027_vm0, %v13579_v49 }
 0x2be   : > { %10759 = vmatprep.mubr.msk.f32.mxu0 %vm1027_vm0, %v13581_v58 }
 0x2c1   : > { %10760 = vmatmul.mubr.msk.f32.gmra.mrb[18].mxu0 %vm1027_vm0, %v13583_v61 }
 0x2c2   : > { %10762 = vmatprep.mubr.msk.f32.mxu0 %vm1027_vm0, %v13585_v1 }
 0x2c5   : > { %10763 = vmatmul.mubr.msk.f32.gmra.mrb[20].mxu0 %vm1027_vm0, %v13587_v4  ;;  %v3137_v4 = vld [vmem:[%s15263_s29 + $0x8] sm:$0xff] }
 0x2c6   : > { %10765 = vmatprep.mubr.msk.f32.mxu0 %vm1027_vm0, %v13589_v8  ;;  %v9452_v8 = vld [vmem:[%s15263_s29 + $0x30] sm:$0xff] }
 0x2c9   : > { %10766 = vmatmul.mubr.msk.f32.gmra.mrb[22].mxu0 %vm1027_vm0, %v13591_v13  ;;  %v9472_v13 = vld [vmem:[%s15263_s29 + $0x50] sm:$0xff] }
 0x2ca   : > { %10784 = vmatprep.mubr.msk.f32.mxu0 %vm3138_vm1, %v3136_v44  ;;  %v9447_v44 = vld [vmem:[%s15265_s3 + $0x48] sm:$0xff] }
 0x2cb   : > { %v11889_v7 = vpack.c.bf16 %v9447_v44, %v9446_v39  ;;  %v4770_v39 = vld [vmem:[%s15214_s9 + $0x20] sm:$0xff]  ;;  %v4771_v44 = vld [vmem:[%s15214_s9 + $0x28] sm:$0xff] }
 0x390   : > { %v10758_v5 = vpop.f32.mrb[16].mxu0 }
 0x391   : > { %v3121_v14 = vadd.f32 %v10758_v5, %v9427_v56  ;;  %v3066_v19 = vpop.f32.mrb[17].mxu0  ;;  %v9449_v5 = vld [vmem:[%s15265_s3 + $0x58] sm:$0xff] }
 0x392   : > { %v3120_v24 = vadd.f32 %v9427_v56, %v3066_v19  ;;  %v9456_v19 = vld [vmem:[%s15265_s3 + $0x60] sm:$0xff] }
 0x393   : > { %v3129_v29 = vmax.f32 %v3121_v14, 0.0 }
 0x394   : > { %v3128_v32 = vmax.f32 %v3120_v24, 0.0  ;;  %v10761_v38 = vpop.f32.mrb[18].mxu0  ;;  %v9457_v24 = vld [vmem:[%s15265_s3 + $0x68] sm:$0xff] }
 0x395   : > { %v3123_v43 = vadd.f32 %v10761_v38, %v9427_v56  ;;  %v3076_v50 = vpop.f32.mrb[19].mxu0  ;;  %v9459_v38 = vld [vmem:[%s15265_s3 + $0x78] sm:$0xff] }
 0x396   : > { %v13666_v10 = vpack.c.bf16 %v3129_v29, %v3128_v32  ;;  %v3122_v16 = vadd.f32 %v9427_v56, %v3076_v50  ;;  %v11913_v29 = vpack.c.bf16 %v9457_v24, %v9456_v19  ;;  %v9458_v32 = vld [vmem:[%s15265_s3 + $0x70] sm:$0xff]  ;;  %v9512_v19 = vld [vmem:[%s15266_s25] ss:$0 sm:$0xff]  ;;  %s15268_s25 = sld [smem:[#allocation12_spill]] }
 0x397   : > { %v3131_v22 = vmax.f32 %v3123_v43, 0.0  ;;  %v11917_v50 = vpack.c.bf16 %v9459_v38, %v9458_v32 }
 0x398   : > { %v3130_v33 = vmax.f32 %v3122_v16, 0.0  ;;  %v10764_v40 = vpop.f32.mrb[20].mxu0  ;;  %11826 = vmatprep.subr.bf16.mxu0 %v13666_v10  ;;  %11874 = vmatprep.subr.bf16.mxu1 %v13666_v10 }
 0x399   : > { %v3125_v45 = vadd.f32 %v10764_v40, %v9427_v56  ;;  %v3086_v46 = vpop.f32.mrb[21].mxu0  ;;  %11828 = vmatpush3.bf16.msra.mxu0 %v13666_v10  ;;  %11876 = vmatpush3.bf16.msra.mxu1 %v13666_v10  ;;  %v9467_v40 = vld [vmem:[%s15265_s3 + $0x88] sm:$0xff] }
 0x39a   : > { %v13672_v49 = vpack.c.bf16 %v3131_v22, %v3130_v33  ;;  %v3124_v54 = vadd.f32 %v9427_v56, %v3086_v46  ;;  %v9462_v22 = vld [vmem:[%s15263_s29 + $0x40] sm:$0xff]  ;;  %v9468_v46 = vld [vmem:[%s15265_s3 + $0x90] sm:$0xff] }
 0x39b   : > { %v3133_v57 = vmax.f32 %v3125_v45, 0.0  ;;  %v9466_v33 = vld [vmem:[%s15265_s3 + $0x80] sm:$0xff] }
 0x39c   : > { %v3132_v58 = vmax.f32 %v3124_v54, 0.0  ;;  %v10767_v59 = vpop.f32.mrb[22].mxu0  ;;  %11830 = vmatprep.subr.bf16.mxu0 %v13672_v49  ;;  %11878 = vmatprep.subr.bf16.mxu1 %v13672_v49  ;;  %v11937_v45 = vpack.c.bf16 %v9467_v40, %v9466_v33  ;;  %v9469_v54 = vld [vmem:[%s15265_s3 + $0x98] sm:$0xff]  ;;  %v9516_v33 = vld [vmem:[%s15214_s9 + $0x40] sm:$0xff]  ;;  %v9517_v40 = vld [vmem:[%s15214_s9 + $0x48] sm:$0xff]  ;;  %s14404_s26 = scalar_lea.vmem %s15268_s25, %s9672_s6  ;;  %s12633_s25 = smov 96  }
 0x39d   : > { %v3127_v60 = vadd.f32 %v10767_v59, %v9427_v56  ;;  %v3096_v61 = vpop.f32.mrb[23].mxu0  ;;  %11832 = vmatpush3.bf16.msra.mxu0 %v13672_v49  ;;  %11880 = vmatpush3.bf16.msra.mxu1 %v13672_v49  ;;  %v9476_v59 = vld [vmem:[%s15265_s3 + $0xa0] sm:$0xff] }
 0x39e   : > { %v13678_v62 = vpack.c.bf16 %v3133_v57, %v3132_v58  ;;  %v3126_v63 = vadd.f32 %v9427_v56, %v3096_v61  ;;  %v9448_v56 = vld [vmem:[%s15265_s3 + $0x50] sm:$0xff]  ;;  %v9463_v57 = vld [vmem:[%s15263_s29 + $0x48] sm:$0xff]  ;;  %v11941_v58 = vpack.c.bf16 %v9469_v54, %v9468_v46  ;;  %v12048_v46 = vpack.c.bf16 %v9517_v40, %v9516_v33  ;;  %v9557_v33 = vld [vmem:[%s15214_s9 + $0x138] sm:$0xff] }
 0x39f   : > { %v3135_v1 = vmax.f32 %v3127_v60, 0.0  ;;  %v11893_v14 = vpack.c.bf16 %v9449_v5, %v9448_v56  ;;  %v9477_v60 = vld [vmem:[%s15265_s3 + $0xa8] sm:$0xff]  ;;  %v4772_v56 = vld [vmem:[%s15214_s9 + $0x30] sm:$0xff]  ;;  %v4773_v5 = vld [vmem:[%s15214_s9 + $0x38] sm:$0xff] }
 0x3a0   : > { %v3134_v2 = vmax.f32 %v3126_v63, 0.0  ;;  %11834 = vmatprep.subr.bf16.mxu0 %v13678_v62  ;;  %11882 = vmatprep.subr.bf16.mxu1 %v13678_v62  ;;  %v11961_v61 = vpack.c.bf16 %v9477_v60, %v9476_v59  ;;  %v9518_v54 = vld [vmem:[%s15214_s9 + $0x50] sm:$0xff]  ;;  %v9520_v59 = vld [vmem:[%s15214_s9 + $0x60] sm:$0xff]  ;;  %v9521_v60 = vld [vmem:[%s15214_s9 + $0x68] sm:$0xff] }
 0x3a1   : > { %11836 = vmatpush3.bf16.msra.mxu0 %v13678_v62  ;;  %11884 = vmatpush3.bf16.msra.mxu1 %v13678_v62 }
 0x3a2   : > { %v13684_v3 = vpack.c.bf16 %v3135_v1, %v3134_v2 }
 0x3a4   : > { %11838 = vmatprep.subr.bf16.mxu0 %v13684_v3  ;;  %11886 = vmatprep.subr.bf16.mxu1 %v13684_v3 }
 0x3a5   : > { %11840 = vmatpush3.bf16.msra.mxu0 %v13684_v3  ;;  %11888 = vmatpush3.bf16.msra.mxu1 %v13684_v3 }
 0x3a6   : > { %11842 = vmatprep.subr.bf16.mxu0 %v13666_v10  ;;  %11898 = vmatprep.subr.bf16.mxu1 %v13666_v10 }
 0x3a8   : > { %10785 = vmatmul.mubr.msk.f32.vlgmr.msra.gmra.mrb[40].mxu0 %vm3138_vm1, %v3137_v4  ;;  %10845 = vmatmul.mubr.msk.f32.vlgmr.msra.gmra.mrb[112].mxu1 %vm3138_vm1, %v9443_v6  ;;  %v9478_v6 = vld [vmem:[%s15265_s3 + $0xb0] sm:$0xff] }
 0x3a9   : > { %11844 = vmatpush3.bf16.msra.mxu0 %v13666_v10  ;;  %11900 = vmatpush3.bf16.msra.mxu1 %v13666_v10 }
 0x3aa   : > { %11846 = vmatprep.subr.bf16.mxu0 %v13672_v49  ;;  %11902 = vmatprep.subr.bf16.mxu1 %v13672_v49 }
 0x3ab   : > { %10803 = vmatprep.mubr.msk.f32.mxu0 %vm3138_vm1, %v9430_v55  ;;  %10874 = vmatprep.mubr.msk.f32.mxu1 %vm3138_vm1, %v9452_v8  ;;  %v9479_v55 = vld [vmem:[%s15265_s3 + $0xb8] sm:$0xff] }
 0x3ad   : > { %11848 = vmatpush3.bf16.msra.mxu0 %v13672_v49  ;;  %11904 = vmatpush3.bf16.msra.mxu1 %v13672_v49 }
 0x3ae   : > { %11850 = vmatprep.subr.bf16.mxu0 %v13678_v62  ;;  %11906 = vmatprep.subr.bf16.mxu1 %v13678_v62 }
 0x3b1   : > { %11852 = vmatpush3.bf16.msra.mxu0 %v13678_v62  ;;  %11908 = vmatpush3.bf16.msra.mxu1 %v13678_v62 }
 0x3b2   : > { %11854 = vmatprep.subr.bf16.mxu0 %v13684_v3  ;;  %11910 = vmatprep.subr.bf16.mxu1 %v13684_v3 }
 0x3b5   : > { %11856 = vmatpush3.bf16.msra.mxu0 %v13684_v3  ;;  %11912 = vmatpush3.bf16.msra.mxu1 %v13684_v3 }
 0x3b6   : > { %11946 = vmatprep.subr.bf16.mxu1 %v13666_v10  ;;  %11858 = vmatprep.subr.bf16.mxu0 %v11857_v26 }
 0x3b8   : > { %10804 = vmatmul.mubr.msk.f32.vlgmr.msra.gmra.mrb[42].mxu0 %vm3138_vm1, %v9431_v0  ;;  %10875 = vmatmul.mubr.msk.f32.vlgmr.msra.gmra.mrb[114].mxu1 %vm3138_vm1, %v9453_v12  ;;  %v11965_v12 = vpack.c.bf16 %v9479_v55, %v9478_v6  ;;  %v9528_v55 = vld [vmem:[%s15214_s9 + $0x80] sm:$0xff] }
 0x3b9   : > { %11948 = vmatpush3.bf16.msra.mxu1 %v13666_v10  ;;  %10934 = vmatprep.mubr.msk.f32.mxu1 %vm3138_vm1, %v9472_v13  ;;  %v9486_v13 = vld [vmem:[%s15265_s3 + $0xc0] sm:$0xff] }
 0x3ba   : > { %11950 = vmatprep.subr.bf16.mxu1 %v13672_v49  ;;  %11860 = vmatpush3.bf16.msra.mxu0 %v11857_v26  ;;  %v9497_v26 = vld [vmem:[%s15265_s3 + $0xe8] sm:$0xff] }
 0x3bb   : > { %11862 = vmatprep.subr.bf16.mxu0 %v11861_v31  ;;  %v12009_v30 = vpack.c.bf16 %v9497_v26, %v9496_v25  ;;  %v9533_v25 = vld [vmem:[%s15214_s9 + $0xa8] sm:$0xff] }
 0x3bd   : > { %11952 = vmatpush3.bf16.msra.mxu1 %v13672_v49 }
 0x3be   : > { %11954 = vmatprep.subr.bf16.mxu1 %v13678_v62  ;;  %11864 = vmatpush3.bf16.msra.mxu0 %v11861_v31  ;;  %v9498_v31 = vld [vmem:[%s15265_s3 + $0xf0] sm:$0xff] }
 0x3bf   : > { %11866 = vmatprep.subr.bf16.mxu0 %v11865_v41  ;;  %v12013_v37 = vpack.c.bf16 %v9499_v35, %v9498_v31  ;;  %v9535_v31 = vld [vmem:[%s15214_s9 + $0xb8] sm:$0xff] }
 0x3c1   : > { %11956 = vmatpush3.bf16.msra.mxu1 %v13678_v62 }
 0x3c2   : > { %11958 = vmatprep.subr.bf16.mxu1 %v13684_v3 }
 0x3c5   : > { %11960 = vmatpush3.bf16.msra.mxu1 %v13684_v3 }
 0x3c6   : > { %11970 = vmatprep.subr.bf16.mxu1 %v13666_v10 }
 0x3c8   : > { %10935 = vmatmul.mubr.msk.f32.vlgmr.msra.gmra.mrb[116].mxu1 %vm3138_vm1, %v9473_v11  ;;  %v9487_v11 = vld [vmem:[%s15265_s3 + $0xc8] sm:$0xff] }
 0x3c9   : > { %11972 = vmatpush3.bf16.msra.mxu1 %v13666_v10  ;;  %10964 = vmatprep.mubr.msk.f32.mxu1 %vm3138_vm1, %v9482_v17  ;;  %v11985_v17 = vpack.c.bf16 %v9487_v11, %v9486_v13  ;;  %v9526_v13 = vld [vmem:[%s15267_s8 + $0x8] sm:$0xf] }
 0x3ca   : > { %11974 = vmatprep.subr.bf16.mxu1 %v13672_v49 }
 0x3cd   : > { %11976 = vmatpush3.bf16.msra.mxu1 %v13672_v49 }
 0x3ce   : > { %11978 = vmatprep.subr.bf16.mxu1 %v13678_v62 }
 0x3d1   : > { %11980 = vmatpush3.bf16.msra.mxu1 %v13678_v62 }
 0x3d2   : > { %11982 = vmatprep.subr.bf16.mxu1 %v13684_v3 }
 0x3d5   : > { %11984 = vmatpush3.bf16.msra.mxu1 %v13684_v3 }
 0x3d6   : > { %11994 = vmatprep.subr.bf16.mxu1 %v13666_v10 }
 0x3d8   : > { %10965 = vmatmul.mubr.msk.f32.vlgmr.msra.gmra.mrb[118].mxu1 %vm3138_vm1, %v9483_v18  ;;  %v9488_v18 = vld [vmem:[%s15265_s3 + $0xd0] sm:$0xff] }
 0x3d9   : > { %11996 = vmatpush3.bf16.msra.mxu1 %v13666_v10  ;;  %10994 = vmatprep.mubr.msk.f32.mxu1 %vm3138_vm1, %v9492_v42  ;;  %v11989_v23 = vpack.c.bf16 %v9489_v20, %v9488_v18  ;;  %v9506_v42 = vld [vmem:[%s15265_s3 + $0x100] sm:$0xff]  ;;  %v9531_v18 = vld [vmem:[%s15214_s9 + $0x98] sm:$0xff] }
 0x3da   : > { %11998 = vmatprep.subr.bf16.mxu1 %v13672_v49 }
 0x3dd   : > { %12000 = vmatpush3.bf16.msra.mxu1 %v13672_v49 }
 0x3de   : > { %12002 = vmatprep.subr.bf16.mxu1 %v13678_v62 }
 0x3e1   : > { %12004 = vmatpush3.bf16.msra.mxu1 %v13678_v62 }
 0x3e2   : > { %12006 = vmatprep.subr.bf16.mxu1 %v13684_v3 }
 0x3e5   : > { %12008 = vmatpush3.bf16.msra.mxu1 %v13684_v3 }
 0x3e6   : > { %12041 = vmatprep.subr.bf16.mxu1 %v12629_v52 }
 0x3e8   : > { %10995 = vmatmul.mubr.msk.f32.vlgmr.msra.gmra.mrb[120].mxu1 %vm3138_vm1, %v9493_v47  ;;  %v9507_v47 = vld [vmem:[%s15265_s3 + $0x108] sm:$0xff] }
 0x47b   : > { %v10786_v48 = vpop.f32.mrb[40].mxu0  ;;  %v10846_v9 = vpop.f32.mrb[112].mxu1 }
 0x47c   : > { %v3211_v51 = vpop.f32.mrb[41].mxu0  ;;  %v3551_v15 = vpop.f32.mrb[113].mxu1 }
 0x48b   : > { %v10805_v36 = vpop.f32.mrb[42].mxu0  ;;  %v10876_v53 = vpop.f32.mrb[114].mxu1 }
 0x48c   : > { %v3299_v27 = vpop.f32.mrb[43].mxu0  ;;  %v3723_v34 = vpop.f32.mrb[115].mxu1 }
 0x48d   : > { %10814 = vmatprep.mubr.msk.f32.mxu0 %vm3313_vm2, %v3299_v27  ;;  %v4768_v27 = vld [vmem:[%s15214_s9 + $0x10] sm:$0xff] }
 0x48e   : > { %10815 = vmatmul.mubr.msk.f32.vlgmr.msra.gmra.mrb[44].mxu0 %vm3313_vm2, %v10805_v36  ;;  %v4767_v36 = vld [vmem:[%s15214_s9 + $0x8] sm:$0xff] }
 0x48f   : > { %11868 = vmatpush3.bf16.msra.mxu0 %v11865_v41  ;;  %10825 = vmatprep.mubr.msk.f32.mxu0 %vm3313_vm2, %v3211_v51  ;;  %v9502_v41 = vld [vmem:[%s15263_s29 + $0x80] sm:$0xff] }
 0x490   : > { %11870 = vmatprep.subr.bf16.mxu0 %v11869_v28 }
 0x493   : > { %11872 = vmatpush3.bf16.msra.mxu0 %v11869_v28  ;;  %v4769_v28 = vld [vmem:[%s15214_s9 + $0x18] sm:$0xff] }
 0x494   : > { %11890 = vmatprep.subr.bf16.mxu0 %v11889_v7 }
 0x496   : > { %10826 = vmatmul.mubr.msk.f32.vlgmr.msra.gmra.mrb[44].mxu0 %vm3313_vm2, %v10786_v48  ;;  %v9508_v48 = vld [vmem:[%s15265_s3 + $0x110] sm:$0xff] }
 0x497   : > { %11892 = vmatpush3.bf16.msra.mxu0 %v11889_v7  ;;  %10855 = vmatprep.mubr.msk.f32.mxu0 %vm3313_vm2, %v3551_v15  ;;  %v12066_v7 = vpack.c.bf16 %v4771_v44, %v4770_v39  ;;  %v9550_v39 = vld [vmem:[%s15214_s9 + $0x100] sm:$0xff]  ;;  %v9551_v44 = vld [vmem:[%s15214_s9 + $0x108] sm:$0xff] }
 0x498   : > { %11894 = vmatprep.subr.bf16.mxu0 %v11893_v14 }
 0x49b   : > { %11896 = vmatpush3.bf16.msra.mxu0 %v11893_v14  ;;  %v10936_v43 = vpop.f32.mrb[116].mxu1  ;;  %v12069_v14 = vpack.c.bf16 %v4773_v5, %v4772_v56  ;;  %v12105_v56 = vpack.c.bf16 %v9551_v44, %v9550_v39  ;;  %v9552_v5 = vld [vmem:[%s15214_s9 + $0x110] sm:$0xff]  ;;  %v9594_v39 = vld [vmem:[%s15214_s9 + $0x200] sm:$0xff]  ;;  %v9595_v44 = vld [vmem:[%s15214_s9 + $0x208] sm:$0xff] }
 0x49c   : > { %11914 = vmatprep.subr.bf16.mxu0 %v11913_v29  ;;  %v4067_v16 = vpop.f32.mrb[117].mxu1 }
 0x49e   : > { %10856 = vmatmul.mubr.msk.f32.vlgmr.msra.gmra.mrb[44].mxu0 %vm3313_vm2, %v10846_v9  ;;  %v9503_v9 = vld [vmem:[%s15263_s29 + $0x88] sm:$0xff] }
 0x49f   : > { %11916 = vmatpush3.bf16.msra.mxu0 %v11913_v29  ;;  %10885 = vmatprep.mubr.msk.f32.mxu0 %vm3313_vm2, %v3723_v34  ;;  %v12063_v34 = vpack.c.bf16 %v4769_v28, %v4768_v27 }
 0x4a0   : > { %11918 = vmatprep.subr.bf16.mxu0 %v11917_v50 }
 0x4a3   : > { %11920 = vmatpush3.bf16.msra.mxu0 %v11917_v50 }
 0x4a4   : > { %11922 = vmatprep.subr.bf16.mxu0 %v13666_v10 }
 0x4a6   : > { %10886 = vmatmul.mubr.msk.f32.vlgmr.msra.gmra.mrb[44].mxu0 %vm3313_vm2, %v10876_v53  ;;  %v12060_v53 = vpack.c.bf16 %v4767_v36, %v4766_v21 }
 0x4a7   : > { %11924 = vmatpush3.bf16.msra.mxu0 %v13666_v10  ;;  %10904 = vmatprep.mubr.msk.f32.mxu0 %vm3138_vm1, %v9462_v22  ;;  %v4691_v22 = vld [vmem:[%s15267_s8] sm:$0xf] }
 0x4a8   : > { %11926 = vmatprep.subr.bf16.mxu0 %v13672_v49 }
 0x4ab   : > { %11928 = vmatpush3.bf16.msra.mxu0 %v13672_v49  ;;  %v10966_v63 = vpop.f32.mrb[118].mxu1 }
 0x4ac   : > { %11930 = vmatprep.subr.bf16.mxu0 %v13678_v62  ;;  %v4239_v1 = vpop.f32.mrb[119].mxu1 }
 0x4af   : > { %11932 = vmatpush3.bf16.msra.mxu0 %v13678_v62 }
 0x4b0   : > { %11934 = vmatprep.subr.bf16.mxu0 %v13684_v3 }
 0x4b3   : > { %11936 = vmatpush3.bf16.msra.mxu0 %v13684_v3 }
 0x4b4   : > { %11938 = vmatprep.subr.bf16.mxu0 %v11937_v45 }
 0x4b6   : > { %10905 = vmatmul.mubr.msk.f32.vlgmr.msra.gmra.mrb[46].mxu0 %vm3138_vm1, %v9463_v57  ;;  %v9519_v57 = vld [vmem:[%s15214_s9 + $0x58] sm:$0xff] }
 0x4b7   : > { %11940 = vmatpush3.bf16.msra.mxu0 %v11937_v45  ;;  %v9514_v45 = vld [vmem:[%s15267_s8 + $0x4] sm:$0xf] }
 0x4b8   : > { %11942 = vmatprep.subr.bf16.mxu0 %v11941_v58 }
 0x4bb   : > { %11944 = vmatpush3.bf16.msra.mxu0 %v11941_v58  ;;  %v10996_v2 = vpop.f32.mrb[120].mxu1  ;;  %v12051_v58 = vpack.c.bf16 %v9519_v57, %v9518_v54 }
 0x4bc   : > { %11962 = vmatprep.subr.bf16.mxu0 %v11961_v61  ;;  %v4411_v4 = vpop.f32.mrb[121].mxu1 }
 0x589   : > { %v10906_v8 = vpop.f32.mrb[46].mxu0 }
 0x58a   : > { %v3895_v0 = vpop.f32.mrb[47].mxu0 }
 0x58b   : > { %10915 = vmatprep.mubr.msk.f32.mxu0 %vm3313_vm2, %v3895_v0 }
 0x58c   : > { %10916 = vmatmul.mubr.msk.f32.vlgmr.msra.gmra.mrb[44].mxu0 %vm3313_vm2, %v10906_v8  ;;  %v9529_v8 = vld [vmem:[%s15214_s9 + $0x88] sm:$0xff] }
 0x58d   : > { %11964 = vmatpush3.bf16.msra.mxu0 %v11961_v61  ;;  %10945 = vmatprep.mubr.msk.f32.mxu0 %vm3313_vm2, %v4067_v16  ;;  %v12054_v61 = vpack.c.bf16 %v9521_v60, %v9520_v59  ;;  %v12075_v11 = vpack.c.bf16 %v9529_v8, %v9528_v55  ;;  %v9562_v59 = vld [vmem:[%s15214_s9 + $0x148] sm:$0xff]  ;;  %v9564_v55 = vld [vmem:[%s15214_s9 + $0x158] sm:$0xff] }
 0x58e   : > { %11966 = vmatprep.subr.bf16.mxu0 %v11965_v12 }
 0x591   : > { %11968 = vmatpush3.bf16.msra.mxu0 %v11965_v12 }
 0x592   : > { %11986 = vmatprep.subr.bf16.mxu0 %v11985_v17 }
 0x594   : > { %10946 = vmatmul.mubr.msk.f32.vlgmr.msra.gmra.mrb[44].mxu0 %vm3313_vm2, %v10936_v43 }
 0x595   : > { %11988 = vmatpush3.bf16.msra.mxu0 %v11985_v17  ;;  %10975 = vmatprep.mubr.msk.f32.mxu0 %vm3313_vm2, %v4239_v1  ;;  %v9523_v1 = vld [vmem:[%s15214_s9 + $0x78] sm:$0xff]  ;;  %v9530_v17 = vld [vmem:[%s15214_s9 + $0x90] sm:$0xff] }
 0x596   : > { %11990 = vmatprep.subr.bf16.mxu0 %v11989_v23  ;;  %v12078_v20 = vpack.c.bf16 %v9531_v18, %v9530_v17  ;;  %v9575_v17 = vld [vmem:[%s15214_s9 + $0x198] sm:$0xff]  ;;  %v9565_v18 = vld [vmem:[%s15214_s9 + $0x160] sm:$0xff] }
 0x599   : > { %11992 = vmatpush3.bf16.msra.mxu0 %v11989_v23  ;;  %v9532_v23 = vld [vmem:[%s15214_s9 + $0xa0] sm:$0xff] }
 0x59a   : > { %12010 = vmatprep.subr.bf16.mxu0 %v12009_v30  ;;  %v12081_v26 = vpack.c.bf16 %v9533_v25, %v9532_v23 }
 0x59c   : > { %10976 = vmatmul.mubr.msk.f32.vlgmr.msra.gmra.mrb[44].mxu0 %vm3313_vm2, %v10966_v63  ;;  %v9522_v63 = vld [vmem:[%s15214_s9 + $0x70] sm:$0xff] }
 0x59d   : > { %12012 = vmatpush3.bf16.msra.mxu0 %v12009_v30  ;;  %11005 = vmatprep.mubr.msk.f32.mxu0 %vm3313_vm2, %v4411_v4  ;;  %v9534_v30 = vld [vmem:[%s15214_s9 + $0xb0] sm:$0xff] }
 0x59e   : > { %12014 = vmatprep.subr.bf16.mxu0 %v12013_v37  ;;  %v12084_v35 = vpack.c.bf16 %v9535_v31, %v9534_v30  ;;  %v9568_v30 = vld [vmem:[%s15214_s9 + $0x178] sm:$0xff]  ;;  %v9576_v31 = vld [vmem:[%s15214_s9 + $0x1a0] sm:$0xff] }
 0x5a1   : > { %12016 = vmatpush3.bf16.msra.mxu0 %v12013_v37  ;;  %v9539_v37 = vld [vmem:[%s15214_s9 + $0xc0] sm:$0xff] }
 0x5a2   : > { %12018 = vmatprep.subr.bf16.mxu0 %v13666_v10 }
 0x5a4   : > { %11006 = vmatmul.mubr.msk.f32.vlgmr.msra.gmra.mrb[44].mxu0 %vm3313_vm2, %v10996_v2  ;;  %v12057_v2 = vpack.c.bf16 %v9523_v1, %v9522_v63  ;;  %v9572_v1 = vld [vmem:[%s15214_s9 + $0x180] sm:$0xff] }
 0x5a5   : > { %12020 = vmatpush3.bf16.msra.mxu0 %v13666_v10  ;;  %11024 = vmatprep.mubr.msk.f32.mxu0 %vm3138_vm1, %v9502_v41  ;;  %v12033_v10 = vpack.c.bf16 %v9507_v47, %v9506_v42  ;;  %v9540_v41 = vld [vmem:[%s15214_s9 + $0xc8] sm:$0xff]  ;;  %v9541_v42 = vld [vmem:[%s15214_s9 + $0xd0] sm:$0xff] }
 0x5a6   : > { %12022 = vmatprep.subr.bf16.mxu0 %v13672_v49  ;;  %v12090_v47 = vpack.c.bf16 %v9540_v41, %v9539_v37  ;;  %v9577_v37 = vld [vmem:[%s15214_s9 + $0x1a8] sm:$0xff] }
 0x5a7   : > { %v12141_v41 = vpack.c.bf16 %v9577_v37, %v9576_v31 }
 0x5a9   : > { %12024 = vmatpush3.bf16.msra.mxu0 %v13672_v49  ;;  %v9509_v49 = vld [vmem:[%s15265_s3 + $0x118] sm:$0xff] }
 0x5aa   : > { %12026 = vmatprep.subr.bf16.mxu0 %v13678_v62  ;;  %v12037_v51 = vpack.c.bf16 %v9509_v49, %v9508_v48  ;;  %v9543_v49 = vld [vmem:[%s15214_s9 + $0xe0] sm:$0xff] }
 0x5ad   : > { %12028 = vmatpush3.bf16.msra.mxu0 %v13678_v62 }
 0x5ae   : > { %12030 = vmatprep.subr.bf16.mxu0 %v13684_v3 }
 0x5b1   : > { %12032 = vmatpush3.bf16.msra.mxu0 %v13684_v3  ;;  %v12631_v3 = vmov 0.0  }
 0x5b2   : > { %12034 = vmatprep.subr.bf16.mxu0 %v12033_v10  ;;  %11042 = vmatprep.mubr.msk.f32.mxu1 %vm12630_vm3, %v12631_v3 }
 0x5b4   : > { %11025 = vmatmul.mubr.msk.f32.vlgmr.msra.gmra.mrb[48].mxu0 %vm3138_vm1, %v9503_v9  ;;  %v9544_v9 = vld [vmem:[%s15214_s9 + $0xe8] sm:$0xff] }
 0x5b5   : > { %12036 = vmatpush3.bf16.msra.mxu0 %v12033_v10  ;;  %v9542_v10 = vld [vmem:[%s15214_s9 + $0xd8] sm:$0xff] }
 0x5b6   : > { %12038 = vmatprep.subr.bf16.mxu0 %v12037_v51  ;;  %v12093_v48 = vpack.c.bf16 %v9542_v10, %v9541_v42  ;;  %v9578_v42 = vld [vmem:[%s15214_s9 + $0x1b0] sm:$0xff] }
 0x5b9   : > { %12040 = vmatpush3.bf16.msra.mxu0 %v12037_v51  ;;  %v12096_v51 = vpack.c.bf16 %v9544_v9, %v9543_v49 }
 0x5ba   : > { %12059 = vmatprep.subr.bf16.mxu0 %v12629_v52 }
 0x687   : > { %v11026_v62 = vpop.f32.mrb[48].mxu0 }
 0x688   : > { %v4583_v15 = vpop.f32.mrb[49].mxu0 }
 0x689   : > { %11035 = vmatprep.mubr.msk.f32.mxu0 %vm3313_vm2, %v4583_v15 }
 0x68a   : > { %11036 = vmatmul.mubr.msk.f32.vlgmr.msra.gmra.mrb[44].mxu0 %vm3313_vm2, %v11026_v62 }
 0x68b   : > { %11087 = vmatprep.mubr.msk.f32.mxu0 %vm12630_vm3, %v12631_v3  ;;  %12061 = vmatpush3.bf16.msra.mxu0 %v12060_v53 }
 0x68c   : > { %12062 = vmatprep.subr.bf16.mxu0 %v12629_v52 }
 0x68f   : > { %12064 = vmatpush3.bf16.msra.mxu0 %v12063_v34  ;;  %v9537_v34 = vld [vmem:[%s15267_s8 + $0xc] sm:$0xf] }
 0x690   : > { %12065 = vmatprep.subr.bf16.mxu0 %v12629_v52 }
 0x693   : > { %12067 = vmatpush3.bf16.msra.mxu0 %v12066_v7  ;;  %v9548_v7 = vld [vmem:[%s15267_s8 + $0x10] sm:$0xf] }
 0x694   : > { %12068 = vmatprep.subr.bf16.mxu0 %v12629_v52 }
 0x697   : > { %12070 = vmatpush3.bf16.msra.mxu0 %v12069_v14  ;;  %v9553_v14 = vld [vmem:[%s15214_s9 + $0x118] sm:$0xff] }
 0x698   : > { %12089 = vmatprep.subr.bf16.mxu0 %v12629_v52 }
 0x75d   : > { %v11037_v24 = vpop.f32.mrb[44].mxu0 }
 0x75e   : > { %v4688_v29 = vadd.f32 %v11037_v24, %v9512_v19  ;;  %v4669_v32 = vpop.f32.mrb[45].mxu0  ;;  %v9545_v24 = vld [vmem:[%s15214_s9 + $0xf0] sm:$0xff] }
 0x75f   : > { %v4687_v38 = vadd.f32 %v9512_v19, %v4669_v32  ;;  %v12108_v19 = vpack.c.bf16 %v9553_v14, %v9552_v5  ;;  %v9554_v32 = vld [vmem:[%s15214_s9 + $0x120] sm:$0xff]  ;;  %v9586_v5 = vld [vmem:[%s15214_s9 + $0x1d8] sm:$0xff] }
 0x760   : > { %v4690_v43 = vmax.f32 %v4688_v29, 0.0  ;;  %v9546_v29 = vld [vmem:[%s15214_s9 + $0xf8] sm:$0xff] }
 0x761   : > { %v4689_v50 = vmax.f32 %v4687_v38, 0.0  ;;  %v12099_v38 = vpack.c.bf16 %v9546_v29, %v9545_v24  ;;  %v12165_v24 = vpack.c.bf16 %v9595_v44, %v9594_v39  ;;  %v6141_v39 = vld [vmem:[%s15216_s11 + $0x90] sm:$0xff]  ;;  %v6144_v44 = vld [vmem:[%s15216_s11 + $0xa8] sm:$0xff] }
 0x763   : > { %v13973_v16 = vpack.c.bf16 %v4690_v43, %v4689_v50  ;;  %v9555_v43 = vld [vmem:[%s15214_s9 + $0x128] sm:$0xff] }
 0x764   : > { %v12111_v50 = vpack.c.bf16 %v9555_v43, %v9554_v32  ;;  %v9596_v32 = vld [vmem:[%s15214_s9 + $0x210] sm:$0xff]  ;;  %v9588_v43 = vld [vmem:[%s15214_s9 + $0x1e8] sm:$0xff] }
 0x765   : > { %12043 = vmatpush3.bf16.msra.mxu1 %v13973_v16 }
 0x766   : > { %12044 = vmatprep.subr.bf16.mxu1 %v12629_v52 }
 0x768   : > { %11043 = vmatmul.mubr.msk.f32.vlgmr.msra.gmra.mrb[122].mxu1 %vm4692_vm4, %v4691_v22  ;;  %v9556_v22 = vld [vmem:[%s15214_s9 + $0x130] sm:$0xff] }
 0x769   : > { %12046 = vmatpush3.bf16.msra.mxu1 %v13973_v16  ;;  %11049 = vmatprep.mubr.msk.f32.mxu1 %vm12630_vm3, %v12631_v3  ;;  %v12114_v40 = vpack.c.bf16 %v9557_v33, %v9556_v22  ;;  %v9589_v33 = vld [vmem:[%s15214_s9 + $0x1f0] sm:$0xff] }
 0x76a   : > { %12047 = vmatprep.subr.bf16.mxu1 %v12629_v52 }
 0x76c   : > { %11050 = vmatmul.mubr.msk.f32.vlgmr.msra.gmra.mrb[124].mxu1 %vm4692_vm4, %v9514_v45 }
 0x76d   : > { %12049 = vmatpush3.bf16.msra.mxu1 %v12048_v46  ;;  %11068 = vmatprep.mubr.msk.f32.mxu1 %vm12630_vm3, %v12631_v3 }
 0x76e   : > { %12050 = vmatprep.subr.bf16.mxu1 %v12629_v52 }
 0x771   : > { %12052 = vmatpush3.bf16.msra.mxu1 %v12051_v58  ;;  %v9561_v58 = vld [vmem:[%s15214_s9 + $0x140] sm:$0xff] }
 0x772   : > { %12053 = vmatprep.subr.bf16.mxu1 %v12629_v52  ;;  %v12120_v63 = vpack.c.bf16 %v9562_v59, %v9561_v58  ;;  %v9600_v58 = vld [vmem:[%s15214_s9 + $0x230] sm:$0xff]  ;;  %v9601_v59 = vld [vmem:[%s15214_s9 + $0x238] sm:$0xff] }
 0x775   : > { %12055 = vmatpush3.bf16.msra.mxu1 %v12054_v61  ;;  %v9559_v61 = vld [vmem:[%s15267_s8 + $0x14] sm:$0xf] }
 0x776   : > { %12056 = vmatprep.subr.bf16.mxu1 %v12629_v52 }
 0x779   : > { %12058 = vmatpush3.bf16.msra.mxu1 %v12057_v2  ;;  %v9573_v2 = vld [vmem:[%s15214_s9 + $0x188] sm:$0xff] }
 0x77a   : > { %12071 = vmatprep.subr.bf16.mxu1 %v12629_v52 }
 0x83b   : > { %v4762_v4 = vpop.f32.mrb[122].mxu1 }
 0x83c   : > { %v11044_v6 = vpop.f32.mrb[123].mxu1  ;;  %11088 = vmatmul.mubr.msk.f32.vlgmr.msra.gmra.mrb[50].mxu0 %vm3138_vm1, %v4762_v4 }
 0x83d   : > { %11139 = vmatprep.mubr.msk.f32.mxu0 %vm12630_vm3, %v12631_v3  ;;  %12091 = vmatpush3.bf16.msra.mxu0 %v12090_v47  ;;  %v9563_v6 = vld [vmem:[%s15214_s9 + $0x150] sm:$0xff]  ;;  %v9579_v47 = vld [vmem:[%s15214_s9 + $0x1b8] sm:$0xff] }
 0x83e   : > { %12092 = vmatprep.subr.bf16.mxu0 %v12629_v52  ;;  %v12144_v10 = vpack.c.bf16 %v9579_v47, %v9578_v42  ;;  %v6131_v42 = vld [vmem:[%s15216_s11 + $0x40] sm:$0xff]  ;;  %v6133_v47 = vld [vmem:[%s15216_s11 + $0x50] sm:$0xff] }
 0x83f   : > { %v4845_v0 = vpop.f32.mrb[124].mxu1 }
 0x840   : > { %v11051_v12 = vpop.f32.mrb[125].mxu1  ;;  %11069 = vmatmul.mubr.msk.f32.vlgmr.msra.gmra.mrb[126].mxu1 %vm3138_vm1, %v4845_v0  ;;  %v9570_v0 = vld [vmem:[%s15267_s8 + $0x18] sm:$0xf] }
 0x841   : > { %12073 = vmatpush3.bf16.msra.mxu1 %v13973_v16  ;;  %11094 = vmatprep.mubr.msk.f32.mxu1 %vm12630_vm3, %v12631_v3  ;;  %v12135_v12 = vpack.c.bf16 %v9573_v2, %v9572_v1  ;;  %v6123_v2 = vld [vmem:[%s15216_s11] sm:$0xff] }
 0x842   : > { %12074 = vmatprep.subr.bf16.mxu1 %v12629_v52  ;;  %12094 = vmatpush3.bf16.msra.mxu0 %v12093_v48 }
 0x843   : > { %12095 = vmatprep.subr.bf16.mxu0 %v12629_v52 }
 0x844   : > { %11095 = vmatmul.mubr.msk.f32.vlgmr.msra.gmra.mrb[128].mxu1 %vm4692_vm4, %v9526_v13  ;;  %v12123_v13 = vpack.c.bf16 %v9564_v55, %v9563_v6  ;;  %v6128_v55 = vld [vmem:[%s15216_s11 + $0x28] sm:$0xff] }
 0x845   : > { %12076 = vmatpush3.bf16.msra.mxu1 %v12075_v11  ;;  %11113 = vmatprep.mubr.msk.f32.mxu1 %vm12630_vm3, %v12631_v3  ;;  %v9574_v11 = vld [vmem:[%s15214_s9 + $0x190] sm:$0xff] }
 0x846   : > { %12077 = vmatprep.subr.bf16.mxu1 %v12629_v52  ;;  %12097 = vmatpush3.bf16.msra.mxu0 %v12096_v51  ;;  %v12138_v23 = vpack.c.bf16 %v9575_v17, %v9574_v11  ;;  %v6127_v17 = vld [vmem:[%s15216_s11 + $0x20] sm:$0xff] }
 0x847   : > { %12098 = vmatprep.subr.bf16.mxu0 %v12629_v52 }
 0x849   : > { %12079 = vmatpush3.bf16.msra.mxu1 %v12078_v20  ;;  %v9566_v20 = vld [vmem:[%s15214_s9 + $0x168] sm:$0xff] }
 0x84a   : > { %12080 = vmatprep.subr.bf16.mxu1 %v12629_v52  ;;  %12100 = vmatpush3.bf16.msra.mxu0 %v12099_v38  ;;  %v12126_v25 = vpack.c.bf16 %v9566_v20, %v9565_v18  ;;  %v9587_v38 = vld [vmem:[%s15214_s9 + $0x1e0] sm:$0xff]  ;;  %v6129_v18 = vld [vmem:[%s15216_s11 + $0x30] sm:$0xff] }
 0x84b   : > { %12116 = vmatprep.subr.bf16.mxu0 %v12629_v52  ;;  %v12156_v22 = vpack.c.bf16 %v9588_v43, %v9587_v38  ;;  %v12182_v37 = vpack.c.bf16 %v6129_v18, %v6127_v17  ;;  %v6147_v38 = vld [vmem:[%s15216_s11 + $0xc0] sm:$0xff]  ;;  %v6149_v43 = vld [vmem:[%s15216_s11 + $0xd0] sm:$0xff] }
 0x84d   : > { %12082 = vmatpush3.bf16.msra.mxu1 %v12081_v26  ;;  %v9567_v26 = vld [vmem:[%s15214_s9 + $0x170] sm:$0xff] }
 0x84e   : > { %12083 = vmatprep.subr.bf16.mxu1 %v12629_v52 }
 0x851   : > { %12085 = vmatpush3.bf16.msra.mxu1 %v12084_v35  ;;  %v12129_v35 = vpack.c.bf16 %v9568_v30, %v9567_v26  ;;  %v6134_v26 = vld [vmem:[%s15216_s11 + $0x58] sm:$0xff] }
 0x852   : > { %12086 = vmatprep.subr.bf16.mxu1 %v12629_v52 }
 0x90f   : > { %v5000_v62 = vpop.f32.mrb[50].mxu0 }
 0x910   : > { %v11089_v15 = vpop.f32.mrb[51].mxu0 }
 0x911   : > { %v9583_v15 = vld [vmem:[%s15214_s9 + $0x1c0] sm:$0xff] }
 0x913   : > { %v4927_v21 = vpop.f32.mrb[126].mxu1 }
 0x914   : > { %v5001_v36 = vadd.f32 %v5000_v62, %v4927_v21  ;;  %v11070_v53 = vpop.f32.mrb[127].mxu1  ;;  %v9584_v21 = vld [vmem:[%s15214_s9 + $0x1c8] sm:$0xff] }
 0x917   : > { %v5075_v27 = vpop.f32.mrb[128].mxu1 }
 0x918   : > { %v11096_v28 = vpop.f32.mrb[129].mxu1  ;;  %11114 = vmatmul.mubr.msk.f32.vlgmr.msra.gmra.mrb[130].mxu1 %vm3138_vm1, %v5075_v27 }
 0x919   : > { %12088 = vmatpush3.bf16.msra.mxu1 %v13973_v16  ;;  %11120 = vmatprep.mubr.msk.f32.mxu1 %vm12630_vm3, %v12631_v3  ;;  %v9581_v28 = vld [vmem:[%s15267_s8 + $0x1c] sm:$0xf] }
 0x91a   : > { %12101 = vmatprep.subr.bf16.mxu1 %v12629_v52 }
 0x91c   : > { %11121 = vmatmul.mubr.msk.f32.vlgmr.msra.gmra.mrb[132].mxu1 %vm4692_vm4, %v9537_v34  ;;  %v12150_v34 = vpack.c.bf16 %v9584_v21, %v9583_v15  ;;  %v6135_v15 = vld [vmem:[%s15216_s11 + $0x60] sm:$0xff]  ;;  %v6137_v21 = vld [vmem:[%s15216_s11 + $0x70] sm:$0xff] }
 0x91d   : > { %12103 = vmatpush3.bf16.msra.mxu1 %v13973_v16  ;;  %11146 = vmatprep.mubr.msk.f32.mxu1 %vm12630_vm3, %v12631_v3 }
 0x91e   : > { %12104 = vmatprep.subr.bf16.mxu1 %v12629_v52 }
 0x920   : > { %11147 = vmatmul.mubr.msk.f32.vlgmr.msra.gmra.mrb[134].mxu1 %vm4692_vm4, %v9548_v7 }
 0x921   : > { %12106 = vmatpush3.bf16.msra.mxu1 %v12105_v56  ;;  %11165 = vmatprep.mubr.msk.f32.mxu1 %vm12630_vm3, %v12631_v3  ;;  %v9585_v56 = vld [vmem:[%s15214_s9 + $0x1d0] sm:$0xff] }
 0x922   : > { %12107 = vmatprep.subr.bf16.mxu1 %v12629_v52  ;;  %v12153_v29 = vpack.c.bf16 %v9586_v5, %v9585_v56 }
 0x925   : > { %12109 = vmatpush3.bf16.msra.mxu1 %v12108_v19  ;;  %v9592_v19 = vld [vmem:[%s15267_s8 + $0x20] sm:$0xf] }
 0x926   : > { %12110 = vmatprep.subr.bf16.mxu1 %v12629_v52 }
 0x929   : > { %12112 = vmatpush3.bf16.msra.mxu1 %v12111_v50 }
 0x92a   : > { %12113 = vmatprep.subr.bf16.mxu1 %v12629_v52 }
 0x92d   : > { %12115 = vmatpush3.bf16.msra.mxu1 %v12114_v40  ;;  %v9590_v40 = vld [vmem:[%s15214_s9 + $0x1f8] sm:$0xff] }
 0x92e   : > { %12131 = vmatprep.subr.bf16.mxu1 %v12629_v52 }
 0x9eb   : > { %v5157_v45 = vpop.f32.mrb[130].mxu1 }
 0x9ec   : > { %v5161_v46 = vadd.f32 %v5157_v45, %v5001_v36  ;;  %v11115_v54 = vpop.f32.mrb[131].mxu1  ;;  %v9598_v45 = vld [vmem:[%s15214_s9 + $0x220] sm:$0xff] }
 0x9ed   : > { %v9599_v54 = vld [vmem:[%s15214_s9 + $0x228] sm:$0xff] }
 0x9ef   : > { %v5233_v57 = vpop.f32.mrb[132].mxu1 }
 0x9f0   : > { %v11122_v60 = vpop.f32.mrb[133].mxu1  ;;  %11140 = vmatmul.mubr.msk.f32.vlgmr.msra.gmra.mrb[52].mxu0 %vm3138_vm1, %v5233_v57  ;;  %v12171_v57 = vpack.c.bf16 %v9599_v54, %v9598_v45  ;;  %v6151_v45 = vld [vmem:[%s15216_s11 + $0xe0] sm:$0xff] }
 0x9f1   : > { %12118 = vmatpush3.bf16.msra.mxu0 %v13973_v16  ;;  %11172 = vmatprep.mubr.msk.f32.mxu0 %vm12630_vm3, %v12631_v3  ;;  %v12174_v60 = vpack.c.bf16 %v9601_v59, %v9600_v58 }
 0x9f2   : > { %12119 = vmatprep.subr.bf16.mxu0 %v12629_v52 }
 0x9f3   : > { %v5391_v4 = vpop.f32.mrb[134].mxu1 }
 0x9f4   : > { %v11148_v8 = vpop.f32.mrb[135].mxu1  ;;  %11166 = vmatmul.mubr.msk.f32.vlgmr.msra.gmra.mrb[136].mxu1 %vm3138_vm1, %v5391_v4  ;;  %11173 = vmatmul.mubr.msk.f32.vlgmr.msra.gmra.mrb[54].mxu0 %vm4692_vm4, %v9559_v61  ;;  %v6124_v61 = vld [vmem:[%s15216_s11 + $0x8] sm:$0xff]  ;;  %v6125_v4 = vld [vmem:[%s15216_s11 + $0x10] sm:$0xff] }
 0x9f5   : > { %12133 = vmatpush3.bf16.msra.mxu1 %v13973_v16  ;;  %11198 = vmatprep.mubr.msk.f32.mxu1 %vm12630_vm3, %v12631_v3  ;;  %v6130_v8 = vld [vmem:[%s15216_s11 + $0x38] sm:$0xff] }
 0x9f6   : > { %12121 = vmatpush3.bf16.msra.mxu0 %v12120_v63  ;;  %12134 = vmatprep.subr.bf16.mxu1 %v12629_v52  ;;  %v6126_v63 = vld [vmem:[%s15216_s11 + $0x18] sm:$0xff]  ;;  %v12180_v11 = vpack.c.bf16 %v6130_v8, %v6128_v55  ;;  %v6157_v55 = vlaneseq }
 0x9f7   : > { %12122 = vmatprep.subr.bf16.mxu0 %v12629_v52  ;;  %11191 = vmatprep.mubr.msk.f32.mxu0 %vm12630_vm3, %v12631_v3  ;;  %v12176_v1 = vpack.c.bf16 %v6126_v63, %v6124_v61  ;;  %v9603_v61 = vld [vmem:[%s15215_s10] ss:$0 sm:$0xff] }
 0x9f8   : > { %11199 = vmatmul.mubr.msk.f32.vlgmr.msra.gmra.mrb[138].mxu1 %vm4692_vm4, %v9570_v0  ;;  %v6158_v8 = vshrl.u32 %v6157_v55, 7 }
 0x9f9   : > { %12136 = vmatpush3.bf16.msra.mxu1 %v12135_v12  ;;  %11217 = vmatprep.mubr.msk.f32.mxu1 %vm12630_vm3, %v12631_v3 }
 0x9fa   : > { %12124 = vmatpush3.bf16.msra.mxu0 %v12123_v13  ;;  %12137 = vmatprep.subr.bf16.mxu1 %v12629_v52  ;;  %v12178_v13 = vpack.c.bf16 %v6125_v4, %v6123_v2 }
 0x9fb   : > { %12125 = vmatprep.subr.bf16.mxu0 %v12629_v52 }
 0x9fd   : > { %12139 = vmatpush3.bf16.msra.mxu1 %v12138_v23 }
 0x9fe   : > { %12127 = vmatpush3.bf16.msra.mxu0 %v12126_v25  ;;  %12140 = vmatprep.subr.bf16.mxu1 %v12629_v52  ;;  %v6132_v25 = vld [vmem:[%s15216_s11 + $0x48] sm:$0xff] }
 0x9ff   : > { %12128 = vmatprep.subr.bf16.mxu0 %v12629_v52 }
 0xa01   : > { %12142 = vmatpush3.bf16.msra.mxu1 %v12141_v41  ;;  %v12184_v41 = vpack.c.bf16 %v6134_v26, %v6132_v25  ;;  %v14421_v25 = vld [vmem:[%s14404_s26 + $0x8] sm:$0xff]  ;;  %v14425_v26 = vld [vmem:[%s14404_s26 + $0x10] sm:$0xff] }
 0xa02   : > { %12130 = vmatpush3.bf16.msra.mxu0 %v12129_v35  ;;  %12143 = vmatprep.subr.bf16.mxu1 %v12629_v52 }
 0xa03   : > { %12146 = vmatprep.subr.bf16.mxu0 %v12629_v52 }
 0xa05   : > { %12145 = vmatpush3.bf16.msra.mxu1 %v12144_v10 }
 0xa06   : > { %12161 = vmatprep.subr.bf16.mxu1 %v12629_v52 }
 0xac3   : > { %v5315_v48 = vpop.f32.mrb[52].mxu0 }
 0xac4   : > { %v5319_v49 = vadd.f32 %v5315_v48, %v5161_v46  ;;  %v11141_v9 = vpop.f32.mrb[53].mxu0  ;;  %v12159_v46 = vpack.c.bf16 %v9590_v40, %v9589_v33  ;;  %v6136_v48 = vld [vmem:[%s15216_s11 + $0x68] sm:$0xff]  ;;  %v6154_v33 = vld [vmem:[%s15216_s11 + $0xf8] sm:$0xff] }
 0xac7   : > { %v5473_v51 = vpop.f32.mrb[136].mxu1  ;;  %v5549_v62 = vpop.f32.mrb[54].mxu0 }
 0xac8   : > { %v14220_v36 = vadd.f32 %v5473_v51, %v5319_v49  ;;  %v11167_v53 = vpop.f32.mrb[137].mxu1  ;;  %11192 = vmatmul.mubr.msk.f32.vlgmr.msra.gmra.mrb[56].mxu0 %vm3138_vm1, %v5549_v62  ;;  %v11174_v27 = vpop.f32.mrb[55].mxu0  ;;  %v6138_v49 = vld [vmem:[%s15216_s11 + $0x78] sm:$0xff]  ;;  %v12186_v51 = vpack.c.bf16 %v6133_v47, %v6131_v42 }
 0xac9   : > { %12148 = vmatpush3.bf16.msra.mxu0 %v13973_v16  ;;  %11224 = vmatprep.mubr.msk.f32.mxu0 %vm12630_vm3, %v12631_v3  ;;  %v12188_v62 = vpack.c.bf16 %v6138_v49, %v6136_v48  ;;  %v6142_v53 = vld [vmem:[%s15216_s11 + $0x98] sm:$0xff]  ;;  %v12190_v27 = vpack.c.bf16 %v6137_v21, %v6135_v15 }
 0xaca   : > { %12149 = vmatprep.subr.bf16.mxu0 %v12629_v52 }
 0xacb   : > { %v5707_v7 = vpop.f32.mrb[138].mxu1 }
 0xacc   : > { %v11200_v14 = vpop.f32.mrb[139].mxu1  ;;  %11218 = vmatmul.mubr.msk.f32.vlgmr.msra.gmra.mrb[140].mxu1 %vm3138_vm1, %v5707_v7  ;;  %11225 = vmatmul.mubr.msk.f32.vlgmr.msra.gmra.mrb[58].mxu0 %vm4692_vm4, %v9581_v28  ;;  %v6146_v7 = vld [vmem:[%s15216_s11 + $0xb8] sm:$0xff] }
 0xacd   : > { %12163 = vmatpush3.bf16.msra.mxu1 %v13973_v16  ;;  %11250 = vmatprep.mubr.msk.f32.mxu1 %vm12630_vm3, %v12631_v3  ;;  %v9597_v16 = vld [vmem:[%s15214_s9 + $0x218] sm:$0xff]  ;;  %v12196_v5 = vpack.c.bf16 %v6146_v7, %v6144_v44  ;;  %v6143_v14 = vld [vmem:[%s15216_s11 + $0xa0] sm:$0xff] }
 0xace   : > { %12151 = vmatpush3.bf16.msra.mxu0 %v12150_v34  ;;  %12164 = vmatprep.subr.bf16.mxu1 %v12629_v52  ;;  %v12168_v50 = vpack.c.bf16 %v9597_v16, %v9596_v32  ;;  %v6139_v34 = vld [vmem:[%s15216_s11 + $0x80] sm:$0xff]  ;;  %v6150_v32 = vld [vmem:[%s15216_s11 + $0xd8] sm:$0xff] }
 0xacf   : > { %12152 = vmatprep.subr.bf16.mxu0 %v12629_v52  ;;  %11243 = vmatprep.mubr.msk.f32.mxu0 %vm12630_vm3, %v12631_v3  ;;  %v12194_v56 = vpack.c.bf16 %v6141_v39, %v6139_v34 }
 0xad0   : > { %11251 = vmatmul.mubr.msk.f32.vlgmr.msra.gmra.mrb[142].mxu1 %vm4692_vm4, %v9592_v19  ;;  %v6145_v19 = vld [vmem:[%s15216_s11 + $0xb0] sm:$0xff] }
 0xad1   : > { %12166 = vmatpush3.bf16.msra.mxu1 %v12165_v24  ;;  %11269 = vmatprep.mubr.msk.f32.mxu1 %vm12630_vm3, %v12631_v3  ;;  %v12198_v24 = vpack.c.bf16 %v6145_v19, %v6143_v14 }
 0xad2   : > { %12154 = vmatpush3.bf16.msra.mxu0 %v12153_v29  ;;  %12167 = vmatprep.subr.bf16.mxu1 %v12629_v52  ;;  %v6148_v29 = vld [vmem:[%s15216_s11 + $0xc8] sm:$0xff] }
 0xad3   : > { %12155 = vmatprep.subr.bf16.mxu0 %v12629_v52  ;;  %v12200_v16 = vpack.c.bf16 %v6150_v32, %v6148_v29 }
 0xad5   : > { %12169 = vmatpush3.bf16.msra.mxu1 %v12168_v50  ;;  %v12202_v50 = vpack.c.bf16 %v6149_v43, %v6147_v38  ;;  %v6480_v38 = vld [vmem:[%s15218_s13 + $0x8] sm:$0xff] }
 0xad6   : > { %12157 = vmatpush3.bf16.msra.mxu0 %v12156_v22  ;;  %12170 = vmatprep.subr.bf16.mxu1 %v12629_v52  ;;  %v6152_v22 = vld [vmem:[%s15216_s11 + $0xe8] sm:$0xff] }
 0xad7   : > { %12158 = vmatprep.subr.bf16.mxu0 %v12629_v52  ;;  %v12204_v40 = vpack.c.bf16 %v6154_v33, %v6152_v22 }
 0xad9   : > { %12172 = vmatpush3.bf16.msra.mxu1 %v12171_v57 }
 0xada   : > { %12160 = vmatpush3.bf16.msra.mxu0 %v12159_v46  ;;  %12173 = vmatprep.subr.bf16.mxu1 %v12629_v52  ;;  %v6153_v46 = vld [vmem:[%s15216_s11 + $0xf0] sm:$0xff] }
 0xadb   : > { %12177 = vmatprep.subr.bf16.mxu0 %v12176_v1  ;;  %v12206_v54 = vpack.c.bf16 %v6153_v46, %v6151_v45 }
 0xadd   : > { %12175 = vmatpush3.bf16.msra.mxu1 %v12174_v60 }
 0xb9b   : > { %v5631_v6 = vpop.f32.mrb[56].mxu0 }
 0xb9c   : > { %v5635_v0 = vadd.f32 %v5631_v6, %v14220_v36  ;;  %v11193_v12 = vpop.f32.mrb[57].mxu0  ;;  %v6140_v36 = vld [vmem:[%s15216_s11 + $0x88] sm:$0xff]  ;;  %v14407_v6 = vld [vmem:[%s14404_s26] sm:$0xff] }
 0xb9d   : > { %v12192_v28 = vpack.c.bf16 %v6142_v53, %v6140_v36  ;;  %v6155_v12 = vld [vmem:[%s15217_s12] sm:$0x3] }
 0xb9f   : > { %v5789_v20 = vpop.f32.mrb[140].mxu1  ;;  %v5865_v23 = vpop.f32.mrb[58].mxu0 }
 0xba0   : > { %v5793_v30 = vadd.f32 %v5789_v20, %v5635_v0  ;;  %v11219_v31 = vpop.f32.mrb[141].mxu1  ;;  %11244 = vmatmul.mubr.msk.f32.vlgmr.msra.gmra.mrb[60].mxu0 %vm3138_vm1, %v5865_v23  ;;  %v11226_v35 = vpop.f32.mrb[59].mxu0  ;;  %v6159_v0 = vsub.s32 0, %v6158_v8 }
 0xba1   : > { %12179 = vmatpush1.bf16.msra.mxu0 %v12178_v13  ;;  %6231 = vmatprep.mubr.f32.mxu0 %v12631_v3  ;;  %v14436_v31 = vld [vmem:[%s14404_s26 + $0x18] sm:$0xff] }
 0xba2   : > { %12181 = vmatprep.subr.bf16.mxu0 %v12180_v11  ;;  %v6160_v13 = vrot.slane %v6155_v12, %v6159_v0  ;;  %v6163_v11 = vsub.s32 1, %v6158_v8 }
 0xba3   : > { %v6023_v10 = vpop.f32.mrb[142].mxu1 }
 0xba4   : > { %v11252_v9 = vpop.f32.mrb[143].mxu1  ;;  %11270 = vmatmul.mubr.msk.f32.vlgmr.msra.gmra.mrb[144].mxu1 %vm3138_vm1, %v6023_v10  ;;  %v6164_v23 = vrot.slane %v6155_v12, %v6163_v11 }
 0xba5   : > { %12183 = vmatpush1.bf16.msra.mxu0 %v12182_v37  ;;  %11274 = vmatprep.mubr.msk.f32.mxu1 %vm4692_vm4, %v14407_v6 }
 0xba6   : > { %12185 = vmatprep.subr.bf16.mxu0 %v12184_v41 }
 0xba9   : > { %12187 = vmatpush1.bf16.msra.mxu0 %v12186_v51 }
 0xbaa   : > { %12189 = vmatprep.subr.bf16.mxu0 %v12188_v62 }
 0xbad   : > { %12191 = vmatpush1.bf16.msra.mxu0 %v12190_v27 }
 0xbae   : > { %12193 = vmatprep.subr.bf16.mxu0 %v12192_v28 }
 0xbb1   : > { %12195 = vmatpush1.bf16.msra.mxu0 %v12194_v56 }
 0xbb2   : > { %12197 = vmatprep.subr.bf16.mxu0 %v12196_v5 }
 0xbb5   : > { %12199 = vmatpush1.bf16.msra.mxu0 %v12198_v24 }
 0xbb6   : > { %12201 = vmatprep.subr.bf16.mxu0 %v12200_v16  ;;  %v6479_v16 = vld [vmem:[%s15218_s13] sm:$0xff] }
 0xbb7   : > { %v12212_v43 = vpack.c.bf16 %v6480_v38, %v6479_v16 }
 0xbb9   : > { %12203 = vmatpush1.bf16.msra.mxu0 %v12202_v50 }
 0xbba   : > { %12205 = vmatprep.subr.bf16.mxu0 %v12204_v40 }
 0xbbd   : > { %12207 = vmatpush1.bf16.msra.mxu0 %v12206_v54 }
 0xbbe   : > { %12211 = vmatprep.subr.bf16.mxu0 %v12629_v52 }
 0xc73   : > { %v5947_v57 = vpop.f32.mrb[60].mxu0 }
 0xc74   : > { %v5951_v58 = vadd.f32 %v5947_v57, %v5793_v30  ;;  %v11245_v59 = vpop.f32.mrb[61].mxu0 }
 0xc77   : > { %v6105_v60 = vpop.f32.mrb[144].mxu1 }
 0xc78   : > { %v6109_v63 = vadd.f32 %v6105_v60, %v5951_v58  ;;  %v11271_v1 = vpop.f32.mrb[145].mxu1 }
 0xc7a   : > { %v6117_v2 = vadd.f32 %v9603_v61, %v6109_v63 }
 0xc7c   : > { %v6118_v4 = vmax.f32 %v6117_v2, 0.0 }
 0xc7e   : > { %6232 = vmatmul.mubr.f32.vlgmr.msra.gmra.mrb[62].mxu0 %v6118_v4 }
 0xc7f   : > { %11309 = vmatprep.mubr.msk.f32.mxu0 %vm12630_vm3, %v12631_v3  ;;  %12213 = vmatpush3.bf16.msra.mxu0 %v12212_v43 }
 0xc80   : > { %11320 = vmatprep.subr.mxu0 %v12631_v3 }
 0xd51   : > { %v6233_v17 = vpop.f32.mrb[62].mxu0 }
 0xd52   : > { %v14414_v18 = vadd.f32 %v6233_v17, %v6160_v13  ;;  %v6235_v20 = vpop.f32.mrb[63].mxu0 }
 0xd53   : > { %v14427_v30 = vadd.f32 %v6235_v20, %v6164_v23 }
 0xd54   : > { %11272 = vmatprep.subr.msk.mxu1 %vm4692_vm4, %v14414_v18 }
 0xd55   : > { %11273 = vmatpush3.xpose.msk.msra.mxu1 %vm4692_vm4, %v14414_v18 }
 0xd56   : > { %11280 = vmatprep.subr.mxu1 %v12631_v3 }
 0xd58   : > { %11275 = vmatmul.mubr.msk.f32.vlgmr.msra.gmra.mrb[146].mxu1 %vm4692_vm4, %v14421_v25 }
 0xd59   : > { %11281 = vmatpush3.msk.msra.mxu1 %vm6405_vm5, %v14427_v30  ;;  %11277 = vmatprep.mubr.msk.f32.mxu1 %vm4692_vm4, %v14425_v26 }
 0xd5c   : > { %11278 = vmatmul.mubr.msk.f32.gmra.mrb[148].mxu1 %vm4692_vm4, %v14436_v31 }
 0xd5d   : > { %11282 = vmatprep.mubr.msk.f32.mxu1 %vm12630_vm3, %v12631_v3 }
 0xe2b   : > { %v11276_v35 = vpop.f32.mrb[146].mxu1 }
 0xe2c   : > { %v6319_v37 = vpop.f32.mrb[147].mxu1  ;;  %v6342_v10 = vsel %vm6338_vm6, %v11276_v35, -inf }
 0xe2d   : > { %v6339_v41 = vsel %vm6338_vm6, %v6319_v37, -inf }
 0xe2e   : > { %6340 = vmax.xlane.f32.xlu0 %v6339_v41 }
 0xe2f   : > { %v11279_v42 = vpop.f32.mrb[148].mxu1 }
 0xe30   : > { %v6329_v47 = vpop.f32.mrb[149].mxu1  ;;  %v6348_v49 = vsel %vm6338_vm6, %v11279_v42, -inf }
 0xe31   : > { %v6345_v48 = vsel %vm6338_vm6, %v6329_v47, -inf }
 0xe32   : > { %6343 = vmax.xlane.f32.xlu0 %v6342_v10  ;;  %6346 = vmax.xlane.f32.xlu1 %v6345_v48 }
 0xe36   : > { %6349 = vmax.xlane.f32.xlu1 %v6348_v49 }
 0xebb   : > { %v6341_v9 = vpop.xlane.xlu0 %6340 }
 0xebc   : > { %v6351_v51 = vsub.f32 %v6319_v37, %v6341_v9 }
 0xebe   : > { %v6355_v62 = vmul.f32 1.442695, %v6351_v51 }
 0xebf   : > { %v6344_v15 = vpop.xlane.xlu0 %6343  ;;  %v6347_v21 = vpop.xlane.xlu1 %6346 }
 0xec0   : > { %12433 = vpow2.f32 %v6355_v62  ;;  %v6352_v36 = vsub.f32 %v11276_v35, %v6344_v15  ;;  %v6353_v53 = vsub.f32 %v6329_v47, %v6347_v21 }
 0xec2   : > { %v6357_v27 = vmul.f32 1.442695, %v6352_v36  ;;  %v6359_v28 = vmul.f32 1.442695, %v6353_v53 }
 0xec3   : > { %v6350_v34 = vpop.xlane.xlu1 %6349 }
 0xec4   : > { %12435 = vpow2.f32 %v6357_v27  ;;  %v6354_v39 = vsub.f32 %v11279_v42, %v6350_v34 }
 0xec5   : > { %12437 = vpow2.f32 %v6359_v28 }
 0xec6   : > { %v6361_v44 = vmul.f32 1.442695, %v6354_v39 }
 0xec8   : > { %12439 = vpow2.f32 %v6361_v44 }
 0xeca   : > { %v12434_v7 = vpop.eup %12433 }
 0xecb   : > { %v6363_v56 = vsel %vm6338_vm6, %v12434_v7, 0.0 }
 0xecc   : > { %6364 = vadd.xlane.f32.xlu0 %v6363_v56 }
 0xece   : > { %v12436_v5 = vpop.eup %12435 }
 0xecf   : > { %v12438_v14 = vpop.eup %12437  ;;  %v6366_v19 = vsel %vm6338_vm6, %v12436_v5, 0.0 }
 0xed0   : > { %6367 = vadd.xlane.f32.xlu1 %v6366_v19  ;;  %v6369_v24 = vsel %vm6338_vm6, %v12438_v14, 0.0 }
 0xed1   : > { %6370 = vadd.xlane.f32.xlu0 %v6369_v24 }
 0xed2   : > { %v12440_v29 = vpop.eup %12439 }
 0xed3   : > { %v6372_v32 = vsel %vm6338_vm6, %v12440_v29, 0.0 }
 0xed4   : > { %6373 = vadd.xlane.f32.xlu1 %v6372_v32 }
 0xee5   : > { %6481 = vrot.lane.b32.xlu1 %v14407_v6, %s12632_s27 }
 0xee7   : > { %6489 = vrot.lane.b32.xlu0 %v14414_v18, %s12632_s27 }
 0xee9   : > { %6483 = vrot.lane.b32.xlu1 %v14421_v25, %s12632_s27 }
 0xeeb   : > { %6487 = vrot.lane.b32.xlu0 %v14436_v31, %s12632_s27 }
 0xeed   : > { %6485 = vrot.lane.b32.xlu1 %v14425_v26, %s12632_s27 }
 0xf59   : > { %v6365_v50 = vpop.xlane.xlu0 %6364 }
 0xf5a   : > { %12441 = vrcp.f32 %v6365_v50 }
 0xf5d   : > { %v6368_v22 = vpop.xlane.xlu1 %6367 }
 0xf5e   : > { %v6371_v33 = vpop.xlane.xlu0 %6370  ;;  %12443 = vrcp.f32 %v6368_v22 }
 0xf5f   : > { %12445 = vrcp.f32 %v6371_v33 }
 0xf61   : > { %v6374_v40 = vpop.xlane.xlu1 %6373 }
 0xf62   : > { %v6490_v45 = vpop.permute.xlu0 %6489  ;;  %12447 = vrcp.f32 %v6374_v40 }
 0xf63   : > { %11285 = vmatprep.subr.msk.mxu1 %vm4692_vm4, %v6490_v45 }
 0xf64   : > { %v12442_v46 = vpop.eup %12441 }
 0xf65   : > { %v14468_v54 = vmul.f32 %v12442_v46, %v12434_v7  ;;  %v6482_v20 = vpop.permute.xlu1 %6481 }
 0xf66   : > { %v6488_v10 = vpop.permute.xlu0 %6487 }
 0xf67   : > { %v6387_v61 = vsel %vm6338_vm6, %v14468_v54, 0.0 }
 0xf68   : > { %v12444_v57 = vpop.eup %12443 }
 0xf69   : > { %v12446_v58 = vpop.eup %12445  ;;  %v14470_v59 = vmul.f32 %v12444_v57, %v12436_v5  ;;  %v6484_v41 = vpop.permute.xlu1 %6483 }
 0xf6a   : > { %v14472_v60 = vmul.f32 %v12446_v58, %v12438_v14 }
 0xf6b   : > { %v6388_v63 = vsel %vm6338_vm6, %v14470_v59, 0.0 }
 0xf6c   : > { %v12448_v1 = vpop.eup %12447  ;;  %v6389_v2 = vadd.f32 %v6388_v63, %v6387_v61  ;;  %v6390_v4 = vsel %vm6338_vm6, %v14472_v60, 0.0 }
 0xf6d   : > { %v14480_v55 = vmul.f32 %v12448_v1, %v12440_v29  ;;  %v6486_v47 = vpop.permute.xlu1 %6485 }
 0xf6e   : > { %v6391_v8 = vadd.f32 %v6390_v4, %v6389_v2 }
 0xf6f   : > { %v6392_v0 = vsel %vm6338_vm6, %v14480_v55, 0.0 }
 0xf70   : > { %v6393_v12 = vadd.f32 %v6392_v0, %v6391_v8 }
 0xf72   : > { %v6394_v13 = vrot.slane %v6393_v12, 4 }
 0xf74   : > { %v6395_v11 = vadd.f32 %v6394_v13, %v6393_v12 }
 0xf76   : > { %v6396_v17 = vrot.slane %v6395_v11, 2 }
 0xf78   : > { %v6397_v23 = vadd.f32 %v6396_v17, %v6395_v11 }
 0xf7a   : > { %v6398_v35 = vrot.slane %v6397_v23, 1 }
 0xf7c   : > { %v6399_v37 = vadd.f32 %v6398_v35, %v6397_v23 }
 0xf7e   : > { %v6401_v42 = vmul.f32 0.03125, %v6399_v37 }
 0xf80   : > { %11283 = vmatmul.mubr.msk.f32.vlgmr.msra.gmra.mrb[150].mxu1 %vm6338_vm6, %v6401_v42 }
 0xf81   : > { %11286 = vmatpush3.xpose.msk.msra.mxu1 %vm4692_vm4, %v6490_v45  ;;  %11287 = vmatprep.mubr.msk.f32.mxu1 %vm4692_vm4, %v6482_v20 }
 0xf82   : > { %11293 = vmatprep.subr.mxu1 %v12631_v3 }
 0xf84   : > { %11288 = vmatmul.mubr.msk.f32.vlgmr.msra.gmra.mrb[152].mxu1 %vm4692_vm4, %v6484_v41 }
 0xf85   : > { %11290 = vmatprep.mubr.msk.f32.mxu1 %vm4692_vm4, %v6486_v47 }
 0xf88   : > { %11291 = vmatmul.mubr.msk.f32.gmra.mrb[154].mxu1 %vm4692_vm4, %v6488_v10 }
 0xf89   : > { %11295 = vmatprep.mubr.msk.f32.mxu1 %vm12630_vm3, %v12631_v3 }
0x1053   : > { %v6475_v48 = vpop.f32.mrb[150].mxu1 }
0x1054   : > { %v11284_v49 = vpop.f32.mrb[151].mxu1  ;;  %11310 = vmatmul.mubr.msk.f32.vlgmr.msra.gmra.mrb[64].mxu0 %vm4692_vm4, %v6475_v48 }
0x1055   : > { %11322 = vmatprep.mubr.msk.f32.mxu0 %vm12630_vm3, %v12631_v3 }
0x1057   : > { %v11289_v9 = vpop.f32.mrb[152].mxu1 }
0x1058   : > { %v6567_v51 = vpop.f32.mrb[153].mxu1  ;;  %v6589_v62 = vsel %vm6338_vm6, %v11289_v9, -inf }
0x1059   : > { %6590 = vmax.xlane.f32.xlu0 %v6589_v62  ;;  %v6586_v15 = vsel %vm6338_vm6, %v6567_v51, -inf }
0x105a   : > { %6587 = vmax.xlane.f32.xlu1 %v6586_v15  ;;  %v6725_v15 = vld [vmem:[%s15218_s13 + $0x10] sm:$0xff] }
0x105b   : > { %v11292_v21 = vpop.f32.mrb[154].mxu1 }
0x105c   : > { %v6577_v36 = vpop.f32.mrb[155].mxu1  ;;  %v6595_v27 = vsel %vm6338_vm6, %v11292_v21, -inf }
0x105d   : > { %v6592_v53 = vsel %vm6338_vm6, %v6577_v36, -inf }
0x105e   : > { %6593 = vmax.xlane.f32.xlu0 %v6592_v53 }
0x1062   : > { %6596 = vmax.xlane.f32.xlu0 %v6595_v27 }
0x10e6   : > { %v6591_v28 = vpop.xlane.xlu0 %6590 }
0x10e7   : > { %v6599_v34 = vsub.f32 %v11289_v9, %v6591_v28  ;;  %v6588_v39 = vpop.xlane.xlu1 %6587 }
0x10e8   : > { %v6598_v44 = vsub.f32 %v6567_v51, %v6588_v39 }
0x10e9   : > { %v6604_v7 = vmul.f32 1.442695, %v6599_v34 }
0x10ea   : > { %v6602_v56 = vmul.f32 1.442695, %v6598_v44 }
0x10eb   : > { %12449 = vpow2.f32 %v6604_v7  ;;  %v6594_v5 = vpop.xlane.xlu0 %6593 }
0x10ec   : > { %12451 = vpow2.f32 %v6602_v56  ;;  %v6600_v14 = vsub.f32 %v6577_v36, %v6594_v5 }
0x10ee   : > { %v6606_v19 = vmul.f32 1.442695, %v6600_v14 }
0x10ef   : > { %v6597_v24 = vpop.xlane.xlu0 %6596 }
0x10f0   : > { %12453 = vpow2.f32 %v6606_v19  ;;  %v6601_v29 = vsub.f32 %v11292_v21, %v6597_v24  ;;  %v6726_v21 = vld [vmem:[%s15218_s13 + $0x18] sm:$0xff] }
0x10f1   : > { %v12209_v53 = vpack.c.bf16 %v6726_v21, %v6725_v15 }
0x10f2   : > { %v6608_v32 = vmul.f32 1.442695, %v6601_v29 }
0x10f4   : > { %12455 = vpow2.f32 %v6608_v32 }
0x10f5   : > { %v12450_v16 = vpop.eup %12449 }
0x10f6   : > { %v12452_v38 = vpop.eup %12451  ;;  %v6613_v43 = vsel %vm6338_vm6, %v12450_v16, 0.0 }
0x10f7   : > { %6614 = vadd.xlane.f32.xlu0 %v6613_v43  ;;  %v6610_v50 = vsel %vm6338_vm6, %v12452_v38, 0.0 }
0x10f8   : > { %6611 = vadd.xlane.f32.xlu1 %v6610_v50 }
0x10fa   : > { %v12454_v22 = vpop.eup %12453 }
0x10fb   : > { %v6616_v33 = vsel %vm6338_vm6, %v12454_v22, 0.0 }
0x10fc   : > { %6617 = vadd.xlane.f32.xlu1 %v6616_v33 }
0x10fe   : > { %v12456_v40 = vpop.eup %12455 }
0x10ff   : > { %v6619_v45 = vsel %vm6338_vm6, %v12456_v40, 0.0 }
0x1100   : > { %6620 = vadd.xlane.f32.xlu0 %v6619_v45 }
0x110d   : > { %6648 = vrot.lane.b32.xlu1 %v14427_v30, %s12632_s27  ;;  %s12637_s27 = smov 32  }
0x1111   : > { %6873 = vrot.lane.b32.xlu1 %v14407_v6, %s12633_s25 }
0x1115   : > { %6875 = vrot.lane.b32.xlu1 %v14421_v25, %s12633_s25 }
0x1116   : > { %6881 = vrot.lane.b32.xlu0 %v14414_v18, %s12633_s25 }
0x1119   : > { %6877 = vrot.lane.b32.xlu1 %v14425_v26, %s12633_s25 }
0x111a   : > { %6879 = vrot.lane.b32.xlu0 %v14436_v31, %s12633_s25 }
0x111d   : > { %7201 = vrot.lane.b32.xlu1 %v14414_v18, %s12634_s21 }
0x111e   : > { %7193 = vrot.lane.b32.xlu0 %v14407_v6, %s12634_s21 }
0x1121   : > { %7195 = vrot.lane.b32.xlu1 %v14421_v25, %s12634_s21 }
0x1122   : > { %7197 = vrot.lane.b32.xlu0 %v14425_v26, %s12634_s21 }
0x1125   : > { %7199 = vrot.lane.b32.xlu1 %v14436_v31, %s12634_s21 }
0x1127   : > { %v14526_v46 = vpop.f32.mrb[64].mxu0 }
0x1128   : > { %v11311_v57 = vpop.f32.mrb[65].mxu0 }
0x1184   : > { %v6615_v58 = vpop.xlane.xlu0 %6614 }
0x1185   : > { %12457 = vrcp.f32 %v6615_v58  ;;  %v6612_v61 = vpop.xlane.xlu1 %6611 }
0x1186   : > { %12459 = vrcp.f32 %v6612_v61 }
0x1189   : > { %v6618_v63 = vpop.xlane.xlu1 %6617 }
0x118a   : > { %12461 = vrcp.f32 %v6618_v63 }
0x118d   : > { %v6621_v1 = vpop.xlane.xlu0 %6620  ;;  %v6649_v2 = vpop.permute.xlu1 %6648 }
0x118e   : > { %12463 = vrcp.f32 %v6621_v1  ;;  %11294 = vmatpush3.msk.msra.mxu1 %vm6405_vm5, %v6649_v2 }
0x118f   : > { %v12458_v4 = vpop.eup %12457  ;;  %12208 = vmatprep.subr.bf16.mxu1 %v12629_v52 }
0x1190   : > { %v12460_v8 = vpop.eup %12459  ;;  %v14530_v0 = vmul.f32 %v12458_v4, %v12450_v16 }
0x1191   : > { %v14532_v12 = vmul.f32 %v12460_v8, %v12452_v38  ;;  %v6882_v28 = vpop.permute.xlu0 %6881  ;;  %v6874_v34 = vpop.permute.xlu1 %6873 }
0x1192   : > { %v6635_v11 = vsel %vm6338_vm6, %v14530_v0, 0.0 }
0x1193   : > { %v6634_v17 = vsel %vm6338_vm6, %v14532_v12, 0.0 }
0x1194   : > { %v12462_v13 = vpop.eup %12461  ;;  %v6636_v37 = vadd.f32 %v6635_v11, %v6634_v17 }
0x1195   : > { %v14538_v20 = vmul.f32 %v12462_v13, %v12454_v22  ;;  %v6876_v39 = vpop.permute.xlu1 %6875  ;;  %v6880_v14 = vpop.permute.xlu0 %6879 }
0x1197   : > { %v6637_v23 = vsel %vm6338_vm6, %v14538_v20, 0.0 }
0x1198   : > { %v12464_v35 = vpop.eup %12463  ;;  %v6638_v42 = vadd.f32 %v6637_v23, %v6636_v37 }
0x1199   : > { %v14542_v41 = vmul.f32 %v12464_v35, %v12456_v40  ;;  %v6878_v44 = vpop.permute.xlu1 %6877  ;;  %v7194_v19 = vpop.permute.xlu0 %7193 }
0x119b   : > { %v6639_v47 = vsel %vm6338_vm6, %v14542_v41, 0.0 }
0x119c   : > { %v6640_v10 = vadd.f32 %v6639_v47, %v6638_v42 }
0x119d   : > { %v7202_v5 = vpop.permute.xlu1 %7201  ;;  %v7198_v29 = vpop.permute.xlu0 %7197 }
0x119e   : > { %v6641_v48 = vrot.slane %v6640_v10, 4 }
0x11a0   : > { %v6642_v49 = vadd.f32 %v6641_v48, %v6640_v10 }
0x11a1   : > { %v7196_v24 = vpop.permute.xlu1 %7195 }
0x11a2   : > { %v6643_v9 = vrot.slane %v6642_v49, 2 }
0x11a4   : > { %v6644_v51 = vadd.f32 %v6643_v9, %v6642_v49 }
0x11a5   : > { %v7200_v32 = vpop.permute.xlu1 %7199 }
0x11a6   : > { %v6645_v62 = vrot.slane %v6644_v51, 1 }
0x11a8   : > { %v6646_v36 = vadd.f32 %v6645_v62, %v6644_v51 }
0x11aa   : > { %v6647_v27 = vmul.f32 0.03125, %v6646_v36 }
0x11ac   : > { %11296 = vmatmul.mubr.msk.f32.vlgmr.msra.gmra.mrb[156].mxu1 %vm6338_vm6, %v6647_v27 }
0x11ad   : > { %12210 = vmatpush3.bf16.msra.mxu1 %v12209_v53  ;;  %11302 = vmatprep.mubr.msk.f32.mxu1 %vm12630_vm3, %v12631_v3 }
0x11ae   : > { %11312 = vmatprep.subr.msk.mxu1 %vm4692_vm4, %v6882_v28 }
0x127f   : > { %v6721_v7 = vpop.f32.mrb[156].mxu1 }
0x1280   : > { %v11297_v56 = vpop.f32.mrb[157].mxu1  ;;  %11303 = vmatmul.mubr.msk.f32.vlgmr.msra.gmra.mrb[158].mxu1 %vm4692_vm4, %v6721_v7 }
0x1281   : > { %11313 = vmatpush3.xpose.msk.msra.mxu1 %vm4692_vm4, %v6882_v28  ;;  %11314 = vmatprep.mubr.msk.f32.mxu1 %vm4692_vm4, %v6874_v34 }
0x1282   : > { %11332 = vmatprep.subr.msk.mxu1 %vm4692_vm4, %v7202_v5 }
0x1284   : > { %11315 = vmatmul.mubr.msk.f32.vlgmr.msra.gmra.mrb[160].mxu1 %vm4692_vm4, %v6876_v39 }
0x1285   : > { %11333 = vmatpush3.xpose.msk.msra.mxu1 %vm4692_vm4, %v7202_v5  ;;  %11317 = vmatprep.mubr.msk.f32.mxu1 %vm4692_vm4, %v6878_v44 }
0x1288   : > { %11318 = vmatmul.mubr.msk.f32.gmra.mrb[162].mxu1 %vm4692_vm4, %v6880_v14 }
0x1289   : > { %11334 = vmatprep.mubr.msk.f32.mxu1 %vm4692_vm4, %v7194_v19 }
0x128c   : > { %11335 = vmatmul.mubr.msk.f32.vlgmr.msra.gmra.mrb[164].mxu1 %vm4692_vm4, %v7196_v24 }
0x128d   : > { %11337 = vmatprep.mubr.msk.f32.mxu1 %vm4692_vm4, %v7198_v29  ;;  %v6631_v29 = vadd.f32 %v14530_v0, %v14470_v59 }
0x1290   : > { %11338 = vmatmul.mubr.msk.f32.gmra.mrb[166].mxu1 %vm4692_vm4, %v7200_v32 }
0x1353   : > { %v6796_v16 = vpop.f32.mrb[158].mxu1 }
0x1354   : > { %v14569_v38 = vadd.f32 %v14526_v46, %v6796_v16  ;;  %v11304_v43 = vpop.f32.mrb[159].mxu1  ;;  %v6630_v16 = vadd.f32 %v14532_v12, %v14468_v54 }
0x1357   : > { %v11316_v50 = vpop.f32.mrb[160].mxu1 }
0x1358   : > { %v6959_v22 = vpop.f32.mrb[161].mxu1  ;;  %v6981_v33 = vsel %vm6338_vm6, %v11316_v50, -inf }
0x1359   : > { %6982 = vmax.xlane.f32.xlu1 %v6981_v33  ;;  %v6978_v40 = vsel %vm6338_vm6, %v6959_v22, -inf }
0x135a   : > { %6979 = vmax.xlane.f32.xlu0 %v6978_v40 }
0x135b   : > { %v11319_v45 = vpop.f32.mrb[162].mxu1 }
0x135c   : > { %v6969_v57 = vpop.f32.mrb[163].mxu1  ;;  %v6987_v61 = vsel %vm6338_vm6, %v11319_v45, -inf }
0x135d   : > { %v6984_v58 = vsel %vm6338_vm6, %v6969_v57, -inf }
0x135e   : > { %6985 = vmax.xlane.f32.xlu0 %v6984_v58 }
0x135f   : > { %v14575_v63 = vpop.f32.mrb[164].mxu1 }
0x1360   : > { %v14577_v46 = vpop.f32.mrb[165].mxu1  ;;  %v7301_v39 = vsel %vm6338_vm6, %v14575_v63, -inf }
0x1361   : > { %v7298_v27 = vsel %vm6338_vm6, %v14577_v46, -inf }
0x1362   : > { %6988 = vmax.xlane.f32.xlu0 %v6987_v61 }
0x1363   : > { %v14579_v1 = vpop.f32.mrb[166].mxu1 }
0x1364   : > { %v14581_v2 = vpop.f32.mrb[167].mxu1  ;;  %v7307_v34 = vsel %vm6338_vm6, %v14579_v1, -inf }
0x1365   : > { %v7304_v28 = vsel %vm6338_vm6, %v14581_v2, -inf }
0x13e6   : > { %v6983_v4 = vpop.xlane.xlu1 %6982 }
0x13e7   : > { %v6991_v8 = vsub.f32 %v11316_v50, %v6983_v4  ;;  %v6980_v13 = vpop.xlane.xlu0 %6979 }
0x13e8   : > { %v6990_v11 = vsub.f32 %v6959_v22, %v6980_v13 }
0x13e9   : > { %v6996_v17 = vmul.f32 1.442695, %v6991_v8  ;;  %v6633_v8 = vadd.f32 %v14542_v41, %v14480_v55 }
0x13ea   : > { %v6994_v23 = vmul.f32 1.442695, %v6990_v11 }
0x13eb   : > { %12465 = vpow2.f32 %v6996_v17  ;;  %v6986_v35 = vpop.xlane.xlu0 %6985 }
0x13ec   : > { %12467 = vpow2.f32 %v6994_v23  ;;  %v6992_v37 = vsub.f32 %v6969_v57, %v6986_v35 }
0x13ee   : > { %v6998_v42 = vmul.f32 1.442695, %v6992_v37 }
0x13ef   : > { %v6989_v47 = vpop.xlane.xlu0 %6988 }
0x13f0   : > { %12469 = vpow2.f32 %v6998_v42  ;;  %v6993_v10 = vsub.f32 %v11319_v45, %v6989_v47  ;;  %v6632_v45 = vadd.f32 %v14538_v20, %v14472_v60 }
0x13f2   : > { %v7000_v48 = vmul.f32 1.442695, %v6993_v10 }
0x13f4   : > { %12471 = vpow2.f32 %v7000_v48 }
0x13f5   : > { %v12466_v49 = vpop.eup %12465 }
0x13f6   : > { %v12468_v9 = vpop.eup %12467  ;;  %v7005_v51 = vsel %vm6338_vm6, %v12466_v49, 0.0 }
0x13f7   : > { %7006 = vadd.xlane.f32.xlu1 %v7005_v51  ;;  %v7002_v62 = vsel %vm6338_vm6, %v12468_v9, 0.0 }
0x13f8   : > { %7003 = vadd.xlane.f32.xlu0 %v7002_v62 }
0x13fa   : > { %v12470_v15 = vpop.eup %12469 }
0x13fb   : > { %v7008_v21 = vsel %vm6338_vm6, %v12470_v15, 0.0 }
0x13fc   : > { %7009 = vadd.xlane.f32.xlu0 %v7008_v21 }
0x13fe   : > { %v12472_v36 = vpop.eup %12471 }
0x13ff   : > { %v7011_v53 = vsel %vm6338_vm6, %v12472_v36, 0.0 }
0x1400   : > { %7012 = vadd.xlane.f32.xlu1 %v7011_v53 }
0x1411   : > { %7521 = vrot.lane.b32.xlu1 %v14414_v18, %s12635_s0 }
0x1412   : > { %7040 = vrot.lane.b32.xlu0 %v14427_v30, %s12633_s25  ;;  %s12569_s25 = sshll.u32 %s12639_s28, 4  ;;  %s12570_s25 = int_to_ptr.vmem [resolvable:$false] %s12569_s25 }
0x1413   : > { %s12571_s8 = scalar_lea.vmem %s12570_s25, 32 }
0x1415   : > { %7513 = vrot.lane.b32.xlu1 %v14407_v6, %s12635_s0 }
0x1416   : > { %7517 = vrot.lane.b32.xlu0 %v14425_v26, %s12635_s0 }
0x1419   : > { %7515 = vrot.lane.b32.xlu1 %v14421_v25, %s12635_s0 }
0x141d   : > { %7519 = vrot.lane.b32.xlu1 %v14436_v31, %s12635_s0 }
0x1435   : > { %7299 = vmax.xlane.f32.xlu0 %v7298_v27 }
0x1439   : > { %7305 = vmax.xlane.f32.xlu0 %v7304_v28 }
0x143d   : > { %7308 = vmax.xlane.f32.xlu0 %v7307_v34 }
0x1441   : > { %7302 = vmax.xlane.f32.xlu1 %v7301_v39 }
0x1484   : > { %v7007_v44 = vpop.xlane.xlu1 %7006 }
0x1485   : > { %12473 = vrcp.f32 %v7007_v44  ;;  %v7004_v7 = vpop.xlane.xlu0 %7003 }
0x1486   : > { %12475 = vrcp.f32 %v7004_v7 }
0x1489   : > { %v7010_v56 = vpop.xlane.xlu0 %7009 }
0x148a   : > { %12477 = vrcp.f32 %v7010_v56 }
0x148d   : > { %v7041_v5 = vpop.permute.xlu0 %7040  ;;  %v7013_v14 = vpop.xlane.xlu1 %7012 }
0x148e   : > { %12479 = vrcp.f32 %v7013_v14  ;;  %11321 = vmatpush3.msk.msra.mxu0 %vm6405_vm5, %v7041_v5 }
0x148f   : > { %v12474_v19 = vpop.eup %12473  ;;  %12214 = vmatprep.subr.bf16.mxu0 %v12629_v52 }
0x1490   : > { %v12476_v24 = vpop.eup %12475  ;;  %v7017_v32 = vmul.f32 %v12474_v19, %v12466_v49 }
0x1491   : > { %v7015_v43 = vmul.f32 %v12476_v24, %v12468_v9  ;;  %v7522_v50 = vpop.permute.xlu1 %7521  ;;  %v7518_v20 = vpop.permute.xlu0 %7517  ;;  %v7118_v24 = vld [vmem:[%s15218_s13 + $0x28] sm:$0xff] }
0x1492   : > { %v14613_v22 = vadd.f32 %v7017_v32, %v6631_v29  ;;  %11352 = vmatprep.subr.msk.mxu1 %vm4692_vm4, %v7522_v50  ;;  %v7027_v59 = vsel %vm6338_vm6, %v7017_v32, 0.0 }
0x1493   : > { %v14616_v33 = vadd.f32 %v7015_v43, %v6630_v16  ;;  %11353 = vmatpush3.xpose.msk.msra.mxu1 %vm4692_vm4, %v7522_v50  ;;  %v7026_v0 = vsel %vm6338_vm6, %v7015_v43, 0.0 }
0x1494   : > { %v12478_v40 = vpop.eup %12477  ;;  %v7028_v4 = vadd.f32 %v7027_v59, %v7026_v0 }
0x1495   : > { %v7019_v57 = vmul.f32 %v12478_v40, %v12470_v15  ;;  %v7514_v54 = vpop.permute.xlu1 %7513 }
0x1496   : > { %11354 = vmatprep.mubr.msk.f32.mxu1 %vm4692_vm4, %v7514_v54 }
0x1497   : > { %v14624_v12 = vadd.f32 %v7019_v57, %v6632_v45  ;;  %v7029_v58 = vsel %vm6338_vm6, %v7019_v57, 0.0 }
0x1498   : > { %v12480_v61 = vpop.eup %12479  ;;  %v7030_v60 = vadd.f32 %v7029_v58, %v7028_v4 }
0x1499   : > { %v7021_v13 = vmul.f32 %v12480_v61, %v12472_v36  ;;  %v7516_v11 = vpop.permute.xlu1 %7515 }
0x149a   : > { %11355 = vmatmul.mubr.msk.f32.vlgmr.msra.gmra.mrb[168].mxu1 %vm4692_vm4, %v7516_v11 }
0x149b   : > { %v14630_v17 = vadd.f32 %v7021_v13, %v6633_v8  ;;  %v7031_v23 = vsel %vm6338_vm6, %v7021_v13, 0.0  ;;  %11357 = vmatprep.mubr.msk.f32.mxu1 %vm4692_vm4, %v7518_v20 }
0x149c   : > { %v7032_v35 = vadd.f32 %v7031_v23, %v7030_v60 }
0x149d   : > { %v7520_v37 = vpop.permute.xlu1 %7519 }
0x149e   : > { %v7033_v42 = vrot.slane %v7032_v35, 4  ;;  %11358 = vmatmul.mubr.msk.f32.gmra.mrb[170].mxu1 %vm4692_vm4, %v7520_v37 }
0x14a0   : > { %v7034_v47 = vadd.f32 %v7033_v42, %v7032_v35 }
0x14a2   : > { %v7035_v10 = vrot.slane %v7034_v47, 2 }
0x14a4   : > { %v7036_v55 = vadd.f32 %v7035_v10, %v7034_v47 }
0x14a6   : > { %v7037_v41 = vrot.slane %v7036_v55, 1 }
0x14a8   : > { %v7038_v48 = vadd.f32 %v7037_v41, %v7036_v55 }
0x14aa   : > { %v7039_v49 = vmul.f32 0.03125, %v7038_v48 }
0x14ac   : > { %11323 = vmatmul.mubr.msk.f32.vlgmr.msra.gmra.mrb[66].mxu0 %vm6338_vm6, %v7039_v49 }
0x14ad   : > { %11329 = vmatprep.mubr.msk.f32.mxu0 %vm12630_vm3, %v12631_v3 }
0x14c2   : > { %v7300_v9 = vpop.xlane.xlu0 %7299 }
0x14c3   : > { %v7310_v51 = vsub.f32 %v14577_v46, %v7300_v9 }
0x14c5   : > { %v7314_v62 = vmul.f32 1.442695, %v7310_v51 }
0x14c6   : > { %v7306_v15 = vpop.xlane.xlu0 %7305 }
0x14c7   : > { %12481 = vpow2.f32 %v7314_v62  ;;  %v7312_v21 = vsub.f32 %v14581_v2, %v7306_v15 }
0x14c9   : > { %v7318_v36 = vmul.f32 1.442695, %v7312_v21 }
0x14ca   : > { %v7309_v53 = vpop.xlane.xlu0 %7308 }
0x14cb   : > { %12483 = vpow2.f32 %v7318_v36  ;;  %v7313_v27 = vsub.f32 %v14579_v1, %v7309_v53 }
0x14cd   : > { %v7320_v44 = vmul.f32 1.442695, %v7313_v27 }
0x14ce   : > { %v7303_v28 = vpop.xlane.xlu1 %7302 }
0x14cf   : > { %v7311_v34 = vsub.f32 %v14575_v63, %v7303_v28  ;;  %v7117_v63 = vld [vmem:[%s15218_s13 + $0x20] sm:$0xff] }
0x14d0   : > { %v12215_v29 = vpack.c.bf16 %v7118_v24, %v7117_v63 }
0x14d1   : > { %v12482_v39 = vpop.eup %12481  ;;  %v7316_v7 = vmul.f32 1.442695, %v7311_v34 }
0x14d2   : > { %v7322_v56 = vsel %vm6338_vm6, %v12482_v39, 0.0  ;;  %12216 = vmatpush3.bf16.msra.mxu0 %v12215_v29 }
0x14d3   : > { %12485 = vpow2.f32 %v7316_v7  ;;  %7323 = vadd.xlane.f32.xlu0 %v7322_v56  ;;  %11340 = vmatprep.subr.mxu0 %v12631_v3 }
0x14d4   : > { %12487 = vpow2.f32 %v7320_v44 }
0x14d5   : > { %v12484_v46 = vpop.eup %12483 }
0x14d6   : > { %v7328_v5 = vsel %vm6338_vm6, %v12484_v46, 0.0 }
0x14d7   : > { %7329 = vadd.xlane.f32.xlu0 %v7328_v5  ;;  %v7438_v5 = vld [vmem:[%s15218_s13 + $0x38] sm:$0xff] }
0x14dd   : > { %v12486_v2 = vpop.eup %12485 }
0x14de   : > { %v7325_v14 = vsel %vm6338_vm6, %v12486_v2, 0.0  ;;  %v12488_v19 = vpop.eup %12487 }
0x14df   : > { %7326 = vadd.xlane.f32.xlu1 %v7325_v14  ;;  %v7331_v1 = vsel %vm6338_vm6, %v12488_v19, 0.0 }
0x14e3   : > { %7332 = vadd.xlane.f32.xlu1 %v7331_v1 }
0x14ed   : > { %7360 = vrot.lane.b32.xlu0 %v14427_v30, %s12634_s21  ;;  %s722_s21 = sand.u32 1, %s12619_s30  }
0x14f1   : > { %7837 = vrot.lane.b32.xlu0 %v14425_v26, %s12636_s24 }
0x14f4   : > { %7841 = vrot.lane.b32.xlu1 %v14414_v18, %s12636_s24 }
0x14f8   : > { %7833 = vrot.lane.b32.xlu1 %v14407_v6, %s12636_s24 }
0x14fc   : > { %7835 = vrot.lane.b32.xlu1 %v14421_v25, %s12636_s24 }
0x1500   : > { %7839 = vrot.lane.b32.xlu1 %v14436_v31, %s12636_s24 }
0x1560   : > { %v7324_v32 = vpop.xlane.xlu0 %7323 }
0x1561   : > { %12489 = vrcp.f32 %v7324_v32 }
0x1564   : > { %v7330_v16 = vpop.xlane.xlu0 %7329 }
0x1565   : > { %12491 = vrcp.f32 %v7330_v16 }
0x1568   : > { %v7361_v23 = vpop.permute.xlu0 %7360 }
0x156b   : > { %v12490_v43 = vpop.eup %12489 }
0x156c   : > { %v7335_v50 = vmul.f32 %v12490_v43, %v12482_v39  ;;  %v7327_v40 = vpop.xlane.xlu1 %7326  ;;  %v7838_v48 = vpop.permute.xlu0 %7837 }
0x156d   : > { %12493 = vrcp.f32 %v7327_v40  ;;  %v14665_v45 = vpop.f32.mrb[168].mxu1 }
0x156e   : > { %v14668_v59 = vadd.f32 %v7335_v50, %v14616_v33  ;;  %v14670_v0 = vpop.f32.mrb[169].mxu1  ;;  %v7621_v57 = vsel %vm6338_vm6, %v14665_v45, -inf }
0x156f   : > { %v12492_v54 = vpop.eup %12491  ;;  %7622 = vmax.xlane.f32.xlu1 %v7621_v57  ;;  %v7618_v58 = vsel %vm6338_vm6, %v14670_v0, -inf }
0x1570   : > { %v7339_v61 = vmul.f32 %v12492_v54, %v12484_v46  ;;  %7619 = vmax.xlane.f32.xlu0 %v7618_v58  ;;  %v7333_v4 = vpop.xlane.xlu1 %7332  ;;  %v7437_v46 = vld [vmem:[%s15218_s13 + $0x30] sm:$0xff] }
0x1571   : > { %12495 = vrcp.f32 %v7333_v4  ;;  %v14676_v8 = vpop.f32.mrb[170].mxu1 }
0x1572   : > { %v14679_v13 = vadd.f32 %v7339_v61, %v14624_v12  ;;  %v7609_v33 = vpop.f32.mrb[171].mxu1  ;;  %v7627_v35 = vsel %vm6338_vm6, %v14676_v8, -inf  ;;  %v7346_v12 = vsel %vm6338_vm6, %v7335_v50, 0.0  ;;  %v7349_v49 = vsel %vm6338_vm6, %v7339_v61, 0.0 }
0x1573   : > { %v7624_v11 = vsel %vm6338_vm6, %v7609_v33, -inf }
0x1574   : > { %7625 = vmax.xlane.f32.xlu0 %v7624_v11  ;;  %v7842_v60 = vpop.permute.xlu1 %7841 }
0x1575   : > { %11372 = vmatprep.subr.msk.mxu1 %vm4692_vm4, %v7842_v60 }
0x1576   : > { %11373 = vmatpush3.xpose.msk.msra.mxu1 %vm4692_vm4, %v7842_v60 }
0x1577   : > { %v12494_v20 = vpop.eup %12493 }
0x1578   : > { %v7337_v37 = vmul.f32 %v12494_v20, %v12486_v2  ;;  %7628 = vmax.xlane.f32.xlu0 %v7627_v35  ;;  %v7834_v42 = vpop.permute.xlu1 %7833  ;;  %v12218_v2 = vpack.c.bf16 %v7438_v5, %v7437_v46 }
0x1579   : > { %11374 = vmatprep.mubr.msk.f32.mxu1 %vm4692_vm4, %v7834_v42 }
0x157a   : > { %v14689_v47 = vadd.f32 %v7337_v37, %v14613_v22  ;;  %v7347_v10 = vsel %vm6338_vm6, %v7337_v37, 0.0 }
0x157b   : > { %v12496_v55 = vpop.eup %12495  ;;  %v7348_v41 = vadd.f32 %v7347_v10, %v7346_v12 }
0x157c   : > { %v7341_v9 = vmul.f32 %v12496_v55, %v12488_v19  ;;  %v7836_v51 = vpop.permute.xlu1 %7835 }
0x157d   : > { %v7350_v62 = vadd.f32 %v7349_v49, %v7348_v41  ;;  %11375 = vmatmul.mubr.msk.f32.vlgmr.msra.gmra.mrb[172].mxu1 %vm4692_vm4, %v7836_v51 }
0x157e   : > { %v14695_v15 = vadd.f32 %v7341_v9, %v14630_v17  ;;  %v7351_v21 = vsel %vm6338_vm6, %v7341_v9, 0.0  ;;  %11377 = vmatprep.mubr.msk.f32.mxu1 %vm4692_vm4, %v7838_v48 }
0x157f   : > { %v7352_v22 = vadd.f32 %v7351_v21, %v7350_v62  ;;  %v7113_v36 = vpop.f32.mrb[66].mxu0 }
0x1580   : > { %v11324_v53 = vpop.f32.mrb[67].mxu0  ;;  %11330 = vmatmul.mubr.msk.f32.vlgmr.msra.gmra.mrb[68].mxu0 %vm4692_vm4, %v7113_v36  ;;  %v7840_v27 = vpop.permute.xlu1 %7839 }
0x1581   : > { %v7353_v28 = vrot.slane %v7352_v22, 4  ;;  %11341 = vmatpush3.msk.msra.mxu0 %vm6405_vm5, %v7361_v23  ;;  %11378 = vmatmul.mubr.msk.f32.gmra.mrb[174].mxu1 %vm4692_vm4, %v7840_v27 }
0x1582   : > { %11342 = vmatprep.mubr.msk.f32.mxu0 %vm12630_vm3, %v12631_v3  ;;  %12217 = vmatprep.subr.bf16.mxu0 %v12629_v52 }
0x1583   : > { %v7354_v17 = vadd.f32 %v7353_v28, %v7352_v22 }
0x1585   : > { %v7355_v34 = vrot.slane %v7354_v17, 2 }
0x1587   : > { %v7356_v39 = vadd.f32 %v7355_v34, %v7354_v17 }
0x1589   : > { %v7357_v44 = vrot.slane %v7356_v39, 1 }
0x158b   : > { %v7358_v7 = vadd.f32 %v7357_v44, %v7356_v39 }
0x158d   : > { %v7359_v56 = vmul.f32 0.03125, %v7358_v7 }
0x158f   : > { %11343 = vmatmul.mubr.msk.f32.vlgmr.msra.gmra.mrb[70].mxu0 %vm6338_vm6, %v7359_v56 }
0x1590   : > { %11349 = vmatprep.mubr.msk.f32.mxu0 %vm12630_vm3, %v12631_v3  ;;  %12219 = vmatpush3.bf16.msra.mxu0 %v12218_v2 }
0x1591   : > { %11360 = vmatprep.subr.mxu0 %v12631_v3 }
0x15fc   : > { %v7623_v14 = vpop.xlane.xlu1 %7622 }
0x15fd   : > { %v7631_v19 = vsub.f32 %v14665_v45, %v7623_v14  ;;  %v7620_v1 = vpop.xlane.xlu0 %7619 }
0x15fe   : > { %v7630_v63 = vsub.f32 %v14670_v0, %v7620_v1 }
0x15ff   : > { %v7636_v24 = vmul.f32 1.442695, %v7631_v19 }
0x1600   : > { %v7634_v29 = vmul.f32 1.442695, %v7630_v63 }
0x1601   : > { %12497 = vpow2.f32 %v7636_v24  ;;  %v7626_v32 = vpop.xlane.xlu0 %7625 }
0x1602   : > { %12499 = vpow2.f32 %v7634_v29  ;;  %v7632_v16 = vsub.f32 %v7609_v33, %v7626_v32 }
0x1604   : > { %v7638_v43 = vmul.f32 1.442695, %v7632_v16 }
0x1605   : > { %v7629_v50 = vpop.xlane.xlu0 %7628 }
0x1606   : > { %12501 = vpow2.f32 %v7638_v43  ;;  %v7633_v40 = vsub.f32 %v14676_v8, %v7629_v50 }
0x1608   : > { %v7640_v57 = vmul.f32 1.442695, %v7633_v40 }
0x160a   : > { %12503 = vpow2.f32 %v7640_v57 }
0x160b   : > { %v12498_v54 = vpop.eup %12497 }
0x160c   : > { %v12500_v58 = vpop.eup %12499  ;;  %v7645_v45 = vsel %vm6338_vm6, %v12498_v54, 0.0 }
0x160d   : > { %7646 = vadd.xlane.f32.xlu1 %v7645_v45  ;;  %v7642_v0 = vsel %vm6338_vm6, %v12500_v58, 0.0 }
0x160e   : > { %7643 = vadd.xlane.f32.xlu0 %v7642_v0 }
0x1610   : > { %v12502_v61 = vpop.eup %12501 }
0x1611   : > { %v7648_v4 = vsel %vm6338_vm6, %v12502_v61, 0.0 }
0x1612   : > { %7649 = vadd.xlane.f32.xlu0 %v7648_v4 }
0x1614   : > { %v12504_v33 = vpop.eup %12503 }
0x1615   : > { %v7651_v11 = vsel %vm6338_vm6, %v12504_v33, 0.0 }
0x1616   : > { %7652 = vadd.xlane.f32.xlu1 %v7651_v11 }
0x1627   : > { %8161 = vrot.lane.b32.xlu1 %v14414_v18, %s12637_s27 }
0x1628   : > { %7680 = vrot.lane.b32.xlu0 %v14427_v30, %s12635_s0  ;;  %s12638_s0 = smov 16  }
0x162b   : > { %8153 = vrot.lane.b32.xlu1 %v14407_v6, %s12637_s27 }
0x162c   : > { %8157 = vrot.lane.b32.xlu0 %v14425_v26, %s12637_s27 }
0x162f   : > { %8155 = vrot.lane.b32.xlu1 %v14421_v25, %s12637_s27 }
0x1633   : > { %8159 = vrot.lane.b32.xlu1 %v14436_v31, %s12637_s27 }
0x1650   : > { %v14734_v8 = vpop.f32.mrb[172].mxu1 }
0x1651   : > { %v14736_v60 = vpop.f32.mrb[173].mxu1  ;;  %v7941_v31 = vsel %vm6338_vm6, %v14734_v8, -inf }
0x1652   : > { %v7938_v20 = vsel %vm6338_vm6, %v14736_v60, -inf }
0x1653   : > { %v7188_v23 = vpop.f32.mrb[68].mxu0  ;;  %7939 = vmax.xlane.f32.xlu0 %v7938_v20 }
0x1654   : > { %v14741_v6 = vadd.f32 %v7188_v23, %v14569_v38  ;;  %v11331_v35 = vpop.f32.mrb[69].mxu0  ;;  %v14743_v26 = vpop.f32.mrb[174].mxu1 }
0x1655   : > { %v14745_v37 = vpop.f32.mrb[175].mxu1  ;;  %v7947_v42 = vsel %vm6338_vm6, %v14743_v26, -inf }
0x1656   : > { %v7944_v25 = vsel %vm6338_vm6, %v14745_v37, -inf }
0x1657   : > { %7945 = vmax.xlane.f32.xlu0 %v7944_v25  ;;  %7942 = vmax.xlane.f32.xlu1 %v7941_v31 }
0x165b   : > { %7948 = vmax.xlane.f32.xlu0 %v7947_v42  ;;  %v12561_v42 = vld [vmem:[%s14404_s26] sm:$0xff] }
0x1662   : > { %v7433_v12 = vpop.f32.mrb[70].mxu0 }
0x1663   : > { %v11344_v38 = vpop.f32.mrb[71].mxu0  ;;  %11350 = vmatmul.mubr.msk.f32.vlgmr.msra.gmra.mrb[72].mxu0 %vm4692_vm4, %v7433_v12  ;;  %v12562_v12 = vld [vmem:[%s14404_s26 + $0x10] sm:$0xff] }
0x1664   : > { %11362 = vmatprep.mubr.msk.f32.mxu0 %vm12630_vm3, %v12631_v3  ;;  %v7757_v38 = vld [vmem:[%s15218_s13 + $0x40] sm:$0xff] }
0x169a   : > { %v7647_v10 = vpop.xlane.xlu1 %7646 }
0x169b   : > { %12505 = vrcp.f32 %v7647_v10  ;;  %v7644_v55 = vpop.xlane.xlu0 %7643  ;;  %v7758_v10 = vld [vmem:[%s15218_s13 + $0x48] sm:$0xff] }
0x169c   : > { %12507 = vrcp.f32 %v7644_v55  ;;  %v12221_v55 = vpack.c.bf16 %v7758_v10, %v7757_v38 }
0x169f   : > { %v7650_v41 = vpop.xlane.xlu0 %7649 }
0x16a0   : > { %12509 = vrcp.f32 %v7650_v41  ;;  %v12563_v41 = vld [vmem:[%s14404_s26 + $0x8] sm:$0xff] }
0x16a3   : > { %v7681_v48 = vpop.permute.xlu0 %7680  ;;  %v7653_v49 = vpop.xlane.xlu1 %7652 }
0x16a4   : > { %12511 = vrcp.f32 %v7653_v49  ;;  %11361 = vmatpush3.msk.msra.mxu0 %vm6405_vm5, %v7681_v48 }
0x16a5   : > { %v12506_v9 = vpop.eup %12505  ;;  %12220 = vmatprep.subr.bf16.mxu0 %v12629_v52 }
0x16a6   : > { %v12508_v51 = vpop.eup %12507  ;;  %v7657_v62 = vmul.f32 %v12506_v9, %v12498_v54 }
0x16a7   : > { %v7655_v21 = vmul.f32 %v12508_v51, %v12500_v58  ;;  %v8162_v22 = vpop.permute.xlu1 %8161  ;;  %v8158_v2 = vpop.permute.xlu0 %8157 }
0x16a8   : > { %v14759_v36 = vadd.f32 %v7657_v62, %v14689_v47  ;;  %11392 = vmatprep.subr.msk.mxu1 %vm4692_vm4, %v8162_v22  ;;  %v7667_v28 = vsel %vm6338_vm6, %v7657_v62, 0.0 }
0x16a9   : > { %v14763_v53 = vadd.f32 %v7655_v21, %v14668_v59  ;;  %11393 = vmatpush3.xpose.msk.msra.mxu1 %vm4692_vm4, %v8162_v22  ;;  %v7666_v17 = vsel %vm6338_vm6, %v7655_v21, 0.0 }
0x16aa   : > { %v12510_v27 = vpop.eup %12509  ;;  %v7668_v56 = vadd.f32 %v7667_v28, %v7666_v17 }
0x16ab   : > { %v7659_v34 = vmul.f32 %v12510_v27, %v12502_v61  ;;  %v8154_v39 = vpop.permute.xlu1 %8153 }
0x16ac   : > { %11394 = vmatprep.mubr.msk.f32.mxu1 %vm4692_vm4, %v8154_v39 }
0x16ad   : > { %v14770_v44 = vadd.f32 %v7659_v34, %v14679_v13  ;;  %v7669_v47 = vsel %vm6338_vm6, %v7659_v34, 0.0 }
0x16ae   : > { %v12512_v7 = vpop.eup %12511  ;;  %v7670_v5 = vadd.f32 %v7669_v47, %v7668_v56 }
0x16af   : > { %v7661_v59 = vmul.f32 %v12512_v7, %v12504_v33  ;;  %v8156_v46 = vpop.permute.xlu1 %8155 }
0x16b0   : > { %11395 = vmatmul.mubr.msk.f32.vlgmr.msra.gmra.mrb[176].mxu1 %vm4692_vm4, %v8156_v46 }
0x16b1   : > { %v14775_v14 = vadd.f32 %v7661_v59, %v14695_v15  ;;  %v7671_v19 = vsel %vm6338_vm6, %v7661_v59, 0.0  ;;  %11397 = vmatprep.mubr.msk.f32.mxu1 %vm4692_vm4, %v8158_v2 }
0x16b2   : > { %v7672_v1 = vadd.f32 %v7671_v19, %v7670_v5 }
0x16b3   : > { %v8160_v13 = vpop.permute.xlu1 %8159 }
0x16b4   : > { %v7673_v63 = vrot.slane %v7672_v1, 4  ;;  %11398 = vmatmul.mubr.msk.f32.gmra.mrb[178].mxu1 %vm4692_vm4, %v8160_v13 }
0x16b6   : > { %v7674_v24 = vadd.f32 %v7673_v63, %v7672_v1 }
0x16b8   : > { %v7675_v29 = vrot.slane %v7674_v24, 2 }
0x16ba   : > { %v7676_v32 = vadd.f32 %v7675_v29, %v7674_v24 }
0x16bc   : > { %v7677_v16 = vrot.slane %v7676_v32, 1 }
0x16be   : > { %v7678_v43 = vadd.f32 %v7677_v16, %v7676_v32 }
0x16c0   : > { %v7679_v50 = vmul.f32 0.03125, %v7678_v43 }
0x16c2   : > { %11363 = vmatmul.mubr.msk.f32.vlgmr.msra.gmra.mrb[74].mxu0 %vm6338_vm6, %v7679_v50 }
0x16c3   : > { %11369 = vmatprep.mubr.msk.f32.mxu0 %vm12630_vm3, %v12631_v3  ;;  %12222 = vmatpush3.bf16.msra.mxu0 %v12221_v55 }
0x16c4   : > { %11380 = vmatprep.subr.mxu0 %v12631_v3 }
0x16e0   : > { %v7940_v15 = vpop.xlane.xlu0 %7939 }
0x16e1   : > { %v7950_v40 = vsub.f32 %v14736_v60, %v7940_v15 }
0x16e3   : > { %v7954_v57 = vmul.f32 1.442695, %v7950_v40 }
0x16e4   : > { %v7946_v54 = vpop.xlane.xlu0 %7945  ;;  %v7943_v58 = vpop.xlane.xlu1 %7942 }
0x16e5   : > { %12513 = vpow2.f32 %v7954_v57  ;;  %v7952_v45 = vsub.f32 %v14745_v37, %v7946_v54  ;;  %v7951_v0 = vsub.f32 %v14734_v8, %v7943_v58 }
0x16e7   : > { %v7958_v61 = vmul.f32 1.442695, %v7952_v45  ;;  %v7956_v4 = vmul.f32 1.442695, %v7951_v0 }
0x16e8   : > { %v7949_v33 = vpop.xlane.xlu0 %7948 }
0x16e9   : > { %12515 = vpow2.f32 %v7958_v61  ;;  %v7953_v11 = vsub.f32 %v14743_v26, %v7949_v33 }
0x16ea   : > { %12517 = vpow2.f32 %v7956_v4 }
0x16eb   : > { %v7960_v20 = vmul.f32 1.442695, %v7953_v11 }
0x16ed   : > { %12519 = vpow2.f32 %v7960_v20 }
0x16ef   : > { %v12514_v23 = vpop.eup %12513 }
0x16f0   : > { %v7962_v60 = vsel %vm6338_vm6, %v12514_v23, 0.0 }
0x16f1   : > { %7963 = vadd.xlane.f32.xlu0 %v7962_v60 }
0x16f3   : > { %v12516_v35 = vpop.eup %12515 }
0x16f4   : > { %v12518_v25 = vpop.eup %12517  ;;  %v7968_v37 = vsel %vm6338_vm6, %v12516_v35, 0.0 }
0x16f5   : > { %7969 = vadd.xlane.f32.xlu0 %v7968_v37  ;;  %v7965_v8 = vsel %vm6338_vm6, %v12518_v25, 0.0  ;;  %v8078_v37 = vld [vmem:[%s15218_s13 + $0x58] sm:$0xff] }
0x16f6   : > { %7966 = vadd.xlane.f32.xlu1 %v7965_v8 }
0x16f7   : > { %v14790_v31 = vpop.eup %12519 }
0x16f8   : > { %v7971_v26 = vsel %vm6338_vm6, %v14790_v31, 0.0 }
0x16fa   : > { %7972 = vadd.xlane.f32.xlu1 %v7971_v26 }
0x170b   : > { %8481 = vrot.lane.b32.xlu1 %v14414_v18, %s12638_s0  ;;  %8000 = vrot.lane.b32.xlu0 %v14427_v30, %s12636_s24  ;;  %v12564_v18 = vld [vmem:[%s14404_s26 + $0x18] sm:$0xff]  ;;  %s14944_s24 = scalar_lea.vmem %s15228_s23, %s9672_s6  ;;  %s9668_s26 = sshll.u32 %s12781_s5, 4 }
0x170c   : > { %s15162_s2 = scalar_lea.hbm %s15227_s22, %s9668_s26 }
0x170f   : > { %8473 = vrot.lane.b32.xlu1 %v12561_v42, %s12638_s0  ;;  %8477 = vrot.lane.b32.xlu0 %v12562_v12, %s12638_s0 }
0x1713   : > { %8475 = vrot.lane.b32.xlu1 %v12563_v41, %s12638_s0 }
0x1717   : > { %8479 = vrot.lane.b32.xlu1 %v12564_v18, %s12638_s0 }
0x1736   : > { %v7508_v48 = vpop.f32.mrb[72].mxu0 }
0x1737   : > { %v14814_v49 = vadd.f32 %v7508_v48, %v14741_v6  ;;  %v11351_v9 = vpop.f32.mrb[73].mxu0 }
0x177e   : > { %v7964_v51 = vpop.xlane.xlu0 %7963 }
0x177f   : > { %12521 = vrcp.f32 %v7964_v51 }
0x1782   : > { %v7970_v62 = vpop.xlane.xlu0 %7969 }
0x1783   : > { %12523 = vrcp.f32 %v7970_v62  ;;  %v7967_v21 = vpop.xlane.xlu1 %7966  ;;  %v14816_v22 = vpop.f32.mrb[176].mxu1 }
0x1784   : > { %12525 = vrcp.f32 %v7967_v21  ;;  %v14818_v27 = vpop.f32.mrb[177].mxu1  ;;  %v8261_v28 = vsel %vm6338_vm6, %v14816_v22, -inf }
0x1785   : > { %8262 = vmax.xlane.f32.xlu1 %v8261_v28  ;;  %v8258_v17 = vsel %vm6338_vm6, %v14818_v27, -inf }
0x1786   : > { %8259 = vmax.xlane.f32.xlu0 %v8258_v17  ;;  %v8001_v13 = vpop.permute.xlu0 %8000 }
0x1787   : > { %v7973_v6 = vpop.xlane.xlu1 %7972  ;;  %v14824_v34 = vpop.f32.mrb[178].mxu1 }
0x1788   : > { %12527 = vrcp.f32 %v7973_v6  ;;  %v14826_v39 = vpop.f32.mrb[179].mxu1  ;;  %v8267_v2 = vsel %vm6338_vm6, %v14824_v34, -inf }
0x1789   : > { %v12522_v47 = vpop.eup %12521  ;;  %v8264_v7 = vsel %vm6338_vm6, %v14826_v39, -inf }
0x178a   : > { %v7975_v56 = vmul.f32 %v12522_v47, %v12514_v23  ;;  %8265 = vmax.xlane.f32.xlu0 %v8264_v7  ;;  %v8478_v15 = vpop.permute.xlu0 %8477 }
0x178b   : > { %v8482_v59 = vpop.permute.xlu1 %8481 }
0x178c   : > { %v14831_v46 = vadd.f32 %v7975_v56, %v14763_v53  ;;  %11412 = vmatprep.subr.msk.mxu1 %vm4692_vm4, %v8482_v59  ;;  %v7986_v53 = vsel %vm6338_vm6, %v7975_v56, 0.0 }
0x178d   : > { %v12524_v5 = vpop.eup %12523  ;;  %11413 = vmatpush3.xpose.msk.msra.mxu1 %vm4692_vm4, %v8482_v59 }
0x178e   : > { %v12526_v19 = vpop.eup %12525  ;;  %v7979_v1 = vmul.f32 %v12524_v5, %v12516_v35  ;;  %8268 = vmax.xlane.f32.xlu0 %v8267_v2  ;;  %12232 = vmatprep.subr.bf16.mxu1 %v12629_v52 }
0x178f   : > { %v7977_v63 = vmul.f32 %v12526_v19, %v12518_v25  ;;  %v8474_v24 = vpop.permute.xlu1 %8473  ;;  %v8077_v25 = vld [vmem:[%s15218_s13 + $0x50] sm:$0xff] }
0x1790   : > { %v14839_v29 = vadd.f32 %v7979_v1, %v14770_v44  ;;  %11414 = vmatprep.mubr.msk.f32.mxu1 %vm4692_vm4, %v8474_v24  ;;  %v7989_v40 = vsel %vm6338_vm6, %v7979_v1, 0.0  ;;  %v12224_v8 = vpack.c.bf16 %v8078_v37, %v8077_v25 }
0x1791   : > { %v14844_v32 = vadd.f32 %v7977_v63, %v14759_v36  ;;  %v7987_v16 = vsel %vm6338_vm6, %v7977_v63, 0.0 }
0x1792   : > { %v12528_v43 = vpop.eup %12527  ;;  %v7988_v50 = vadd.f32 %v7987_v16, %v7986_v53 }
0x1793   : > { %v7981_v57 = vmul.f32 %v12528_v43, %v14790_v31  ;;  %v8476_v54 = vpop.permute.xlu1 %8475 }
0x1794   : > { %v7990_v58 = vadd.f32 %v7989_v40, %v7988_v50  ;;  %11415 = vmatmul.mubr.msk.f32.vlgmr.msra.gmra.mrb[180].mxu1 %vm4692_vm4, %v8476_v54 }
0x1795   : > { %v14851_v44 = vadd.f32 %v7981_v57, %v14775_v14  ;;  %v7991_v45 = vsel %vm6338_vm6, %v7981_v57, 0.0  ;;  %v7753_v36 = vpop.f32.mrb[74].mxu0  ;;  %11417 = vmatprep.mubr.msk.f32.mxu1 %vm4692_vm4, %v8478_v15 }
0x1796   : > { %v7992_v0 = vadd.f32 %v7991_v45, %v7990_v58  ;;  %v11364_v61 = vpop.f32.mrb[75].mxu0  ;;  %11370 = vmatmul.mubr.msk.f32.vlgmr.msra.gmra.mrb[76].mxu0 %vm4692_vm4, %v7753_v36 }
0x1797   : > { %11381 = vmatpush3.msk.msra.mxu0 %vm6405_vm5, %v8001_v13  ;;  %v8480_v4 = vpop.permute.xlu1 %8479  ;;  %11382 = vmatprep.mubr.msk.f32.mxu0 %vm12630_vm3, %v12631_v3 }
0x1798   : > { %v7993_v33 = vrot.slane %v7992_v0, 4  ;;  %11418 = vmatmul.mubr.msk.f32.gmra.mrb[182].mxu1 %vm4692_vm4, %v8480_v4  ;;  %12223 = vmatprep.subr.bf16.mxu0 %v12629_v52 }
0x1799   : > { %11464 = vmatprep.mubr.msk.f32.mxu1 %vm12630_vm3, %v12631_v3 }
0x179a   : > { %v7994_v14 = vadd.f32 %v7993_v33, %v7992_v0 }
0x179c   : > { %v7995_v11 = vrot.slane %v7994_v14, 2 }
0x179e   : > { %v7996_v20 = vadd.f32 %v7995_v11, %v7994_v14 }
0x17a0   : > { %v7997_v23 = vrot.slane %v7996_v20, 1 }
0x17a2   : > { %v7998_v60 = vadd.f32 %v7997_v23, %v7996_v20 }
0x17a4   : > { %v7999_v35 = vmul.f32 0.03125, %v7998_v60 }
0x17a6   : > { %11383 = vmatmul.mubr.msk.f32.vlgmr.msra.gmra.mrb[78].mxu0 %vm6338_vm6, %v7999_v35 }
0x17a7   : > { %11389 = vmatprep.mubr.msk.f32.mxu0 %vm12630_vm3, %v12631_v3  ;;  %12225 = vmatpush3.bf16.msra.mxu0 %v12224_v8 }
0x17a8   : > { %11400 = vmatprep.subr.mxu0 %v12631_v3 }
0x1812   : > { %v8263_v31 = vpop.xlane.xlu1 %8262 }
0x1813   : > { %v8271_v26 = vsub.f32 %v14816_v22, %v8263_v31  ;;  %v8260_v42 = vpop.xlane.xlu0 %8259 }
0x1814   : > { %v8270_v12 = vsub.f32 %v14818_v27, %v8260_v42 }
0x1815   : > { %v8276_v38 = vmul.f32 1.442695, %v8271_v26 }
0x1816   : > { %v8274_v10 = vmul.f32 1.442695, %v8270_v12 }
0x1817   : > { %12529 = vpow2.f32 %v8276_v38  ;;  %v8266_v55 = vpop.xlane.xlu0 %8265 }
0x1818   : > { %12531 = vpow2.f32 %v8274_v10  ;;  %v8272_v41 = vsub.f32 %v14826_v39, %v8266_v55 }
0x181a   : > { %v8278_v18 = vmul.f32 1.442695, %v8272_v41 }
0x181b   : > { %v8269_v48 = vpop.xlane.xlu0 %8268 }
0x181c   : > { %12533 = vpow2.f32 %v8278_v18  ;;  %v8273_v9 = vsub.f32 %v14824_v34, %v8269_v48 }
0x181e   : > { %v8280_v51 = vmul.f32 1.442695, %v8273_v9 }
0x1820   : > { %12535 = vpow2.f32 %v8280_v51 }
0x1821   : > { %v12530_v62 = vpop.eup %12529 }
0x1822   : > { %v12532_v21 = vpop.eup %12531  ;;  %v8285_v22 = vsel %vm6338_vm6, %v12530_v62, 0.0 }
0x1823   : > { %8286 = vadd.xlane.f32.xlu1 %v8285_v22  ;;  %v8282_v27 = vsel %vm6338_vm6, %v12532_v21, 0.0 }
0x1824   : > { %8283 = vadd.xlane.f32.xlu0 %v8282_v27 }
0x1826   : > { %v12534_v28 = vpop.eup %12533 }
0x1827   : > { %v8288_v17 = vsel %vm6338_vm6, %v12534_v28, 0.0 }
0x1828   : > { %8289 = vadd.xlane.f32.xlu0 %v8288_v17 }
0x182a   : > { %v12536_v6 = vpop.eup %12535 }
0x182b   : > { %v8291_v39 = vsel %vm6338_vm6, %v12536_v6, 0.0 }
0x182c   : > { %8292 = vadd.xlane.f32.xlu1 %v8291_v39 }
0x183e   : > { %8320 = vrot.lane.b32.xlu0 %v14427_v30, %s12637_s27  ;;  %s9075_s27 = scalar_lea.sflag [#allocation3], %s722_s21 }
0x1867   : > { %v14883_v34 = vpop.f32.mrb[180].mxu1 }
0x1868   : > { %v8559_v47 = vpop.f32.mrb[181].mxu1  ;;  %v8581_v1 = vsel %vm6338_vm6, %v14883_v34, -inf }
0x1869   : > { %v7828_v7 = vpop.f32.mrb[76].mxu0  ;;  %v8578_v56 = vsel %vm6338_vm6, %v8559_v47, -inf }
0x186a   : > { %v14887_v59 = vadd.f32 %v7828_v7, %v14814_v49  ;;  %8579 = vmax.xlane.f32.xlu1 %v8578_v56  ;;  %v11371_v5 = vpop.f32.mrb[77].mxu0  ;;  %v8397_v56 = vld [vmem:[%s15218_s13 + $0x60] sm:$0xff] }
0x186b   : > { %v14889_v2 = vpop.f32.mrb[182].mxu1  ;;  %v8398_v5 = vld [vmem:[%s15218_s13 + $0x68] sm:$0xff] }
0x186c   : > { %v8569_v19 = vpop.f32.mrb[183].mxu1  ;;  %v8587_v63 = vsel %vm6338_vm6, %v14889_v2, -inf }
0x186d   : > { %v8584_v13 = vsel %vm6338_vm6, %v8569_v19, -inf }
0x186e   : > { %8582 = vmax.xlane.f32.xlu1 %v8581_v1 }
0x1872   : > { %8585 = vmax.xlane.f32.xlu1 %v8584_v13 }
0x1876   : > { %8588 = vmax.xlane.f32.xlu1 %v8587_v63 }
0x1879   : > { %v8073_v24 = vpop.f32.mrb[78].mxu0 }
0x187a   : > { %v11384_v53 = vpop.f32.mrb[79].mxu0  ;;  %11390 = vmatmul.mubr.msk.f32.vlgmr.msra.gmra.mrb[80].mxu0 %vm4692_vm4, %v8073_v24 }
0x187b   : > { %11402 = vmatprep.mubr.msk.f32.mxu0 %vm12630_vm3, %v12631_v3 }
0x18b0   : > { %v8287_v49 = vpop.xlane.xlu1 %8286 }
0x18b1   : > { %12537 = vrcp.f32 %v8287_v49  ;;  %v8284_v16 = vpop.xlane.xlu0 %8283 }
0x18b2   : > { %12539 = vrcp.f32 %v8284_v16 }
0x18b5   : > { %v8290_v43 = vpop.xlane.xlu0 %8289 }
0x18b6   : > { %12541 = vrcp.f32 %v8290_v43 }
0x18b9   : > { %v8321_v50 = vpop.permute.xlu0 %8320  ;;  %v8293_v15 = vpop.xlane.xlu1 %8292 }
0x18ba   : > { %12543 = vrcp.f32 %v8293_v15  ;;  %11401 = vmatpush3.msk.msra.mxu0 %vm6405_vm5, %v8321_v50 }
0x18bb   : > { %v12538_v40 = vpop.eup %12537  ;;  %12226 = vmatprep.subr.bf16.mxu0 %v12629_v52 }
0x18bc   : > { %v12540_v57 = vpop.eup %12539  ;;  %v8297_v54 = vmul.f32 %v12538_v40, %v12530_v62 }
0x18bd   : > { %v8295_v58 = vmul.f32 %v12540_v57, %v12532_v21 }
0x18be   : > { %v14902_v45 = vadd.f32 %v8297_v54, %v14844_v32  ;;  %v8307_v61 = vsel %vm6338_vm6, %v8297_v54, 0.0 }
0x18bf   : > { %v14905_v36 = vadd.f32 %v8295_v58, %v14831_v46  ;;  %v8306_v4 = vsel %vm6338_vm6, %v8295_v58, 0.0 }
0x18c0   : > { %v12542_v0 = vpop.eup %12541  ;;  %v8308_v23 = vadd.f32 %v8307_v61, %v8306_v4 }
0x18c1   : > { %v8299_v33 = vmul.f32 %v12542_v0, %v12534_v28 }
0x18c3   : > { %v14910_v14 = vadd.f32 %v8299_v33, %v14839_v29  ;;  %v8309_v11 = vsel %vm6338_vm6, %v8299_v33, 0.0 }
0x18c4   : > { %v12544_v20 = vpop.eup %12543  ;;  %v8310_v35 = vadd.f32 %v8309_v11, %v8308_v23 }
0x18c5   : > { %v8301_v60 = vmul.f32 %v12544_v20, %v12536_v6 }
0x18c7   : > { %v14914_v32 = vadd.f32 %v8301_v60, %v14851_v44  ;;  %v8311_v46 = vsel %vm6338_vm6, %v8301_v60, 0.0 }
0x18c8   : > { %v8312_v25 = vadd.f32 %v8311_v46, %v8310_v35 }
0x18ca   : > { %v8313_v37 = vrot.slane %v8312_v25, 4 }
0x18cc   : > { %v8314_v8 = vadd.f32 %v8313_v37, %v8312_v25 }
0x18ce   : > { %v8315_v31 = vrot.slane %v8314_v8, 2 }
0x18d0   : > { %v8316_v26 = vadd.f32 %v8315_v31, %v8314_v8 }
0x18d2   : > { %v8317_v42 = vrot.slane %v8316_v26, 1 }
0x18d4   : > { %v8318_v12 = vadd.f32 %v8317_v42, %v8316_v26 }
0x18d6   : > { %v8319_v29 = vmul.f32 0.03125, %v8318_v12 }
0x18d8   : > { %11403 = vmatmul.mubr.msk.f32.vlgmr.msra.gmra.mrb[82].mxu0 %vm6338_vm6, %v8319_v29 }
0x18d9   : > { %11409 = vmatprep.mubr.msk.f32.mxu0 %vm12630_vm3, %v12631_v3 }
0x18f7   : > { %v8580_v38 = vpop.xlane.xlu1 %8579 }
0x18f8   : > { %v8590_v10 = vsub.f32 %v8559_v47, %v8580_v38 }
0x18fa   : > { %v8594_v41 = vmul.f32 1.442695, %v8590_v10 }
0x18fb   : > { %v8583_v55 = vpop.xlane.xlu1 %8582 }
0x18fc   : > { %v8591_v44 = vsub.f32 %v14883_v34, %v8583_v55 }
0x18fe   : > { %v8596_v18 = vmul.f32 1.442695, %v8591_v44 }
0x18ff   : > { %v8586_v48 = vpop.xlane.xlu1 %8585 }
0x1900   : > { %12545 = vpow2.f32 %v8596_v18  ;;  %v8592_v9 = vsub.f32 %v8569_v19, %v8586_v48  ;;  %v8718_v48 = vld [vmem:[%s15218_s13 + $0x78] sm:$0xff] }
0x1901   : > { %12547 = vpow2.f32 %v8594_v41 }
0x1902   : > { %v8598_v51 = vmul.f32 1.442695, %v8592_v9 }
0x1903   : > { %v8589_v62 = vpop.xlane.xlu1 %8588 }
0x1904   : > { %12549 = vpow2.f32 %v8598_v51  ;;  %v8593_v21 = vsub.f32 %v14889_v2, %v8589_v62  ;;  %v12227_v2 = vpack.c.bf16 %v8398_v5, %v8397_v56  ;;  %v8795_v51 = vld [vmem:[%s15220_s15] sm:$0xff]  ;;  %v8796_v62 = vld [vmem:[%s15220_s15 + $0x8] sm:$0xff] }
0x1905   : > { %v8803_v56 = vld [vmem:[%s15220_s15 + $0x40] sm:$0xff]  ;;  %v8804_v5 = vld [vmem:[%s15220_s15 + $0x48] sm:$0xff] }
0x1906   : > { %v8600_v22 = vmul.f32 1.442695, %v8593_v21  ;;  %12228 = vmatpush3.bf16.msra.mxu0 %v12227_v2  ;;  %v8797_v21 = vld [vmem:[%s15220_s15 + $0x10] sm:$0xff]  ;;  %v12245_v2 = vpack.c.bf16 %v8804_v5, %v8803_v56 }
0x1907   : > { %11420 = vmatprep.subr.mxu0 %v12631_v3  ;;  %v8985_v5 = vld [vmem:[%s15224_s19 + $0x70] sm:$0xff] }
0x1908   : > { %12551 = vpow2.f32 %v8600_v22  ;;  %v12233_v22 = vpack.c.bf16 %v8796_v62, %v8795_v51  ;;  %v8976_v51 = vld [vmem:[%s15224_s19 + $0x28] sm:$0xff] }
0x190a   : > { %v12546_v27 = vpop.eup %12545  ;;  %12234 = vmatpush3.bf16.msra.mxu1 %v12233_v22 }
0x190b   : > { %v8605_v28 = vsel %vm6338_vm6, %v12546_v27, 0.0  ;;  %v12548_v17 = vpop.eup %12547  ;;  %12235 = vmatprep.subr.bf16.mxu1 %v12629_v52 }
0x190c   : > { %8606 = vadd.xlane.f32.xlu1 %v8605_v28  ;;  %v8602_v39 = vsel %vm6338_vm6, %v12548_v17, 0.0 }
0x190e   : > { %v12550_v6 = vpop.eup %12549 }
0x190f   : > { %v8608_v34 = vsel %vm6338_vm6, %v12550_v6, 0.0 }
0x1910   : > { %8603 = vadd.xlane.f32.xlu1 %v8602_v39  ;;  %8609 = vadd.xlane.f32.xlu0 %v8608_v34  ;;  %v8801_v34 = vld [vmem:[%s15220_s15 + $0x30] sm:$0xff] }
0x1912   : > { %v12552_v47 = vpop.eup %12551 }
0x1913   : > { %v8611_v7 = vsel %vm6338_vm6, %v12552_v47, 0.0 }
0x1914   : > { %8612 = vadd.xlane.f32.xlu1 %v8611_v7 }
0x1925   : > { %8640 = vrot.lane.b32.xlu1 %v14427_v30, %s12638_s0  ;;  %s723_s0 = scalar_lea.vmem [#allocation2], %s722_s21 }
0x194d   : > { %v8148_v19 = vpop.f32.mrb[80].mxu0 }
0x194e   : > { %v14936_v1 = vadd.f32 %v8148_v19, %v14887_v59  ;;  %v11391_v13 = vpop.f32.mrb[81].mxu0  ;;  %v8805_v19 = vld [vmem:[%s15220_s15 + $0x50] sm:$0xff] }
0x194f   : > { %v8806_v13 = vld [vmem:[%s15220_s15 + $0x58] sm:$0xff] }
0x1999   : > { %v8607_v63 = vpop.xlane.xlu1 %8606 }
0x199a   : > { %12553 = vrcp.f32 %v8607_v63  ;;  %v12248_v63 = vpack.c.bf16 %v8806_v13, %v8805_v19  ;;  %v8897_v13 = vld [vmem:[%s15222_s17 + $0x70] sm:$0xff] }
0x199d   : > { %v8610_v30 = vpop.xlane.xlu0 %8609  ;;  %v8604_v24 = vpop.xlane.xlu1 %8603 }
0x199e   : > { %12555 = vrcp.f32 %v8610_v30  ;;  %v8807_v30 = vld [vmem:[%s15220_s15 + $0x60] sm:$0xff] }
0x199f   : > { %12557 = vrcp.f32 %v8604_v24  ;;  %v8808_v24 = vld [vmem:[%s15220_s15 + $0x68] sm:$0xff] }
0x19a1   : > { %v8613_v53 = vpop.xlane.xlu1 %8612 }
0x19a2   : > { %12559 = vrcp.f32 %v8613_v53  ;;  %v12251_v53 = vpack.c.bf16 %v8808_v24, %v8807_v30  ;;  %v8811_v24 = vld [vmem:[%s15221_s16] sm:$0x1] }
0x19a4   : > { %v12554_v49 = vpop.eup %12553 }
0x19a5   : > { %v8617_v16 = vmul.f32 %v12554_v49, %v12546_v27  ;;  %v8641_v11 = vpop.permute.xlu1 %8640  ;;  %v8798_v27 = vld [vmem:[%s15220_s15 + $0x18] sm:$0xff] }
0x19a6   : > { %v12236_v28 = vpack.c.bf16 %v8798_v27, %v8797_v21  ;;  %v8977_v21 = vld [vmem:[%s15224_s19 + $0x30] sm:$0xff]  ;;  %v8979_v27 = vld [vmem:[%s15224_s19 + $0x40] sm:$0xff] }
0x19a7   : > { %v8623_v43 = vadd.f32 %v8617_v16, %v14902_v45  ;;  %v8627_v45 = vsel %vm6338_vm6, %v8617_v16, 0.0 }
0x19a8   : > { %v12556_v50 = vpop.eup %12555  ;;  %12237 = vmatpush3.bf16.msra.mxu1 %v12236_v28  ;;  %v8980_v28 = vld [vmem:[%s15224_s19 + $0x48] sm:$0xff] }
0x19a9   : > { %v12558_v15 = vpop.eup %12557  ;;  %v9060_v59 = vmul.f32 0.125, %v8623_v43  ;;  %v8619_v40 = vmul.f32 %v12556_v50, %v12550_v6  ;;  %v8800_v6 = vld [vmem:[%s15220_s15 + $0x28] sm:$0xff]  ;;  %12238 = vmatprep.subr.bf16.mxu1 %v12629_v52 }
0x19aa   : > { %v8615_v57 = vmul.f32 %v12558_v15, %v12548_v17  ;;  %v8799_v17 = vld [vmem:[%s15220_s15 + $0x20] sm:$0xff] }
0x19ab   : > { %v9064_v54 = vsel %vm6338_vm6, %v9060_v59, 0.0  ;;  %v8624_v58 = vadd.f32 %v8619_v40, %v14910_v14  ;;  %v8393_v0 = vpop.f32.mrb[82].mxu0  ;;  %v8629_v14 = vsel %vm6338_vm6, %v8619_v40, 0.0  ;;  %v12239_v39 = vpack.c.bf16 %v8800_v6, %v8799_v17  ;;  %v8809_v59 = vld [vmem:[%s15220_s15 + $0x70] sm:$0xff]  ;;  %v8810_v40 = vld [vmem:[%s15220_s15 + $0x78] sm:$0xff] }
0x19ac   : > { %v12560_v61 = vpop.eup %12559  ;;  %9068 = vst [vmem:[%s14944_s24 + $0x8] sm:$0xff] %v9064_v54  ;;  %v8622_v4 = vadd.f32 %v8615_v57, %v14905_v36  ;;  %v8626_v33 = vsel %vm6338_vm6, %v8615_v57, 0.0  ;;  %v11404_v20 = vpop.f32.mrb[83].mxu0  ;;  %11410 = vmatmul.mubr.msk.f32.vlgmr.msra.gmra.mrb[84].mxu0 %vm4692_vm4, %v8393_v0  ;;  %v12254_v57 = vpack.c.bf16 %v8810_v40, %v8809_v59  ;;  %v8884_v54 = vld [vmem:[%s15222_s17 + $0x8] sm:$0xff]  ;;  %v12293_v17 = vpack.c.bf16 %v8980_v28, %v8979_v27  ;;  %v8981_v6 = vld [vmem:[%s15224_s19 + $0x50] sm:$0xff] }
0x19ad   : > { %v9061_v23 = vmul.f32 0.125, %v8624_v58  ;;  %v8628_v60 = vadd.f32 %v8627_v45, %v8626_v33  ;;  %v8621_v35 = vmul.f32 %v12560_v61, %v12552_v47  ;;  %11421 = vmatpush3.msk.msra.mxu0 %vm6405_vm5, %v8641_v11  ;;  %11422 = vmatprep.mubr.msk.f32.mxu0 %vm12630_vm3, %v12631_v3  ;;  %v8802_v47 = vld [vmem:[%s15220_s15 + $0x38] sm:$0xff]  ;;  %v8885_v58 = vld [vmem:[%s15222_s17 + $0x10] sm:$0xff]  ;;  %v8888_v33 = vld [vmem:[%s15222_s17 + $0x28] sm:$0xff] }
0x19ae   : > { %v9059_v36 = vmul.f32 0.125, %v8622_v4  ;;  %12229 = vmatprep.subr.bf16.mxu0 %v12629_v52  ;;  %12240 = vmatpush3.bf16.msra.mxu1 %v12239_v39  ;;  %v12242_v7 = vpack.c.bf16 %v8802_v47, %v8801_v34  ;;  %v8886_v61 = vld [vmem:[%s15222_s17 + $0x18] sm:$0xff]  ;;  %v8887_v4 = vld [vmem:[%s15222_s17 + $0x20] sm:$0xff]  ;;  %v8889_v20 = vld [vmem:[%s15222_s17 + $0x30] sm:$0xff] }
0x19af   : > { %v9065_v46 = vsel %vm6338_vm6, %v9061_v23, 0.0  ;;  %v8630_v25 = vadd.f32 %v8629_v14, %v8628_v60  ;;  %v8625_v37 = vadd.f32 %v8621_v35, %v14914_v32  ;;  %v8631_v8 = vsel %vm6338_vm6, %v8621_v35, 0.0  ;;  %v8717_v32 = vld [vmem:[%s15218_s13 + $0x70] sm:$0xff]  ;;  %12241 = vmatprep.subr.bf16.mxu1 %v12629_v52  ;;  %v8890_v23 = vld [vmem:[%s15222_s17 + $0x38] sm:$0xff]  ;;  %v8891_v35 = vld [vmem:[%s15222_s17 + $0x40] sm:$0xff] }
0x19b0   : > { %9069 = vst [vmem:[%s14944_s24 + $0x10] sm:$0xff] %v9065_v46  ;;  %v9063_v31 = vsel %vm6338_vm6, %v9059_v36, 0.0  ;;  %v12230_v9 = vpack.c.bf16 %v8718_v48, %v8717_v32  ;;  %v12260_v45 = vpack.c.bf16 %v8886_v61, %v8885_v58  ;;  %v12263_v11 = vpack.c.bf16 %v8888_v33, %v8887_v4  ;;  %v8892_v14 = vld [vmem:[%s15222_s17 + $0x48] sm:$0xff]  ;;  %v8893_v46 = vld [vmem:[%s15222_s17 + $0x50] sm:$0xff]  ;;  %v8974_v32 = vld [vmem:[%s15224_s19 + $0x18] sm:$0xff] }
0x19b1   : > { %9067 = vst [vmem:[%s14944_s24] sm:$0xff] %v9063_v31  ;;  %v8632_v26 = vadd.f32 %v8631_v8, %v8630_v25  ;;  %v9062_v42 = vmul.f32 0.125, %v8625_v37  ;;  %v12266_v60 = vpack.c.bf16 %v8890_v23, %v8889_v20  ;;  %v12269_v36 = vpack.c.bf16 %v8892_v14, %v8891_v35  ;;  %v8894_v25 = vld [vmem:[%s15222_s17 + $0x58] sm:$0xff]  ;;  %v8895_v8 = vld [vmem:[%s15222_s17 + $0x60] sm:$0xff]  ;;  %v8896_v31 = vld [vmem:[%s15222_s17 + $0x68] sm:$0xff] }
0x19b2   : > { %12243 = vmatpush3.bf16.msra.mxu1 %v12242_v7  ;;  %v12272_v37 = vpack.c.bf16 %v8894_v25, %v8893_v46  ;;  %v8982_v39 = vld [vmem:[%s15224_s19 + $0x58] sm:$0xff]  ;;  %v8983_v47 = vld [vmem:[%s15224_s19 + $0x60] sm:$0xff]  ;;  %v8984_v7 = vld [vmem:[%s15224_s19 + $0x68] sm:$0xff] }
0x19b3   : > { %v8633_v12 = vrot.slane %v8632_v26, 4  ;;  %v9066_v29 = vsel %vm6338_vm6, %v9062_v42, 0.0  ;;  %12244 = vmatprep.subr.bf16.mxu1 %v12629_v52  ;;  %v8971_v42 = vld [vmem:[%s15224_s19] sm:$0xff]  ;;  %v12296_v34 = vpack.c.bf16 %v8982_v39, %v8981_v6  ;;  %v12299_v56 = vpack.c.bf16 %v8984_v7, %v8983_v47 }
0x19b4   : > { %9070 = vst [vmem:[%s14944_s24 + $0x18] sm:$0xff] %v9066_v29  ;;  %s9095_s24 = sshll.u32 %s723_s0, 4  ;;  %s9096_s24 = int_to_ptr.vmem [resolvable:$true] %s9095_s24 }
0x19b5   : > { %v8634_v38 = vadd.f32 %v8633_v12, %v8632_v26  ;;  %v12275_v26 = vpack.c.bf16 %v8896_v31, %v8895_v8  ;;  %v8972_v12 = vld [vmem:[%s15224_s19 + $0x8] sm:$0xff]  ;;  %s12565_s3 = scalar_lea.vmem %s9096_s24, 16  ;;  %p12572_p0 = scmp.lt.s32.totalorder %s9096_s24, %s12570_s25 }
0x19b6   : > { %12246 = vmatpush3.bf16.msra.mxu1 %v12245_v2  ;;  %v8986_v2 = vld [vmem:[%s15224_s19 + $0x78] sm:$0xff]  ;;  %p12566_p11 = scmp.ne.s32.totalorder %s9096_s24, %s12565_s3  ;;  %p12573_p1 = scmp.lt.s32.totalorder %s12571_s8, %s12565_s3 }
0x19b7   : > { %v8635_v10 = vrot.slane %v8634_v38, 2  ;;  %12247 = vmatprep.subr.bf16.mxu1 %v12629_v52  ;;  %v12302_v19 = vpack.c.bf16 %v8986_v2, %v8985_v5 }
0x19b8   : > { %p12567_p12 = pnand %p12566_p11, %p12798_p5  ;;  %p12574_p2 = por %p12573_p1, %p12572_p0 }
0x19b9   : > { %v8636_v55 = vadd.f32 %v8635_v10, %v8634_v38  ;;  %v8793_v38 = vld [vmem:[%s15219_s14] sm:$0x1] }
0x19ba   : > { %12249 = vmatpush3.bf16.msra.mxu1 %v12248_v63  ;;  %v8898_v63 = vld [vmem:[%s15222_s17 + $0x78] sm:$0xff]  ;;  %p12568_p13 = pneg %p12567_p12 }
0x19bb   : > { %v8637_v44 = vrot.slane %v8636_v55, 1  ;;  %12250 = vmatprep.subr.bf16.mxu1 %v12629_v52  ;;  %v12278_v30 = vpack.c.bf16 %v8898_v63, %v8897_v13 }
0x19bc   : > { %p12575_p3 = pnand %p12574_p2, %p12568_p13 }
0x19bd   : > { %v8638_v41 = vadd.f32 %v8637_v44, %v8636_v55  ;;  %v12281_v44 = vpack.c.bf16 %v8972_v12, %v8971_v42 }
0x19be   : > { %12252 = vmatpush3.bf16.msra.mxu1 %v12251_v53 }
0x19bf   : > { %v8639_v18 = vmul.f32 0.03125, %v8638_v41  ;;  %12253 = vmatprep.subr.bf16.mxu1 %v12629_v52 }
0x19c1   : > { %11423 = vmatmul.mubr.msk.f32.vlgmr.msra.gmra.mrb[86].mxu0 %vm6338_vm6, %v8639_v18  ;;  %v8973_v18 = vld [vmem:[%s15224_s19 + $0x10] sm:$0xff] }
0x19c2   : > { %11429 = vmatprep.mubr.msk.f32.mxu0 %vm12630_vm3, %v12631_v3  ;;  %12231 = vmatpush3.bf16.msra.mxu0 %v12230_v9  ;;  %v12284_v48 = vpack.c.bf16 %v8974_v32, %v8973_v18  ;;  %v8975_v9 = vld [vmem:[%s15224_s19 + $0x20] sm:$0xff] }
0x19c3   : > { %12256 = vmatprep.subr.bf16.mxu0 %v12629_v52  ;;  %12255 = vmatpush3.bf16.msra.mxu1 %v12254_v57  ;;  %v12287_v62 = vpack.c.bf16 %v8976_v51, %v8975_v9 }
0x19c4   : > { %12280 = vmatprep.subr.bf16.mxu1 %v12629_v52 }
0x1a7f   : > { %v8468_v49 = vpop.f32.mrb[84].mxu0 }
0x1a80   : > { %v8472_v16 = vadd.f32 %v8468_v49, %v14936_v1  ;;  %v11411_v43 = vpop.f32.mrb[85].mxu0  ;;  %v8883_v1 = vld [vmem:[%s15222_s17] sm:$0xff] }
0x1a81   : > { %v12257_v0 = vpack.c.bf16 %v8884_v54, %v8883_v1  ;;  %v8987_v43 = vld [vmem:[%s15225_s20] sm:$0x1] }
0x1a94   : > { %v8713_v50 = vpop.f32.mrb[86].mxu0 }
0x1a95   : > { %v11424_v15 = vpop.f32.mrb[87].mxu0  ;;  %11430 = vmatmul.mubr.msk.f32.vlgmr.msra.gmra.mrb[88].mxu0 %vm4692_vm4, %v8713_v50 }
0x1a96   : > { %11499 = vmatprep.mubr.msk.f32.mxu0 %vm12630_vm3, %v12631_v3  ;;  %12258 = vmatpush3.bf16.msra.mxu0 %v12257_v0 }
0x1a97   : > { %12259 = vmatprep.subr.bf16.mxu0 %v12629_v52 }
0x1a9a   : > { %12261 = vmatpush3.bf16.msra.mxu0 %v12260_v45 }
0x1a9b   : > { %12262 = vmatprep.subr.bf16.mxu0 %v12629_v52 }
0x1a9e   : > { %12264 = vmatpush3.bf16.msra.mxu0 %v12263_v11 }
0x1a9f   : > { %12265 = vmatprep.subr.bf16.mxu0 %v12629_v52 }
0x1aa2   : > { %12267 = vmatpush3.bf16.msra.mxu0 %v12266_v60 }
0x1aa3   : > { %12268 = vmatprep.subr.bf16.mxu0 %v12629_v52 }
0x1aa6   : > { %12270 = vmatpush3.bf16.msra.mxu0 %v12269_v36 }
0x1aa7   : > { %12271 = vmatprep.subr.bf16.mxu0 %v12629_v52 }
0x1aaa   : > { %12273 = vmatpush3.bf16.msra.mxu0 %v12272_v37 }
0x1aab   : > { %12274 = vmatprep.subr.bf16.mxu0 %v12629_v52 }
0x1aae   : > { %12276 = vmatpush3.bf16.msra.mxu0 %v12275_v26 }
0x1aaf   : > { %12277 = vmatprep.subr.bf16.mxu0 %v12629_v52 }
0x1ab2   : > { %12279 = vmatpush3.bf16.msra.mxu0 %v12278_v30 }
0x1b68   : > { %v8788_v29 = vpop.f32.mrb[88].mxu0 }
0x1b69   : > { %v8792_v10 = vadd.f32 %v8788_v29, %v8472_v16  ;;  %v11431_v55 = vpop.f32.mrb[89].mxu0 }
0x1b6b   : > { %v8794_v41 = vadd.f32 %v8793_v38, %v8792_v10 }
0x1b6d   : > { %11465 = vmatmul.mubr.f32.vlgmr.msra.gmra.mrb[184].mxu1 %v8794_v41 }
0x1b6e   : > { %12282 = vmatpush3.bf16.msra.mxu1 %v12281_v44  ;;  %11534 = vmatprep.mubr.msk.f32.mxu1 %vm12630_vm3, %v12631_v3  ;;  %v8978_v3 = vld [vmem:[%s15224_s19 + $0x38] sm:$0xff] }
0x1b6f   : > { %12283 = vmatprep.subr.bf16.mxu1 %v12629_v52  ;;  %v12290_v22 = vpack.c.bf16 %v8978_v3, %v8977_v21 }
0x1b72   : > { %12285 = vmatpush3.bf16.msra.mxu1 %v12284_v48 }
0x1b73   : > { %12286 = vmatprep.subr.bf16.mxu1 %v12629_v52 }
0x1b76   : > { %12288 = vmatpush3.bf16.msra.mxu1 %v12287_v62 }
0x1b77   : > { %12289 = vmatprep.subr.bf16.mxu1 %v12629_v52 }
0x1b7a   : > { %12291 = vmatpush3.bf16.msra.mxu1 %v12290_v22 }
0x1b7b   : > { %12292 = vmatprep.subr.bf16.mxu1 %v12629_v52 }
0x1b7e   : > { %12294 = vmatpush3.bf16.msra.mxu1 %v12293_v17 }
0x1b7f   : > { %12295 = vmatprep.subr.bf16.mxu1 %v12629_v52 }
0x1b82   : > { %12297 = vmatpush3.bf16.msra.mxu1 %v12296_v34 }
0x1b83   : > { %12298 = vmatprep.subr.bf16.mxu1 %v12629_v52 }
0x1b86   : > { %12300 = vmatpush3.bf16.msra.mxu1 %v12299_v56 }
0x1b87   : > { %12301 = vmatprep.subr.bf16.mxu1 %v12629_v52 }
0x1b8a   : > { %12303 = vmatpush3.bf16.msra.mxu1 %v12302_v19 }
0x1b8d   : > { %11535 = vmatmul.mubr.f32.vlgmr.msra.gmra.mrb[186].mxu1 %v8794_v41 }
0x1c40   : > { %v8878_v53 = vpop.f32.mrb[184].mxu1 }
0x1c41   : > { %v8879_v49 = vadd.f32 %v8878_v53, %v8811_v24  ;;  %v11466_v52 = vpop.f32.mrb[185].mxu1 }
0x1c43   : > { %v8882_v16 = vmax.f32 %v8879_v49, 0.0 }
0x1c45   : > { %11500 = vmatmul.mubr.f32.vlgmr.msra.gmra.mrb[90].mxu0 %v8882_v16 }
0x1c60   : > { %v9054_v50 = vpop.f32.mrb[186].mxu1 }
0x1c61   : > { %v9055_v15 = vadd.f32 %v9054_v50, %v8987_v43  ;;  %v11536_v59 = vpop.f32.mrb[187].mxu1 }
0x1c63   : > { %9058 = vst [vmem:[%s723_s0] sm:$0x1] %v9055_v15 }
0x1c64   : > { %12578 = shalt.err (!%p12575_p3)
}
0x1c65   : > { %s12579_s5 = scalar_lea.hbm %s15162_s2, 16  ;;  %s12583_s26 = scalar_lea.hbm %s15227_s22, 32 }
0x1c66   : > { %p12580_p4 = scmp.ne.s32.totalorder %s15162_s2, %s12579_s5  ;;  %p12584_p9 = scmp.lt.u32.totalorder %s15162_s2, %s15227_s22 }
0x1c67   : > { %p12585_p10 = scmp.lt.u32.totalorder %s12583_s26, %s12579_s5  ;;  %p12587_p12 = scmp.lt.u32.totalorder %s12579_s5, %s15162_s2 }
0x1c68   : > { %p12581_p7 = pnand %p12580_p4, %p12798_p5 }
0x1c69   : > { %p12586_p11 = por %p12585_p10, %p12584_p9 }
0x1c6a   : > { %p12582_p8 = pneg %p12581_p7 }
0x1c6b   : > { %p12588_p13 = por %p12587_p12, %p12586_p11 }
0x1c6d   : > { %p12589_p0 = pnand %p12588_p13, %p12582_p8 }
0x1c6f   : > { %12592 = shalt.err (!%p12589_p0)
}
0x1c70   : > { %12384 = dma.vmem_to_hbm [thread:$0]  (%p12798_p5), %s9096_s24, 16, %s15162_s2, %s9075_s27   ;;  %v8899_v40 = vld [vmem:[%s15223_s18] sm:$0x1] }
0x1c71   : > { %s15269_s21 = sld [smem:[#allocation20_spill]] }
0x1c77   : > { %s743_s0 = scalar_lea.vmem %s15269_s21, %s12813_s1 }
0x1d18   : > { %v8966_v57 = vpop.f32.mrb[90].mxu0 }
0x1d19   : > { %v8967_v1 = vadd.f32 %v8966_v57, %v8899_v40  ;;  %v11501_v54 = vpop.f32.mrb[91].mxu0 }
0x1d1b   : > { %8970 = vst [vmem:[%s743_s0] sm:$0x1] %v8967_v1 }
0x1d1c PF: > { %s15270_s5 = sld [smem:[#allocation7_spill]]  ;;  %s15271_s26 = sld [smem:[#allocation5_spill]] }
0x1d22   : > { %p12390_p1 = scmp.ge.s32.totalorder %s15270_s5, 2  ;;  %s9116_s7 = sand.u32 1, %s15271_s26  }
0x1d23   : > { %s9117_s24 = scalar_lea.sflag [#allocation3], %s9116_s7 }
0x1d24   : > { %p12387_p5 = pnand %p12390_p1, %p12802_p6 }
0x1d26   : > { %12610 = dma.done.wait (!%p12387_p5), %s9117_s24, 16  }
0x1d27   : > { %12612 = vsyncadd (!%p12387_p5), %s9117_s24, 4294967280  ;;  %s15273_s25 = sld [smem:[#allocation8_spill]]  ;;  %s15274_s2 = sld [smem:[#allocation6_spill]] }
0x1d28   : > { %s15275_s24 = sld [smem:[#allocation9_spill]]  ;;  %s15276_s4 = smov %s12619_s30 }
0x1d2d   : > { %p34_p2 = scmp.ge.s32.totalorder %s15273_s25, 4   ;;  %s15277_s30 = smov %s15274_s2 }
0x1d2f   :  { %36 = sbr.rel (!%p34_p2) target bundleno = 14 (0xe), region = 214 }
0x1d36   :  { %9129 = vsyncpa [#allocation3], 1 }
0x1d37   :  { %9131 = vsyncpa [#allocation3 + $0x1], 1 }

</bundles_post_ra>
